<compile_context>
chip_gen: v7x
topology: tpu7x:2x2x1
jax: 0.10.0
libtpu: 0.0.40
codegen_flags: <defaults>
</compile_context>

<pallas_src>
import jax
import jax.numpy as jnp
from jax.experimental import pallas as pl
from jax.experimental.pallas import tpu as pltpu


# -----------------------------------------------------------------------------
# Fused Pallas kernel: the entire LeNet5 forward for a small batch.
# -----------------------------------------------------------------------------
def _lenet5_kernel(x_ref, t1b_ref, sel_ref, w2b_ref, w3e_ref, w4_ref, w5_ref,
                   b1_ref, b2_ref, b3_ref, b4_ref, b5_ref, out_ref):
    f32 = jnp.float32
    batch = x_ref.shape[0]

    feats = []
    for b in range(batch):                      # batch is tiny; fully unrolled
        # ---- conv1 + tanh: 5 banded MXU matmuls -> (28, 168) --------------
        a1 = jnp.zeros((28, 168), f32)
        for kh in range(5):
            lhs = x_ref[b, 0, kh:kh + 28, :]                    # (28, 32)
            a1 = a1 + jnp.dot(lhs, t1b_ref[kh],
                              preferred_element_type=f32)       # (28, 168)
        t1 = jnp.tanh(a1 + b1_ref[...])                         # (28, 168)

        # ---- pool1 folded into conv2, + tanh -> (10, 160) ------------------
        a2 = jnp.zeros((10, 160), f32)
        for k in range(10):
            rows = jnp.dot(sel_ref[k], t1,
                           preferred_element_type=f32)          # (10, 168)
            a2 = a2 + jnp.dot(rows, w2b_ref[k],
                              preferred_element_type=f32)       # (10, 160)
        t2 = jnp.tanh(a2 + b2_ref[...])                         # (10, 160)

        # ---- pool2 folded into conv3-as-dense, + tanh -> (1, 120) ----------
        a3 = jnp.zeros((1, 120), f32)
        for a in range(10):
            a3 = a3 + jnp.dot(t2[a:a + 1, :], w3e_ref[a],
                              preferred_element_type=f32)       # (1, 120)
        feats.append(jnp.tanh(a3 + b3_ref[...]))                # (1, 120)

    feat = jnp.concatenate(feats, axis=0)                       # (B, 120)

    # ---- classifier --------------------------------------------------------
    h4 = jnp.tanh(jnp.dot(feat, w4_ref[...],
                          preferred_element_type=f32) + b4_ref[...])    # (B, 84)
    logits = jnp.dot(h4, w5_ref[...],
                     preferred_element_type=f32) + b5_ref[...]          # (B, n)
    out_ref[...] = logits.astype(out_ref.dtype)


# -----------------------------------------------------------------------------
# One-time parameter transform: PyTorch layout -> banded / pool-folded matrices.
# (This is weight preprocessing, NOT per-call activation glue.)
# -----------------------------------------------------------------------------
def prepare_params(p, n_classes):
    f32 = jnp.float32
    w1, b1 = p["w1"].astype(f32), p["b1"].astype(f32)   # (6,1,5,5),   (6,)
    w2, b2 = p["w2"].astype(f32), p["b2"].astype(f32)   # (16,6,5,5),  (16,)
    w3, b3 = p["w3"].astype(f32), p["b3"].astype(f32)   # (120,16,5,5),(120,)
    w4, b4 = p["w4"].astype(f32), p["b4"].astype(f32)   # (84,120),    (84,)
    w5, b5 = p["w5"].astype(f32), p["b5"].astype(f32)   # (n,84),      (n,)

    # conv1 -> 5 banded matrices T1B[kh]: (32, 28*6)
    w1t = jnp.transpose(w1[:, 0], (1, 2, 0))                         # (5,5,6) [kh,kw,co]
    m1 = (jnp.arange(32)[:, None, None] ==
          jnp.arange(28)[None, :, None] + jnp.arange(5)[None, None, :]
          ).astype(f32)                                              # (32,28,5) [w,ow1,kw]
    t1b = jnp.einsum("aok,hkc->haoc", m1, w1t).reshape(5, 32, 168)

    # stride-2 row-selection matrices S[k]: (10, 28)
    sel = (jnp.arange(28)[None, None, :] ==
           2 * jnp.arange(10)[None, :, None] + jnp.arange(10)[:, None, None]
           ).astype(f32)                                             # (10,10,28) [k,oh2,h]

    # pool1 folded into conv2 -> 10 banded matrices W2B[k]: (28*6, 10*16)
    w2t = jnp.transpose(w2, (2, 3, 1, 0))                            # (5,5,6,16) [kh,kw,ci,co]
    w2e = 0.25 * jnp.repeat(jnp.repeat(w2t, 2, axis=0), 2, axis=1)   # (10,10,6,16)
    m2 = (jnp.arange(28)[:, None, None] ==
          2 * jnp.arange(10)[None, :, None] + jnp.arange(10)[None, None, :]
          ).astype(f32)                                              # (28,10,10) [ow1,ow2,kw']
    w2b = jnp.einsum("awk,hkcd->hacwd", m2, w2e).reshape(10, 168, 160)

    # pool2 folded into conv3-as-dense -> W3E[a]: (10*16, 120)
    w3t = jnp.transpose(w3, (2, 3, 1, 0))                            # (5,5,16,120) [kh,kw,ci,co]
    w3e = 0.25 * jnp.repeat(jnp.repeat(w3t, 2, axis=0), 2, axis=1)   # (10,10,16,120)
    w3e = w3e.reshape(10, 160, 120)

    return {
        "t1b": t1b, "sel": sel, "w2b": w2b, "w3e": w3e,
        "w4": w4.T, "w5": w5.T,
        "b1": jnp.tile(b1, 28).reshape(1, 168),   # lane l = ow1*6+co -> b1[co]
        "b2": jnp.tile(b2, 10).reshape(1, 160),   # lane l = ow2*16+co -> b2[co]
        "b3": b3.reshape(1, 120),
        "b4": b4.reshape(1, 84),
        "b5": b5.reshape(1, n_classes),
    }


# -----------------------------------------------------------------------------
# Forward wrapper: a single grid-less pallas_call, everything resident in VMEM.
# -----------------------------------------------------------------------------
def lenet5_forward(x_nchw, prep):
    """x_nchw: (B, 1, 32, 32) float -> logits (B, n_classes)."""
    B, C, H, W = x_nchw.shape
    assert (C, H, W) == (1, 32, 32), "LeNet5 expects 1x32x32 inputs"
    n_classes = prep["b5"].shape[1]
    # TODO(synk): for large batches, tile B with a "parallel" grid axis (2-TC
    # sharding on v7x) and cast matmul operands to bf16; at B=2 the network is
    # launch-overhead bound, so a single grid-less call is the right shape.
    return pl.pallas_call(
        _lenet5_kernel,
        out_shape=jax.ShapeDtypeStruct((B, n_classes), jnp.float32),
        compiler_params=pltpu.CompilerParams(
            vmem_limit_bytes=32 * 1024 * 1024),
    )(x_nchw.astype(jnp.float32),
      prep["t1b"], prep["sel"], prep["w2b"], prep["w3e"],
      prep["w4"], prep["w5"],
      prep["b1"], prep["b2"], prep["b3"], prep["b4"], prep["b5"])


# -----------------------------------------------------------------------------
# Parameters (deterministic, PyTorch-style uniform(-1/sqrt(fan_in), +))
# -----------------------------------------------------------------------------
def init_params(key, n_classes):
    def uniform(key, shape, fan_in):
        bound = 1.0 / jnp.sqrt(float(fan_in))
        return jax.random.uniform(key, shape, jnp.float32, -bound, bound)

    keys = jax.random.split(key, 10)
    p = {}
    p["w1"] = uniform(keys[0], (6, 1, 5, 5), 1 * 5 * 5)
    p["b1"] = uniform(keys[1], (6,), 1 * 5 * 5)
    p["w2"] = uniform(keys[2], (16, 6, 5, 5), 6 * 5 * 5)
    p["b2"] = uniform(keys[3], (16,), 6 * 5 * 5)
    p["w3"] = uniform(keys[4], (120, 16, 5, 5), 16 * 5 * 5)
    p["b3"] = uniform(keys[5], (120,), 16 * 5 * 5)
    p["w4"] = uniform(keys[6], (84, 120), 120)
    p["b4"] = uniform(keys[7], (84,), 120)
    p["w5"] = uniform(keys[8], (n_classes, 84), 84)
    p["b5"] = uniform(keys[9], (n_classes,), 84)
    return p


if __name__ == "__main__":
    n_classes = 10
    key = jax.random.PRNGKey(0)
    pkey, xkey = jax.random.split(key)
    params = init_params(pkey, n_classes)
    prep = prepare_params(params, n_classes)          # one-time weight transform

    # LeNet5 expects 1x32x32 inputs (the conv chain reduces to 1x1 at conv3).
    x = jax.random.normal(xkey, (2, 1, 32, 32), dtype=jnp.float32)

    fwd = jax.jit(lenet5_forward)
    logits = jax.block_until_ready(fwd(x, prep))
    assert logits.shape == (2, n_classes) and logits.dtype == jnp.float32
    assert bool(jnp.all(jnp.isfinite(logits)))
    print("KERNEL_OK")
</pallas_src>

<mosaic_0001>
module attributes {stable_mosaic.version = 11 : i64} {
  func.func @_lenet5_kernel(%arg0: memref<2x1x32x32xf32, #tpu.memory_space<vmem>>, %arg1: memref<5x32x168xf32, #tpu.memory_space<vmem>>, %arg2: memref<10x10x28xf32, #tpu.memory_space<vmem>>, %arg3: memref<10x168x160xf32, #tpu.memory_space<vmem>>, %arg4: memref<10x160x120xf32, #tpu.memory_space<vmem>>, %arg5: memref<120x84xf32, #tpu.memory_space<vmem>>, %arg6: memref<84x10xf32, #tpu.memory_space<vmem>>, %arg7: memref<1x168xf32, #tpu.memory_space<vmem>>, %arg8: memref<1x160xf32, #tpu.memory_space<vmem>>, %arg9: memref<1x120xf32, #tpu.memory_space<vmem>>, %arg10: memref<1x84xf32, #tpu.memory_space<vmem>>, %arg11: memref<1x10xf32, #tpu.memory_space<vmem>>, %arg12: memref<2x10xf32, #tpu.memory_space<vmem>>) attributes {dimension_semantics = [], scalar_prefetch = 0 : i64, scratch_operands = 0 : i64, tpu.core_type = #tpu.core_type<tc>} {
    %cst = arith.constant 0.000000e+00 : f32
    %0 = vector.broadcast %cst : f32 to vector<28x168xf32>
    %c0 = arith.constant 0 : index
    %c0_0 = arith.constant 0 : index
    %c0_1 = arith.constant 0 : index
    %c0_2 = arith.constant 0 : index
    %1 = vector.load %arg0[%c0, %c0_0, %c0_1, %c0_2] : memref<2x1x32x32xf32, #tpu.memory_space<vmem>>, vector<1x1x28x32xf32>
    %2 = vector.shape_cast %1 : vector<1x1x28x32xf32> to vector<28x32xf32>
    %c0_3 = arith.constant 0 : index
    %c0_4 = arith.constant 0 : index
    %c0_5 = arith.constant 0 : index
    %3 = vector.load %arg1[%c0_3, %c0_4, %c0_5] : memref<5x32x168xf32, #tpu.memory_space<vmem>>, vector<1x32x168xf32>
    %4 = vector.shape_cast %3 : vector<1x32x168xf32> to vector<32x168xf32>
    %cst_6 = arith.constant dense<0.000000e+00> : vector<28x168xf32>
    %5 = tpu.matmul %2, %4, %cst_6 {dimension_numbers = #tpu.dot_dimension_numbers<[1], [0], [0], [1], [0, 0, 1, 1], [], []>} : vector<28x32xf32>, vector<32x168xf32>, vector<28x168xf32> -> vector<28x168xf32>
    %6 = arith.addf %0, %5 : vector<28x168xf32>
    %c0_7 = arith.constant 0 : index
    %c0_8 = arith.constant 0 : index
    %c1 = arith.constant 1 : index
    %c0_9 = arith.constant 0 : index
    %7 = vector.load %arg0[%c0_7, %c0_8, %c1, %c0_9] : memref<2x1x32x32xf32, #tpu.memory_space<vmem>>, vector<1x1x28x32xf32>
    %8 = vector.shape_cast %7 : vector<1x1x28x32xf32> to vector<28x32xf32>
    %c1_10 = arith.constant 1 : index
    %c0_11 = arith.constant 0 : index
    %c0_12 = arith.constant 0 : index
    %9 = vector.load %arg1[%c1_10, %c0_11, %c0_12] : memref<5x32x168xf32, #tpu.memory_space<vmem>>, vector<1x32x168xf32>
    %10 = vector.shape_cast %9 : vector<1x32x168xf32> to vector<32x168xf32>
    %cst_13 = arith.constant dense<0.000000e+00> : vector<28x168xf32>
    %11 = tpu.matmul %8, %10, %cst_13 {dimension_numbers = #tpu.dot_dimension_numbers<[1], [0], [0], [1], [0, 0, 1, 1], [], []>} : vector<28x32xf32>, vector<32x168xf32>, vector<28x168xf32> -> vector<28x168xf32>
    %12 = arith.addf %6, %11 : vector<28x168xf32>
    %c0_14 = arith.constant 0 : index
    %c0_15 = arith.constant 0 : index
    %c2 = arith.constant 2 : index
    %c0_16 = arith.constant 0 : index
    %13 = vector.load %arg0[%c0_14, %c0_15, %c2, %c0_16] : memref<2x1x32x32xf32, #tpu.memory_space<vmem>>, vector<1x1x28x32xf32>
    %14 = vector.shape_cast %13 : vector<1x1x28x32xf32> to vector<28x32xf32>
    %c2_17 = arith.constant 2 : index
    %c0_18 = arith.constant 0 : index
    %c0_19 = arith.constant 0 : index
    %15 = vector.load %arg1[%c2_17, %c0_18, %c0_19] : memref<5x32x168xf32, #tpu.memory_space<vmem>>, vector<1x32x168xf32>
    %16 = vector.shape_cast %15 : vector<1x32x168xf32> to vector<32x168xf32>
    %cst_20 = arith.constant dense<0.000000e+00> : vector<28x168xf32>
    %17 = tpu.matmul %14, %16, %cst_20 {dimension_numbers = #tpu.dot_dimension_numbers<[1], [0], [0], [1], [0, 0, 1, 1], [], []>} : vector<28x32xf32>, vector<32x168xf32>, vector<28x168xf32> -> vector<28x168xf32>
    %18 = arith.addf %12, %17 : vector<28x168xf32>
    %c0_21 = arith.constant 0 : index
    %c0_22 = arith.constant 0 : index
    %c3 = arith.constant 3 : index
    %c0_23 = arith.constant 0 : index
    %19 = vector.load %arg0[%c0_21, %c0_22, %c3, %c0_23] : memref<2x1x32x32xf32, #tpu.memory_space<vmem>>, vector<1x1x28x32xf32>
    %20 = vector.shape_cast %19 : vector<1x1x28x32xf32> to vector<28x32xf32>
    %c3_24 = arith.constant 3 : index
    %c0_25 = arith.constant 0 : index
    %c0_26 = arith.constant 0 : index
    %21 = vector.load %arg1[%c3_24, %c0_25, %c0_26] : memref<5x32x168xf32, #tpu.memory_space<vmem>>, vector<1x32x168xf32>
    %22 = vector.shape_cast %21 : vector<1x32x168xf32> to vector<32x168xf32>
    %cst_27 = arith.constant dense<0.000000e+00> : vector<28x168xf32>
    %23 = tpu.matmul %20, %22, %cst_27 {dimension_numbers = #tpu.dot_dimension_numbers<[1], [0], [0], [1], [0, 0, 1, 1], [], []>} : vector<28x32xf32>, vector<32x168xf32>, vector<28x168xf32> -> vector<28x168xf32>
    %24 = arith.addf %18, %23 : vector<28x168xf32>
    %c0_28 = arith.constant 0 : index
    %c0_29 = arith.constant 0 : index
    %c4 = arith.constant 4 : index
    %c0_30 = arith.constant 0 : index
    %25 = vector.load %arg0[%c0_28, %c0_29, %c4, %c0_30] : memref<2x1x32x32xf32, #tpu.memory_space<vmem>>, vector<1x1x28x32xf32>
    %26 = vector.shape_cast %25 : vector<1x1x28x32xf32> to vector<28x32xf32>
    %c4_31 = arith.constant 4 : index
    %c0_32 = arith.constant 0 : index
    %c0_33 = arith.constant 0 : index
    %27 = vector.load %arg1[%c4_31, %c0_32, %c0_33] : memref<5x32x168xf32, #tpu.memory_space<vmem>>, vector<1x32x168xf32>
    %28 = vector.shape_cast %27 : vector<1x32x168xf32> to vector<32x168xf32>
    %cst_34 = arith.constant dense<0.000000e+00> : vector<28x168xf32>
    %29 = tpu.matmul %26, %28, %cst_34 {dimension_numbers = #tpu.dot_dimension_numbers<[1], [0], [0], [1], [0, 0, 1, 1], [], []>} : vector<28x32xf32>, vector<32x168xf32>, vector<28x168xf32> -> vector<28x168xf32>
    %30 = arith.addf %24, %29 : vector<28x168xf32>
    %c0_35 = arith.constant 0 : index
    %c0_36 = arith.constant 0 : index
    %31 = vector.load %arg7[%c0_35, %c0_36] : memref<1x168xf32, #tpu.memory_space<vmem>>, vector<1x168xf32>
    %32 = vector.broadcast %31 : vector<1x168xf32> to vector<28x168xf32>
    %33 = arith.addf %30, %32 : vector<28x168xf32>
    %34 = math.tanh %33 : vector<28x168xf32>
    %cst_37 = arith.constant 0.000000e+00 : f32
    %35 = vector.broadcast %cst_37 : f32 to vector<10x160xf32>
    %c0_38 = arith.constant 0 : index
    %c0_39 = arith.constant 0 : index
    %c0_40 = arith.constant 0 : index
    %36 = vector.load %arg2[%c0_38, %c0_39, %c0_40] : memref<10x10x28xf32, #tpu.memory_space<vmem>>, vector<1x10x28xf32>
    %37 = vector.shape_cast %36 : vector<1x10x28xf32> to vector<10x28xf32>
    %cst_41 = arith.constant dense<0.000000e+00> : vector<10x168xf32>
    %38 = tpu.matmul %37, %34, %cst_41 {dimension_numbers = #tpu.dot_dimension_numbers<[1], [0], [0], [1], [0, 0, 1, 1], [], []>} : vector<10x28xf32>, vector<28x168xf32>, vector<10x168xf32> -> vector<10x168xf32>
    %c0_42 = arith.constant 0 : index
    %c0_43 = arith.constant 0 : index
    %c0_44 = arith.constant 0 : index
    %39 = vector.load %arg3[%c0_42, %c0_43, %c0_44] : memref<10x168x160xf32, #tpu.memory_space<vmem>>, vector<1x168x160xf32>
    %40 = vector.shape_cast %39 : vector<1x168x160xf32> to vector<168x160xf32>
    %cst_45 = arith.constant dense<0.000000e+00> : vector<10x160xf32>
    %41 = tpu.matmul %38, %40, %cst_45 {dimension_numbers = #tpu.dot_dimension_numbers<[1], [0], [0], [1], [0, 0, 1, 1], [], []>} : vector<10x168xf32>, vector<168x160xf32>, vector<10x160xf32> -> vector<10x160xf32>
    %42 = arith.addf %35, %41 : vector<10x160xf32>
    %c1_46 = arith.constant 1 : index
    %c0_47 = arith.constant 0 : index
    %c0_48 = arith.constant 0 : index
    %43 = vector.load %arg2[%c1_46, %c0_47, %c0_48] : memref<10x10x28xf32, #tpu.memory_space<vmem>>, vector<1x10x28xf32>
    %44 = vector.shape_cast %43 : vector<1x10x28xf32> to vector<10x28xf32>
    %cst_49 = arith.constant dense<0.000000e+00> : vector<10x168xf32>
    %45 = tpu.matmul %44, %34, %cst_49 {dimension_numbers = #tpu.dot_dimension_numbers<[1], [0], [0], [1], [0, 0, 1, 1], [], []>} : vector<10x28xf32>, vector<28x168xf32>, vector<10x168xf32> -> vector<10x168xf32>
    %c1_50 = arith.constant 1 : index
    %c0_51 = arith.constant 0 : index
    %c0_52 = arith.constant 0 : index
    %46 = vector.load %arg3[%c1_50, %c0_51, %c0_52] : memref<10x168x160xf32, #tpu.memory_space<vmem>>, vector<1x168x160xf32>
    %47 = vector.shape_cast %46 : vector<1x168x160xf32> to vector<168x160xf32>
    %cst_53 = arith.constant dense<0.000000e+00> : vector<10x160xf32>
    %48 = tpu.matmul %45, %47, %cst_53 {dimension_numbers = #tpu.dot_dimension_numbers<[1], [0], [0], [1], [0, 0, 1, 1], [], []>} : vector<10x168xf32>, vector<168x160xf32>, vector<10x160xf32> -> vector<10x160xf32>
    %49 = arith.addf %42, %48 : vector<10x160xf32>
    %c2_54 = arith.constant 2 : index
    %c0_55 = arith.constant 0 : index
    %c0_56 = arith.constant 0 : index
    %50 = vector.load %arg2[%c2_54, %c0_55, %c0_56] : memref<10x10x28xf32, #tpu.memory_space<vmem>>, vector<1x10x28xf32>
    %51 = vector.shape_cast %50 : vector<1x10x28xf32> to vector<10x28xf32>
    %cst_57 = arith.constant dense<0.000000e+00> : vector<10x168xf32>
    %52 = tpu.matmul %51, %34, %cst_57 {dimension_numbers = #tpu.dot_dimension_numbers<[1], [0], [0], [1], [0, 0, 1, 1], [], []>} : vector<10x28xf32>, vector<28x168xf32>, vector<10x168xf32> -> vector<10x168xf32>
    %c2_58 = arith.constant 2 : index
    %c0_59 = arith.constant 0 : index
    %c0_60 = arith.constant 0 : index
    %53 = vector.load %arg3[%c2_58, %c0_59, %c0_60] : memref<10x168x160xf32, #tpu.memory_space<vmem>>, vector<1x168x160xf32>
    %54 = vector.shape_cast %53 : vector<1x168x160xf32> to vector<168x160xf32>
    %cst_61 = arith.constant dense<0.000000e+00> : vector<10x160xf32>
    %55 = tpu.matmul %52, %54, %cst_61 {dimension_numbers = #tpu.dot_dimension_numbers<[1], [0], [0], [1], [0, 0, 1, 1], [], []>} : vector<10x168xf32>, vector<168x160xf32>, vector<10x160xf32> -> vector<10x160xf32>
    %56 = arith.addf %49, %55 : vector<10x160xf32>
    %c3_62 = arith.constant 3 : index
    %c0_63 = arith.constant 0 : index
    %c0_64 = arith.constant 0 : index
    %57 = vector.load %arg2[%c3_62, %c0_63, %c0_64] : memref<10x10x28xf32, #tpu.memory_space<vmem>>, vector<1x10x28xf32>
    %58 = vector.shape_cast %57 : vector<1x10x28xf32> to vector<10x28xf32>
    %cst_65 = arith.constant dense<0.000000e+00> : vector<10x168xf32>
    %59 = tpu.matmul %58, %34, %cst_65 {dimension_numbers = #tpu.dot_dimension_numbers<[1], [0], [0], [1], [0, 0, 1, 1], [], []>} : vector<10x28xf32>, vector<28x168xf32>, vector<10x168xf32> -> vector<10x168xf32>
    %c3_66 = arith.constant 3 : index
    %c0_67 = arith.constant 0 : index
    %c0_68 = arith.constant 0 : index
    %60 = vector.load %arg3[%c3_66, %c0_67, %c0_68] : memref<10x168x160xf32, #tpu.memory_space<vmem>>, vector<1x168x160xf32>
    %61 = vector.shape_cast %60 : vector<1x168x160xf32> to vector<168x160xf32>
    %cst_69 = arith.constant dense<0.000000e+00> : vector<10x160xf32>
    %62 = tpu.matmul %59, %61, %cst_69 {dimension_numbers = #tpu.dot_dimension_numbers<[1], [0], [0], [1], [0, 0, 1, 1], [], []>} : vector<10x168xf32>, vector<168x160xf32>, vector<10x160xf32> -> vector<10x160xf32>
    %63 = arith.addf %56, %62 : vector<10x160xf32>
    %c4_70 = arith.constant 4 : index
    %c0_71 = arith.constant 0 : index
    %c0_72 = arith.constant 0 : index
    %64 = vector.load %arg2[%c4_70, %c0_71, %c0_72] : memref<10x10x28xf32, #tpu.memory_space<vmem>>, vector<1x10x28xf32>
    %65 = vector.shape_cast %64 : vector<1x10x28xf32> to vector<10x28xf32>
    %cst_73 = arith.constant dense<0.000000e+00> : vector<10x168xf32>
    %66 = tpu.matmul %65, %34, %cst_73 {dimension_numbers = #tpu.dot_dimension_numbers<[1], [0], [0], [1], [0, 0, 1, 1], [], []>} : vector<10x28xf32>, vector<28x168xf32>, vector<10x168xf32> -> vector<10x168xf32>
    %c4_74 = arith.constant 4 : index
    %c0_75 = arith.constant 0 : index
    %c0_76 = arith.constant 0 : index
    %67 = vector.load %arg3[%c4_74, %c0_75, %c0_76] : memref<10x168x160xf32, #tpu.memory_space<vmem>>, vector<1x168x160xf32>
    %68 = vector.shape_cast %67 : vector<1x168x160xf32> to vector<168x160xf32>
    %cst_77 = arith.constant dense<0.000000e+00> : vector<10x160xf32>
    %69 = tpu.matmul %66, %68, %cst_77 {dimension_numbers = #tpu.dot_dimension_numbers<[1], [0], [0], [1], [0, 0, 1, 1], [], []>} : vector<10x168xf32>, vector<168x160xf32>, vector<10x160xf32> -> vector<10x160xf32>
    %70 = arith.addf %63, %69 : vector<10x160xf32>
    %c5 = arith.constant 5 : index
    %c0_78 = arith.constant 0 : index
    %c0_79 = arith.constant 0 : index
    %71 = vector.load %arg2[%c5, %c0_78, %c0_79] : memref<10x10x28xf32, #tpu.memory_space<vmem>>, vector<1x10x28xf32>
    %72 = vector.shape_cast %71 : vector<1x10x28xf32> to vector<10x28xf32>
    %cst_80 = arith.constant dense<0.000000e+00> : vector<10x168xf32>
    %73 = tpu.matmul %72, %34, %cst_80 {dimension_numbers = #tpu.dot_dimension_numbers<[1], [0], [0], [1], [0, 0, 1, 1], [], []>} : vector<10x28xf32>, vector<28x168xf32>, vector<10x168xf32> -> vector<10x168xf32>
    %c5_81 = arith.constant 5 : index
    %c0_82 = arith.constant 0 : index
    %c0_83 = arith.constant 0 : index
    %74 = vector.load %arg3[%c5_81, %c0_82, %c0_83] : memref<10x168x160xf32, #tpu.memory_space<vmem>>, vector<1x168x160xf32>
    %75 = vector.shape_cast %74 : vector<1x168x160xf32> to vector<168x160xf32>
    %cst_84 = arith.constant dense<0.000000e+00> : vector<10x160xf32>
    %76 = tpu.matmul %73, %75, %cst_84 {dimension_numbers = #tpu.dot_dimension_numbers<[1], [0], [0], [1], [0, 0, 1, 1], [], []>} : vector<10x168xf32>, vector<168x160xf32>, vector<10x160xf32> -> vector<10x160xf32>
    %77 = arith.addf %70, %76 : vector<10x160xf32>
    %c6 = arith.constant 6 : index
    %c0_85 = arith.constant 0 : index
    %c0_86 = arith.constant 0 : index
    %78 = vector.load %arg2[%c6, %c0_85, %c0_86] : memref<10x10x28xf32, #tpu.memory_space<vmem>>, vector<1x10x28xf32>
    %79 = vector.shape_cast %78 : vector<1x10x28xf32> to vector<10x28xf32>
    %cst_87 = arith.constant dense<0.000000e+00> : vector<10x168xf32>
    %80 = tpu.matmul %79, %34, %cst_87 {dimension_numbers = #tpu.dot_dimension_numbers<[1], [0], [0], [1], [0, 0, 1, 1], [], []>} : vector<10x28xf32>, vector<28x168xf32>, vector<10x168xf32> -> vector<10x168xf32>
    %c6_88 = arith.constant 6 : index
    %c0_89 = arith.constant 0 : index
    %c0_90 = arith.constant 0 : index
    %81 = vector.load %arg3[%c6_88, %c0_89, %c0_90] : memref<10x168x160xf32, #tpu.memory_space<vmem>>, vector<1x168x160xf32>
    %82 = vector.shape_cast %81 : vector<1x168x160xf32> to vector<168x160xf32>
    %cst_91 = arith.constant dense<0.000000e+00> : vector<10x160xf32>
    %83 = tpu.matmul %80, %82, %cst_91 {dimension_numbers = #tpu.dot_dimension_numbers<[1], [0], [0], [1], [0, 0, 1, 1], [], []>} : vector<10x168xf32>, vector<168x160xf32>, vector<10x160xf32> -> vector<10x160xf32>
    %84 = arith.addf %77, %83 : vector<10x160xf32>
    %c7 = arith.constant 7 : index
    %c0_92 = arith.constant 0 : index
    %c0_93 = arith.constant 0 : index
    %85 = vector.load %arg2[%c7, %c0_92, %c0_93] : memref<10x10x28xf32, #tpu.memory_space<vmem>>, vector<1x10x28xf32>
    %86 = vector.shape_cast %85 : vector<1x10x28xf32> to vector<10x28xf32>
    %cst_94 = arith.constant dense<0.000000e+00> : vector<10x168xf32>
    %87 = tpu.matmul %86, %34, %cst_94 {dimension_numbers = #tpu.dot_dimension_numbers<[1], [0], [0], [1], [0, 0, 1, 1], [], []>} : vector<10x28xf32>, vector<28x168xf32>, vector<10x168xf32> -> vector<10x168xf32>
    %c7_95 = arith.constant 7 : index
    %c0_96 = arith.constant 0 : index
    %c0_97 = arith.constant 0 : index
    %88 = vector.load %arg3[%c7_95, %c0_96, %c0_97] : memref<10x168x160xf32, #tpu.memory_space<vmem>>, vector<1x168x160xf32>
    %89 = vector.shape_cast %88 : vector<1x168x160xf32> to vector<168x160xf32>
    %cst_98 = arith.constant dense<0.000000e+00> : vector<10x160xf32>
    %90 = tpu.matmul %87, %89, %cst_98 {dimension_numbers = #tpu.dot_dimension_numbers<[1], [0], [0], [1], [0, 0, 1, 1], [], []>} : vector<10x168xf32>, vector<168x160xf32>, vector<10x160xf32> -> vector<10x160xf32>
    %91 = arith.addf %84, %90 : vector<10x160xf32>
    %c8 = arith.constant 8 : index
    %c0_99 = arith.constant 0 : index
    %c0_100 = arith.constant 0 : index
    %92 = vector.load %arg2[%c8, %c0_99, %c0_100] : memref<10x10x28xf32, #tpu.memory_space<vmem>>, vector<1x10x28xf32>
    %93 = vector.shape_cast %92 : vector<1x10x28xf32> to vector<10x28xf32>
    %cst_101 = arith.constant dense<0.000000e+00> : vector<10x168xf32>
    %94 = tpu.matmul %93, %34, %cst_101 {dimension_numbers = #tpu.dot_dimension_numbers<[1], [0], [0], [1], [0, 0, 1, 1], [], []>} : vector<10x28xf32>, vector<28x168xf32>, vector<10x168xf32> -> vector<10x168xf32>
    %c8_102 = arith.constant 8 : index
    %c0_103 = arith.constant 0 : index
    %c0_104 = arith.constant 0 : index
    %95 = vector.load %arg3[%c8_102, %c0_103, %c0_104] : memref<10x168x160xf32, #tpu.memory_space<vmem>>, vector<1x168x160xf32>
    %96 = vector.shape_cast %95 : vector<1x168x160xf32> to vector<168x160xf32>
    %cst_105 = arith.constant dense<0.000000e+00> : vector<10x160xf32>
    %97 = tpu.matmul %94, %96, %cst_105 {dimension_numbers = #tpu.dot_dimension_numbers<[1], [0], [0], [1], [0, 0, 1, 1], [], []>} : vector<10x168xf32>, vector<168x160xf32>, vector<10x160xf32> -> vector<10x160xf32>
    %98 = arith.addf %91, %97 : vector<10x160xf32>
    %c9 = arith.constant 9 : index
    %c0_106 = arith.constant 0 : index
    %c0_107 = arith.constant 0 : index
    %99 = vector.load %arg2[%c9, %c0_106, %c0_107] : memref<10x10x28xf32, #tpu.memory_space<vmem>>, vector<1x10x28xf32>
    %100 = vector.shape_cast %99 : vector<1x10x28xf32> to vector<10x28xf32>
    %cst_108 = arith.constant dense<0.000000e+00> : vector<10x168xf32>
    %101 = tpu.matmul %100, %34, %cst_108 {dimension_numbers = #tpu.dot_dimension_numbers<[1], [0], [0], [1], [0, 0, 1, 1], [], []>} : vector<10x28xf32>, vector<28x168xf32>, vector<10x168xf32> -> vector<10x168xf32>
    %c9_109 = arith.constant 9 : index
    %c0_110 = arith.constant 0 : index
    %c0_111 = arith.constant 0 : index
    %102 = vector.load %arg3[%c9_109, %c0_110, %c0_111] : memref<10x168x160xf32, #tpu.memory_space<vmem>>, vector<1x168x160xf32>
    %103 = vector.shape_cast %102 : vector<1x168x160xf32> to vector<168x160xf32>
    %cst_112 = arith.constant dense<0.000000e+00> : vector<10x160xf32>
    %104 = tpu.matmul %101, %103, %cst_112 {dimension_numbers = #tpu.dot_dimension_numbers<[1], [0], [0], [1], [0, 0, 1, 1], [], []>} : vector<10x168xf32>, vector<168x160xf32>, vector<10x160xf32> -> vector<10x160xf32>
    %105 = arith.addf %98, %104 : vector<10x160xf32>
    %c0_113 = arith.constant 0 : index
    %c0_114 = arith.constant 0 : index
    %106 = vector.load %arg8[%c0_113, %c0_114] : memref<1x160xf32, #tpu.memory_space<vmem>>, vector<1x160xf32>
    %107 = vector.broadcast %106 : vector<1x160xf32> to vector<10x160xf32>
    %108 = arith.addf %105, %107 : vector<10x160xf32>
    %109 = math.tanh %108 : vector<10x160xf32>
    %cst_115 = arith.constant 0.000000e+00 : f32
    %110 = vector.broadcast %cst_115 : f32 to vector<1x120xf32>
    %111 = vector.extract_strided_slice %109 {offsets = [0, 0], sizes = [1, 160], strides = [1, 1]} : vector<10x160xf32> to vector<1x160xf32>
    %c0_116 = arith.constant 0 : index
    %c0_117 = arith.constant 0 : index
    %c0_118 = arith.constant 0 : index
    %112 = vector.load %arg4[%c0_116, %c0_117, %c0_118] : memref<10x160x120xf32, #tpu.memory_space<vmem>>, vector<1x160x120xf32>
    %113 = vector.shape_cast %112 : vector<1x160x120xf32> to vector<160x120xf32>
    %cst_119 = arith.constant dense<0.000000e+00> : vector<1x120xf32>
    %114 = tpu.matmul %111, %113, %cst_119 {dimension_numbers = #tpu.dot_dimension_numbers<[1], [0], [0], [1], [0, 0, 1, 1], [], []>} : vector<1x160xf32>, vector<160x120xf32>, vector<1x120xf32> -> vector<1x120xf32>
    %115 = arith.addf %110, %114 : vector<1x120xf32>
    %116 = vector.extract_strided_slice %109 {offsets = [1, 0], sizes = [1, 160], strides = [1, 1]} : vector<10x160xf32> to vector<1x160xf32>
    %c1_120 = arith.constant 1 : index
    %c0_121 = arith.constant 0 : index
    %c0_122 = arith.constant 0 : index
    %117 = vector.load %arg4[%c1_120, %c0_121, %c0_122] : memref<10x160x120xf32, #tpu.memory_space<vmem>>, vector<1x160x120xf32>
    %118 = vector.shape_cast %117 : vector<1x160x120xf32> to vector<160x120xf32>
    %cst_123 = arith.constant dense<0.000000e+00> : vector<1x120xf32>
    %119 = tpu.matmul %116, %118, %cst_123 {dimension_numbers = #tpu.dot_dimension_numbers<[1], [0], [0], [1], [0, 0, 1, 1], [], []>} : vector<1x160xf32>, vector<160x120xf32>, vector<1x120xf32> -> vector<1x120xf32>
    %120 = arith.addf %115, %119 : vector<1x120xf32>
    %121 = vector.extract_strided_slice %109 {offsets = [2, 0], sizes = [1, 160], strides = [1, 1]} : vector<10x160xf32> to vector<1x160xf32>
    %c2_124 = arith.constant 2 : index
    %c0_125 = arith.constant 0 : index
    %c0_126 = arith.constant 0 : index
    %122 = vector.load %arg4[%c2_124, %c0_125, %c0_126] : memref<10x160x120xf32, #tpu.memory_space<vmem>>, vector<1x160x120xf32>
    %123 = vector.shape_cast %122 : vector<1x160x120xf32> to vector<160x120xf32>
    %cst_127 = arith.constant dense<0.000000e+00> : vector<1x120xf32>
    %124 = tpu.matmul %121, %123, %cst_127 {dimension_numbers = #tpu.dot_dimension_numbers<[1], [0], [0], [1], [0, 0, 1, 1], [], []>} : vector<1x160xf32>, vector<160x120xf32>, vector<1x120xf32> -> vector<1x120xf32>
    %125 = arith.addf %120, %124 : vector<1x120xf32>
    %126 = vector.extract_strided_slice %109 {offsets = [3, 0], sizes = [1, 160], strides = [1, 1]} : vector<10x160xf32> to vector<1x160xf32>
    %c3_128 = arith.constant 3 : index
    %c0_129 = arith.constant 0 : index
    %c0_130 = arith.constant 0 : index
    %127 = vector.load %arg4[%c3_128, %c0_129, %c0_130] : memref<10x160x120xf32, #tpu.memory_space<vmem>>, vector<1x160x120xf32>
    %128 = vector.shape_cast %127 : vector<1x160x120xf32> to vector<160x120xf32>
    %cst_131 = arith.constant dense<0.000000e+00> : vector<1x120xf32>
    %129 = tpu.matmul %126, %128, %cst_131 {dimension_numbers = #tpu.dot_dimension_numbers<[1], [0], [0], [1], [0, 0, 1, 1], [], []>} : vector<1x160xf32>, vector<160x120xf32>, vector<1x120xf32> -> vector<1x120xf32>
    %130 = arith.addf %125, %129 : vector<1x120xf32>
    %131 = vector.extract_strided_slice %109 {offsets = [4, 0], sizes = [1, 160], strides = [1, 1]} : vector<10x160xf32> to vector<1x160xf32>
    %c4_132 = arith.constant 4 : index
    %c0_133 = arith.constant 0 : index
    %c0_134 = arith.constant 0 : index
    %132 = vector.load %arg4[%c4_132, %c0_133, %c0_134] : memref<10x160x120xf32, #tpu.memory_space<vmem>>, vector<1x160x120xf32>
    %133 = vector.shape_cast %132 : vector<1x160x120xf32> to vector<160x120xf32>
    %cst_135 = arith.constant dense<0.000000e+00> : vector<1x120xf32>
    %134 = tpu.matmul %131, %133, %cst_135 {dimension_numbers = #tpu.dot_dimension_numbers<[1], [0], [0], [1], [0, 0, 1, 1], [], []>} : vector<1x160xf32>, vector<160x120xf32>, vector<1x120xf32> -> vector<1x120xf32>
    %135 = arith.addf %130, %134 : vector<1x120xf32>
    %136 = vector.extract_strided_slice %109 {offsets = [5, 0], sizes = [1, 160], strides = [1, 1]} : vector<10x160xf32> to vector<1x160xf32>
    %c5_136 = arith.constant 5 : index
    %c0_137 = arith.constant 0 : index
    %c0_138 = arith.constant 0 : index
    %137 = vector.load %arg4[%c5_136, %c0_137, %c0_138] : memref<10x160x120xf32, #tpu.memory_space<vmem>>, vector<1x160x120xf32>
    %138 = vector.shape_cast %137 : vector<1x160x120xf32> to vector<160x120xf32>
    %cst_139 = arith.constant dense<0.000000e+00> : vector<1x120xf32>
    %139 = tpu.matmul %136, %138, %cst_139 {dimension_numbers = #tpu.dot_dimension_numbers<[1], [0], [0], [1], [0, 0, 1, 1], [], []>} : vector<1x160xf32>, vector<160x120xf32>, vector<1x120xf32> -> vector<1x120xf32>
    %140 = arith.addf %135, %139 : vector<1x120xf32>
    %141 = vector.extract_strided_slice %109 {offsets = [6, 0], sizes = [1, 160], strides = [1, 1]} : vector<10x160xf32> to vector<1x160xf32>
    %c6_140 = arith.constant 6 : index
    %c0_141 = arith.constant 0 : index
    %c0_142 = arith.constant 0 : index
    %142 = vector.load %arg4[%c6_140, %c0_141, %c0_142] : memref<10x160x120xf32, #tpu.memory_space<vmem>>, vector<1x160x120xf32>
    %143 = vector.shape_cast %142 : vector<1x160x120xf32> to vector<160x120xf32>
    %cst_143 = arith.constant dense<0.000000e+00> : vector<1x120xf32>
    %144 = tpu.matmul %141, %143, %cst_143 {dimension_numbers = #tpu.dot_dimension_numbers<[1], [0], [0], [1], [0, 0, 1, 1], [], []>} : vector<1x160xf32>, vector<160x120xf32>, vector<1x120xf32> -> vector<1x120xf32>
    %145 = arith.addf %140, %144 : vector<1x120xf32>
    %146 = vector.extract_strided_slice %109 {offsets = [7, 0], sizes = [1, 160], strides = [1, 1]} : vector<10x160xf32> to vector<1x160xf32>
    %c7_144 = arith.constant 7 : index
    %c0_145 = arith.constant 0 : index
    %c0_146 = arith.constant 0 : index
    %147 = vector.load %arg4[%c7_144, %c0_145, %c0_146] : memref<10x160x120xf32, #tpu.memory_space<vmem>>, vector<1x160x120xf32>
    %148 = vector.shape_cast %147 : vector<1x160x120xf32> to vector<160x120xf32>
    %cst_147 = arith.constant dense<0.000000e+00> : vector<1x120xf32>
    %149 = tpu.matmul %146, %148, %cst_147 {dimension_numbers = #tpu.dot_dimension_numbers<[1], [0], [0], [1], [0, 0, 1, 1], [], []>} : vector<1x160xf32>, vector<160x120xf32>, vector<1x120xf32> -> vector<1x120xf32>
    %150 = arith.addf %145, %149 : vector<1x120xf32>
    %151 = vector.extract_strided_slice %109 {offsets = [8, 0], sizes = [1, 160], strides = [1, 1]} : vector<10x160xf32> to vector<1x160xf32>
    %c8_148 = arith.constant 8 : index
    %c0_149 = arith.constant 0 : index
    %c0_150 = arith.constant 0 : index
    %152 = vector.load %arg4[%c8_148, %c0_149, %c0_150] : memref<10x160x120xf32, #tpu.memory_space<vmem>>, vector<1x160x120xf32>
    %153 = vector.shape_cast %152 : vector<1x160x120xf32> to vector<160x120xf32>
    %cst_151 = arith.constant dense<0.000000e+00> : vector<1x120xf32>
    %154 = tpu.matmul %151, %153, %cst_151 {dimension_numbers = #tpu.dot_dimension_numbers<[1], [0], [0], [1], [0, 0, 1, 1], [], []>} : vector<1x160xf32>, vector<160x120xf32>, vector<1x120xf32> -> vector<1x120xf32>
    %155 = arith.addf %150, %154 : vector<1x120xf32>
    %156 = vector.extract_strided_slice %109 {offsets = [9, 0], sizes = [1, 160], strides = [1, 1]} : vector<10x160xf32> to vector<1x160xf32>
    %c9_152 = arith.constant 9 : index
    %c0_153 = arith.constant 0 : index
    %c0_154 = arith.constant 0 : index
    %157 = vector.load %arg4[%c9_152, %c0_153, %c0_154] : memref<10x160x120xf32, #tpu.memory_space<vmem>>, vector<1x160x120xf32>
    %158 = vector.shape_cast %157 : vector<1x160x120xf32> to vector<160x120xf32>
    %cst_155 = arith.constant dense<0.000000e+00> : vector<1x120xf32>
    %159 = tpu.matmul %156, %158, %cst_155 {dimension_numbers = #tpu.dot_dimension_numbers<[1], [0], [0], [1], [0, 0, 1, 1], [], []>} : vector<1x160xf32>, vector<160x120xf32>, vector<1x120xf32> -> vector<1x120xf32>
    %160 = arith.addf %155, %159 : vector<1x120xf32>
    %c0_156 = arith.constant 0 : index
    %c0_157 = arith.constant 0 : index
    %161 = vector.load %arg9[%c0_156, %c0_157] : memref<1x120xf32, #tpu.memory_space<vmem>>, vector<1x120xf32>
    %162 = arith.addf %160, %161 : vector<1x120xf32>
    %163 = math.tanh %162 : vector<1x120xf32>
    %cst_158 = arith.constant 0.000000e+00 : f32
    %164 = vector.broadcast %cst_158 : f32 to vector<28x168xf32>
    %c1_159 = arith.constant 1 : index
    %c0_160 = arith.constant 0 : index
    %c0_161 = arith.constant 0 : index
    %c0_162 = arith.constant 0 : index
    %165 = vector.load %arg0[%c1_159, %c0_160, %c0_161, %c0_162] : memref<2x1x32x32xf32, #tpu.memory_space<vmem>>, vector<1x1x28x32xf32>
    %166 = vector.shape_cast %165 : vector<1x1x28x32xf32> to vector<28x32xf32>
    %c0_163 = arith.constant 0 : index
    %c0_164 = arith.constant 0 : index
    %c0_165 = arith.constant 0 : index
    %167 = vector.load %arg1[%c0_163, %c0_164, %c0_165] : memref<5x32x168xf32, #tpu.memory_space<vmem>>, vector<1x32x168xf32>
    %168 = vector.shape_cast %167 : vector<1x32x168xf32> to vector<32x168xf32>
    %cst_166 = arith.constant dense<0.000000e+00> : vector<28x168xf32>
    %169 = tpu.matmul %166, %168, %cst_166 {dimension_numbers = #tpu.dot_dimension_numbers<[1], [0], [0], [1], [0, 0, 1, 1], [], []>} : vector<28x32xf32>, vector<32x168xf32>, vector<28x168xf32> -> vector<28x168xf32>
    %170 = arith.addf %164, %169 : vector<28x168xf32>
    %c1_167 = arith.constant 1 : index
    %c0_168 = arith.constant 0 : index
    %c1_169 = arith.constant 1 : index
    %c0_170 = arith.constant 0 : index
    %171 = vector.load %arg0[%c1_167, %c0_168, %c1_169, %c0_170] : memref<2x1x32x32xf32, #tpu.memory_space<vmem>>, vector<1x1x28x32xf32>
    %172 = vector.shape_cast %171 : vector<1x1x28x32xf32> to vector<28x32xf32>
    %c1_171 = arith.constant 1 : index
    %c0_172 = arith.constant 0 : index
    %c0_173 = arith.constant 0 : index
    %173 = vector.load %arg1[%c1_171, %c0_172, %c0_173] : memref<5x32x168xf32, #tpu.memory_space<vmem>>, vector<1x32x168xf32>
    %174 = vector.shape_cast %173 : vector<1x32x168xf32> to vector<32x168xf32>
    %cst_174 = arith.constant dense<0.000000e+00> : vector<28x168xf32>
    %175 = tpu.matmul %172, %174, %cst_174 {dimension_numbers = #tpu.dot_dimension_numbers<[1], [0], [0], [1], [0, 0, 1, 1], [], []>} : vector<28x32xf32>, vector<32x168xf32>, vector<28x168xf32> -> vector<28x168xf32>
    %176 = arith.addf %170, %175 : vector<28x168xf32>
    %c1_175 = arith.constant 1 : index
    %c0_176 = arith.constant 0 : index
    %c2_177 = arith.constant 2 : index
    %c0_178 = arith.constant 0 : index
    %177 = vector.load %arg0[%c1_175, %c0_176, %c2_177, %c0_178] : memref<2x1x32x32xf32, #tpu.memory_space<vmem>>, vector<1x1x28x32xf32>
    %178 = vector.shape_cast %177 : vector<1x1x28x32xf32> to vector<28x32xf32>
    %c2_179 = arith.constant 2 : index
    %c0_180 = arith.constant 0 : index
    %c0_181 = arith.constant 0 : index
    %179 = vector.load %arg1[%c2_179, %c0_180, %c0_181] : memref<5x32x168xf32, #tpu.memory_space<vmem>>, vector<1x32x168xf32>
    %180 = vector.shape_cast %179 : vector<1x32x168xf32> to vector<32x168xf32>
    %cst_182 = arith.constant dense<0.000000e+00> : vector<28x168xf32>
    %181 = tpu.matmul %178, %180, %cst_182 {dimension_numbers = #tpu.dot_dimension_numbers<[1], [0], [0], [1], [0, 0, 1, 1], [], []>} : vector<28x32xf32>, vector<32x168xf32>, vector<28x168xf32> -> vector<28x168xf32>
    %182 = arith.addf %176, %181 : vector<28x168xf32>
    %c1_183 = arith.constant 1 : index
    %c0_184 = arith.constant 0 : index
    %c3_185 = arith.constant 3 : index
    %c0_186 = arith.constant 0 : index
    %183 = vector.load %arg0[%c1_183, %c0_184, %c3_185, %c0_186] : memref<2x1x32x32xf32, #tpu.memory_space<vmem>>, vector<1x1x28x32xf32>
    %184 = vector.shape_cast %183 : vector<1x1x28x32xf32> to vector<28x32xf32>
    %c3_187 = arith.constant 3 : index
    %c0_188 = arith.constant 0 : index
    %c0_189 = arith.constant 0 : index
    %185 = vector.load %arg1[%c3_187, %c0_188, %c0_189] : memref<5x32x168xf32, #tpu.memory_space<vmem>>, vector<1x32x168xf32>
    %186 = vector.shape_cast %185 : vector<1x32x168xf32> to vector<32x168xf32>
    %cst_190 = arith.constant dense<0.000000e+00> : vector<28x168xf32>
    %187 = tpu.matmul %184, %186, %cst_190 {dimension_numbers = #tpu.dot_dimension_numbers<[1], [0], [0], [1], [0, 0, 1, 1], [], []>} : vector<28x32xf32>, vector<32x168xf32>, vector<28x168xf32> -> vector<28x168xf32>
    %188 = arith.addf %182, %187 : vector<28x168xf32>
    %c1_191 = arith.constant 1 : index
    %c0_192 = arith.constant 0 : index
    %c4_193 = arith.constant 4 : index
    %c0_194 = arith.constant 0 : index
    %189 = vector.load %arg0[%c1_191, %c0_192, %c4_193, %c0_194] : memref<2x1x32x32xf32, #tpu.memory_space<vmem>>, vector<1x1x28x32xf32>
    %190 = vector.shape_cast %189 : vector<1x1x28x32xf32> to vector<28x32xf32>
    %c4_195 = arith.constant 4 : index
    %c0_196 = arith.constant 0 : index
    %c0_197 = arith.constant 0 : index
    %191 = vector.load %arg1[%c4_195, %c0_196, %c0_197] : memref<5x32x168xf32, #tpu.memory_space<vmem>>, vector<1x32x168xf32>
    %192 = vector.shape_cast %191 : vector<1x32x168xf32> to vector<32x168xf32>
    %cst_198 = arith.constant dense<0.000000e+00> : vector<28x168xf32>
    %193 = tpu.matmul %190, %192, %cst_198 {dimension_numbers = #tpu.dot_dimension_numbers<[1], [0], [0], [1], [0, 0, 1, 1], [], []>} : vector<28x32xf32>, vector<32x168xf32>, vector<28x168xf32> -> vector<28x168xf32>
    %194 = arith.addf %188, %193 : vector<28x168xf32>
    %c0_199 = arith.constant 0 : index
    %c0_200 = arith.constant 0 : index
    %195 = vector.load %arg7[%c0_199, %c0_200] : memref<1x168xf32, #tpu.memory_space<vmem>>, vector<1x168xf32>
    %196 = vector.broadcast %195 : vector<1x168xf32> to vector<28x168xf32>
    %197 = arith.addf %194, %196 : vector<28x168xf32>
    %198 = math.tanh %197 : vector<28x168xf32>
    %cst_201 = arith.constant 0.000000e+00 : f32
    %199 = vector.broadcast %cst_201 : f32 to vector<10x160xf32>
    %c0_202 = arith.constant 0 : index
    %c0_203 = arith.constant 0 : index
    %c0_204 = arith.constant 0 : index
    %200 = vector.load %arg2[%c0_202, %c0_203, %c0_204] : memref<10x10x28xf32, #tpu.memory_space<vmem>>, vector<1x10x28xf32>
    %201 = vector.shape_cast %200 : vector<1x10x28xf32> to vector<10x28xf32>
    %cst_205 = arith.constant dense<0.000000e+00> : vector<10x168xf32>
    %202 = tpu.matmul %201, %198, %cst_205 {dimension_numbers = #tpu.dot_dimension_numbers<[1], [0], [0], [1], [0, 0, 1, 1], [], []>} : vector<10x28xf32>, vector<28x168xf32>, vector<10x168xf32> -> vector<10x168xf32>
    %c0_206 = arith.constant 0 : index
    %c0_207 = arith.constant 0 : index
    %c0_208 = arith.constant 0 : index
    %203 = vector.load %arg3[%c0_206, %c0_207, %c0_208] : memref<10x168x160xf32, #tpu.memory_space<vmem>>, vector<1x168x160xf32>
    %204 = vector.shape_cast %203 : vector<1x168x160xf32> to vector<168x160xf32>
    %cst_209 = arith.constant dense<0.000000e+00> : vector<10x160xf32>
    %205 = tpu.matmul %202, %204, %cst_209 {dimension_numbers = #tpu.dot_dimension_numbers<[1], [0], [0], [1], [0, 0, 1, 1], [], []>} : vector<10x168xf32>, vector<168x160xf32>, vector<10x160xf32> -> vector<10x160xf32>
    %206 = arith.addf %199, %205 : vector<10x160xf32>
    %c1_210 = arith.constant 1 : index
    %c0_211 = arith.constant 0 : index
    %c0_212 = arith.constant 0 : index
    %207 = vector.load %arg2[%c1_210, %c0_211, %c0_212] : memref<10x10x28xf32, #tpu.memory_space<vmem>>, vector<1x10x28xf32>
    %208 = vector.shape_cast %207 : vector<1x10x28xf32> to vector<10x28xf32>
    %cst_213 = arith.constant dense<0.000000e+00> : vector<10x168xf32>
    %209 = tpu.matmul %208, %198, %cst_213 {dimension_numbers = #tpu.dot_dimension_numbers<[1], [0], [0], [1], [0, 0, 1, 1], [], []>} : vector<10x28xf32>, vector<28x168xf32>, vector<10x168xf32> -> vector<10x168xf32>
    %c1_214 = arith.constant 1 : index
    %c0_215 = arith.constant 0 : index
    %c0_216 = arith.constant 0 : index
    %210 = vector.load %arg3[%c1_214, %c0_215, %c0_216] : memref<10x168x160xf32, #tpu.memory_space<vmem>>, vector<1x168x160xf32>
    %211 = vector.shape_cast %210 : vector<1x168x160xf32> to vector<168x160xf32>
    %cst_217 = arith.constant dense<0.000000e+00> : vector<10x160xf32>
    %212 = tpu.matmul %209, %211, %cst_217 {dimension_numbers = #tpu.dot_dimension_numbers<[1], [0], [0], [1], [0, 0, 1, 1], [], []>} : vector<10x168xf32>, vector<168x160xf32>, vector<10x160xf32> -> vector<10x160xf32>
    %213 = arith.addf %206, %212 : vector<10x160xf32>
    %c2_218 = arith.constant 2 : index
    %c0_219 = arith.constant 0 : index
    %c0_220 = arith.constant 0 : index
    %214 = vector.load %arg2[%c2_218, %c0_219, %c0_220] : memref<10x10x28xf32, #tpu.memory_space<vmem>>, vector<1x10x28xf32>
    %215 = vector.shape_cast %214 : vector<1x10x28xf32> to vector<10x28xf32>
    %cst_221 = arith.constant dense<0.000000e+00> : vector<10x168xf32>
    %216 = tpu.matmul %215, %198, %cst_221 {dimension_numbers = #tpu.dot_dimension_numbers<[1], [0], [0], [1], [0, 0, 1, 1], [], []>} : vector<10x28xf32>, vector<28x168xf32>, vector<10x168xf32> -> vector<10x168xf32>
    %c2_222 = arith.constant 2 : index
    %c0_223 = arith.constant 0 : index
    %c0_224 = arith.constant 0 : index
    %217 = vector.load %arg3[%c2_222, %c0_223, %c0_224] : memref<10x168x160xf32, #tpu.memory_space<vmem>>, vector<1x168x160xf32>
    %218 = vector.shape_cast %217 : vector<1x168x160xf32> to vector<168x160xf32>
    %cst_225 = arith.constant dense<0.000000e+00> : vector<10x160xf32>
    %219 = tpu.matmul %216, %218, %cst_225 {dimension_numbers = #tpu.dot_dimension_numbers<[1], [0], [0], [1], [0, 0, 1, 1], [], []>} : vector<10x168xf32>, vector<168x160xf32>, vector<10x160xf32> -> vector<10x160xf32>
    %220 = arith.addf %213, %219 : vector<10x160xf32>
    %c3_226 = arith.constant 3 : index
    %c0_227 = arith.constant 0 : index
    %c0_228 = arith.constant 0 : index
    %221 = vector.load %arg2[%c3_226, %c0_227, %c0_228] : memref<10x10x28xf32, #tpu.memory_space<vmem>>, vector<1x10x28xf32>
    %222 = vector.shape_cast %221 : vector<1x10x28xf32> to vector<10x28xf32>
    %cst_229 = arith.constant dense<0.000000e+00> : vector<10x168xf32>
    %223 = tpu.matmul %222, %198, %cst_229 {dimension_numbers = #tpu.dot_dimension_numbers<[1], [0], [0], [1], [0, 0, 1, 1], [], []>} : vector<10x28xf32>, vector<28x168xf32>, vector<10x168xf32> -> vector<10x168xf32>
    %c3_230 = arith.constant 3 : index
    %c0_231 = arith.constant 0 : index
    %c0_232 = arith.constant 0 : index
    %224 = vector.load %arg3[%c3_230, %c0_231, %c0_232] : memref<10x168x160xf32, #tpu.memory_space<vmem>>, vector<1x168x160xf32>
    %225 = vector.shape_cast %224 : vector<1x168x160xf32> to vector<168x160xf32>
    %cst_233 = arith.constant dense<0.000000e+00> : vector<10x160xf32>
    %226 = tpu.matmul %223, %225, %cst_233 {dimension_numbers = #tpu.dot_dimension_numbers<[1], [0], [0], [1], [0, 0, 1, 1], [], []>} : vector<10x168xf32>, vector<168x160xf32>, vector<10x160xf32> -> vector<10x160xf32>
    %227 = arith.addf %220, %226 : vector<10x160xf32>
    %c4_234 = arith.constant 4 : index
    %c0_235 = arith.constant 0 : index
    %c0_236 = arith.constant 0 : index
    %228 = vector.load %arg2[%c4_234, %c0_235, %c0_236] : memref<10x10x28xf32, #tpu.memory_space<vmem>>, vector<1x10x28xf32>
    %229 = vector.shape_cast %228 : vector<1x10x28xf32> to vector<10x28xf32>
    %cst_237 = arith.constant dense<0.000000e+00> : vector<10x168xf32>
    %230 = tpu.matmul %229, %198, %cst_237 {dimension_numbers = #tpu.dot_dimension_numbers<[1], [0], [0], [1], [0, 0, 1, 1], [], []>} : vector<10x28xf32>, vector<28x168xf32>, vector<10x168xf32> -> vector<10x168xf32>
    %c4_238 = arith.constant 4 : index
    %c0_239 = arith.constant 0 : index
    %c0_240 = arith.constant 0 : index
    %231 = vector.load %arg3[%c4_238, %c0_239, %c0_240] : memref<10x168x160xf32, #tpu.memory_space<vmem>>, vector<1x168x160xf32>
    %232 = vector.shape_cast %231 : vector<1x168x160xf32> to vector<168x160xf32>
    %cst_241 = arith.constant dense<0.000000e+00> : vector<10x160xf32>
    %233 = tpu.matmul %230, %232, %cst_241 {dimension_numbers = #tpu.dot_dimension_numbers<[1], [0], [0], [1], [0, 0, 1, 1], [], []>} : vector<10x168xf32>, vector<168x160xf32>, vector<10x160xf32> -> vector<10x160xf32>
    %234 = arith.addf %227, %233 : vector<10x160xf32>
    %c5_242 = arith.constant 5 : index
    %c0_243 = arith.constant 0 : index
    %c0_244 = arith.constant 0 : index
    %235 = vector.load %arg2[%c5_242, %c0_243, %c0_244] : memref<10x10x28xf32, #tpu.memory_space<vmem>>, vector<1x10x28xf32>
    %236 = vector.shape_cast %235 : vector<1x10x28xf32> to vector<10x28xf32>
    %cst_245 = arith.constant dense<0.000000e+00> : vector<10x168xf32>
    %237 = tpu.matmul %236, %198, %cst_245 {dimension_numbers = #tpu.dot_dimension_numbers<[1], [0], [0], [1], [0, 0, 1, 1], [], []>} : vector<10x28xf32>, vector<28x168xf32>, vector<10x168xf32> -> vector<10x168xf32>
    %c5_246 = arith.constant 5 : index
    %c0_247 = arith.constant 0 : index
    %c0_248 = arith.constant 0 : index
    %238 = vector.load %arg3[%c5_246, %c0_247, %c0_248] : memref<10x168x160xf32, #tpu.memory_space<vmem>>, vector<1x168x160xf32>
    %239 = vector.shape_cast %238 : vector<1x168x160xf32> to vector<168x160xf32>
    %cst_249 = arith.constant dense<0.000000e+00> : vector<10x160xf32>
    %240 = tpu.matmul %237, %239, %cst_249 {dimension_numbers = #tpu.dot_dimension_numbers<[1], [0], [0], [1], [0, 0, 1, 1], [], []>} : vector<10x168xf32>, vector<168x160xf32>, vector<10x160xf32> -> vector<10x160xf32>
    %241 = arith.addf %234, %240 : vector<10x160xf32>
    %c6_250 = arith.constant 6 : index
    %c0_251 = arith.constant 0 : index
    %c0_252 = arith.constant 0 : index
    %242 = vector.load %arg2[%c6_250, %c0_251, %c0_252] : memref<10x10x28xf32, #tpu.memory_space<vmem>>, vector<1x10x28xf32>
    %243 = vector.shape_cast %242 : vector<1x10x28xf32> to vector<10x28xf32>
    %cst_253 = arith.constant dense<0.000000e+00> : vector<10x168xf32>
    %244 = tpu.matmul %243, %198, %cst_253 {dimension_numbers = #tpu.dot_dimension_numbers<[1], [0], [0], [1], [0, 0, 1, 1], [], []>} : vector<10x28xf32>, vector<28x168xf32>, vector<10x168xf32> -> vector<10x168xf32>
    %c6_254 = arith.constant 6 : index
    %c0_255 = arith.constant 0 : index
    %c0_256 = arith.constant 0 : index
    %245 = vector.load %arg3[%c6_254, %c0_255, %c0_256] : memref<10x168x160xf32, #tpu.memory_space<vmem>>, vector<1x168x160xf32>
    %246 = vector.shape_cast %245 : vector<1x168x160xf32> to vector<168x160xf32>
    %cst_257 = arith.constant dense<0.000000e+00> : vector<10x160xf32>
    %247 = tpu.matmul %244, %246, %cst_257 {dimension_numbers = #tpu.dot_dimension_numbers<[1], [0], [0], [1], [0, 0, 1, 1], [], []>} : vector<10x168xf32>, vector<168x160xf32>, vector<10x160xf32> -> vector<10x160xf32>
    %248 = arith.addf %241, %247 : vector<10x160xf32>
    %c7_258 = arith.constant 7 : index
    %c0_259 = arith.constant 0 : index
    %c0_260 = arith.constant 0 : index
    %249 = vector.load %arg2[%c7_258, %c0_259, %c0_260] : memref<10x10x28xf32, #tpu.memory_space<vmem>>, vector<1x10x28xf32>
    %250 = vector.shape_cast %249 : vector<1x10x28xf32> to vector<10x28xf32>
    %cst_261 = arith.constant dense<0.000000e+00> : vector<10x168xf32>
    %251 = tpu.matmul %250, %198, %cst_261 {dimension_numbers = #tpu.dot_dimension_numbers<[1], [0], [0], [1], [0, 0, 1, 1], [], []>} : vector<10x28xf32>, vector<28x168xf32>, vector<10x168xf32> -> vector<10x168xf32>
    %c7_262 = arith.constant 7 : index
    %c0_263 = arith.constant 0 : index
    %c0_264 = arith.constant 0 : index
    %252 = vector.load %arg3[%c7_262, %c0_263, %c0_264] : memref<10x168x160xf32, #tpu.memory_space<vmem>>, vector<1x168x160xf32>
    %253 = vector.shape_cast %252 : vector<1x168x160xf32> to vector<168x160xf32>
    %cst_265 = arith.constant dense<0.000000e+00> : vector<10x160xf32>
    %254 = tpu.matmul %251, %253, %cst_265 {dimension_numbers = #tpu.dot_dimension_numbers<[1], [0], [0], [1], [0, 0, 1, 1], [], []>} : vector<10x168xf32>, vector<168x160xf32>, vector<10x160xf32> -> vector<10x160xf32>
    %255 = arith.addf %248, %254 : vector<10x160xf32>
    %c8_266 = arith.constant 8 : index
    %c0_267 = arith.constant 0 : index
    %c0_268 = arith.constant 0 : index
    %256 = vector.load %arg2[%c8_266, %c0_267, %c0_268] : memref<10x10x28xf32, #tpu.memory_space<vmem>>, vector<1x10x28xf32>
    %257 = vector.shape_cast %256 : vector<1x10x28xf32> to vector<10x28xf32>
    %cst_269 = arith.constant dense<0.000000e+00> : vector<10x168xf32>
    %258 = tpu.matmul %257, %198, %cst_269 {dimension_numbers = #tpu.dot_dimension_numbers<[1], [0], [0], [1], [0, 0, 1, 1], [], []>} : vector<10x28xf32>, vector<28x168xf32>, vector<10x168xf32> -> vector<10x168xf32>
    %c8_270 = arith.constant 8 : index
    %c0_271 = arith.constant 0 : index
    %c0_272 = arith.constant 0 : index
    %259 = vector.load %arg3[%c8_270, %c0_271, %c0_272] : memref<10x168x160xf32, #tpu.memory_space<vmem>>, vector<1x168x160xf32>
    %260 = vector.shape_cast %259 : vector<1x168x160xf32> to vector<168x160xf32>
    %cst_273 = arith.constant dense<0.000000e+00> : vector<10x160xf32>
    %261 = tpu.matmul %258, %260, %cst_273 {dimension_numbers = #tpu.dot_dimension_numbers<[1], [0], [0], [1], [0, 0, 1, 1], [], []>} : vector<10x168xf32>, vector<168x160xf32>, vector<10x160xf32> -> vector<10x160xf32>
    %262 = arith.addf %255, %261 : vector<10x160xf32>
    %c9_274 = arith.constant 9 : index
    %c0_275 = arith.constant 0 : index
    %c0_276 = arith.constant 0 : index
    %263 = vector.load %arg2[%c9_274, %c0_275, %c0_276] : memref<10x10x28xf32, #tpu.memory_space<vmem>>, vector<1x10x28xf32>
    %264 = vector.shape_cast %263 : vector<1x10x28xf32> to vector<10x28xf32>
    %cst_277 = arith.constant dense<0.000000e+00> : vector<10x168xf32>
    %265 = tpu.matmul %264, %198, %cst_277 {dimension_numbers = #tpu.dot_dimension_numbers<[1], [0], [0], [1], [0, 0, 1, 1], [], []>} : vector<10x28xf32>, vector<28x168xf32>, vector<10x168xf32> -> vector<10x168xf32>
    %c9_278 = arith.constant 9 : index
    %c0_279 = arith.constant 0 : index
    %c0_280 = arith.constant 0 : index
    %266 = vector.load %arg3[%c9_278, %c0_279, %c0_280] : memref<10x168x160xf32, #tpu.memory_space<vmem>>, vector<1x168x160xf32>
    %267 = vector.shape_cast %266 : vector<1x168x160xf32> to vector<168x160xf32>
    %cst_281 = arith.constant dense<0.000000e+00> : vector<10x160xf32>
    %268 = tpu.matmul %265, %267, %cst_281 {dimension_numbers = #tpu.dot_dimension_numbers<[1], [0], [0], [1], [0, 0, 1, 1], [], []>} : vector<10x168xf32>, vector<168x160xf32>, vector<10x160xf32> -> vector<10x160xf32>
    %269 = arith.addf %262, %268 : vector<10x160xf32>
    %c0_282 = arith.constant 0 : index
    %c0_283 = arith.constant 0 : index
    %270 = vector.load %arg8[%c0_282, %c0_283] : memref<1x160xf32, #tpu.memory_space<vmem>>, vector<1x160xf32>
    %271 = vector.broadcast %270 : vector<1x160xf32> to vector<10x160xf32>
    %272 = arith.addf %269, %271 : vector<10x160xf32>
    %273 = math.tanh %272 : vector<10x160xf32>
    %cst_284 = arith.constant 0.000000e+00 : f32
    %274 = vector.broadcast %cst_284 : f32 to vector<1x120xf32>
    %275 = vector.extract_strided_slice %273 {offsets = [0, 0], sizes = [1, 160], strides = [1, 1]} : vector<10x160xf32> to vector<1x160xf32>
    %c0_285 = arith.constant 0 : index
    %c0_286 = arith.constant 0 : index
    %c0_287 = arith.constant 0 : index
    %276 = vector.load %arg4[%c0_285, %c0_286, %c0_287] : memref<10x160x120xf32, #tpu.memory_space<vmem>>, vector<1x160x120xf32>
    %277 = vector.shape_cast %276 : vector<1x160x120xf32> to vector<160x120xf32>
    %cst_288 = arith.constant dense<0.000000e+00> : vector<1x120xf32>
    %278 = tpu.matmul %275, %277, %cst_288 {dimension_numbers = #tpu.dot_dimension_numbers<[1], [0], [0], [1], [0, 0, 1, 1], [], []>} : vector<1x160xf32>, vector<160x120xf32>, vector<1x120xf32> -> vector<1x120xf32>
    %279 = arith.addf %274, %278 : vector<1x120xf32>
    %280 = vector.extract_strided_slice %273 {offsets = [1, 0], sizes = [1, 160], strides = [1, 1]} : vector<10x160xf32> to vector<1x160xf32>
    %c1_289 = arith.constant 1 : index
    %c0_290 = arith.constant 0 : index
    %c0_291 = arith.constant 0 : index
    %281 = vector.load %arg4[%c1_289, %c0_290, %c0_291] : memref<10x160x120xf32, #tpu.memory_space<vmem>>, vector<1x160x120xf32>
    %282 = vector.shape_cast %281 : vector<1x160x120xf32> to vector<160x120xf32>
    %cst_292 = arith.constant dense<0.000000e+00> : vector<1x120xf32>
    %283 = tpu.matmul %280, %282, %cst_292 {dimension_numbers = #tpu.dot_dimension_numbers<[1], [0], [0], [1], [0, 0, 1, 1], [], []>} : vector<1x160xf32>, vector<160x120xf32>, vector<1x120xf32> -> vector<1x120xf32>
    %284 = arith.addf %279, %283 : vector<1x120xf32>
    %285 = vector.extract_strided_slice %273 {offsets = [2, 0], sizes = [1, 160], strides = [1, 1]} : vector<10x160xf32> to vector<1x160xf32>
    %c2_293 = arith.constant 2 : index
    %c0_294 = arith.constant 0 : index
    %c0_295 = arith.constant 0 : index
    %286 = vector.load %arg4[%c2_293, %c0_294, %c0_295] : memref<10x160x120xf32, #tpu.memory_space<vmem>>, vector<1x160x120xf32>
    %287 = vector.shape_cast %286 : vector<1x160x120xf32> to vector<160x120xf32>
    %cst_296 = arith.constant dense<0.000000e+00> : vector<1x120xf32>
    %288 = tpu.matmul %285, %287, %cst_296 {dimension_numbers = #tpu.dot_dimension_numbers<[1], [0], [0], [1], [0, 0, 1, 1], [], []>} : vector<1x160xf32>, vector<160x120xf32>, vector<1x120xf32> -> vector<1x120xf32>
    %289 = arith.addf %284, %288 : vector<1x120xf32>
    %290 = vector.extract_strided_slice %273 {offsets = [3, 0], sizes = [1, 160], strides = [1, 1]} : vector<10x160xf32> to vector<1x160xf32>
    %c3_297 = arith.constant 3 : index
    %c0_298 = arith.constant 0 : index
    %c0_299 = arith.constant 0 : index
    %291 = vector.load %arg4[%c3_297, %c0_298, %c0_299] : memref<10x160x120xf32, #tpu.memory_space<vmem>>, vector<1x160x120xf32>
    %292 = vector.shape_cast %291 : vector<1x160x120xf32> to vector<160x120xf32>
    %cst_300 = arith.constant dense<0.000000e+00> : vector<1x120xf32>
    %293 = tpu.matmul %290, %292, %cst_300 {dimension_numbers = #tpu.dot_dimension_numbers<[1], [0], [0], [1], [0, 0, 1, 1], [], []>} : vector<1x160xf32>, vector<160x120xf32>, vector<1x120xf32> -> vector<1x120xf32>
    %294 = arith.addf %289, %293 : vector<1x120xf32>
    %295 = vector.extract_strided_slice %273 {offsets = [4, 0], sizes = [1, 160], strides = [1, 1]} : vector<10x160xf32> to vector<1x160xf32>
    %c4_301 = arith.constant 4 : index
    %c0_302 = arith.constant 0 : index
    %c0_303 = arith.constant 0 : index
    %296 = vector.load %arg4[%c4_301, %c0_302, %c0_303] : memref<10x160x120xf32, #tpu.memory_space<vmem>>, vector<1x160x120xf32>
    %297 = vector.shape_cast %296 : vector<1x160x120xf32> to vector<160x120xf32>
    %cst_304 = arith.constant dense<0.000000e+00> : vector<1x120xf32>
    %298 = tpu.matmul %295, %297, %cst_304 {dimension_numbers = #tpu.dot_dimension_numbers<[1], [0], [0], [1], [0, 0, 1, 1], [], []>} : vector<1x160xf32>, vector<160x120xf32>, vector<1x120xf32> -> vector<1x120xf32>
    %299 = arith.addf %294, %298 : vector<1x120xf32>
    %300 = vector.extract_strided_slice %273 {offsets = [5, 0], sizes = [1, 160], strides = [1, 1]} : vector<10x160xf32> to vector<1x160xf32>
    %c5_305 = arith.constant 5 : index
    %c0_306 = arith.constant 0 : index
    %c0_307 = arith.constant 0 : index
    %301 = vector.load %arg4[%c5_305, %c0_306, %c0_307] : memref<10x160x120xf32, #tpu.memory_space<vmem>>, vector<1x160x120xf32>
    %302 = vector.shape_cast %301 : vector<1x160x120xf32> to vector<160x120xf32>
    %cst_308 = arith.constant dense<0.000000e+00> : vector<1x120xf32>
    %303 = tpu.matmul %300, %302, %cst_308 {dimension_numbers = #tpu.dot_dimension_numbers<[1], [0], [0], [1], [0, 0, 1, 1], [], []>} : vector<1x160xf32>, vector<160x120xf32>, vector<1x120xf32> -> vector<1x120xf32>
    %304 = arith.addf %299, %303 : vector<1x120xf32>
    %305 = vector.extract_strided_slice %273 {offsets = [6, 0], sizes = [1, 160], strides = [1, 1]} : vector<10x160xf32> to vector<1x160xf32>
    %c6_309 = arith.constant 6 : index
    %c0_310 = arith.constant 0 : index
    %c0_311 = arith.constant 0 : index
    %306 = vector.load %arg4[%c6_309, %c0_310, %c0_311] : memref<10x160x120xf32, #tpu.memory_space<vmem>>, vector<1x160x120xf32>
    %307 = vector.shape_cast %306 : vector<1x160x120xf32> to vector<160x120xf32>
    %cst_312 = arith.constant dense<0.000000e+00> : vector<1x120xf32>
    %308 = tpu.matmul %305, %307, %cst_312 {dimension_numbers = #tpu.dot_dimension_numbers<[1], [0], [0], [1], [0, 0, 1, 1], [], []>} : vector<1x160xf32>, vector<160x120xf32>, vector<1x120xf32> -> vector<1x120xf32>
    %309 = arith.addf %304, %308 : vector<1x120xf32>
    %310 = vector.extract_strided_slice %273 {offsets = [7, 0], sizes = [1, 160], strides = [1, 1]} : vector<10x160xf32> to vector<1x160xf32>
    %c7_313 = arith.constant 7 : index
    %c0_314 = arith.constant 0 : index
    %c0_315 = arith.constant 0 : index
    %311 = vector.load %arg4[%c7_313, %c0_314, %c0_315] : memref<10x160x120xf32, #tpu.memory_space<vmem>>, vector<1x160x120xf32>
    %312 = vector.shape_cast %311 : vector<1x160x120xf32> to vector<160x120xf32>
    %cst_316 = arith.constant dense<0.000000e+00> : vector<1x120xf32>
    %313 = tpu.matmul %310, %312, %cst_316 {dimension_numbers = #tpu.dot_dimension_numbers<[1], [0], [0], [1], [0, 0, 1, 1], [], []>} : vector<1x160xf32>, vector<160x120xf32>, vector<1x120xf32> -> vector<1x120xf32>
    %314 = arith.addf %309, %313 : vector<1x120xf32>
    %315 = vector.extract_strided_slice %273 {offsets = [8, 0], sizes = [1, 160], strides = [1, 1]} : vector<10x160xf32> to vector<1x160xf32>
    %c8_317 = arith.constant 8 : index
    %c0_318 = arith.constant 0 : index
    %c0_319 = arith.constant 0 : index
    %316 = vector.load %arg4[%c8_317, %c0_318, %c0_319] : memref<10x160x120xf32, #tpu.memory_space<vmem>>, vector<1x160x120xf32>
    %317 = vector.shape_cast %316 : vector<1x160x120xf32> to vector<160x120xf32>
    %cst_320 = arith.constant dense<0.000000e+00> : vector<1x120xf32>
    %318 = tpu.matmul %315, %317, %cst_320 {dimension_numbers = #tpu.dot_dimension_numbers<[1], [0], [0], [1], [0, 0, 1, 1], [], []>} : vector<1x160xf32>, vector<160x120xf32>, vector<1x120xf32> -> vector<1x120xf32>
    %319 = arith.addf %314, %318 : vector<1x120xf32>
    %320 = vector.extract_strided_slice %273 {offsets = [9, 0], sizes = [1, 160], strides = [1, 1]} : vector<10x160xf32> to vector<1x160xf32>
    %c9_321 = arith.constant 9 : index
    %c0_322 = arith.constant 0 : index
    %c0_323 = arith.constant 0 : index
    %321 = vector.load %arg4[%c9_321, %c0_322, %c0_323] : memref<10x160x120xf32, #tpu.memory_space<vmem>>, vector<1x160x120xf32>
    %322 = vector.shape_cast %321 : vector<1x160x120xf32> to vector<160x120xf32>
    %cst_324 = arith.constant dense<0.000000e+00> : vector<1x120xf32>
    %323 = tpu.matmul %320, %322, %cst_324 {dimension_numbers = #tpu.dot_dimension_numbers<[1], [0], [0], [1], [0, 0, 1, 1], [], []>} : vector<1x160xf32>, vector<160x120xf32>, vector<1x120xf32> -> vector<1x120xf32>
    %324 = arith.addf %319, %323 : vector<1x120xf32>
    %c0_325 = arith.constant 0 : index
    %c0_326 = arith.constant 0 : index
    %325 = vector.load %arg9[%c0_325, %c0_326] : memref<1x120xf32, #tpu.memory_space<vmem>>, vector<1x120xf32>
    %326 = arith.addf %324, %325 : vector<1x120xf32>
    %327 = math.tanh %326 : vector<1x120xf32>
    %328 = tpu.concatenate %163, %327 in 0 : vector<1x120xf32>, vector<1x120xf32> -> vector<2x120xf32>
    %c0_327 = arith.constant 0 : index
    %c0_328 = arith.constant 0 : index
    %329 = vector.load %arg5[%c0_327, %c0_328] : memref<120x84xf32, #tpu.memory_space<vmem>>, vector<120x84xf32>
    %cst_329 = arith.constant dense<0.000000e+00> : vector<2x84xf32>
    %330 = tpu.matmul %328, %329, %cst_329 {dimension_numbers = #tpu.dot_dimension_numbers<[1], [0], [0], [1], [0, 0, 1, 1], [], []>} : vector<2x120xf32>, vector<120x84xf32>, vector<2x84xf32> -> vector<2x84xf32>
    %c0_330 = arith.constant 0 : index
    %c0_331 = arith.constant 0 : index
    %331 = vector.load %arg10[%c0_330, %c0_331] : memref<1x84xf32, #tpu.memory_space<vmem>>, vector<1x84xf32>
    %332 = vector.broadcast %331 : vector<1x84xf32> to vector<2x84xf32>
    %333 = arith.addf %330, %332 : vector<2x84xf32>
    %334 = math.tanh %333 : vector<2x84xf32>
    %c0_332 = arith.constant 0 : index
    %c0_333 = arith.constant 0 : index
    %335 = vector.load %arg6[%c0_332, %c0_333] : memref<84x10xf32, #tpu.memory_space<vmem>>, vector<84x10xf32>
    %cst_334 = arith.constant dense<0.000000e+00> : vector<2x10xf32>
    %336 = tpu.matmul %334, %335, %cst_334 {dimension_numbers = #tpu.dot_dimension_numbers<[1], [0], [0], [1], [0, 0, 1, 1], [], []>} : vector<2x84xf32>, vector<84x10xf32>, vector<2x10xf32> -> vector<2x10xf32>
    %c0_335 = arith.constant 0 : index
    %c0_336 = arith.constant 0 : index
    %337 = vector.load %arg11[%c0_335, %c0_336] : memref<1x10xf32, #tpu.memory_space<vmem>>, vector<1x10xf32>
    %338 = vector.broadcast %337 : vector<1x10xf32> to vector<2x10xf32>
    %339 = arith.addf %336, %338 : vector<2x10xf32>
    %c0_337 = arith.constant 0 : index
    %c0_338 = arith.constant 0 : index
    %340 = vector.load %arg12[%c0_337, %c0_338] : memref<2x10xf32, #tpu.memory_space<vmem>>, vector<2x10xf32>
    tpu.vector_store %arg12[%c0_337, %c0_338], %339 {strides = array<i32>} : memref<2x10xf32, #tpu.memory_space<vmem>>, vector<2x10xf32>,
    return
  }
}

</mosaic_0001>

<bundles_post_ra>
// kernel: lenet5_forward.1
= control target key start
LH: loop header
LB: loop body
LE: loop exit
PB: predicated region body
PF: predicated region fallthrough
CT: control target
= control target key end

     0   :  { %v14552_v7 = vmov 0.0   ;;  %vm67_vm0 = vcmask 261120   ;;  %s14537_s0 = inlined_call_operand.vmem [shape: f32[2,1,32,32], index: 0, kind: input, shape index: {}]   ;;  %s14538_s1 = inlined_call_operand.vmem [shape: f32[5,32,168], index: 1, kind: input, shape index: {}]   ;;  %s14539_s2 = inlined_call_operand.vmem [shape: f32[10,10,28], index: 2, kind: input, shape index: {}]   ;;  %s14540_s3 = inlined_call_operand.vmem [shape: f32[10,168,160], index: 3, kind: input, shape index: {}]   ;;  %s14541_s4 = inlined_call_operand.vmem [shape: f32[10,160,120], index: 4, kind: input, shape index: {}]   ;;  %s14542_s5 = inlined_call_operand.vmem [shape: f32[120,84], index: 5, kind: input, shape index: {}]   ;;  %s14543_s6 = inlined_call_operand.vmem [shape: f32[84,10], index: 6, kind: input, shape index: {}]   ;;  %s14544_s7 = inlined_call_operand.vmem [shape: f32[1,168], index: 7, kind: input, shape index: {}]   ;;  %s14545_s8 = inlined_call_operand.vmem [shape: f32[1,160], index: 8, kind: input, shape index: {}]   ;;  %s14546_s9 = inlined_call_operand.vmem [shape: f32[1,120], index: 9, kind: input, shape index: {}]   ;;  %s14547_s10 = inlined_call_operand.vmem [shape: f32[1,84], index: 10, kind: input, shape index: {}]   ;;  %s14548_s11 = inlined_call_operand.vmem [shape: f32[1,10], index: 11, kind: input, shape index: {}]   ;;  %s14549_s12 = inlined_call_operand.hbm [shape: f32[2,10], index: 12, kind: output, shape index: {}]  }
   0x1   :  { %v6995_v0 = vld [vmem:[%s14538_s1 + $0x48] sm:$0xff]  ;;  %v6997_v1 = vld [vmem:[%s14538_s1 + $0x58] sm:$0xff]  ;;  %v6994_v2 = vld [vmem:[%s14538_s1 + $0x40] sm:$0xff]  ;;  %144 = vmatprep.mubr.f32.mxu0 %v14552_v7  ;;  %744 = vmatprep.mubr.f32.mxu1 %v14552_v7 }
   0x2   :  { %v9947_v3 = vpack.c.bf16 %v6997_v1, %v6995_v0  ;;  %v6996_v4 = vld [vmem:[%s14538_s1 + $0x50] sm:$0xff]  ;;  %v6999_v5 = vld [vmem:[%s14538_s1 + $0x68] sm:$0xff]  ;;  %v7001_v6 = vld [vmem:[%s14538_s1 + $0x78] sm:$0xff] }
   0x3   :  { %v9960_v8 = vpack.c.bf16 %v6996_v4, %v6994_v2  ;;  %v9962_v9 = vpack.c.bf16 %v7001_v6, %v6999_v5  ;;  %v6998_v10 = vld [vmem:[%s14538_s1 + $0x60] sm:$0xff]  ;;  %v7000_v11 = vld [vmem:[%s14538_s1 + $0x70] sm:$0xff]  ;;  %v47_v12 = vld [vmem:[%s14538_s1 + $0x8] sm:$0xff] }
   0x4   :  { %7894 = vmatprep.subr.bf16.mxu0 %v9947_v3  ;;  %v49_v13 = vld [vmem:[%s14538_s1 + $0x18] sm:$0xff]  ;;  %v9978_v14 = vpack.c.bf16 %v7000_v11, %v6998_v10  ;;  %v46_v16 = vld [vmem:[%s14538_s1] sm:$0xff]  ;;  %v48_v17 = vld [vmem:[%s14538_s1 + $0x10] sm:$0xff] }
   0x5   :  { %7896 = vmatpush1.bf16.msra.mxu0 %v9960_v8  ;;  %v9981_v15 = vpack.c.bf16 %v49_v13, %v47_v12  ;;  %v51_v18 = vld [vmem:[%s14538_s1 + $0x28] sm:$0xff]  ;;  %v53_v19 = vld [vmem:[%s14538_s1 + $0x38] sm:$0xff]  ;;  %v9999_v21 = vpack.c.bf16 %v48_v17, %v46_v16  ;;  %v50_v23 = vld [vmem:[%s14538_s1 + $0x20] sm:$0xff] }
   0x6   :  { %7898 = vmatprep.subr.bf16.mxu0 %v9962_v9  ;;  %v54_v20 = vld [vmem:[%s14537_s0 + $0x1] sm:$0xff]  ;;  %v10002_v22 = vpack.c.bf16 %v53_v19, %v51_v18  ;;  %v52_v24 = vld [vmem:[%s14538_s1 + $0x30] sm:$0xff]  ;;  %v7013_v26 = vld [vmem:[%s14538_s1 + $0x98] sm:$0xff] }
   0x7   :  { %v7011_v25 = vld [vmem:[%s14538_s1 + $0x88] sm:$0xff]  ;;  %v10022_v28 = vpack.c.bf16 %v52_v24, %v50_v23  ;;  %v56_v30 = vld [vmem:[%s14537_s0 + $0x11] sm:$0xff]  ;;  %v57_v31 = vld [vmem:[%s14537_s0 + $0x19] sm:$0xf] }
   0x8   :  { %v55_v27 = vld [vmem:[%s14537_s0 + $0x9] sm:$0xff]  ;;  %v10025_v29 = vpack.c.bf16 %v7013_v26, %v7011_v25 }
   0x9   :  { %7900 = vmatpush1.bf16.msra.mxu0 %v9978_v14 }
   0xa   :  { %7902 = vmatprep.subr.bf16.mxu0 %v9981_v15 }
   0xc   :  { %7002 = vmatmul.mubr.msk.f32.vlgmr.msra.gmra.mrb[0].mxu0 %vm67_vm0, %v54_v20 }
   0xd   :  { %7904 = vmatpush1.bf16.msra.mxu0 %v9999_v21  ;;  %150 = vmatprep.mubr.f32.mxu0 %v14552_v7 }
   0xe   :  { %7906 = vmatprep.subr.bf16.mxu0 %v10002_v22 }
  0x10   :  { %7003 = vmatmul.mubr.msk.f32.gmra.mrb[2].mxu0 %vm67_vm0, %v55_v27 }
  0x11   :  { %156 = vmatprep.mubr.f32.mxu0 %v14552_v7  ;;  %7908 = vmatpush1.bf16.msra.mxu0 %v10022_v28 }
  0x12   :  { %7910 = vmatprep.subr.bf16.mxu0 %v10025_v29 }
  0x14   :  { %7004 = vmatmul.mubr.msk.f32.gmra.mrb[4].mxu0 %vm67_vm0, %v56_v30 }
  0x15   :  { %162 = vmatprep.mubr.f32.mxu0 %v14552_v7 }
  0x16   :  { %17 = vsyncpa [#allocation3], 0  ;;  %v7010_v32 = vld [vmem:[%s14538_s1 + $0x80] sm:$0xff]  ;;  %v7012_v33 = vld [vmem:[%s14538_s1 + $0x90] sm:$0xff]  ;;  %v638_v25 = vlaneseq  ;;  %vm673_vm1 = vcmask 1043456   ;;  %vm9869_vm2 = vmmov 1  }
  0x17   :  { %v7015_v34 = vld [vmem:[%s14538_s1 + $0xa8] sm:$0xff]  ;;  %v7017_v35 = vld [vmem:[%s14538_s1 + $0xb8] sm:$0xff]  ;;  %v42_v36 = vld [vmem:[%s14537_s0] sm:$0xff]  ;;  %v10056_v37 = vpack.c.bf16 %v7012_v33, %v7010_v32  ;;  %vm666_vm4 = vcmask 228352   ;;  %vm928_vm5 = vcmask 326656   ;;  %vm9871_vm6 = vmmov 0  }
  0x18   :  { %7005 = vmatmul.mubr.msk.f32.gmra.mrb[6].mxu0 %vm67_vm0, %v57_v31  ;;  %v10058_v38 = vpack.c.bf16 %v7017_v35, %v7015_v34  ;;  %v7014_v39 = vld [vmem:[%s14538_s1 + $0xa0] sm:$0xff]  ;;  %v7016_v40 = vld [vmem:[%s14538_s1 + $0xb0] sm:$0xff]  ;;  %v7023_v41 = vld [vmem:[%s14538_s1 + $0xc8] sm:$0xff]  ;;  %v10220_v26 = vshrl.u32 %v638_v25, 7  ;;  %vm6784_vm7 = vcmask 1040384   ;;  %vm6808_vm8 = vcmask 982016  }
  0x19   :  { %245 = vmatprep.mubr.f32.mxu0 %v14552_v7  ;;  %v7025_v42 = vld [vmem:[%s14538_s1 + $0xd8] sm:$0xff]  ;;  %v43_v43 = vld [vmem:[%s14537_s0 + $0x8] sm:$0xff]  ;;  %v10078_v44 = vpack.c.bf16 %v7016_v40, %v7014_v39  ;;  %v44_v46 = vld [vmem:[%s14537_s0 + $0x10] sm:$0xff]  ;;  %vm6901_vm9 = vcmask 687104   ;;  %s9872_s21 = smov [#allocation2]   ;;  %vm6978_vm10 = vcmask 74752  }
  0x1a   :  { %v10081_v45 = vpack.c.bf16 %v7025_v42, %v7023_v41  ;;  %v45_v47 = vld [vmem:[%s14537_s0 + $0x18] sm:$0xf]  ;;  %v7022_v48 = vld [vmem:[%s14538_s1 + $0xc0] sm:$0xff]  ;;  %v7024_v49 = vld [vmem:[%s14538_s1 + $0xd0] sm:$0xff]  ;;  %v14551_v27 = vsub.s32 0, %v10220_v26  ;;  %v14550_v31 = vsub.s32 1, %v10220_v26 }
  0x1b   :  { %v7027_v50 = vld [vmem:[%s14538_s1 + $0xe8] sm:$0xff]  ;;  %v7029_v51 = vld [vmem:[%s14538_s1 + $0xf8] sm:$0xff]  ;;  %v10112_v53 = vpack.c.bf16 %v7024_v49, %v7022_v48  ;;  %v7026_v55 = vld [vmem:[%s14538_s1 + $0xe0] sm:$0xff] }
  0x1c   :  { %7006 = vmatmul.mubr.msk.f32.vlgmr.msra.gmra.mrb[0].mxu0 %vm67_vm0, %v42_v36  ;;  %v270_v52 = vld [vmem:[%s14537_s0 + $0x2] sm:$0xff]  ;;  %v10114_v54 = vpack.c.bf16 %v7029_v51, %v7027_v50  ;;  %v7028_v56 = vld [vmem:[%s14538_s1 + $0xf0] sm:$0xff]  ;;  %v7037_v58 = vld [vmem:[%s14538_s1 + $0x118] sm:$0xff] }
  0x1d   :  { %7912 = vmatpush1.bf16.msra.mxu0 %v10056_v37  ;;  %251 = vmatprep.mubr.f32.mxu0 %v14552_v7  ;;  %v7035_v57 = vld [vmem:[%s14538_s1 + $0x108] sm:$0xff]  ;;  %v10134_v60 = vpack.c.bf16 %v7028_v56, %v7026_v55  ;;  %v272_v62 = vld [vmem:[%s14537_s0 + $0x12] sm:$0xff]  ;;  %v273_v63 = vld [vmem:[%s14537_s0 + $0x1a] sm:$0xf] }
  0x1e   :  { %7914 = vmatprep.subr.bf16.mxu0 %v10058_v38  ;;  %v271_v59 = vld [vmem:[%s14537_s0 + $0xa] sm:$0xff]  ;;  %v10137_v61 = vpack.c.bf16 %v7037_v58, %v7035_v57  ;;  %v7034_v0 = vld [vmem:[%s14538_s1 + $0x100] sm:$0xff]  ;;  %v7041_v4 = vld [vmem:[%s14538_s1 + $0x138] sm:$0xff] }
  0x1f   :  { %v7036_v1 = vld [vmem:[%s14538_s1 + $0x110] sm:$0xff]  ;;  %v7039_v2 = vld [vmem:[%s14538_s1 + $0x128] sm:$0xff]  ;;  %v7038_v11 = vld [vmem:[%s14538_s1 + $0x120] sm:$0xff] }
  0x20   :  { %7007 = vmatmul.mubr.msk.f32.gmra.mrb[2].mxu0 %vm67_vm0, %v43_v43  ;;  %v392_v5 = vld [vmem:[%s14537_s0 + $0x3] sm:$0xff]  ;;  %v10168_v6 = vpack.c.bf16 %v7036_v1, %v7034_v0  ;;  %v10170_v10 = vpack.c.bf16 %v7041_v4, %v7039_v2  ;;  %v7040_v12 = vld [vmem:[%s14538_s1 + $0x130] sm:$0xff]  ;;  %v395_v18 = vld [vmem:[%s14537_s0 + $0x1b] sm:$0xf]  ;;  %s6986_s1 = sshll.u32 %s9872_s21, 4  ;;  %s6987_s1 = int_to_ptr.vmem [resolvable:$true] %s6986_s1 }
  0x21   :  { %257 = vmatprep.mubr.f32.mxu0 %v14552_v7  ;;  %7916 = vmatpush1.bf16.msra.mxu0 %v10078_v44  ;;  %v393_v13 = vld [vmem:[%s14537_s0 + $0xb] sm:$0xff]  ;;  %v10184_v16 = vpack.c.bf16 %v7040_v12, %v7038_v11  ;;  %v394_v17 = vld [vmem:[%s14537_s0 + $0x13] sm:$0xff]  ;;  %v517_v24 = vld [vmem:[%s14537_s0 + $0x1c] sm:$0xf]  ;;  %p9849_p1 = scmp.lt.s32.totalorder %s6987_s1, %s6987_s1 }
  0x22   :  { %7918 = vmatprep.subr.bf16.mxu0 %v10081_v45  ;;  %v514_v19 = vld [vmem:[%s14537_s0 + $0x4] sm:$0xff]  ;;  %v515_v20 = vld [vmem:[%s14537_s0 + $0xc] sm:$0xff]  ;;  %v516_v23 = vld [vmem:[%s14537_s0 + $0x14] sm:$0xff] }
  0x23   :  { %v636_v30 = vld [vmem:[%s14544_s7] sm:$0x3]  ;;  %vm10254_vm3 = vmpackc.low %vm673_vm1, %vm9869_vm2  ;;  %v7056_v25 = vld [vmem:[%s14540_s3 + $0x150] sm:$0xff] }
  0x24   :  { %7008 = vmatmul.mubr.msk.f32.gmra.mrb[4].mxu0 %vm67_vm0, %v44_v46  ;;  %v10229_v32 = vrot.slane %v636_v30, %v14551_v27  ;;  %v10233_v33 = vrot.slane %v636_v30, %v14550_v31  ;;  %v7058_v30 = vld [vmem:[%s14540_s3 + $0x160] sm:$0xff] }
  0x25   :  { %263 = vmatprep.mubr.f32.mxu0 %v14552_v7  ;;  %v761_v27 = vld [vmem:[%s14540_s3 + $0x20] sm:$0xff] }
  0x28   :  { %7009 = vmatmul.mubr.msk.f32.gmra.mrb[6].mxu0 %vm67_vm0, %v45_v47 }
  0x29   :  { %359 = vmatprep.mubr.f32.mxu0 %v14552_v7 }
  0x2c   :  { %7018 = vmatmul.mubr.msk.f32.vlgmr.msra.gmra.mrb[0].mxu0 %vm67_vm0, %v270_v52 }
  0x2d   :  { %7920 = vmatpush1.bf16.msra.mxu0 %v10112_v53  ;;  %365 = vmatprep.mubr.f32.mxu0 %v14552_v7 }
  0x2e   :  { %7922 = vmatprep.subr.bf16.mxu0 %v10114_v54 }
  0x30   :  { %7019 = vmatmul.mubr.msk.f32.gmra.mrb[2].mxu0 %vm67_vm0, %v271_v59 }
  0x31   :  { %371 = vmatprep.mubr.f32.mxu0 %v14552_v7  ;;  %7924 = vmatpush1.bf16.msra.mxu0 %v10134_v60 }
  0x32   :  { %7926 = vmatprep.subr.bf16.mxu0 %v10137_v61 }
  0x34   :  { %7020 = vmatmul.mubr.msk.f32.gmra.mrb[4].mxu0 %vm67_vm0, %v272_v62 }
  0x35   :  { %377 = vmatprep.mubr.f32.mxu0 %v14552_v7 }
  0x38   :  { %7021 = vmatmul.mubr.msk.f32.gmra.mrb[6].mxu0 %vm67_vm0, %v273_v63 }
  0x39   :  { %481 = vmatprep.mubr.f32.mxu0 %v14552_v7 }
  0x3c   :  { %7030 = vmatmul.mubr.msk.f32.vlgmr.msra.gmra.mrb[0].mxu0 %vm67_vm0, %v392_v5 }
  0x3d   :  { %7928 = vmatpush1.bf16.msra.mxu0 %v10168_v6  ;;  %487 = vmatprep.mubr.f32.mxu0 %v14552_v7 }
  0x3e   :  { %7930 = vmatprep.subr.bf16.mxu0 %v10170_v10 }
  0x40   :  { %7031 = vmatmul.mubr.msk.f32.gmra.mrb[2].mxu0 %vm67_vm0, %v393_v13  ;;  %v664_v13 = vld [vmem:[%s14539_s2] sm:$0xff] }
  0x41   :  { %493 = vmatprep.mubr.f32.mxu0 %v14552_v7  ;;  %7932 = vmatpush1.bf16.msra.mxu0 %v10184_v16 }
  0x44   :  { %7032 = vmatmul.mubr.msk.f32.gmra.mrb[4].mxu0 %vm67_vm0, %v394_v17  ;;  %v7102_v17 = vld [vmem:[%s14539_s2 + $0x20] sm:$0xff] }
  0x45   :  { %499 = vmatprep.mubr.f32.mxu0 %v14552_v7 }
  0x48   :  { %7033 = vmatmul.mubr.msk.f32.gmra.mrb[6].mxu0 %vm67_vm0, %v395_v18  ;;  %v7057_v18 = vld [vmem:[%s14540_s3 + $0x158] sm:$0xff] }
  0x49   :  { %603 = vmatprep.mubr.f32.mxu0 %v14552_v7 }
  0x4c   :  { %7042 = vmatmul.mubr.msk.f32.vlgmr.msra.gmra.mrb[0].mxu0 %vm67_vm0, %v514_v19  ;;  %v7059_v19 = vld [vmem:[%s14540_s3 + $0x168] sm:$0xff] }
  0x4d   :  { %609 = vmatprep.mubr.f32.mxu0 %v14552_v7 }
  0x50   :  { %7043 = vmatmul.mubr.msk.f32.gmra.mrb[2].mxu0 %vm67_vm0, %v515_v20  ;;  %v665_v20 = vld [vmem:[%s14539_s2 + $0x8] sm:$0x3] }
  0x51   :  { %615 = vmatprep.mubr.f32.mxu0 %v14552_v7 }
  0x54   :  { %7044 = vmatmul.mubr.msk.f32.gmra.mrb[4].mxu0 %vm67_vm0, %v516_v23  ;;  %v7103_v23 = vld [vmem:[%s14539_s2 + $0x28] sm:$0x3] }
  0x55   :  { %621 = vmatprep.mubr.f32.mxu0 %v14552_v7 }
  0x58   :  { %7045 = vmatmul.mubr.msk.f32.gmra.mrb[6].mxu0 %vm67_vm0, %v517_v24  ;;  %v10304_v24 = vpack.c.bf16 %v7059_v19, %v7057_v18 }
  0x59   :  { %1168 = vmatprep.mubr.f32.mxu0 %v14552_v7 }
 0x11f   :  { %v605_v34 = vpop.f32.mrb[0].mxu0 }
 0x120   :  { %v648_v35 = vadd.f32 %v10229_v32, %v605_v34  ;;  %v607_v36 = vpop.f32.mrb[1].mxu0  ;;  %v7050_v34 = vld [vmem:[%s14539_s2 + $0x10] sm:$0xff] }
 0x121   :  { %v649_v39 = vadd.f32 %v10233_v33, %v607_v36  ;;  %v10330_v36 = vpack.c.bf16 %v7058_v30, %v7056_v25  ;;  %v7252_v25 = vld [vmem:[%s14539_s2 + $0x50] sm:$0xff]  ;;  %v7077_v30 = vld [vmem:[%s14540_s3 + $0x1f8] sm:$0xff] }
 0x122   :  { %9750 = vtanh.f32 %v648_v35  ;;  %v7152_v35 = vld [vmem:[%s14539_s2 + $0x30] sm:$0xff] }
 0x123   :  { %v611_v40 = vpop.f32.mrb[2].mxu0  ;;  %9752 = vtanh.f32 %v649_v39  ;;  %v7061_v39 = vld [vmem:[%s14540_s3 + $0x178] sm:$0xff] }
 0x124   :  { %v650_v41 = vadd.f32 %v10229_v32, %v611_v40  ;;  %v613_v42 = vpop.f32.mrb[3].mxu0  ;;  %v7063_v40 = vld [vmem:[%s14540_s3 + $0x188] sm:$0xff] }
 0x125   :  { %v651_v43 = vadd.f32 %v10233_v33, %v613_v42  ;;  %v7060_v42 = vld [vmem:[%s14540_s3 + $0x170] sm:$0xff] }
 0x126   :  { %9754 = vtanh.f32 %v650_v41  ;;  %v7051_v41 = vld [vmem:[%s14539_s2 + $0x18] sm:$0x3] }
 0x127   :  { %9756 = vtanh.f32 %v651_v43  ;;  %v617_v46 = vpop.f32.mrb[4].mxu0  ;;  %v7062_v43 = vld [vmem:[%s14540_s3 + $0x180] sm:$0xff] }
 0x128   :  { %v652_v47 = vadd.f32 %v10229_v32, %v617_v46  ;;  %v619_v48 = vpop.f32.mrb[5].mxu0  ;;  %v7153_v46 = vld [vmem:[%s14539_s2 + $0x38] sm:$0x3] }
 0x129   :  { %v653_v49 = vadd.f32 %v10233_v33, %v619_v48  ;;  %v7067_v48 = vld [vmem:[%s14540_s3 + $0x1a8] sm:$0xff] }
 0x12a   :  { %9758 = vtanh.f32 %v652_v47  ;;  %v7065_v47 = vld [vmem:[%s14540_s3 + $0x198] sm:$0xff] }
 0x12b   :  { %v623_v50 = vpop.f32.mrb[6].mxu0  ;;  %9760 = vtanh.f32 %v653_v49  ;;  %v10364_v49 = vpack.c.bf16 %v7063_v40, %v7061_v39  ;;  %v7076_v40 = vld [vmem:[%s14540_s3 + $0x1f0] sm:$0xff] }
 0x12c   :  { %v654_v51 = vadd.f32 %v10229_v32, %v623_v50  ;;  %v625_v52 = vpop.f32.mrb[7].mxu0  ;;  %v9751_v56 = vpop.eup %9750  ;;  %v10367_v50 = vpack.c.bf16 %v7062_v43, %v7060_v42  ;;  %v7253_v42 = vld [vmem:[%s14539_s2 + $0x58] sm:$0x3] }
 0x12d   :  { %v655_v55 = vadd.f32 %v10233_v33, %v625_v52  ;;  %v9753_v57 = vpop.eup %9752  ;;  %v7064_v52 = vld [vmem:[%s14540_s3 + $0x190] sm:$0xff]  ;;  %v7081_v43 = vld [vmem:[%s14540_s3 + $0x218] sm:$0xff] }
 0x12e   :  { %9762 = vtanh.f32 %v654_v51  ;;  %v10371_v51 = vpack.c.bf16 %v7067_v48, %v7065_v47 }
 0x12f   :  { %9764 = vtanh.f32 %v655_v55  ;;  %v7066_v55 = vld [vmem:[%s14540_s3 + $0x1a0] sm:$0xff] }
 0x130   :  { %v9755_v58 = vpop.eup %9754 }
 0x131   :  { %v9757_v59 = vpop.eup %9756  ;;  %v10243_v62 = vpack.c.bf16 %v9755_v58, %v9751_v56  ;;  %v7202_v56 = vld [vmem:[%s14539_s2 + $0x40] sm:$0xff]  ;;  %v7071_v58 = vld [vmem:[%s14540_s3 + $0x1c8] sm:$0xff] }
 0x132   :  { %v10245_v63 = vpack.c.bf16 %v9757_v59, %v9753_v57  ;;  %v7069_v57 = vld [vmem:[%s14540_s3 + $0x1b8] sm:$0xff]  ;;  %v10395_v59 = vpack.c.bf16 %v7066_v55, %v7064_v52  ;;  %v7080_v52 = vld [vmem:[%s14540_s3 + $0x210] sm:$0xff]  ;;  %v7082_v55 = vld [vmem:[%s14540_s3 + $0x220] sm:$0xff] }
 0x134   :  { %7934 = vmatprep.subr.bf16.mxu1 %v10245_v63  ;;  %8034 = vmatprep.subr.bf16.mxu0 %v10245_v63  ;;  %v9759_v0 = vpop.eup %9758 }
 0x135   :  { %7936 = vmatpush1.bf16.msra.mxu1 %v10243_v62  ;;  %8036 = vmatpush1.bf16.msra.mxu0 %v10243_v62  ;;  %v9761_v1 = vpop.eup %9760 }
 0x138   :  { %v9763_v2 = vpop.eup %9762 }
 0x139   :  { %v9765_v4 = vpop.eup %9764  ;;  %v10251_v5 = vpack.c.bf16 %v9763_v2, %v9759_v0  ;;  %v10399_v0 = vpack.c.bf16 %v7071_v58, %v7069_v57  ;;  %v7070_v2 = vld [vmem:[%s14540_s3 + $0x1c0] sm:$0xff]  ;;  %v7085_v57 = vld [vmem:[%s14540_s3 + $0x238] sm:$0xff]  ;;  %v7087_v58 = vld [vmem:[%s14540_s3 + $0x248] sm:$0xff] }
 0x13a   :  { %v10258_v12 = vpack.c.bf16 %v9765_v4, %v9761_v1  ;;  %v7068_v1 = vld [vmem:[%s14540_s3 + $0x1b0] sm:$0xff]  ;;  %v7203_v4 = vld [vmem:[%s14539_s2 + $0x48] sm:$0x3] }
 0x13b   :  { %v10422_v18 = vpack.c.bf16 %v7070_v2, %v7068_v1  ;;  %v10503_v1 = vpack.c.bf16 %v7082_v55, %v7080_v52  ;;  %v10507_v2 = vpack.c.bf16 %v7087_v58, %v7085_v57  ;;  %v7094_v52 = vld [vmem:[%s14540_s3 + $0x280] sm:$0xff]  ;;  %v758_v57 = vld [vmem:[%s14540_s3 + $0x8] sm:$0xff]  ;;  %v760_v58 = vld [vmem:[%s14540_s3 + $0x18] sm:$0xff] }
 0x13c   :  { %7939 = vmatprep.subr.msk.bf16.mxu1 %vm10254_vm3, %v10258_v12  ;;  %8039 = vmatprep.subr.msk.bf16.mxu0 %vm10254_vm3, %v10258_v12 }
 0x13d   :  { %7942 = vmatpush1.bf16.msk.msra.mxu1 %vm10254_vm3, %v10251_v5  ;;  %8042 = vmatpush1.bf16.msk.msra.mxu0 %vm10254_vm3, %v10251_v5  ;;  %14813 = vst [vmem:[#allocation5_spill] sm:$0xff] %v10503_v1  ;;  %14814 = vst [vmem:[#allocation6_spill] sm:$0xff] %v10507_v2 }
 0x13e   :  { %7944 = vmatprep.subr.bf16.mxu1 %v10245_v63  ;;  %8084 = vmatprep.subr.bf16.mxu0 %v10245_v63 }
 0x140   :  { %7048 = vmatmul.mubr.msk.f32.vlgmr.msra.gmra.mrb[0].mxu1 %vm666_vm4, %v664_v13  ;;  %7106 = vmatmul.mubr.msk.f32.vlgmr.msra.gmra.mrb[8].mxu0 %vm666_vm4, %v7102_v17  ;;  %v7073_v13 = vld [vmem:[%s14540_s3 + $0x1d8] sm:$0xff]  ;;  %v7075_v17 = vld [vmem:[%s14540_s3 + $0x1e8] sm:$0xff] }
 0x141   :  { %7946 = vmatpush1.bf16.msra.mxu1 %v10243_v62  ;;  %8086 = vmatpush1.bf16.msra.mxu0 %v10243_v62  ;;  %v10426_v19 = vpack.c.bf16 %v7075_v17, %v7073_v13  ;;  %v7086_v13 = vld [vmem:[%s14540_s3 + $0x240] sm:$0xff]  ;;  %v7303_v17 = vld [vmem:[%s14539_s2 + $0x68] sm:$0x3] }
 0x142   :  { %7949 = vmatprep.subr.msk.bf16.mxu1 %vm10254_vm3, %v10258_v12  ;;  %8089 = vmatprep.subr.msk.bf16.mxu0 %vm10254_vm3, %v10258_v12 }
 0x143   :  { %750 = vmatprep.mubr.f32.mxu1 %v14552_v7  ;;  %1174 = vmatprep.mubr.f32.mxu0 %v14552_v7 }
 0x144   :  { %7049 = vmatmul.mubr.msk.f32.gmra.mrb[2].mxu1 %vm666_vm4, %v665_v20  ;;  %7107 = vmatmul.mubr.msk.f32.gmra.mrb[10].mxu0 %vm666_vm4, %v7103_v23  ;;  %v7072_v20 = vld [vmem:[%s14540_s3 + $0x1d0] sm:$0xff]  ;;  %v7074_v23 = vld [vmem:[%s14540_s3 + $0x1e0] sm:$0xff] }
 0x145   :  { %7952 = vmatpush1.bf16.msk.msra.mxu1 %vm10254_vm3, %v10251_v5  ;;  %8092 = vmatpush1.bf16.msk.msra.mxu0 %vm10254_vm3, %v10251_v5 }
 0x146   :  { %8134 = vmatprep.subr.bf16.mxu0 %v10245_v63  ;;  %872 = vmatprep.mubr.f32.mxu1 %v14552_v7 }
 0x147   :  { %1384 = vmatprep.mubr.f32.mxu0 %v14552_v7  ;;  %7954 = vmatprep.subr.bf16.mxu1 %v10304_v24 }
 0x148   :  { %7054 = vmatmul.mubr.msk.f32.vlgmr.msra.gmra.mrb[4].mxu1 %vm666_vm4, %v7050_v34  ;;  %7156 = vmatmul.mubr.msk.f32.vlgmr.msra.gmra.mrb[12].mxu0 %vm666_vm4, %v7152_v35  ;;  %v7079_v34 = vld [vmem:[%s14540_s3 + $0x208] sm:$0xff]  ;;  %v10449_v35 = vpack.c.bf16 %v7074_v23, %v7072_v20  ;;  %v7352_v23 = vld [vmem:[%s14539_s2 + $0x70] sm:$0xff] }
 0x149   :  { %8136 = vmatpush1.bf16.msra.mxu0 %v10243_v62  ;;  %878 = vmatprep.mubr.f32.mxu1 %v14552_v7  ;;  %v10453_v39 = vpack.c.bf16 %v7079_v34, %v7077_v30  ;;  %v7402_v30 = vld [vmem:[%s14539_s2 + $0x80] sm:$0xff]  ;;  %v7089_v34 = vld [vmem:[%s14540_s3 + $0x258] sm:$0xff] }
 0x14a   :  { %8139 = vmatprep.subr.msk.bf16.mxu0 %vm10254_vm3, %v10258_v12  ;;  %1390 = vmatprep.mubr.f32.mxu0 %v14552_v7 }
 0x14b   :  { %7956 = vmatpush1.bf16.msra.mxu1 %v10330_v36 }
 0x14c   :  { %7055 = vmatmul.mubr.msk.f32.gmra.mrb[6].mxu1 %vm666_vm4, %v7051_v41  ;;  %7157 = vmatmul.mubr.msk.f32.gmra.mrb[14].mxu0 %vm666_vm4, %v7153_v46  ;;  %v7078_v41 = vld [vmem:[%s14540_s3 + $0x200] sm:$0xff]  ;;  %v7083_v46 = vld [vmem:[%s14540_s3 + $0x228] sm:$0xff] }
 0x14d   :  { %8142 = vmatpush1.bf16.msk.msra.mxu0 %vm10254_vm3, %v10251_v5  ;;  %1600 = vmatprep.mubr.f32.mxu0 %v14552_v7  ;;  %v10476_v47 = vpack.c.bf16 %v7078_v41, %v7076_v40  ;;  %v10480_v48 = vpack.c.bf16 %v7083_v46, %v7081_v43  ;;  %v7092_v46 = vld [vmem:[%s14540_s3 + $0x270] sm:$0xff] }
 0x14e   :  { %8184 = vmatprep.subr.bf16.mxu0 %v10245_v63  ;;  %7958 = vmatprep.subr.bf16.mxu1 %v10364_v49  ;;  %v10596_v55 = vpack.c.bf16 %v7094_v52, %v7092_v46  ;;  %v762_v46 = vld [vmem:[%s14540_s3 + $0x28] sm:$0xff]  ;;  %v764_v52 = vld [vmem:[%s14540_s3 + $0x38] sm:$0xff] }
 0x14f   :  { %7960 = vmatpush1.bf16.msra.mxu1 %v10367_v50  ;;  %v10645_v31 = vpack.c.bf16 %v764_v52, %v762_v46 }
 0x150   :  { %7206 = vmatmul.mubr.msk.f32.vlgmr.msra.gmra.mrb[16].mxu0 %vm666_vm4, %v7202_v56  ;;  %7962 = vmatprep.subr.bf16.mxu1 %v10371_v51  ;;  %v7302_v56 = vld [vmem:[%s14539_s2 + $0x60] sm:$0xff]  ;;  %14819 = vst [vmem:[#allocation11_spill] sm:$0xff] %v10596_v55 }
 0x151   :  { %8186 = vmatpush1.bf16.msra.mxu0 %v10243_v62  ;;  %1606 = vmatprep.mubr.f32.mxu0 %v14552_v7  ;;  %14822 = vst [vmem:[#allocation14_spill] sm:$0xff] %v10645_v31 }
 0x152   :  { %8189 = vmatprep.subr.msk.bf16.mxu0 %vm10254_vm3, %v10258_v12 }
 0x153   :  { %7964 = vmatpush1.bf16.msra.mxu1 %v10395_v59 }
 0x154   :  { %7207 = vmatmul.mubr.msk.f32.gmra.mrb[18].mxu0 %vm666_vm4, %v7203_v4  ;;  %7966 = vmatprep.subr.bf16.mxu1 %v10399_v0  ;;  %v7084_v4 = vld [vmem:[%s14540_s3 + $0x230] sm:$0xff] }
 0x155   :  { %8192 = vmatpush1.bf16.msk.msra.mxu0 %vm10254_vm3, %v10251_v5  ;;  %1816 = vmatprep.mubr.f32.mxu0 %v14552_v7  ;;  %v10524_v20 = vpack.c.bf16 %v7086_v13, %v7084_v4  ;;  %v7096_v4 = vld [vmem:[%s14540_s3 + $0x290] sm:$0xff]  ;;  %v10612_v13 = vpack.c.bf16 %v760_v58, %v758_v57 }
 0x156   :  { %8234 = vmatprep.subr.bf16.mxu0 %v10245_v63 }
 0x157   :  { %7968 = vmatpush1.bf16.msra.mxu1 %v10422_v18  ;;  %14815 = vst [vmem:[#allocation7_spill] sm:$0xff] %v10524_v20  ;;  %14820 = vst [vmem:[#allocation12_spill] sm:$0xff] %v10612_v13 }
 0x158   :  { %7256 = vmatmul.mubr.msk.f32.vlgmr.msra.gmra.mrb[20].mxu0 %vm666_vm4, %v7252_v25  ;;  %7970 = vmatprep.subr.bf16.mxu1 %v10426_v19  ;;  %v7353_v25 = vld [vmem:[%s14539_s2 + $0x78] sm:$0x3] }
 0x159   :  { %8236 = vmatpush1.bf16.msra.mxu0 %v10243_v62  ;;  %1822 = vmatprep.mubr.f32.mxu0 %v14552_v7 }
 0x15a   :  { %8239 = vmatprep.subr.msk.bf16.mxu0 %vm10254_vm3, %v10258_v12 }
 0x15b   :  { %7972 = vmatpush1.bf16.msra.mxu1 %v10449_v35 }
 0x15c   :  { %7257 = vmatmul.mubr.msk.f32.gmra.mrb[22].mxu0 %vm666_vm4, %v7253_v42  ;;  %7974 = vmatprep.subr.bf16.mxu1 %v10453_v39  ;;  %v7095_v42 = vld [vmem:[%s14540_s3 + $0x288] sm:$0xff] }
 0x15d   :  { %8242 = vmatpush1.bf16.msk.msra.mxu0 %vm10254_vm3, %v10251_v5  ;;  %2032 = vmatprep.mubr.f32.mxu0 %v14552_v7 }
 0x15e   :  { %8284 = vmatprep.subr.bf16.mxu0 %v10245_v63 }
 0x15f   :  { %7976 = vmatpush1.bf16.msra.mxu1 %v10476_v47 }
 0x160   :  { %7306 = vmatmul.mubr.msk.f32.vlgmr.msra.gmra.mrb[24].mxu0 %vm666_vm4, %v7302_v56  ;;  %7978 = vmatprep.subr.bf16.mxu1 %v10480_v48  ;;  %v7097_v56 = vld [vmem:[%s14540_s3 + $0x298] sm:$0xff] }
 0x161   :  { %8286 = vmatpush1.bf16.msra.mxu0 %v10243_v62  ;;  %2038 = vmatprep.mubr.f32.mxu0 %v14552_v7 }
 0x162   :  { %8289 = vmatprep.subr.msk.bf16.mxu0 %vm10254_vm3, %v10258_v12 }
 0x163   :  { %7980 = vmatpush1.bf16.msra.mxu1 %v10503_v1  ;;  %v7112_v1 = vld [vmem:[%s14540_s3 + $0x2c0] sm:$0xff] }
 0x164   :  { %7307 = vmatmul.mubr.msk.f32.gmra.mrb[26].mxu0 %vm666_vm4, %v7303_v17  ;;  %7982 = vmatprep.subr.bf16.mxu1 %v10507_v2 }
 0x165   :  { %8292 = vmatpush1.bf16.msk.msra.mxu0 %vm10254_vm3, %v10251_v5  ;;  %2248 = vmatprep.mubr.f32.mxu0 %v14552_v7 }
 0x166   :  { %8334 = vmatprep.subr.bf16.mxu0 %v10245_v63 }
 0x167   :  { %7984 = vmatpush1.bf16.msra.mxu1 %v10524_v20 }
 0x168   :  { %7356 = vmatmul.mubr.msk.f32.vlgmr.msra.gmra.mrb[28].mxu0 %vm666_vm4, %v7352_v23 }
 0x169   :  { %8336 = vmatpush1.bf16.msra.mxu0 %v10243_v62  ;;  %2254 = vmatprep.mubr.f32.mxu0 %v14552_v7 }
 0x16a   :  { %8339 = vmatprep.subr.msk.bf16.mxu0 %vm10254_vm3, %v10258_v12 }
 0x16c   :  { %7357 = vmatmul.mubr.msk.f32.gmra.mrb[30].mxu0 %vm666_vm4, %v7353_v25 }
 0x16d   :  { %8342 = vmatpush1.bf16.msk.msra.mxu0 %vm10254_vm3, %v10251_v5  ;;  %2464 = vmatprep.mubr.f32.mxu0 %v14552_v7 }
 0x16e   :  { %8384 = vmatprep.subr.bf16.mxu0 %v10245_v63  ;;  %v7091_v63 = vld [vmem:[%s14540_s3 + $0x268] sm:$0xff] }
 0x16f   :  { %v10570_v40 = vpack.c.bf16 %v7091_v63, %v7089_v34 }
 0x170   :  { %7406 = vmatmul.mubr.msk.f32.vlgmr.msra.gmra.mrb[32].mxu0 %vm666_vm4, %v7402_v30 }
 0x171   :  { %8386 = vmatpush1.bf16.msra.mxu0 %v10243_v62  ;;  %2470 = vmatprep.mubr.f32.mxu0 %v14552_v7  ;;  %14816 = vst [vmem:[#allocation8_spill] sm:$0xff] %v10570_v40  ;;  %v7088_v62 = vld [vmem:[%s14540_s3 + $0x250] sm:$0xff] }
 0x172   :  { %8389 = vmatprep.subr.msk.bf16.mxu0 %vm10254_vm3, %v10258_v12  ;;  %v7090_v12 = vld [vmem:[%s14540_s3 + $0x260] sm:$0xff]  ;;  %7986 = vmatprep.subr.bf16.mxu1 %v10570_v40  ;;  %v763_v7 = vld [vmem:[%s14540_s3 + $0x30] sm:$0xff] }
 0x173   :  { %v10578_v41 = vpack.c.bf16 %v7090_v12, %v7088_v62  ;;  %v757_v12 = vld [vmem:[%s14540_s3] sm:$0xff]  ;;  %v10663_v52 = vpack.c.bf16 %v763_v7, %v761_v27  ;;  %v770_v7 = vld [vmem:[%s14540_s3 + $0x68] sm:$0xff]  ;;  %v772_v27 = vld [vmem:[%s14540_s3 + $0x78] sm:$0xff] }
 0x175   :  { %8392 = vmatpush1.bf16.msk.msra.mxu0 %vm10254_vm3, %v10251_v5  ;;  %14817 = vst [vmem:[#allocation9_spill] sm:$0xff] %v10578_v41  ;;  %7988 = vmatpush1.bf16.msra.mxu1 %v10578_v41  ;;  %v7093_v5 = vld [vmem:[%s14540_s3 + $0x278] sm:$0xff]  ;;  %14823 = vst [vmem:[#allocation15_spill] sm:$0xff] %v10663_v52  ;;  %v767_v41 = vld [vmem:[%s14540_s3 + $0x50] sm:$0xff] }
 0x176   :  { %v10588_v43 = vpack.c.bf16 %v7095_v42, %v7093_v5  ;;  %v759_v5 = vld [vmem:[%s14540_s3 + $0x10] sm:$0xff] }
 0x177   :  { %v10641_v57 = vpack.c.bf16 %v759_v5, %v757_v12  ;;  %v766_v12 = vld [vmem:[%s14540_s3 + $0x48] sm:$0xff]  ;;  %v768_v5 = vld [vmem:[%s14540_s3 + $0x58] sm:$0xff] }
 0x178   :  { %14818 = vst [vmem:[#allocation10_spill] sm:$0xff] %v10588_v43  ;;  %7990 = vmatprep.subr.bf16.mxu1 %v10588_v43  ;;  %v10666_v43 = vpack.c.bf16 %v768_v5, %v766_v12  ;;  %v10686_v12 = vpack.c.bf16 %v772_v27, %v770_v7  ;;  %v771_v5 = vld [vmem:[%s14540_s3 + $0x70] sm:$0xff]  ;;  %v773_v7 = vld [vmem:[%s14540_s3 + $0x80] sm:$0xff] }
 0x179   :  { %7992 = vmatpush1.bf16.msra.mxu1 %v10596_v55  ;;  %14821 = vst [vmem:[#allocation13_spill] sm:$0xff] %v10641_v57  ;;  %v775_v27 = vld [vmem:[%s14540_s3 + $0x90] sm:$0xff] }
 0x17a   :  { %975 = vmatprep.subr.mxu1 %v7097_v56  ;;  %14824 = vst [vmem:[#allocation16_spill] sm:$0xff] %v10666_v43  ;;  %14826 = vst [vmem:[#allocation18_spill] sm:$0xff] %v10686_v12 }
 0x17d   :  { %976 = vmatpush1.msra.mxu1 %v7096_v4 }
 0x17e   :  { %7994 = vmatprep.subr.bf16.mxu1 %v10612_v13 }
 0x213   :  { %v10615_v17 = vpop.f32.mrb[0].mxu1  ;;  %v10617_v23 = vpop.f32.mrb[8].mxu0 }
 0x214   :  { %v748_v25 = vpop.f32.mrb[1].mxu1  ;;  %v10619_v30 = vpop.f32.mrb[9].mxu0 }
 0x217   :  { %v10621_v34 = vpop.f32.mrb[2].mxu1  ;;  %v10623_v63 = vpop.f32.mrb[10].mxu0 }
 0x218   :  { %v10625_v62 = vpop.f32.mrb[3].mxu1  ;;  %v10633_v42 = vpop.f32.mrb[11].mxu0 }
 0x21b   :  { %v874_v56 = vpop.f32.mrb[4].mxu1  ;;  %v10643_v58 = vpop.f32.mrb[12].mxu0 }
 0x21c   :  { %v876_v4 = vpop.f32.mrb[5].mxu1  ;;  %v10653_v13 = vpop.f32.mrb[13].mxu0 }
 0x21d   :  { %7098 = vmatprep.mubr.msk.f32.mxu1 %vm928_vm5, %v876_v4  ;;  %v765_v4 = vld [vmem:[%s14540_s3 + $0x40] sm:$0xff] }
 0x21e   :  { %1000 = vmatmul.mubr.f32.vlgmr.msra.gmra.mrb[8].mxu1 %v874_v56  ;;  %v10683_v56 = vpack.c.bf16 %v767_v41, %v765_v4  ;;  %v776_v41 = vld [vmem:[%s14540_s3 + $0x98] sm:$0xff] }
 0x21f   :  { %7996 = vmatpush1.bf16.msra.mxu1 %v10641_v57  ;;  %v880_v46 = vpop.f32.mrb[6].mxu1  ;;  %v797_v57 = vld [vmem:[%s14540_s3 + $0x140] sm:$0xff] }
 0x220   :  { %v882_v55 = vpop.f32.mrb[7].mxu1  ;;  %7998 = vmatprep.subr.bf16.mxu1 %v10645_v31  ;;  %14825 = vst [vmem:[#allocation17_spill] sm:$0xff] %v10683_v56  ;;  %v10807_v31 = vpop.f32.mrb[14].mxu0 }
 0x221   :  { %7099 = vmatprep.mubr.msk.f32.mxu1 %vm928_vm5, %v882_v55  ;;  %v769_v55 = vld [vmem:[%s14540_s3 + $0x60] sm:$0xff] }
 0x222   :  { %1006 = vmatmul.mubr.f32.gmra.mrb[10].mxu1 %v880_v46  ;;  %v774_v46 = vld [vmem:[%s14540_s3 + $0x88] sm:$0xff] }
 0x223   :  { %8000 = vmatpush1.bf16.msra.mxu1 %v10663_v52  ;;  %7100 = vmatprep.mubr.msk.f32.mxu1 %vm928_vm5, %v748_v25  ;;  %v10701_v25 = vpack.c.bf16 %v771_v5, %v769_v55  ;;  %v10704_v4 = vpack.c.bf16 %v776_v41, %v774_v46  ;;  %v780_v55 = vld [vmem:[%s14540_s3 + $0xb8] sm:$0xff]  ;;  %v10719_v5 = vpack.c.bf16 %v775_v27, %v773_v7  ;;  %v777_v41 = vld [vmem:[%s14540_s3 + $0xa0] sm:$0xff]  ;;  %v14839_v52 = vmov 0.0  }
 0x224   :  { %8002 = vmatprep.subr.bf16.mxu1 %v10666_v43  ;;  %v778_v43 = vld [vmem:[%s14540_s3 + $0xa8] sm:$0xff]  ;;  %v784_v7 = vld [vmem:[%s14540_s3 + $0xd8] sm:$0xff] }
 0x225   :  { %14827 = vst [vmem:[#allocation19_spill] sm:$0xff] %v10701_v25  ;;  %14828 = vst [vmem:[#allocation20_spill] sm:$0xff] %v10704_v4  ;;  %v10722_v46 = vpack.c.bf16 %v780_v55, %v778_v43  ;;  %v781_v55 = vld [vmem:[%s14540_s3 + $0xc0] sm:$0xff] }
 0x226   :  { %14829 = vst [vmem:[#allocation21_spill] sm:$0xff] %v10719_v5 }
 0x227   :  { %8004 = vmatpush1.bf16.msra.mxu1 %v10683_v56  ;;  %14830 = vst [vmem:[#allocation22_spill] sm:$0xff] %v10722_v46  ;;  %v782_v56 = vld [vmem:[%s14540_s3 + $0xc8] sm:$0xff] }
 0x228   :  { %8006 = vmatprep.subr.bf16.mxu1 %v10686_v12  ;;  %v779_v12 = vld [vmem:[%s14540_s3 + $0xb0] sm:$0xff]  ;;  %v10740_v27 = vpack.c.bf16 %v784_v7, %v782_v56  ;;  %v785_v7 = vld [vmem:[%s14540_s3 + $0xe0] sm:$0xff] }
 0x229   :  { %v10737_v43 = vpack.c.bf16 %v779_v12, %v777_v41  ;;  %v788_v12 = vld [vmem:[%s14540_s3 + $0xf8] sm:$0xff] }
 0x22a   :  { %14832 = vst [vmem:[#allocation24_spill] sm:$0xff] %v10740_v27 }
 0x22b   :  { %8008 = vmatpush1.bf16.msra.mxu1 %v10701_v25  ;;  %14831 = vst [vmem:[#allocation23_spill] sm:$0xff] %v10737_v43  ;;  %v786_v25 = vld [vmem:[%s14540_s3 + $0xe8] sm:$0xff] }
 0x22c   :  { %8010 = vmatprep.subr.bf16.mxu1 %v10704_v4  ;;  %v783_v4 = vld [vmem:[%s14540_s3 + $0xd0] sm:$0xff]  ;;  %v10758_v41 = vpack.c.bf16 %v788_v12, %v786_v25  ;;  %v789_v12 = vld [vmem:[%s14540_s3 + $0x100] sm:$0xff] }
 0x22d   :  { %v10755_v56 = vpack.c.bf16 %v783_v4, %v781_v55  ;;  %v792_v4 = vld [vmem:[%s14540_s3 + $0x118] sm:$0xff] }
 0x22e   :  { %14834 = vst [vmem:[#allocation26_spill] sm:$0xff] %v10758_v41 }
 0x22f   :  { %8012 = vmatpush1.bf16.msra.mxu1 %v10719_v5  ;;  %14833 = vst [vmem:[#allocation25_spill] sm:$0xff] %v10755_v56  ;;  %v790_v5 = vld [vmem:[%s14540_s3 + $0x108] sm:$0xff] }
 0x230   :  { %8014 = vmatprep.subr.bf16.mxu1 %v10722_v46  ;;  %v787_v46 = vld [vmem:[%s14540_s3 + $0xf0] sm:$0xff]  ;;  %v10776_v55 = vpack.c.bf16 %v792_v4, %v790_v5  ;;  %v7403_v5 = vld [vmem:[%s14539_s2 + $0x88] sm:$0x3] }
 0x231   :  { %v10773_v25 = vpack.c.bf16 %v787_v46, %v785_v7  ;;  %v796_v46 = vld [vmem:[%s14540_s3 + $0x138] sm:$0xff]  ;;  %7407 = vmatmul.mubr.msk.f32.gmra.mrb[34].mxu0 %vm666_vm4, %v7403_v5  ;;  %v7109_v5 = vld [vmem:[%s14540_s3 + $0x2a8] sm:$0xff] }
 0x232   :  { %14836 = vst [vmem:[#allocation28_spill] sm:$0xff] %v10776_v55  ;;  %2680 = vmatprep.mubr.f32.mxu0 %v14839_v52 }
 0x233   :  { %8016 = vmatpush1.bf16.msra.mxu1 %v10737_v43  ;;  %14835 = vst [vmem:[#allocation27_spill] sm:$0xff] %v10773_v25  ;;  %v794_v43 = vld [vmem:[%s14540_s3 + $0x128] sm:$0xff] }
 0x234   :  { %8018 = vmatprep.subr.bf16.mxu1 %v10740_v27  ;;  %v791_v27 = vld [vmem:[%s14540_s3 + $0x110] sm:$0xff]  ;;  %v10798_v4 = vpack.c.bf16 %v796_v46, %v794_v43  ;;  %v798_v46 = vld [vmem:[%s14540_s3 + $0x148] sm:$0xff] }
 0x235   :  { %v10794_v7 = vpack.c.bf16 %v791_v27, %v789_v12  ;;  %v10809_v27 = vpop.f32.mrb[15].mxu0  ;;  %v7452_v43 = vld [vmem:[%s14539_s2 + $0x90] sm:$0xff] }
 0x236   :  { %14838 = vst [vmem:[#allocation30_spill] sm:$0xff] %v10798_v4  ;;  %7456 = vmatmul.mubr.msk.f32.vlgmr.msra.gmra.mrb[36].mxu0 %vm666_vm4, %v7452_v43  ;;  %v7113_v43 = vld [vmem:[%s14540_s3 + $0x2c8] sm:$0xff] }
 0x237   :  { %8020 = vmatpush1.bf16.msra.mxu1 %v10755_v56  ;;  %14837 = vst [vmem:[#allocation29_spill] sm:$0xff] %v10794_v7  ;;  %v795_v56 = vld [vmem:[%s14540_s3 + $0x130] sm:$0xff]  ;;  %2686 = vmatprep.mubr.f32.mxu0 %v14839_v52 }
 0x238   :  { %8022 = vmatprep.subr.bf16.mxu1 %v10758_v41  ;;  %v793_v41 = vld [vmem:[%s14540_s3 + $0x120] sm:$0xff] }
 0x239   :  { %v10812_v12 = vpack.c.bf16 %v795_v56, %v793_v41  ;;  %v10828_v56 = vpop.f32.mrb[16].mxu0  ;;  %v7108_v41 = vld [vmem:[%s14540_s3 + $0x2a0] sm:$0xff] }
 0x23b   :  { %8024 = vmatpush1.bf16.msra.mxu1 %v10773_v25  ;;  %14840 = vst [vmem:[#allocation31_spill] sm:$0xff] %v10812_v12  ;;  %v7115_v25 = vld [vmem:[%s14540_s3 + $0x2d8] sm:$0xff] }
 0x23c   :  { %8026 = vmatprep.subr.bf16.mxu1 %v10776_v55  ;;  %v10836_v55 = vpop.f32.mrb[17].mxu0  ;;  %v10856_v2 = vpack.c.bf16 %v7115_v25, %v7113_v43  ;;  %v7119_v25 = vld [vmem:[%s14540_s3 + $0x2f8] sm:$0xff]  ;;  %v7120_v43 = vld [vmem:[%s14540_s3 + $0x300] sm:$0xff] }
 0x23e   :  { %14843 = vst [vmem:[#allocation34_spill] sm:$0xff] %v10856_v2 }
 0x23f   :  { %8028 = vmatpush1.bf16.msra.mxu1 %v10794_v7  ;;  %v7111_v7 = vld [vmem:[%s14540_s3 + $0x2b8] sm:$0xff] }
 0x240   :  { %8030 = vmatprep.subr.bf16.mxu1 %v10798_v4  ;;  %v7110_v4 = vld [vmem:[%s14540_s3 + $0x2b0] sm:$0xff]  ;;  %v10849_v40 = vpack.c.bf16 %v7111_v7, %v7109_v5  ;;  %v7117_v7 = vld [vmem:[%s14540_s3 + $0x2e8] sm:$0xff] }
 0x241   :  { %v10851_v20 = vpack.c.bf16 %v7110_v4, %v7108_v41 }
 0x242   :  { %14841 = vst [vmem:[#allocation32_spill] sm:$0xff] %v10849_v40 }
 0x243   :  { %8032 = vmatpush1.bf16.msra.mxu1 %v10812_v12  ;;  %14842 = vst [vmem:[#allocation33_spill] sm:$0xff] %v10851_v20  ;;  %v7453_v12 = vld [vmem:[%s14539_s2 + $0x98] sm:$0x3] }
 0x244   :  { %1058 = vmatprep.subr.mxu1 %v798_v46  ;;  %v7114_v46 = vld [vmem:[%s14540_s3 + $0x2d0] sm:$0xff]  ;;  %7457 = vmatmul.mubr.msk.f32.gmra.mrb[38].mxu0 %vm666_vm4, %v7453_v12  ;;  %v7116_v12 = vld [vmem:[%s14540_s3 + $0x2e0] sm:$0xff] }
 0x245   :  { %v10876_v4 = vpack.c.bf16 %v7114_v46, %v7112_v1  ;;  %v7123_v1 = vld [vmem:[%s14540_s3 + $0x318] sm:$0xff]  ;;  %v7122_v46 = vld [vmem:[%s14540_s3 + $0x310] sm:$0xff] }
 0x247   :  { %1059 = vmatpush1.msra.mxu1 %v797_v57  ;;  %14844 = vst [vmem:[#allocation35_spill] sm:$0xff] %v10876_v4  ;;  %v10879_v57 = vpack.c.bf16 %v7119_v25, %v7117_v7  ;;  %v10915_v7 = vpack.c.bf16 %v7122_v46, %v7120_v43 }
 0x248   :  { %1083 = vmatmul.mubr.f32.vlgmr.msra.gmra.mrb[8].mxu1 %v10615_v17  ;;  %8044 = vmatprep.subr.bf16.mxu1 %v10849_v40  ;;  %v7118_v17 = vld [vmem:[%s14540_s3 + $0x2f0] sm:$0xff]  ;;  %v7164_v40 = vld [vmem:[%s14540_s3 + $0x420] sm:$0xff] }
 0x249   :  { %7101 = vmatprep.mubr.msk.f32.mxu1 %vm928_vm5, %v10625_v62  ;;  %8046 = vmatpush1.bf16.msra.mxu1 %v10851_v20  ;;  %14845 = vst [vmem:[#allocation36_spill] sm:$0xff] %v10879_v57  ;;  %v7121_v62 = vld [vmem:[%s14540_s3 + $0x308] sm:$0xff]  ;;  %v10895_v5 = vpack.c.bf16 %v7118_v17, %v7116_v12  ;;  %14848 = vst [vmem:[#allocation39_spill] sm:$0xff] %v10915_v7  ;;  %v7124_v12 = vld [vmem:[%s14540_s3 + $0x320] sm:$0xff] }
 0x24a   :  { %8048 = vmatprep.subr.bf16.mxu1 %v10856_v2  ;;  %v10900_v41 = vpack.c.bf16 %v7123_v1, %v7121_v62  ;;  %v7126_v17 = vld [vmem:[%s14540_s3 + $0x330] sm:$0xff]  ;;  %v7129_v62 = vld [vmem:[%s14540_s3 + $0x348] sm:$0xff]  ;;  %v7131_v1 = vld [vmem:[%s14540_s3 + $0x358] sm:$0xff] }
 0x24b   :  { %14846 = vst [vmem:[#allocation37_spill] sm:$0xff] %v10895_v5  ;;  %v10933_v43 = vpack.c.bf16 %v7126_v17, %v7124_v12  ;;  %v10936_v46 = vpack.c.bf16 %v7131_v1, %v7129_v62  ;;  %v7135_v12 = vld [vmem:[%s14540_s3 + $0x378] sm:$0xff]  ;;  %v7132_v1 = vld [vmem:[%s14540_s3 + $0x360] sm:$0xff] }
 0x24c   :  { %1089 = vmatmul.mubr.f32.gmra.mrb[10].mxu1 %v10621_v34  ;;  %14847 = vst [vmem:[#allocation38_spill] sm:$0xff] %v10900_v41  ;;  %v7125_v34 = vld [vmem:[%s14540_s3 + $0x328] sm:$0xff] }
 0x24d   :  { %8050 = vmatpush1.bf16.msra.mxu1 %v10876_v4  ;;  %7150 = vmatprep.mubr.msk.f32.mxu1 %vm928_vm5, %v10619_v30  ;;  %v7127_v30 = vld [vmem:[%s14540_s3 + $0x338] sm:$0xff]  ;;  %14850 = vst [vmem:[#allocation41_spill] sm:$0xff] %v10933_v43  ;;  %14851 = vst [vmem:[#allocation42_spill] sm:$0xff] %v10936_v46 }
 0x24e   :  { %8052 = vmatprep.subr.bf16.mxu1 %v10879_v57  ;;  %v10918_v25 = vpack.c.bf16 %v7127_v30, %v7125_v34  ;;  %v7128_v34 = vld [vmem:[%s14540_s3 + $0x340] sm:$0xff]  ;;  %v7130_v30 = vld [vmem:[%s14540_s3 + $0x350] sm:$0xff] }
 0x24f   :  { %v10951_v17 = vpack.c.bf16 %v7130_v30, %v7128_v34  ;;  %v7139_v34 = vld [vmem:[%s14540_s3 + $0x398] sm:$0xff]  ;;  %v7148_v57 = vld [vmem:[%s14540_s3 + $0x3e0] sm:$0xff] }
 0x250   :  { %14849 = vst [vmem:[#allocation40_spill] sm:$0xff] %v10918_v25 }
 0x251   :  { %8054 = vmatpush1.bf16.msra.mxu1 %v10895_v5  ;;  %14852 = vst [vmem:[#allocation43_spill] sm:$0xff] %v10951_v17 }
 0x252   :  { %8056 = vmatprep.subr.bf16.mxu1 %v10900_v41  ;;  %v7133_v41 = vld [vmem:[%s14540_s3 + $0x368] sm:$0xff] }
 0x253   :  { %v10954_v62 = vpack.c.bf16 %v7135_v12, %v7133_v41  ;;  %v7136_v12 = vld [vmem:[%s14540_s3 + $0x380] sm:$0xff] }
 0x255   :  { %8058 = vmatpush1.bf16.msra.mxu1 %v10915_v7  ;;  %14853 = vst [vmem:[#allocation44_spill] sm:$0xff] %v10954_v62  ;;  %v7137_v7 = vld [vmem:[%s14540_s3 + $0x388] sm:$0xff] }
 0x256   :  { %8060 = vmatprep.subr.bf16.mxu1 %v10918_v25  ;;  %v7134_v25 = vld [vmem:[%s14540_s3 + $0x370] sm:$0xff]  ;;  %v10972_v30 = vpack.c.bf16 %v7139_v34, %v7137_v7  ;;  %v7140_v34 = vld [vmem:[%s14540_s3 + $0x3a0] sm:$0xff] }
 0x257   :  { %v10969_v41 = vpack.c.bf16 %v7134_v25, %v7132_v1  ;;  %v7143_v25 = vld [vmem:[%s14540_s3 + $0x3b8] sm:$0xff] }
 0x258   :  { %14855 = vst [vmem:[#allocation46_spill] sm:$0xff] %v10972_v30 }
 0x259   :  { %8062 = vmatpush1.bf16.msra.mxu1 %v10933_v43  ;;  %14854 = vst [vmem:[#allocation45_spill] sm:$0xff] %v10969_v41  ;;  %v7141_v43 = vld [vmem:[%s14540_s3 + $0x3a8] sm:$0xff] }
 0x25a   :  { %8064 = vmatprep.subr.bf16.mxu1 %v10936_v46  ;;  %v7138_v46 = vld [vmem:[%s14540_s3 + $0x390] sm:$0xff]  ;;  %v10990_v1 = vpack.c.bf16 %v7143_v25, %v7141_v43  ;;  %v7144_v25 = vld [vmem:[%s14540_s3 + $0x3c0] sm:$0xff] }
 0x25b   :  { %v10987_v7 = vpack.c.bf16 %v7138_v46, %v7136_v12  ;;  %v7147_v46 = vld [vmem:[%s14540_s3 + $0x3d8] sm:$0xff] }
 0x25c   :  { %14857 = vst [vmem:[#allocation48_spill] sm:$0xff] %v10990_v1 }
 0x25d   :  { %8066 = vmatpush1.bf16.msra.mxu1 %v10951_v17  ;;  %14856 = vst [vmem:[#allocation47_spill] sm:$0xff] %v10987_v7  ;;  %v7145_v17 = vld [vmem:[%s14540_s3 + $0x3c8] sm:$0xff] }
 0x25e   :  { %8068 = vmatprep.subr.bf16.mxu1 %v10954_v62  ;;  %v7142_v62 = vld [vmem:[%s14540_s3 + $0x3b0] sm:$0xff]  ;;  %v11008_v12 = vpack.c.bf16 %v7147_v46, %v7145_v17  ;;  %v7149_v17 = vld [vmem:[%s14540_s3 + $0x3e8] sm:$0xff] }
 0x25f   :  { %v11005_v43 = vpack.c.bf16 %v7142_v62, %v7140_v34  ;;  %v7159_v34 = vld [vmem:[%s14540_s3 + $0x3f8] sm:$0xff]  ;;  %v7161_v46 = vld [vmem:[%s14540_s3 + $0x408] sm:$0xff] }
 0x260   :  { %14859 = vst [vmem:[#allocation50_spill] sm:$0xff] %v11008_v12  ;;  %v11053_v4 = vpack.c.bf16 %v7161_v46, %v7159_v34  ;;  %v7169_v34 = vld [vmem:[%s14540_s3 + $0x448] sm:$0xff] }
 0x261   :  { %8070 = vmatpush1.bf16.msra.mxu1 %v10969_v41  ;;  %14858 = vst [vmem:[#allocation49_spill] sm:$0xff] %v11005_v43  ;;  %v11016_v41 = vpop.f32.mrb[18].mxu0 }
 0x262   :  { %8072 = vmatprep.subr.bf16.mxu1 %v10972_v30  ;;  %v7146_v30 = vld [vmem:[%s14540_s3 + $0x3d0] sm:$0xff]  ;;  %v11018_v5 = vpop.f32.mrb[19].mxu0  ;;  %14861 = vst [vmem:[#allocation52_spill] sm:$0xff] %v11053_v4 }
 0x263   :  { %v11021_v62 = vpack.c.bf16 %v7146_v30, %v7144_v25  ;;  %v7158_v30 = vld [vmem:[%s14540_s3 + $0x3f0] sm:$0xff]  ;;  %v7160_v25 = vld [vmem:[%s14540_s3 + $0x400] sm:$0xff] }
 0x264   :  { %v11055_v2 = vpack.c.bf16 %v7160_v25, %v7158_v30  ;;  %v7170_v30 = vld [vmem:[%s14540_s3 + $0x450] sm:$0xff]  ;;  %v7172_v25 = vld [vmem:[%s14540_s3 + $0x460] sm:$0xff] }
 0x265   :  { %8074 = vmatpush1.bf16.msra.mxu1 %v10987_v7  ;;  %14860 = vst [vmem:[#allocation51_spill] sm:$0xff] %v11021_v62  ;;  %v7165_v7 = vld [vmem:[%s14540_s3 + $0x428] sm:$0xff] }
 0x266   :  { %8076 = vmatprep.subr.bf16.mxu1 %v10990_v1  ;;  %v11033_v1 = vpop.f32.mrb[20].mxu0  ;;  %14862 = vst [vmem:[#allocation53_spill] sm:$0xff] %v11055_v2 }
 0x269   :  { %8078 = vmatpush1.bf16.msra.mxu1 %v11005_v43  ;;  %v7163_v43 = vld [vmem:[%s14540_s3 + $0x418] sm:$0xff] }
 0x26a   :  { %8080 = vmatprep.subr.bf16.mxu1 %v11008_v12  ;;  %v11041_v12 = vpop.f32.mrb[21].mxu0  ;;  %v11057_v20 = vpack.c.bf16 %v7165_v7, %v7163_v43  ;;  %v7166_v43 = vld [vmem:[%s14540_s3 + $0x430] sm:$0xff] }
 0x26c   :  { %14863 = vst [vmem:[#allocation54_spill] sm:$0xff] %v11057_v20 }
 0x26d   :  { %8082 = vmatpush1.bf16.msra.mxu1 %v11021_v62  ;;  %v7162_v62 = vld [vmem:[%s14540_s3 + $0x410] sm:$0xff] }
 0x26e   :  { %1270 = vmatprep.subr.mxu1 %v7149_v17  ;;  %v7167_v17 = vld [vmem:[%s14540_s3 + $0x438] sm:$0xff]  ;;  %v11074_v7 = vpack.c.bf16 %v7164_v40, %v7162_v62 }
 0x26f   :  { %v7171_v40 = vld [vmem:[%s14540_s3 + $0x458] sm:$0xff] }
 0x270   :  { %14864 = vst [vmem:[#allocation55_spill] sm:$0xff] %v11074_v7 }
 0x271   :  { %1271 = vmatpush1.msra.mxu1 %v7148_v57  ;;  %v11079_v57 = vpack.c.bf16 %v7169_v34, %v7167_v17  ;;  %v11115_v17 = vpack.c.bf16 %v7172_v25, %v7170_v30 }
 0x272   :  { %1295 = vmatmul.mubr.f32.vlgmr.msra.gmra.mrb[8].mxu1 %v10617_v23  ;;  %8094 = vmatprep.subr.bf16.mxu1 %v11053_v4  ;;  %v7168_v23 = vld [vmem:[%s14540_s3 + $0x440] sm:$0xff]  ;;  %v7214_v4 = vld [vmem:[%s14540_s3 + $0x570] sm:$0xff] }
 0x273   :  { %8096 = vmatpush1.bf16.msra.mxu1 %v11055_v2  ;;  %7151 = vmatprep.mubr.msk.f32.mxu1 %vm928_vm5, %v10633_v42  ;;  %14865 = vst [vmem:[#allocation56_spill] sm:$0xff] %v11079_v57  ;;  %v7173_v42 = vld [vmem:[%s14540_s3 + $0x468] sm:$0xff]  ;;  %v11095_v62 = vpack.c.bf16 %v7168_v23, %v7166_v43  ;;  %14868 = vst [vmem:[#allocation59_spill] sm:$0xff] %v11115_v17  ;;  %v7174_v43 = vld [vmem:[%s14540_s3 + $0x470] sm:$0xff] }
 0x274   :  { %8098 = vmatprep.subr.bf16.mxu1 %v11057_v20  ;;  %v11100_v46 = vpack.c.bf16 %v7173_v42, %v7171_v40  ;;  %v7176_v23 = vld [vmem:[%s14540_s3 + $0x480] sm:$0xff]  ;;  %v7179_v40 = vld [vmem:[%s14540_s3 + $0x498] sm:$0xff]  ;;  %v7181_v42 = vld [vmem:[%s14540_s3 + $0x4a8] sm:$0xff] }
 0x275   :  { %14866 = vst [vmem:[#allocation57_spill] sm:$0xff] %v11095_v62  ;;  %v11133_v30 = vpack.c.bf16 %v7176_v23, %v7174_v43  ;;  %v11136_v25 = vpack.c.bf16 %v7181_v42, %v7179_v40  ;;  %v7185_v43 = vld [vmem:[%s14540_s3 + $0x4c8] sm:$0xff]  ;;  %v7182_v42 = vld [vmem:[%s14540_s3 + $0x4b0] sm:$0xff] }
 0x276   :  { %1301 = vmatmul.mubr.f32.gmra.mrb[10].mxu1 %v10623_v63  ;;  %14867 = vst [vmem:[#allocation58_spill] sm:$0xff] %v11100_v46  ;;  %v7175_v63 = vld [vmem:[%s14540_s3 + $0x478] sm:$0xff] }
 0x277   :  { %8100 = vmatpush1.bf16.msra.mxu1 %v11074_v7  ;;  %7200 = vmatprep.mubr.msk.f32.mxu1 %vm928_vm5, %v10653_v13  ;;  %v7177_v13 = vld [vmem:[%s14540_s3 + $0x488] sm:$0xff]  ;;  %14870 = vst [vmem:[#allocation61_spill] sm:$0xff] %v11133_v30  ;;  %14871 = vst [vmem:[#allocation62_spill] sm:$0xff] %v11136_v25 }
 0x278   :  { %8102 = vmatprep.subr.bf16.mxu1 %v11079_v57  ;;  %v11118_v34 = vpack.c.bf16 %v7177_v13, %v7175_v63  ;;  %v7178_v63 = vld [vmem:[%s14540_s3 + $0x490] sm:$0xff]  ;;  %v7180_v13 = vld [vmem:[%s14540_s3 + $0x4a0] sm:$0xff] }
 0x279   :  { %v11151_v23 = vpack.c.bf16 %v7180_v13, %v7178_v63  ;;  %v7189_v63 = vld [vmem:[%s14540_s3 + $0x4e8] sm:$0xff]  ;;  %v7198_v57 = vld [vmem:[%s14540_s3 + $0x530] sm:$0xff] }
 0x27a   :  { %14869 = vst [vmem:[#allocation60_spill] sm:$0xff] %v11118_v34 }
 0x27b   :  { %8104 = vmatpush1.bf16.msra.mxu1 %v11095_v62  ;;  %14872 = vst [vmem:[#allocation63_spill] sm:$0xff] %v11151_v23 }
 0x27c   :  { %8106 = vmatprep.subr.bf16.mxu1 %v11100_v46  ;;  %v7183_v46 = vld [vmem:[%s14540_s3 + $0x4b8] sm:$0xff] }
 0x27d   :  { %v11154_v40 = vpack.c.bf16 %v7185_v43, %v7183_v46  ;;  %v7186_v43 = vld [vmem:[%s14540_s3 + $0x4d0] sm:$0xff] }
 0x27f   :  { %8108 = vmatpush1.bf16.msra.mxu1 %v11115_v17  ;;  %14873 = vst [vmem:[#allocation64_spill] sm:$0xff] %v11154_v40  ;;  %v7187_v17 = vld [vmem:[%s14540_s3 + $0x4d8] sm:$0xff] }
 0x280   :  { %8110 = vmatprep.subr.bf16.mxu1 %v11118_v34  ;;  %v7184_v34 = vld [vmem:[%s14540_s3 + $0x4c0] sm:$0xff]  ;;  %v11172_v13 = vpack.c.bf16 %v7189_v63, %v7187_v17  ;;  %v7190_v63 = vld [vmem:[%s14540_s3 + $0x4f0] sm:$0xff] }
 0x281   :  { %v11169_v46 = vpack.c.bf16 %v7184_v34, %v7182_v42  ;;  %v7193_v34 = vld [vmem:[%s14540_s3 + $0x508] sm:$0xff] }
 0x282   :  { %14875 = vst [vmem:[#allocation66_spill] sm:$0xff] %v11172_v13 }
 0x283   :  { %8112 = vmatpush1.bf16.msra.mxu1 %v11133_v30  ;;  %14874 = vst [vmem:[#allocation65_spill] sm:$0xff] %v11169_v46  ;;  %v7191_v30 = vld [vmem:[%s14540_s3 + $0x4f8] sm:$0xff] }
 0x284   :  { %8114 = vmatprep.subr.bf16.mxu1 %v11136_v25  ;;  %v7188_v25 = vld [vmem:[%s14540_s3 + $0x4e0] sm:$0xff]  ;;  %v11190_v42 = vpack.c.bf16 %v7193_v34, %v7191_v30  ;;  %v7194_v34 = vld [vmem:[%s14540_s3 + $0x510] sm:$0xff] }
 0x285   :  { %v11187_v17 = vpack.c.bf16 %v7188_v25, %v7186_v43  ;;  %v7197_v25 = vld [vmem:[%s14540_s3 + $0x528] sm:$0xff] }
 0x286   :  { %14877 = vst [vmem:[#allocation68_spill] sm:$0xff] %v11190_v42 }
 0x287   :  { %8116 = vmatpush1.bf16.msra.mxu1 %v11151_v23  ;;  %14876 = vst [vmem:[#allocation67_spill] sm:$0xff] %v11187_v17  ;;  %v7195_v23 = vld [vmem:[%s14540_s3 + $0x518] sm:$0xff] }
 0x288   :  { %8118 = vmatprep.subr.bf16.mxu1 %v11154_v40  ;;  %v7192_v40 = vld [vmem:[%s14540_s3 + $0x500] sm:$0xff]  ;;  %v11208_v43 = vpack.c.bf16 %v7197_v25, %v7195_v23  ;;  %v7199_v23 = vld [vmem:[%s14540_s3 + $0x538] sm:$0xff] }
 0x289   :  { %v11205_v30 = vpack.c.bf16 %v7192_v40, %v7190_v63  ;;  %v7209_v63 = vld [vmem:[%s14540_s3 + $0x548] sm:$0xff]  ;;  %v7211_v25 = vld [vmem:[%s14540_s3 + $0x558] sm:$0xff] }
 0x28a   :  { %14879 = vst [vmem:[#allocation70_spill] sm:$0xff] %v11208_v43  ;;  %v11253_v7 = vpack.c.bf16 %v7211_v25, %v7209_v63  ;;  %v7219_v63 = vld [vmem:[%s14540_s3 + $0x598] sm:$0xff] }
 0x28b   :  { %8120 = vmatpush1.bf16.msra.mxu1 %v11169_v46  ;;  %14878 = vst [vmem:[#allocation69_spill] sm:$0xff] %v11205_v30  ;;  %v11216_v46 = vpop.f32.mrb[22].mxu0 }
 0x28c   :  { %8122 = vmatprep.subr.bf16.mxu1 %v11172_v13  ;;  %v7196_v13 = vld [vmem:[%s14540_s3 + $0x520] sm:$0xff]  ;;  %v11218_v62 = vpop.f32.mrb[23].mxu0  ;;  %14881 = vst [vmem:[#allocation72_spill] sm:$0xff] %v11253_v7 }
 0x28d   :  { %v11221_v40 = vpack.c.bf16 %v7196_v13, %v7194_v34  ;;  %v7208_v13 = vld [vmem:[%s14540_s3 + $0x540] sm:$0xff]  ;;  %v7210_v34 = vld [vmem:[%s14540_s3 + $0x550] sm:$0xff] }
 0x28e   :  { %v11255_v20 = vpack.c.bf16 %v7210_v34, %v7208_v13  ;;  %v7220_v13 = vld [vmem:[%s14540_s3 + $0x5a0] sm:$0xff]  ;;  %v7222_v34 = vld [vmem:[%s14540_s3 + $0x5b0] sm:$0xff] }
 0x28f   :  { %8124 = vmatpush1.bf16.msra.mxu1 %v11187_v17  ;;  %14880 = vst [vmem:[#allocation71_spill] sm:$0xff] %v11221_v40  ;;  %v7215_v17 = vld [vmem:[%s14540_s3 + $0x578] sm:$0xff] }
 0x290   :  { %8126 = vmatprep.subr.bf16.mxu1 %v11190_v42  ;;  %v11233_v42 = vpop.f32.mrb[24].mxu0  ;;  %14882 = vst [vmem:[#allocation73_spill] sm:$0xff] %v11255_v20 }
 0x293   :  { %8128 = vmatpush1.bf16.msra.mxu1 %v11205_v30  ;;  %v7213_v30 = vld [vmem:[%s14540_s3 + $0x568] sm:$0xff] }
 0x294   :  { %8130 = vmatprep.subr.bf16.mxu1 %v11208_v43  ;;  %v11241_v43 = vpop.f32.mrb[25].mxu0  ;;  %v11257_v2 = vpack.c.bf16 %v7215_v17, %v7213_v30  ;;  %v7216_v30 = vld [vmem:[%s14540_s3 + $0x580] sm:$0xff] }
 0x296   :  { %14883 = vst [vmem:[#allocation74_spill] sm:$0xff] %v11257_v2 }
 0x297   :  { %8132 = vmatpush1.bf16.msra.mxu1 %v11221_v40  ;;  %v7212_v40 = vld [vmem:[%s14540_s3 + $0x560] sm:$0xff] }
 0x298   :  { %1486 = vmatprep.subr.mxu1 %v7199_v23  ;;  %v7217_v23 = vld [vmem:[%s14540_s3 + $0x588] sm:$0xff]  ;;  %v11274_v17 = vpack.c.bf16 %v7214_v4, %v7212_v40 }
 0x299   :  { %v7221_v4 = vld [vmem:[%s14540_s3 + $0x5a8] sm:$0xff] }
 0x29a   :  { %14884 = vst [vmem:[#allocation75_spill] sm:$0xff] %v11274_v17 }
 0x29b   :  { %1487 = vmatpush1.msra.mxu1 %v7198_v57  ;;  %v11279_v57 = vpack.c.bf16 %v7219_v63, %v7217_v23  ;;  %v11315_v23 = vpack.c.bf16 %v7222_v34, %v7220_v13 }
 0x29c   :  { %1511 = vmatmul.mubr.f32.vlgmr.msra.gmra.mrb[8].mxu1 %v10643_v58  ;;  %8144 = vmatprep.subr.bf16.mxu1 %v11253_v7  ;;  %v7218_v58 = vld [vmem:[%s14540_s3 + $0x590] sm:$0xff]  ;;  %v7264_v7 = vld [vmem:[%s14540_s3 + $0x6c0] sm:$0xff] }
 0x29d   :  { %8146 = vmatpush1.bf16.msra.mxu1 %v11255_v20  ;;  %7201 = vmatprep.mubr.msk.f32.mxu1 %vm928_vm5, %v10809_v27  ;;  %14885 = vst [vmem:[#allocation76_spill] sm:$0xff] %v11279_v57  ;;  %v7223_v27 = vld [vmem:[%s14540_s3 + $0x5b8] sm:$0xff]  ;;  %v11295_v40 = vpack.c.bf16 %v7218_v58, %v7216_v30  ;;  %14888 = vst [vmem:[#allocation79_spill] sm:$0xff] %v11315_v23  ;;  %v7224_v30 = vld [vmem:[%s14540_s3 + $0x5c0] sm:$0xff] }
 0x29e   :  { %8148 = vmatprep.subr.bf16.mxu1 %v11257_v2  ;;  %v11300_v25 = vpack.c.bf16 %v7223_v27, %v7221_v4  ;;  %v7226_v58 = vld [vmem:[%s14540_s3 + $0x5d0] sm:$0xff]  ;;  %v7229_v4 = vld [vmem:[%s14540_s3 + $0x5e8] sm:$0xff]  ;;  %v7231_v27 = vld [vmem:[%s14540_s3 + $0x5f8] sm:$0xff] }
 0x29f   :  { %14886 = vst [vmem:[#allocation77_spill] sm:$0xff] %v11295_v40  ;;  %v11333_v13 = vpack.c.bf16 %v7226_v58, %v7224_v30  ;;  %v11336_v34 = vpack.c.bf16 %v7231_v27, %v7229_v4  ;;  %v7235_v30 = vld [vmem:[%s14540_s3 + $0x618] sm:$0xff]  ;;  %v7232_v27 = vld [vmem:[%s14540_s3 + $0x600] sm:$0xff] }
 0x2a0   :  { %1517 = vmatmul.mubr.f32.gmra.mrb[10].mxu1 %v10807_v31  ;;  %14887 = vst [vmem:[#allocation78_spill] sm:$0xff] %v11300_v25  ;;  %v7225_v31 = vld [vmem:[%s14540_s3 + $0x5c8] sm:$0xff] }
 0x2a1   :  { %8150 = vmatpush1.bf16.msra.mxu1 %v11274_v17  ;;  %7250 = vmatprep.mubr.msk.f32.mxu1 %vm928_vm5, %v10836_v55  ;;  %v7227_v55 = vld [vmem:[%s14540_s3 + $0x5d8] sm:$0xff]  ;;  %14890 = vst [vmem:[#allocation81_spill] sm:$0xff] %v11333_v13  ;;  %14891 = vst [vmem:[#allocation82_spill] sm:$0xff] %v11336_v34 }
 0x2a2   :  { %8152 = vmatprep.subr.bf16.mxu1 %v11279_v57  ;;  %v11318_v63 = vpack.c.bf16 %v7227_v55, %v7225_v31  ;;  %v7228_v31 = vld [vmem:[%s14540_s3 + $0x5e0] sm:$0xff]  ;;  %v7230_v55 = vld [vmem:[%s14540_s3 + $0x5f0] sm:$0xff] }
 0x2a3   :  { %v11351_v58 = vpack.c.bf16 %v7230_v55, %v7228_v31  ;;  %v7239_v31 = vld [vmem:[%s14540_s3 + $0x638] sm:$0xff]  ;;  %v7248_v57 = vld [vmem:[%s14540_s3 + $0x680] sm:$0xff] }
 0x2a4   :  { %14889 = vst [vmem:[#allocation80_spill] sm:$0xff] %v11318_v63 }
 0x2a5   :  { %8154 = vmatpush1.bf16.msra.mxu1 %v11295_v40  ;;  %14892 = vst [vmem:[#allocation83_spill] sm:$0xff] %v11351_v58 }
 0x2a6   :  { %8156 = vmatprep.subr.bf16.mxu1 %v11300_v25  ;;  %v7233_v25 = vld [vmem:[%s14540_s3 + $0x608] sm:$0xff] }
 0x2a7   :  { %v11354_v4 = vpack.c.bf16 %v7235_v30, %v7233_v25  ;;  %v7236_v30 = vld [vmem:[%s14540_s3 + $0x620] sm:$0xff] }
 0x2a9   :  { %8158 = vmatpush1.bf16.msra.mxu1 %v11315_v23  ;;  %14893 = vst [vmem:[#allocation84_spill] sm:$0xff] %v11354_v4  ;;  %v7237_v23 = vld [vmem:[%s14540_s3 + $0x628] sm:$0xff] }
 0x2aa   :  { %8160 = vmatprep.subr.bf16.mxu1 %v11318_v63  ;;  %v7234_v63 = vld [vmem:[%s14540_s3 + $0x610] sm:$0xff]  ;;  %v11372_v55 = vpack.c.bf16 %v7239_v31, %v7237_v23  ;;  %v7240_v31 = vld [vmem:[%s14540_s3 + $0x640] sm:$0xff] }
 0x2ab   :  { %v11369_v25 = vpack.c.bf16 %v7234_v63, %v7232_v27  ;;  %v7243_v63 = vld [vmem:[%s14540_s3 + $0x658] sm:$0xff] }
 0x2ac   :  { %14895 = vst [vmem:[#allocation86_spill] sm:$0xff] %v11372_v55 }
 0x2ad   :  { %8162 = vmatpush1.bf16.msra.mxu1 %v11333_v13  ;;  %14894 = vst [vmem:[#allocation85_spill] sm:$0xff] %v11369_v25  ;;  %v7241_v13 = vld [vmem:[%s14540_s3 + $0x648] sm:$0xff] }
 0x2ae   :  { %8164 = vmatprep.subr.bf16.mxu1 %v11336_v34  ;;  %v7238_v34 = vld [vmem:[%s14540_s3 + $0x630] sm:$0xff]  ;;  %v11390_v27 = vpack.c.bf16 %v7243_v63, %v7241_v13  ;;  %v7244_v63 = vld [vmem:[%s14540_s3 + $0x660] sm:$0xff] }
 0x2af   :  { %v11387_v23 = vpack.c.bf16 %v7238_v34, %v7236_v30  ;;  %v7247_v34 = vld [vmem:[%s14540_s3 + $0x678] sm:$0xff] }
 0x2b0   :  { %14897 = vst [vmem:[#allocation88_spill] sm:$0xff] %v11390_v27 }
 0x2b1   :  { %8166 = vmatpush1.bf16.msra.mxu1 %v11351_v58  ;;  %14896 = vst [vmem:[#allocation87_spill] sm:$0xff] %v11387_v23  ;;  %v7245_v58 = vld [vmem:[%s14540_s3 + $0x668] sm:$0xff] }
 0x2b2   :  { %8168 = vmatprep.subr.bf16.mxu1 %v11354_v4  ;;  %v7242_v4 = vld [vmem:[%s14540_s3 + $0x650] sm:$0xff]  ;;  %v11408_v30 = vpack.c.bf16 %v7247_v34, %v7245_v58  ;;  %v7249_v58 = vld [vmem:[%s14540_s3 + $0x688] sm:$0xff] }
 0x2b3   :  { %v11405_v13 = vpack.c.bf16 %v7242_v4, %v7240_v31  ;;  %v7259_v31 = vld [vmem:[%s14540_s3 + $0x698] sm:$0xff]  ;;  %v7261_v34 = vld [vmem:[%s14540_s3 + $0x6a8] sm:$0xff] }
 0x2b4   :  { %14899 = vst [vmem:[#allocation90_spill] sm:$0xff] %v11408_v30  ;;  %v11453_v17 = vpack.c.bf16 %v7261_v34, %v7259_v31  ;;  %v7269_v31 = vld [vmem:[%s14540_s3 + $0x6e8] sm:$0xff] }
 0x2b5   :  { %8170 = vmatpush1.bf16.msra.mxu1 %v11369_v25  ;;  %14898 = vst [vmem:[#allocation89_spill] sm:$0xff] %v11405_v13  ;;  %v11416_v25 = vpop.f32.mrb[26].mxu0 }
 0x2b6   :  { %8172 = vmatprep.subr.bf16.mxu1 %v11372_v55  ;;  %v7246_v55 = vld [vmem:[%s14540_s3 + $0x670] sm:$0xff]  ;;  %v11418_v40 = vpop.f32.mrb[27].mxu0  ;;  %14901 = vst [vmem:[#allocation92_spill] sm:$0xff] %v11453_v17 }
 0x2b7   :  { %v11421_v4 = vpack.c.bf16 %v7246_v55, %v7244_v63  ;;  %v7258_v55 = vld [vmem:[%s14540_s3 + $0x690] sm:$0xff]  ;;  %v7260_v63 = vld [vmem:[%s14540_s3 + $0x6a0] sm:$0xff] }
 0x2b8   :  { %v11455_v2 = vpack.c.bf16 %v7260_v63, %v7258_v55  ;;  %v7270_v55 = vld [vmem:[%s14540_s3 + $0x6f0] sm:$0xff]  ;;  %v7272_v63 = vld [vmem:[%s14540_s3 + $0x700] sm:$0xff] }
 0x2b9   :  { %8174 = vmatpush1.bf16.msra.mxu1 %v11387_v23  ;;  %14900 = vst [vmem:[#allocation91_spill] sm:$0xff] %v11421_v4  ;;  %v7265_v23 = vld [vmem:[%s14540_s3 + $0x6c8] sm:$0xff] }
 0x2ba   :  { %8176 = vmatprep.subr.bf16.mxu1 %v11390_v27  ;;  %v11433_v27 = vpop.f32.mrb[28].mxu0  ;;  %14902 = vst [vmem:[#allocation93_spill] sm:$0xff] %v11455_v2 }
 0x2bd   :  { %8178 = vmatpush1.bf16.msra.mxu1 %v11405_v13  ;;  %v7263_v13 = vld [vmem:[%s14540_s3 + $0x6b8] sm:$0xff] }
 0x2be   :  { %8180 = vmatprep.subr.bf16.mxu1 %v11408_v30  ;;  %v11441_v30 = vpop.f32.mrb[29].mxu0  ;;  %v11457_v20 = vpack.c.bf16 %v7265_v23, %v7263_v13  ;;  %v7266_v13 = vld [vmem:[%s14540_s3 + $0x6d0] sm:$0xff] }
 0x2c0   :  { %14903 = vst [vmem:[#allocation94_spill] sm:$0xff] %v11457_v20 }
 0x2c1   :  { %8182 = vmatpush1.bf16.msra.mxu1 %v11421_v4  ;;  %v7262_v4 = vld [vmem:[%s14540_s3 + $0x6b0] sm:$0xff] }
 0x2c2   :  { %1702 = vmatprep.subr.mxu1 %v7249_v58  ;;  %v7267_v58 = vld [vmem:[%s14540_s3 + $0x6d8] sm:$0xff]  ;;  %v11474_v23 = vpack.c.bf16 %v7264_v7, %v7262_v4 }
 0x2c3   :  { %v7271_v7 = vld [vmem:[%s14540_s3 + $0x6f8] sm:$0xff] }
 0x2c4   :  { %14904 = vst [vmem:[#allocation95_spill] sm:$0xff] %v11474_v23 }
 0x2c5   :  { %1703 = vmatpush1.msra.mxu1 %v7248_v57  ;;  %v11479_v57 = vpack.c.bf16 %v7269_v31, %v7267_v58  ;;  %v11515_v58 = vpack.c.bf16 %v7272_v63, %v7270_v55 }
 0x2c6   :  { %1727 = vmatmul.mubr.f32.vlgmr.msra.gmra.mrb[8].mxu1 %v10828_v56  ;;  %8194 = vmatprep.subr.bf16.mxu1 %v11453_v17  ;;  %v7268_v56 = vld [vmem:[%s14540_s3 + $0x6e0] sm:$0xff]  ;;  %v7314_v17 = vld [vmem:[%s14540_s3 + $0x810] sm:$0xff] }
 0x2c7   :  { %8196 = vmatpush1.bf16.msra.mxu1 %v11455_v2  ;;  %7251 = vmatprep.mubr.msk.f32.mxu1 %vm928_vm5, %v11018_v5  ;;  %14905 = vst [vmem:[#allocation96_spill] sm:$0xff] %v11479_v57  ;;  %v7273_v5 = vld [vmem:[%s14540_s3 + $0x708] sm:$0xff]  ;;  %v11495_v4 = vpack.c.bf16 %v7268_v56, %v7266_v13  ;;  %14908 = vst [vmem:[#allocation99_spill] sm:$0xff] %v11515_v58  ;;  %v7274_v13 = vld [vmem:[%s14540_s3 + $0x710] sm:$0xff] }
 0x2c8   :  { %8198 = vmatprep.subr.bf16.mxu1 %v11457_v20  ;;  %v11500_v34 = vpack.c.bf16 %v7273_v5, %v7271_v7  ;;  %v7276_v56 = vld [vmem:[%s14540_s3 + $0x720] sm:$0xff]  ;;  %v7279_v7 = vld [vmem:[%s14540_s3 + $0x738] sm:$0xff]  ;;  %v7281_v5 = vld [vmem:[%s14540_s3 + $0x748] sm:$0xff] }
 0x2c9   :  { %14906 = vst [vmem:[#allocation97_spill] sm:$0xff] %v11495_v4  ;;  %v11533_v55 = vpack.c.bf16 %v7276_v56, %v7274_v13  ;;  %v11536_v63 = vpack.c.bf16 %v7281_v5, %v7279_v7  ;;  %v7285_v13 = vld [vmem:[%s14540_s3 + $0x768] sm:$0xff]  ;;  %v7282_v5 = vld [vmem:[%s14540_s3 + $0x750] sm:$0xff] }
 0x2ca   :  { %1733 = vmatmul.mubr.f32.gmra.mrb[10].mxu1 %v11016_v41  ;;  %14907 = vst [vmem:[#allocation98_spill] sm:$0xff] %v11500_v34  ;;  %v7275_v41 = vld [vmem:[%s14540_s3 + $0x718] sm:$0xff] }
 0x2cb   :  { %8200 = vmatpush1.bf16.msra.mxu1 %v11474_v23  ;;  %7300 = vmatprep.mubr.msk.f32.mxu1 %vm928_vm5, %v11041_v12  ;;  %v7277_v12 = vld [vmem:[%s14540_s3 + $0x728] sm:$0xff]  ;;  %14910 = vst [vmem:[#allocation101_spill] sm:$0xff] %v11533_v55  ;;  %14911 = vst [vmem:[#allocation102_spill] sm:$0xff] %v11536_v63 }
 0x2cc   :  { %8202 = vmatprep.subr.bf16.mxu1 %v11479_v57  ;;  %v11518_v31 = vpack.c.bf16 %v7277_v12, %v7275_v41  ;;  %v7278_v41 = vld [vmem:[%s14540_s3 + $0x730] sm:$0xff]  ;;  %v7280_v12 = vld [vmem:[%s14540_s3 + $0x740] sm:$0xff] }
 0x2cd   :  { %v11551_v56 = vpack.c.bf16 %v7280_v12, %v7278_v41  ;;  %v7289_v41 = vld [vmem:[%s14540_s3 + $0x788] sm:$0xff]  ;;  %v7298_v57 = vld [vmem:[%s14540_s3 + $0x7d0] sm:$0xff] }
 0x2ce   :  { %14909 = vst [vmem:[#allocation100_spill] sm:$0xff] %v11518_v31 }
 0x2cf   :  { %8204 = vmatpush1.bf16.msra.mxu1 %v11495_v4  ;;  %14912 = vst [vmem:[#allocation103_spill] sm:$0xff] %v11551_v56 }
 0x2d0   :  { %8206 = vmatprep.subr.bf16.mxu1 %v11500_v34  ;;  %v7283_v34 = vld [vmem:[%s14540_s3 + $0x758] sm:$0xff] }
 0x2d1   :  { %v11554_v7 = vpack.c.bf16 %v7285_v13, %v7283_v34  ;;  %v7286_v13 = vld [vmem:[%s14540_s3 + $0x770] sm:$0xff] }
 0x2d3   :  { %8208 = vmatpush1.bf16.msra.mxu1 %v11515_v58  ;;  %14913 = vst [vmem:[#allocation104_spill] sm:$0xff] %v11554_v7  ;;  %v7287_v58 = vld [vmem:[%s14540_s3 + $0x778] sm:$0xff] }
 0x2d4   :  { %8210 = vmatprep.subr.bf16.mxu1 %v11518_v31  ;;  %v7284_v31 = vld [vmem:[%s14540_s3 + $0x760] sm:$0xff]  ;;  %v11572_v12 = vpack.c.bf16 %v7289_v41, %v7287_v58  ;;  %v7290_v41 = vld [vmem:[%s14540_s3 + $0x790] sm:$0xff] }
 0x2d5   :  { %v11569_v34 = vpack.c.bf16 %v7284_v31, %v7282_v5  ;;  %v7293_v31 = vld [vmem:[%s14540_s3 + $0x7a8] sm:$0xff] }
 0x2d6   :  { %14915 = vst [vmem:[#allocation106_spill] sm:$0xff] %v11572_v12 }
 0x2d7   :  { %8212 = vmatpush1.bf16.msra.mxu1 %v11533_v55  ;;  %14914 = vst [vmem:[#allocation105_spill] sm:$0xff] %v11569_v34  ;;  %v7291_v55 = vld [vmem:[%s14540_s3 + $0x798] sm:$0xff] }
 0x2d8   :  { %8214 = vmatprep.subr.bf16.mxu1 %v11536_v63  ;;  %v7288_v63 = vld [vmem:[%s14540_s3 + $0x780] sm:$0xff]  ;;  %v11590_v5 = vpack.c.bf16 %v7293_v31, %v7291_v55  ;;  %v7294_v31 = vld [vmem:[%s14540_s3 + $0x7b0] sm:$0xff] }
 0x2d9   :  { %v11587_v58 = vpack.c.bf16 %v7288_v63, %v7286_v13  ;;  %v7297_v63 = vld [vmem:[%s14540_s3 + $0x7c8] sm:$0xff] }
 0x2da   :  { %14917 = vst [vmem:[#allocation108_spill] sm:$0xff] %v11590_v5 }
 0x2db   :  { %8216 = vmatpush1.bf16.msra.mxu1 %v11551_v56  ;;  %14916 = vst [vmem:[#allocation107_spill] sm:$0xff] %v11587_v58  ;;  %v7295_v56 = vld [vmem:[%s14540_s3 + $0x7b8] sm:$0xff] }
 0x2dc   :  { %8218 = vmatprep.subr.bf16.mxu1 %v11554_v7  ;;  %v7292_v7 = vld [vmem:[%s14540_s3 + $0x7a0] sm:$0xff]  ;;  %v11608_v13 = vpack.c.bf16 %v7297_v63, %v7295_v56  ;;  %v7299_v56 = vld [vmem:[%s14540_s3 + $0x7d8] sm:$0xff] }
 0x2dd   :  { %v11605_v55 = vpack.c.bf16 %v7292_v7, %v7290_v41  ;;  %v7309_v41 = vld [vmem:[%s14540_s3 + $0x7e8] sm:$0xff]  ;;  %v7311_v63 = vld [vmem:[%s14540_s3 + $0x7f8] sm:$0xff] }
 0x2de   :  { %14919 = vst [vmem:[#allocation110_spill] sm:$0xff] %v11608_v13  ;;  %v11653_v23 = vpack.c.bf16 %v7311_v63, %v7309_v41  ;;  %v7319_v41 = vld [vmem:[%s14540_s3 + $0x838] sm:$0xff] }
 0x2df   :  { %8220 = vmatpush1.bf16.msra.mxu1 %v11569_v34  ;;  %14918 = vst [vmem:[#allocation109_spill] sm:$0xff] %v11605_v55  ;;  %v11616_v34 = vpop.f32.mrb[30].mxu0 }
 0x2e0   :  { %8222 = vmatprep.subr.bf16.mxu1 %v11572_v12  ;;  %v7296_v12 = vld [vmem:[%s14540_s3 + $0x7c0] sm:$0xff]  ;;  %v11618_v4 = vpop.f32.mrb[31].mxu0  ;;  %14921 = vst [vmem:[#allocation112_spill] sm:$0xff] %v11653_v23 }
 0x2e1   :  { %v11621_v7 = vpack.c.bf16 %v7296_v12, %v7294_v31  ;;  %v7308_v12 = vld [vmem:[%s14540_s3 + $0x7e0] sm:$0xff]  ;;  %v7310_v31 = vld [vmem:[%s14540_s3 + $0x7f0] sm:$0xff] }
 0x2e2   :  { %v11655_v20 = vpack.c.bf16 %v7310_v31, %v7308_v12  ;;  %v7320_v12 = vld [vmem:[%s14540_s3 + $0x840] sm:$0xff]  ;;  %v7322_v31 = vld [vmem:[%s14540_s3 + $0x850] sm:$0xff] }
 0x2e3   :  { %8224 = vmatpush1.bf16.msra.mxu1 %v11587_v58  ;;  %14920 = vst [vmem:[#allocation111_spill] sm:$0xff] %v11621_v7  ;;  %v7315_v58 = vld [vmem:[%s14540_s3 + $0x818] sm:$0xff] }
 0x2e4   :  { %8226 = vmatprep.subr.bf16.mxu1 %v11590_v5  ;;  %v11633_v5 = vpop.f32.mrb[32].mxu0  ;;  %14922 = vst [vmem:[#allocation113_spill] sm:$0xff] %v11655_v20 }
 0x2e7   :  { %8228 = vmatpush1.bf16.msra.mxu1 %v11605_v55  ;;  %v7313_v55 = vld [vmem:[%s14540_s3 + $0x808] sm:$0xff] }
 0x2e8   :  { %8230 = vmatprep.subr.bf16.mxu1 %v11608_v13  ;;  %v11641_v13 = vpop.f32.mrb[33].mxu0  ;;  %v11657_v2 = vpack.c.bf16 %v7315_v58, %v7313_v55  ;;  %v7316_v55 = vld [vmem:[%s14540_s3 + $0x820] sm:$0xff] }
 0x2ea   :  { %14923 = vst [vmem:[#allocation114_spill] sm:$0xff] %v11657_v2 }
 0x2eb   :  { %8232 = vmatpush1.bf16.msra.mxu1 %v11621_v7  ;;  %v7312_v7 = vld [vmem:[%s14540_s3 + $0x800] sm:$0xff] }
 0x2ec   :  { %1918 = vmatprep.subr.mxu1 %v7299_v56  ;;  %v7317_v56 = vld [vmem:[%s14540_s3 + $0x828] sm:$0xff]  ;;  %v11674_v58 = vpack.c.bf16 %v7314_v17, %v7312_v7 }
 0x2ed   :  { %v7321_v17 = vld [vmem:[%s14540_s3 + $0x848] sm:$0xff] }
 0x2ee   :  { %14924 = vst [vmem:[#allocation115_spill] sm:$0xff] %v11674_v58 }
 0x2ef   :  { %1919 = vmatpush1.msra.mxu1 %v7298_v57  ;;  %v11679_v57 = vpack.c.bf16 %v7319_v41, %v7317_v56  ;;  %v11715_v56 = vpack.c.bf16 %v7322_v31, %v7320_v12 }
 0x2f0   :  { %1943 = vmatmul.mubr.f32.vlgmr.msra.gmra.mrb[8].mxu1 %v11033_v1  ;;  %8244 = vmatprep.subr.bf16.mxu1 %v11653_v23  ;;  %v7318_v1 = vld [vmem:[%s14540_s3 + $0x830] sm:$0xff]  ;;  %v7364_v23 = vld [vmem:[%s14540_s3 + $0x960] sm:$0xff] }
 0x2f1   :  { %8246 = vmatpush1.bf16.msra.mxu1 %v11655_v20  ;;  %7301 = vmatprep.mubr.msk.f32.mxu1 %vm928_vm5, %v11218_v62  ;;  %14925 = vst [vmem:[#allocation116_spill] sm:$0xff] %v11679_v57  ;;  %v7323_v62 = vld [vmem:[%s14540_s3 + $0x858] sm:$0xff]  ;;  %v11695_v7 = vpack.c.bf16 %v7318_v1, %v7316_v55  ;;  %14928 = vst [vmem:[#allocation119_spill] sm:$0xff] %v11715_v56  ;;  %v7324_v55 = vld [vmem:[%s14540_s3 + $0x860] sm:$0xff] }
 0x2f2   :  { %8248 = vmatprep.subr.bf16.mxu1 %v11657_v2  ;;  %v11700_v63 = vpack.c.bf16 %v7323_v62, %v7321_v17  ;;  %v7326_v1 = vld [vmem:[%s14540_s3 + $0x870] sm:$0xff]  ;;  %v7329_v17 = vld [vmem:[%s14540_s3 + $0x888] sm:$0xff]  ;;  %v7331_v62 = vld [vmem:[%s14540_s3 + $0x898] sm:$0xff] }
 0x2f3   :  { %14926 = vst [vmem:[#allocation117_spill] sm:$0xff] %v11695_v7  ;;  %v11733_v12 = vpack.c.bf16 %v7326_v1, %v7324_v55  ;;  %v11736_v31 = vpack.c.bf16 %v7331_v62, %v7329_v17  ;;  %v7335_v55 = vld [vmem:[%s14540_s3 + $0x8b8] sm:$0xff]  ;;  %v7332_v62 = vld [vmem:[%s14540_s3 + $0x8a0] sm:$0xff]  ;;  %v7362_v20 = vld [vmem:[%s14540_s3 + $0x950] sm:$0xff] }
 0x2f4   :  { %1949 = vmatmul.mubr.f32.gmra.mrb[10].mxu1 %v11216_v46  ;;  %14927 = vst [vmem:[#allocation118_spill] sm:$0xff] %v11700_v63  ;;  %v7325_v46 = vld [vmem:[%s14540_s3 + $0x868] sm:$0xff] }
 0x2f5   :  { %8250 = vmatpush1.bf16.msra.mxu1 %v11674_v58  ;;  %7350 = vmatprep.mubr.msk.f32.mxu1 %vm928_vm5, %v11241_v43  ;;  %v7327_v43 = vld [vmem:[%s14540_s3 + $0x878] sm:$0xff]  ;;  %14930 = vst [vmem:[#allocation121_spill] sm:$0xff] %v11733_v12  ;;  %14931 = vst [vmem:[#allocation122_spill] sm:$0xff] %v11736_v31 }
 0x2f6   :  { %8252 = vmatprep.subr.bf16.mxu1 %v11679_v57  ;;  %v11718_v41 = vpack.c.bf16 %v7327_v43, %v7325_v46  ;;  %v7328_v46 = vld [vmem:[%s14540_s3 + $0x880] sm:$0xff]  ;;  %v7330_v43 = vld [vmem:[%s14540_s3 + $0x890] sm:$0xff] }
 0x2f7   :  { %v11751_v1 = vpack.c.bf16 %v7330_v43, %v7328_v46  ;;  %v7339_v46 = vld [vmem:[%s14540_s3 + $0x8d8] sm:$0xff]  ;;  %v7348_v57 = vld [vmem:[%s14540_s3 + $0x920] sm:$0xff] }
 0x2f8   :  { %14929 = vst [vmem:[#allocation120_spill] sm:$0xff] %v11718_v41 }
 0x2f9   :  { %8254 = vmatpush1.bf16.msra.mxu1 %v11695_v7  ;;  %14932 = vst [vmem:[#allocation123_spill] sm:$0xff] %v11751_v1 }
 0x2fa   :  { %8256 = vmatprep.subr.bf16.mxu1 %v11700_v63  ;;  %v7333_v63 = vld [vmem:[%s14540_s3 + $0x8a8] sm:$0xff] }
 0x2fb   :  { %v11754_v17 = vpack.c.bf16 %v7335_v55, %v7333_v63  ;;  %v7336_v55 = vld [vmem:[%s14540_s3 + $0x8c0] sm:$0xff] }
 0x2fd   :  { %8258 = vmatpush1.bf16.msra.mxu1 %v11715_v56  ;;  %14933 = vst [vmem:[#allocation124_spill] sm:$0xff] %v11754_v17  ;;  %v7337_v56 = vld [vmem:[%s14540_s3 + $0x8c8] sm:$0xff] }
 0x2fe   :  { %8260 = vmatprep.subr.bf16.mxu1 %v11718_v41  ;;  %v7334_v41 = vld [vmem:[%s14540_s3 + $0x8b0] sm:$0xff]  ;;  %v11772_v43 = vpack.c.bf16 %v7339_v46, %v7337_v56  ;;  %v7340_v46 = vld [vmem:[%s14540_s3 + $0x8e0] sm:$0xff] }
 0x2ff   :  { %v11769_v63 = vpack.c.bf16 %v7334_v41, %v7332_v62  ;;  %v7343_v41 = vld [vmem:[%s14540_s3 + $0x8f8] sm:$0xff] }
 0x300   :  { %14935 = vst [vmem:[#allocation126_spill] sm:$0xff] %v11772_v43 }
 0x301   :  { %8262 = vmatpush1.bf16.msra.mxu1 %v11733_v12  ;;  %14934 = vst [vmem:[#allocation125_spill] sm:$0xff] %v11769_v63  ;;  %v7341_v12 = vld [vmem:[%s14540_s3 + $0x8e8] sm:$0xff] }
 0x302   :  { %8264 = vmatprep.subr.bf16.mxu1 %v11736_v31  ;;  %v7338_v31 = vld [vmem:[%s14540_s3 + $0x8d0] sm:$0xff]  ;;  %v11790_v62 = vpack.c.bf16 %v7343_v41, %v7341_v12  ;;  %v7344_v41 = vld [vmem:[%s14540_s3 + $0x900] sm:$0xff] }
 0x303   :  { %v11787_v56 = vpack.c.bf16 %v7338_v31, %v7336_v55  ;;  %v7347_v31 = vld [vmem:[%s14540_s3 + $0x918] sm:$0xff] }
 0x304   :  { %14937 = vst [vmem:[#allocation128_spill] sm:$0xff] %v11790_v62 }
 0x305   :  { %8266 = vmatpush1.bf16.msra.mxu1 %v11751_v1  ;;  %14936 = vst [vmem:[#allocation127_spill] sm:$0xff] %v11787_v56  ;;  %v7345_v1 = vld [vmem:[%s14540_s3 + $0x908] sm:$0xff] }
 0x306   :  { %8268 = vmatprep.subr.bf16.mxu1 %v11754_v17  ;;  %v7342_v17 = vld [vmem:[%s14540_s3 + $0x8f0] sm:$0xff]  ;;  %v11808_v55 = vpack.c.bf16 %v7347_v31, %v7345_v1  ;;  %v7349_v1 = vld [vmem:[%s14540_s3 + $0x928] sm:$0xff] }
 0x307   :  { %v11805_v12 = vpack.c.bf16 %v7342_v17, %v7340_v46  ;;  %v7359_v46 = vld [vmem:[%s14540_s3 + $0x938] sm:$0xff]  ;;  %v7361_v31 = vld [vmem:[%s14540_s3 + $0x948] sm:$0xff] }
 0x308   :  { %14939 = vst [vmem:[#allocation130_spill] sm:$0xff] %v11808_v55  ;;  %v11853_v58 = vpack.c.bf16 %v7361_v31, %v7359_v46  ;;  %v7368_v31 = vld [vmem:[%s14540_s3 + $0x980] sm:$0xff] }
 0x309   :  { %8270 = vmatpush1.bf16.msra.mxu1 %v11769_v63  ;;  %14938 = vst [vmem:[#allocation129_spill] sm:$0xff] %v11805_v12  ;;  %v11816_v63 = vpop.f32.mrb[34].mxu0 }
 0x30a   :  { %8272 = vmatprep.subr.bf16.mxu1 %v11772_v43  ;;  %v7346_v43 = vld [vmem:[%s14540_s3 + $0x910] sm:$0xff]  ;;  %v11818_v7 = vpop.f32.mrb[35].mxu0  ;;  %14941 = vst [vmem:[#allocation132_spill] sm:$0xff] %v11853_v58 }
 0x30b   :  { %v11821_v17 = vpack.c.bf16 %v7346_v43, %v7344_v41  ;;  %v7360_v43 = vld [vmem:[%s14540_s3 + $0x940] sm:$0xff]  ;;  %v11839_v41 = vpop.f32.mrb[36].mxu0 }
 0x30d   :  { %8274 = vmatpush1.bf16.msra.mxu1 %v11787_v56  ;;  %14940 = vst [vmem:[#allocation131_spill] sm:$0xff] %v11821_v17  ;;  %v11848_v56 = vpop.f32.mrb[37].mxu0 }
 0x30e   :  { %8276 = vmatprep.subr.bf16.mxu1 %v11790_v62  ;;  %v7365_v62 = vld [vmem:[%s14540_s3 + $0x968] sm:$0xff] }
 0x311   :  { %8278 = vmatpush1.bf16.msra.mxu1 %v11805_v12  ;;  %v7358_v12 = vld [vmem:[%s14540_s3 + $0x930] sm:$0xff] }
 0x312   :  { %8280 = vmatprep.subr.bf16.mxu1 %v11808_v55  ;;  %v7363_v55 = vld [vmem:[%s14540_s3 + $0x958] sm:$0xff]  ;;  %v11855_v2 = vpack.c.bf16 %v7360_v43, %v7358_v12  ;;  %v7369_v12 = vld [vmem:[%s14540_s3 + $0x988] sm:$0xff] }
 0x313   :  { %v7503_v43 = vld [vmem:[%s14541_s4 + $0xa8] sm:$0xff] }
 0x314   :  { %14942 = vst [vmem:[#allocation133_spill] sm:$0xff] %v11855_v2 }
 0x315   :  { %8282 = vmatpush1.bf16.msra.mxu1 %v11821_v17  ;;  %v11857_v17 = vpack.c.bf16 %v7365_v62, %v7363_v55  ;;  %v11878_v55 = vpack.c.bf16 %v7364_v23, %v7362_v20  ;;  %v7371_v20 = vld [vmem:[%s14540_s3 + $0x998] sm:$0xff]  ;;  %v7502_v23 = vld [vmem:[%s14541_s4 + $0xa0] sm:$0xff] }
 0x316   :  { %2134 = vmatprep.subr.mxu1 %v7349_v1  ;;  %v7367_v1 = vld [vmem:[%s14540_s3 + $0x978] sm:$0xff] }
 0x317   :  { %14943 = vst [vmem:[#allocation134_spill] sm:$0xff] %v11857_v17  ;;  %v11871_v46 = vpop.f32.mrb[38].mxu0  ;;  %14944 = vst [vmem:[#allocation135_spill] sm:$0xff] %v11878_v55 }
 0x318   :  { %v11875_v62 = vpop.f32.mrb[39].mxu0 }
 0x319   :  { %2135 = vmatpush1.msra.mxu1 %v7348_v57  ;;  %v7366_v57 = vld [vmem:[%s14540_s3 + $0x970] sm:$0xff] }
 0x31a   :  { %2159 = vmatmul.mubr.f32.vlgmr.msra.gmra.mrb[8].mxu1 %v11233_v42  ;;  %8294 = vmatprep.subr.bf16.mxu1 %v11853_v58  ;;  %v11889_v42 = vpack.c.bf16 %v7369_v12, %v7367_v1  ;;  %v11904_v1 = vpack.c.bf16 %v7503_v43, %v7502_v23  ;;  %v7504_v12 = vld [vmem:[%s14541_s4 + $0xb0] sm:$0xff]  ;;  %v11914_v58 = vpack.c.bf16 %v7368_v31, %v7366_v57  ;;  %v14950_v31 = vmov 0.0|0.0  }
 0x31b   :  { %8296 = vmatpush1.bf16.msra.mxu1 %v11855_v2  ;;  %7351 = vmatprep.mubr.msk.f32.mxu1 %vm928_vm5, %v11418_v40  ;;  %v7373_v40 = vld [vmem:[%s14540_s3 + $0x9a8] sm:$0xff]  ;;  %v14684_v2 = vmov 0.0|0.0   ;;  %v7370_v43 = vld [vmem:[%s14540_s3 + $0x990] sm:$0xff] }
 0x31c   :  { %8298 = vmatprep.subr.bf16.mxu1 %v11857_v17  ;;  %14945 = vst [vmem:[#allocation136_spill] sm:$0xff] %v11889_v42  ;;  %8433 = vmatprep.subr.bf16.mxu0 %v14684_v2  ;;  %14946 = vst [vmem:[#allocation137_spill] sm:$0xff] %v11904_v1  ;;  %v7505_v17 = vld [vmem:[%s14541_s4 + $0xb8] sm:$0xff]  ;;  %v11919_v23 = vpack.c.bf16 %v7373_v40, %v7371_v20  ;;  %v7372_v2 = vld [vmem:[%s14540_s3 + $0x9a0] sm:$0xff] }
 0x31d   :  { %14947 = vst [vmem:[#allocation138_spill] sm:$0xff] %v11914_v58  ;;  %8435 = vmatpush1.bf16.msra.mxu0 %v11904_v1  ;;  %v11931_v57 = vpack.c.bf16 %v7505_v17, %v7504_v12  ;;  %v7506_v20 = vld [vmem:[%s14541_s4 + $0xc0] sm:$0xff]  ;;  %v7507_v40 = vld [vmem:[%s14541_s4 + $0xc8] sm:$0xff]  ;;  %v7374_v12 = vld [vmem:[%s14540_s3 + $0x9b0] sm:$0xff] }
 0x31e   :  { %2165 = vmatmul.mubr.f32.gmra.mrb[10].mxu1 %v11416_v25  ;;  %14948 = vst [vmem:[#allocation139_spill] sm:$0xff] %v11919_v23  ;;  %v7375_v25 = vld [vmem:[%s14540_s3 + $0x9b8] sm:$0xff]  ;;  %8436 = vmatprep.subr.bf16.mxu0 %v14950_v31 }
 0x31f   :  { %8300 = vmatpush1.bf16.msra.mxu1 %v11878_v55  ;;  %7400 = vmatprep.mubr.msk.f32.mxu1 %vm928_vm5, %v11441_v30  ;;  %14949 = vst [vmem:[#allocation140_spill] sm:$0xff] %v11931_v57  ;;  %v7377_v30 = vld [vmem:[%s14540_s3 + $0x9c8] sm:$0xff]  ;;  %v7376_v55 = vld [vmem:[%s14540_s3 + $0x9c0] sm:$0xff]  ;;  %v7379_v1 = vld [vmem:[%s14540_s3 + $0x9d8] sm:$0xff] }
 0x320   :  { %8302 = vmatprep.subr.bf16.mxu1 %v11889_v42  ;;  %v11944_v42 = vpack.c.bf16 %v7372_v2, %v7370_v43  ;;  %v11947_v17 = vpack.c.bf16 %v7377_v30, %v7375_v25  ;;  %v11959_v2 = vpack.c.bf16 %v7507_v40, %v7506_v20  ;;  %v7381_v43 = vld [vmem:[%s14540_s3 + $0x9e8] sm:$0xff]  ;;  %v7508_v25 = vld [vmem:[%s14541_s4 + $0xd0] sm:$0xff]  ;;  %v7509_v30 = vld [vmem:[%s14541_s4 + $0xd8] sm:$0xff] }
 0x321   :  { %8438 = vmatpush1.bf16.msra.mxu0 %v11931_v57  ;;  %v11975_v20 = vpack.c.bf16 %v7381_v43, %v7379_v1  ;;  %v7378_v40 = vld [vmem:[%s14540_s3 + $0x9d0] sm:$0xff]  ;;  %v7383_v57 = vld [vmem:[%s14540_s3 + $0x9f8] sm:$0xff]  ;;  %v7385_v1 = vld [vmem:[%s14540_s3 + $0xa08] sm:$0xff] }
 0x322   :  { %14951 = vst [vmem:[#allocation141_spill] sm:$0xff] %v11944_v42  ;;  %14952 = vst [vmem:[#allocation142_spill] sm:$0xff] %v11947_v17  ;;  %8439 = vmatprep.subr.bf16.mxu0 %v14950_v31  ;;  %v7511_v43 = vld [vmem:[%s14541_s4 + $0xe8] sm:$0xff] }
 0x323   :  { %8304 = vmatpush1.bf16.msra.mxu1 %v11914_v58  ;;  %14953 = vst [vmem:[#allocation143_spill] sm:$0xff] %v11959_v2  ;;  %14955 = vst [vmem:[#allocation145_spill] sm:$0xff] %v11975_v20  ;;  %v7380_v58 = vld [vmem:[%s14540_s3 + $0x9e0] sm:$0xff] }
 0x324   :  { %8306 = vmatprep.subr.bf16.mxu1 %v11919_v23  ;;  %v11972_v23 = vpack.c.bf16 %v7376_v55, %v7374_v12  ;;  %v11987_v55 = vpack.c.bf16 %v7509_v30, %v7508_v25  ;;  %v7510_v12 = vld [vmem:[%s14541_s4 + $0xe0] sm:$0xff]  ;;  %v12003_v25 = vpack.c.bf16 %v7385_v1, %v7383_v57  ;;  %v7382_v30 = vld [vmem:[%s14540_s3 + $0x9f0] sm:$0xff]  ;;  %v7389_v57 = vld [vmem:[%s14540_s3 + $0xa28] sm:$0xff] }
 0x325   :  { %8441 = vmatpush1.bf16.msra.mxu0 %v11959_v2  ;;  %v7387_v2 = vld [vmem:[%s14540_s3 + $0xa18] sm:$0xff]  ;;  %v15079_v11 = vld [vmem:[#allocation137_spill] sm:$0xff] }
 0x326   :  { %14954 = vst [vmem:[#allocation144_spill] sm:$0xff] %v11972_v23  ;;  %14956 = vst [vmem:[#allocation146_spill] sm:$0xff] %v11987_v55  ;;  %8442 = vmatprep.subr.bf16.mxu0 %v14950_v31  ;;  %v7513_v1 = vld [vmem:[%s14541_s4 + $0xf8] sm:$0xff] }
 0x327   :  { %8308 = vmatpush1.bf16.msra.mxu1 %v11944_v42  ;;  %14958 = vst [vmem:[#allocation148_spill] sm:$0xff] %v12003_v25  ;;  %v7384_v42 = vld [vmem:[%s14540_s3 + $0xa00] sm:$0xff] }
 0x328   :  { %8310 = vmatprep.subr.bf16.mxu1 %v11947_v17  ;;  %v12000_v17 = vpack.c.bf16 %v7380_v58, %v7378_v40  ;;  %v12015_v58 = vpack.c.bf16 %v7511_v43, %v7510_v12  ;;  %v7512_v40 = vld [vmem:[%s14541_s4 + $0xf0] sm:$0xff]  ;;  %v12031_v12 = vpack.c.bf16 %v7389_v57, %v7387_v2  ;;  %v7393_v2 = vld [vmem:[%s14540_s3 + $0xa48] sm:$0xff] }
 0x329   :  { %8444 = vmatpush1.bf16.msra.mxu0 %v11987_v55  ;;  %v7386_v43 = vld [vmem:[%s14540_s3 + $0xa10] sm:$0xff]  ;;  %v12040_v55 = vpack.c.bf16 %v7513_v1, %v7512_v40  ;;  %v7392_v1 = vld [vmem:[%s14540_s3 + $0xa40] sm:$0xff] }
 0x32a   :  { %14957 = vst [vmem:[#allocation147_spill] sm:$0xff] %v12000_v17  ;;  %8445 = vmatprep.subr.bf16.mxu0 %v14950_v31  ;;  %14960 = vst [vmem:[#allocation150_spill] sm:$0xff] %v12031_v12  ;;  %v7390_v40 = vld [vmem:[%s14540_s3 + $0xa30] sm:$0xff] }
 0x32b   :  { %8312 = vmatpush1.bf16.msra.mxu1 %v11972_v23  ;;  %v7388_v23 = vld [vmem:[%s14540_s3 + $0xa20] sm:$0xff]  ;;  %14961 = vst [vmem:[#allocation151_spill] sm:$0xff] %v12040_v55 }
 0x32c   :  { %8314 = vmatprep.subr.bf16.mxu1 %v11975_v20  ;;  %v12028_v20 = vpack.c.bf16 %v7384_v42, %v7382_v30  ;;  %v7391_v42 = vld [vmem:[%s14540_s3 + $0xa38] sm:$0xff]  ;;  %v12050_v30 = vpack.c.bf16 %v7388_v23, %v7386_v43  ;;  %v7397_v23 = vld [vmem:[%s14540_s3 + $0xa68] sm:$0xff]  ;;  %v12070_v43 = vpack.c.bf16 %v7392_v1, %v7390_v40 }
 0x32d   :  { %8447 = vmatpush1.bf16.msra.mxu0 %v12015_v58  ;;  %v12053_v57 = vpack.c.bf16 %v7393_v2, %v7391_v42  ;;  %v7394_v2 = vld [vmem:[%s14540_s3 + $0xa50] sm:$0xff]  ;;  %v7399_v40 = vld [vmem:[%s14540_s3 + $0xa78] sm:$0xff] }
 0x32e   :  { %14959 = vst [vmem:[#allocation149_spill] sm:$0xff] %v12028_v20  ;;  %8448 = vmatprep.subr.bf16.mxu0 %v14950_v31  ;;  %14962 = vst [vmem:[#allocation152_spill] sm:$0xff] %v12050_v30  ;;  %v7411_v1 = vld [vmem:[%s14540_s3 + $0xa98] sm:$0xff] }
 0x32f   :  { %8316 = vmatpush1.bf16.msra.mxu1 %v12000_v17  ;;  %14963 = vst [vmem:[#allocation153_spill] sm:$0xff] %v12053_v57  ;;  %14964 = vst [vmem:[#allocation154_spill] sm:$0xff] %v12070_v43 }
 0x330   :  { %8318 = vmatprep.subr.bf16.mxu1 %v12003_v25 }
 0x331   :  { %8450 = vmatpush1.bf16.msra.mxu0 %v12040_v55  ;;  %v7414_v55 = vld [vmem:[%s14540_s3 + $0xab0] sm:$0xff] }
 0x332   :  { %8451 = vmatprep.subr.bf16.mxu0 %v14950_v31 }
 0x333   :  { %8320 = vmatpush1.bf16.msra.mxu1 %v12028_v20  ;;  %v7395_v20 = vld [vmem:[%s14540_s3 + $0xa58] sm:$0xff] }
 0x334   :  { %8322 = vmatprep.subr.bf16.mxu1 %v12031_v12  ;;  %v12073_v42 = vpack.c.bf16 %v7397_v23, %v7395_v20  ;;  %v7396_v12 = vld [vmem:[%s14540_s3 + $0xa60] sm:$0xff]  ;;  %v7409_v20 = vld [vmem:[%s14540_s3 + $0xa88] sm:$0xff] }
 0x335   :  { %v12082_v25 = vpack.c.bf16 %v7396_v12, %v7394_v2  ;;  %v7408_v23 = vld [vmem:[%s14540_s3 + $0xa80] sm:$0xff]  ;;  %v7410_v12 = vld [vmem:[%s14540_s3 + $0xa90] sm:$0xff]  ;;  %v7413_v2 = vld [vmem:[%s14540_s3 + $0xaa8] sm:$0xff] }
 0x336   :  { %14965 = vst [vmem:[#allocation155_spill] sm:$0xff] %v12073_v42 }
 0x337   :  { %8324 = vmatpush1.bf16.msra.mxu1 %v12050_v30  ;;  %14966 = vst [vmem:[#allocation156_spill] sm:$0xff] %v12082_v25  ;;  %v12112_v30 = vpack.c.bf16 %v7410_v12, %v7408_v23  ;;  %v7420_v12 = vld [vmem:[%s14540_s3 + $0xae0] sm:$0xff] }
 0x338   :  { %8326 = vmatprep.subr.bf16.mxu1 %v12053_v57  ;;  %v12110_v57 = vpack.c.bf16 %v7411_v1, %v7409_v20  ;;  %v7419_v20 = vld [vmem:[%s14540_s3 + $0xad8] sm:$0xff]  ;;  %v7416_v1 = vld [vmem:[%s14540_s3 + $0xac0] sm:$0xff] }
 0x33b   :  { %8328 = vmatpush1.bf16.msra.mxu1 %v12070_v43  ;;  %v7398_v43 = vld [vmem:[%s14540_s3 + $0xa70] sm:$0xff] }
 0x33c   :  { %8330 = vmatprep.subr.bf16.mxu1 %v12073_v42  ;;  %v7415_v42 = vld [vmem:[%s14540_s3 + $0xab8] sm:$0xff] }
 0x33d   :  { %v12114_v17 = vpack.c.bf16 %v7415_v42, %v7413_v2  ;;  %v7422_v2 = vld [vmem:[%s14540_s3 + $0xaf0] sm:$0xff] }
 0x33f   :  { %8332 = vmatpush1.bf16.msra.mxu1 %v12082_v25  ;;  %v7412_v25 = vld [vmem:[%s14540_s3 + $0xaa0] sm:$0xff] }
 0x340   :  { %2350 = vmatprep.subr.mxu1 %v7399_v40  ;;  %v7417_v40 = vld [vmem:[%s14540_s3 + $0xac8] sm:$0xff]  ;;  %v12131_v42 = vpack.c.bf16 %v7414_v55, %v7412_v25 }
 0x341   :  { %v7421_v55 = vld [vmem:[%s14540_s3 + $0xae8] sm:$0xff] }
 0x343   :  { %2351 = vmatpush1.msra.mxu1 %v7398_v43  ;;  %v12136_v43 = vpack.c.bf16 %v7419_v20, %v7417_v40  ;;  %v12172_v40 = vpack.c.bf16 %v7422_v2, %v7420_v12 }
 0x344   :  { %2375 = vmatmul.mubr.f32.vlgmr.msra.gmra.mrb[8].mxu1 %v11433_v27  ;;  %8344 = vmatprep.subr.bf16.mxu1 %v12110_v57  ;;  %v7418_v27 = vld [vmem:[%s14540_s3 + $0xad0] sm:$0xff] }
 0x345   :  { %8346 = vmatpush1.bf16.msra.mxu1 %v12112_v30  ;;  %7401 = vmatprep.mubr.msk.f32.mxu1 %vm928_vm5, %v11618_v4  ;;  %14967 = vst [vmem:[#allocation157_spill] sm:$0xff] %v12136_v43  ;;  %v7423_v4 = vld [vmem:[%s14540_s3 + $0xaf8] sm:$0xff]  ;;  %v12152_v25 = vpack.c.bf16 %v7418_v27, %v7416_v1  ;;  %14970 = vst [vmem:[#allocation160_spill] sm:$0xff] %v12172_v40  ;;  %v7424_v1 = vld [vmem:[%s14540_s3 + $0xb00] sm:$0xff] }
 0x346   :  { %8348 = vmatprep.subr.bf16.mxu1 %v12114_v17  ;;  %v12157_v23 = vpack.c.bf16 %v7423_v4, %v7421_v55  ;;  %v7426_v27 = vld [vmem:[%s14540_s3 + $0xb10] sm:$0xff]  ;;  %v7429_v55 = vld [vmem:[%s14540_s3 + $0xb28] sm:$0xff]  ;;  %v7431_v4 = vld [vmem:[%s14540_s3 + $0xb38] sm:$0xff] }
 0x347   :  { %14968 = vst [vmem:[#allocation158_spill] sm:$0xff] %v12152_v25  ;;  %v12190_v12 = vpack.c.bf16 %v7426_v27, %v7424_v1  ;;  %v12193_v2 = vpack.c.bf16 %v7431_v4, %v7429_v55  ;;  %v7435_v1 = vld [vmem:[%s14540_s3 + $0xb58] sm:$0xff]  ;;  %v7432_v4 = vld [vmem:[%s14540_s3 + $0xb40] sm:$0xff] }
 0x348   :  { %2381 = vmatmul.mubr.f32.gmra.mrb[10].mxu1 %v11616_v34  ;;  %14969 = vst [vmem:[#allocation159_spill] sm:$0xff] %v12157_v23  ;;  %v7425_v34 = vld [vmem:[%s14540_s3 + $0xb08] sm:$0xff] }
 0x349   :  { %8350 = vmatpush1.bf16.msra.mxu1 %v12131_v42  ;;  %7450 = vmatprep.mubr.msk.f32.mxu1 %vm928_vm5, %v11641_v13  ;;  %v7427_v13 = vld [vmem:[%s14540_s3 + $0xb18] sm:$0xff]  ;;  %14972 = vst [vmem:[#allocation162_spill] sm:$0xff] %v12190_v12  ;;  %14973 = vst [vmem:[#allocation163_spill] sm:$0xff] %v12193_v2 }
 0x34a   :  { %8352 = vmatprep.subr.bf16.mxu1 %v12136_v43  ;;  %v12175_v20 = vpack.c.bf16 %v7427_v13, %v7425_v34  ;;  %v7428_v34 = vld [vmem:[%s14540_s3 + $0xb20] sm:$0xff]  ;;  %v7430_v13 = vld [vmem:[%s14540_s3 + $0xb30] sm:$0xff] }
 0x34b   :  { %v12208_v27 = vpack.c.bf16 %v7430_v13, %v7428_v34  ;;  %v7439_v34 = vld [vmem:[%s14540_s3 + $0xb78] sm:$0xff]  ;;  %v7464_v43 = vld [vmem:[%s14540_s3 + $0xc00] sm:$0xff] }
 0x34c   :  { %14971 = vst [vmem:[#allocation161_spill] sm:$0xff] %v12175_v20 }
 0x34d   :  { %8354 = vmatpush1.bf16.msra.mxu1 %v12152_v25  ;;  %14974 = vst [vmem:[#allocation164_spill] sm:$0xff] %v12208_v27 }
 0x34e   :  { %8356 = vmatprep.subr.bf16.mxu1 %v12157_v23  ;;  %v7433_v23 = vld [vmem:[%s14540_s3 + $0xb48] sm:$0xff] }
 0x34f   :  { %v12211_v55 = vpack.c.bf16 %v7435_v1, %v7433_v23  ;;  %v7436_v1 = vld [vmem:[%s14540_s3 + $0xb60] sm:$0xff] }
 0x351   :  { %8358 = vmatpush1.bf16.msra.mxu1 %v12172_v40  ;;  %14975 = vst [vmem:[#allocation165_spill] sm:$0xff] %v12211_v55  ;;  %v7437_v40 = vld [vmem:[%s14540_s3 + $0xb68] sm:$0xff] }
 0x352   :  { %8360 = vmatprep.subr.bf16.mxu1 %v12175_v20  ;;  %v7434_v20 = vld [vmem:[%s14540_s3 + $0xb50] sm:$0xff]  ;;  %v12229_v13 = vpack.c.bf16 %v7439_v34, %v7437_v40  ;;  %v7440_v34 = vld [vmem:[%s14540_s3 + $0xb80] sm:$0xff] }
 0x353   :  { %v12226_v23 = vpack.c.bf16 %v7434_v20, %v7432_v4  ;;  %v7443_v20 = vld [vmem:[%s14540_s3 + $0xb98] sm:$0xff] }
 0x354   :  { %14977 = vst [vmem:[#allocation167_spill] sm:$0xff] %v12229_v13 }
 0x355   :  { %8362 = vmatpush1.bf16.msra.mxu1 %v12190_v12  ;;  %14976 = vst [vmem:[#allocation166_spill] sm:$0xff] %v12226_v23  ;;  %v7441_v12 = vld [vmem:[%s14540_s3 + $0xb88] sm:$0xff] }
 0x356   :  { %8364 = vmatprep.subr.bf16.mxu1 %v12193_v2  ;;  %v7438_v2 = vld [vmem:[%s14540_s3 + $0xb70] sm:$0xff]  ;;  %v12247_v4 = vpack.c.bf16 %v7443_v20, %v7441_v12  ;;  %v7444_v20 = vld [vmem:[%s14540_s3 + $0xba0] sm:$0xff] }
 0x357   :  { %v12244_v40 = vpack.c.bf16 %v7438_v2, %v7436_v1  ;;  %v7447_v2 = vld [vmem:[%s14540_s3 + $0xbb8] sm:$0xff] }
 0x358   :  { %14979 = vst [vmem:[#allocation169_spill] sm:$0xff] %v12247_v4 }
 0x359   :  { %8366 = vmatpush1.bf16.msra.mxu1 %v12208_v27  ;;  %14978 = vst [vmem:[#allocation168_spill] sm:$0xff] %v12244_v40  ;;  %v7445_v27 = vld [vmem:[%s14540_s3 + $0xba8] sm:$0xff] }
 0x35a   :  { %8368 = vmatprep.subr.bf16.mxu1 %v12211_v55  ;;  %v7442_v55 = vld [vmem:[%s14540_s3 + $0xb90] sm:$0xff]  ;;  %v12265_v1 = vpack.c.bf16 %v7447_v2, %v7445_v27  ;;  %v7459_v27 = vld [vmem:[%s14540_s3 + $0xbd8] sm:$0xff] }
 0x35b   :  { %v12262_v12 = vpack.c.bf16 %v7442_v55, %v7440_v34  ;;  %v7449_v55 = vld [vmem:[%s14540_s3 + $0xbc8] sm:$0xff]  ;;  %v7458_v2 = vld [vmem:[%s14540_s3 + $0xbd0] sm:$0xff] }
 0x35c   :  { %14981 = vst [vmem:[#allocation171_spill] sm:$0xff] %v12265_v1  ;;  %v7461_v34 = vld [vmem:[%s14540_s3 + $0xbe8] sm:$0xff] }
 0x35d   :  { %8370 = vmatpush1.bf16.msra.mxu1 %v12226_v23  ;;  %14980 = vst [vmem:[#allocation170_spill] sm:$0xff] %v12262_v12 }
 0x35e   :  { %8372 = vmatprep.subr.bf16.mxu1 %v12229_v13  ;;  %v7446_v13 = vld [vmem:[%s14540_s3 + $0xbb0] sm:$0xff] }
 0x35f   :  { %v12274_v23 = vpack.c.bf16 %v7446_v13, %v7444_v20  ;;  %v7460_v13 = vld [vmem:[%s14540_s3 + $0xbe0] sm:$0xff]  ;;  %v7463_v20 = vld [vmem:[%s14540_s3 + $0xbf8] sm:$0xff] }
 0x361   :  { %8374 = vmatpush1.bf16.msra.mxu1 %v12244_v40  ;;  %14982 = vst [vmem:[#allocation172_spill] sm:$0xff] %v12274_v23  ;;  %v12304_v40 = vpack.c.bf16 %v7460_v13, %v7458_v2  ;;  %v7470_v13 = vld [vmem:[%s14540_s3 + $0xc30] sm:$0xff] }
 0x362   :  { %8376 = vmatprep.subr.bf16.mxu1 %v12247_v4  ;;  %v12302_v4 = vpack.c.bf16 %v7461_v34, %v7459_v27  ;;  %v7469_v27 = vld [vmem:[%s14540_s3 + $0xc28] sm:$0xff]  ;;  %v7466_v34 = vld [vmem:[%s14540_s3 + $0xc10] sm:$0xff] }
 0x365   :  { %8378 = vmatpush1.bf16.msra.mxu1 %v12262_v12  ;;  %v7448_v12 = vld [vmem:[%s14540_s3 + $0xbc0] sm:$0xff] }
 0x366   :  { %8380 = vmatprep.subr.bf16.mxu1 %v12265_v1  ;;  %v7465_v1 = vld [vmem:[%s14540_s3 + $0xc08] sm:$0xff] }
 0x367   :  { %v12306_v25 = vpack.c.bf16 %v7465_v1, %v7463_v20  ;;  %v7472_v20 = vld [vmem:[%s14540_s3 + $0xc40] sm:$0xff] }
 0x369   :  { %8382 = vmatpush1.bf16.msra.mxu1 %v12274_v23  ;;  %v7462_v23 = vld [vmem:[%s14540_s3 + $0xbf0] sm:$0xff] }
 0x36a   :  { %2566 = vmatprep.subr.mxu1 %v7449_v55  ;;  %v7467_v55 = vld [vmem:[%s14540_s3 + $0xc18] sm:$0xff]  ;;  %v12323_v1 = vpack.c.bf16 %v7464_v43, %v7462_v23 }
 0x36b   :  { %v7471_v43 = vld [vmem:[%s14540_s3 + $0xc38] sm:$0xff] }
 0x36d   :  { %2567 = vmatpush1.msra.mxu1 %v7448_v12  ;;  %v12328_v12 = vpack.c.bf16 %v7469_v27, %v7467_v55  ;;  %v12364_v55 = vpack.c.bf16 %v7472_v20, %v7470_v13 }
 0x36e   :  { %2591 = vmatmul.mubr.f32.vlgmr.msra.gmra.mrb[8].mxu1 %v11633_v5  ;;  %8394 = vmatprep.subr.bf16.mxu1 %v12302_v4  ;;  %v7468_v5 = vld [vmem:[%s14540_s3 + $0xc20] sm:$0xff] }
 0x36f   :  { %8396 = vmatpush1.bf16.msra.mxu1 %v12304_v40  ;;  %7451 = vmatprep.mubr.msk.f32.mxu1 %vm928_vm5, %v11818_v7  ;;  %14983 = vst [vmem:[#allocation173_spill] sm:$0xff] %v12328_v12  ;;  %v7473_v7 = vld [vmem:[%s14540_s3 + $0xc48] sm:$0xff]  ;;  %v12344_v23 = vpack.c.bf16 %v7468_v5, %v7466_v34  ;;  %14986 = vst [vmem:[#allocation176_spill] sm:$0xff] %v12364_v55  ;;  %v7474_v34 = vld [vmem:[%s14540_s3 + $0xc50] sm:$0xff] }
 0x370   :  { %8398 = vmatprep.subr.bf16.mxu1 %v12306_v25  ;;  %v12349_v2 = vpack.c.bf16 %v7473_v7, %v7471_v43  ;;  %v7476_v5 = vld [vmem:[%s14540_s3 + $0xc60] sm:$0xff]  ;;  %v7479_v43 = vld [vmem:[%s14540_s3 + $0xc78] sm:$0xff]  ;;  %v7481_v7 = vld [vmem:[%s14540_s3 + $0xc88] sm:$0xff] }
 0x371   :  { %14984 = vst [vmem:[#allocation174_spill] sm:$0xff] %v12344_v23  ;;  %v12382_v13 = vpack.c.bf16 %v7476_v5, %v7474_v34  ;;  %v12385_v20 = vpack.c.bf16 %v7481_v7, %v7479_v43  ;;  %v7485_v34 = vld [vmem:[%s14540_s3 + $0xca8] sm:$0xff]  ;;  %v7482_v7 = vld [vmem:[%s14540_s3 + $0xc90] sm:$0xff] }
 0x372   :  { %2597 = vmatmul.mubr.f32.gmra.mrb[10].mxu1 %v11816_v63  ;;  %14985 = vst [vmem:[#allocation175_spill] sm:$0xff] %v12349_v2  ;;  %v7475_v63 = vld [vmem:[%s14540_s3 + $0xc58] sm:$0xff] }
 0x373   :  { %8400 = vmatpush1.bf16.msra.mxu1 %v12323_v1  ;;  %7500 = vmatprep.mubr.msk.f32.mxu1 %vm928_vm5, %v11848_v56  ;;  %v7477_v56 = vld [vmem:[%s14540_s3 + $0xc68] sm:$0xff]  ;;  %14988 = vst [vmem:[#allocation178_spill] sm:$0xff] %v12382_v13  ;;  %14989 = vst [vmem:[#allocation179_spill] sm:$0xff] %v12385_v20 }
 0x374   :  { %8402 = vmatprep.subr.bf16.mxu1 %v12328_v12  ;;  %v12367_v27 = vpack.c.bf16 %v7477_v56, %v7475_v63  ;;  %v7478_v63 = vld [vmem:[%s14540_s3 + $0xc70] sm:$0xff]  ;;  %v7480_v56 = vld [vmem:[%s14540_s3 + $0xc80] sm:$0xff] }
 0x375   :  { %v12400_v5 = vpack.c.bf16 %v7480_v56, %v7478_v63  ;;  %v7489_v63 = vld [vmem:[%s14540_s3 + $0xcc8] sm:$0xff] }
 0x376   :  { %14987 = vst [vmem:[#allocation177_spill] sm:$0xff] %v12367_v27 }
 0x377   :  { %8404 = vmatpush1.bf16.msra.mxu1 %v12344_v23  ;;  %14990 = vst [vmem:[#allocation180_spill] sm:$0xff] %v12400_v5 }
 0x378   :  { %8406 = vmatprep.subr.bf16.mxu1 %v12349_v2  ;;  %v7483_v2 = vld [vmem:[%s14540_s3 + $0xc98] sm:$0xff] }
 0x379   :  { %v12403_v43 = vpack.c.bf16 %v7485_v34, %v7483_v2  ;;  %v7486_v34 = vld [vmem:[%s14540_s3 + $0xcb0] sm:$0xff] }
 0x37b   :  { %8408 = vmatpush1.bf16.msra.mxu1 %v12364_v55  ;;  %14991 = vst [vmem:[#allocation181_spill] sm:$0xff] %v12403_v43  ;;  %v7487_v55 = vld [vmem:[%s14540_s3 + $0xcb8] sm:$0xff] }
 0x37c   :  { %8410 = vmatprep.subr.bf16.mxu1 %v12367_v27  ;;  %v7484_v27 = vld [vmem:[%s14540_s3 + $0xca0] sm:$0xff]  ;;  %v12421_v56 = vpack.c.bf16 %v7489_v63, %v7487_v55  ;;  %v7490_v63 = vld [vmem:[%s14540_s3 + $0xcd0] sm:$0xff] }
 0x37d   :  { %v12418_v2 = vpack.c.bf16 %v7484_v27, %v7482_v7  ;;  %v7493_v27 = vld [vmem:[%s14540_s3 + $0xce8] sm:$0xff] }
 0x37e   :  { %14993 = vst [vmem:[#allocation183_spill] sm:$0xff] %v12421_v56 }
 0x37f   :  { %8412 = vmatpush1.bf16.msra.mxu1 %v12382_v13  ;;  %14992 = vst [vmem:[#allocation182_spill] sm:$0xff] %v12418_v2  ;;  %v7491_v13 = vld [vmem:[%s14540_s3 + $0xcd8] sm:$0xff] }
 0x380   :  { %8414 = vmatprep.subr.bf16.mxu1 %v12385_v20  ;;  %v7488_v20 = vld [vmem:[%s14540_s3 + $0xcc0] sm:$0xff]  ;;  %v12439_v7 = vpack.c.bf16 %v7493_v27, %v7491_v13  ;;  %v7494_v27 = vld [vmem:[%s14540_s3 + $0xcf0] sm:$0xff] }
 0x381   :  { %v12436_v55 = vpack.c.bf16 %v7488_v20, %v7486_v34  ;;  %v7497_v20 = vld [vmem:[%s14540_s3 + $0xd08] sm:$0xff] }
 0x382   :  { %14995 = vst [vmem:[#allocation185_spill] sm:$0xff] %v12439_v7 }
 0x383   :  { %8416 = vmatpush1.bf16.msra.mxu1 %v12400_v5  ;;  %14994 = vst [vmem:[#allocation184_spill] sm:$0xff] %v12436_v55  ;;  %v7495_v5 = vld [vmem:[%s14540_s3 + $0xcf8] sm:$0xff] }
 0x384   :  { %8418 = vmatprep.subr.bf16.mxu1 %v12403_v43  ;;  %v7492_v43 = vld [vmem:[%s14540_s3 + $0xce0] sm:$0xff]  ;;  %v12457_v34 = vpack.c.bf16 %v7497_v20, %v7495_v5 }
 0x385   :  { %v12454_v13 = vpack.c.bf16 %v7492_v43, %v7490_v63  ;;  %v7499_v43 = vld [vmem:[%s14540_s3 + $0xd18] sm:$0xff]  ;;  %v7650_v5 = vld [vmem:[%s14541_s4 + $0x500] sm:$0xff]  ;;  %v7651_v63 = vld [vmem:[%s14541_s4 + $0x508] sm:$0xff] }
 0x386   :  { %14997 = vst [vmem:[#allocation187_spill] sm:$0xff] %v12457_v34  ;;  %v12482_v20 = vpack.c.bf16 %v7651_v63, %v7650_v5  ;;  %v7654_v5 = vld [vmem:[%s14541_s4 + $0x520] sm:$0xff]  ;;  %v7655_v63 = vld [vmem:[%s14541_s4 + $0x528] sm:$0xff] }
 0x387   :  { %8420 = vmatpush1.bf16.msra.mxu1 %v12418_v2  ;;  %14996 = vst [vmem:[#allocation186_spill] sm:$0xff] %v12454_v13 }
 0x388   :  { %8422 = vmatprep.subr.bf16.mxu1 %v12421_v56  ;;  %v7496_v56 = vld [vmem:[%s14540_s3 + $0xd00] sm:$0xff]  ;;  %14999 = vst [vmem:[#allocation189_spill] sm:$0xff] %v12482_v20 }
 0x389   :  { %v12466_v2 = vpack.c.bf16 %v7496_v56, %v7494_v27  ;;  %v7498_v56 = vld [vmem:[%s14540_s3 + $0xd10] sm:$0xff] }
 0x38a   :  { %v7652_v27 = vld [vmem:[%s14541_s4 + $0x510] sm:$0xff] }
 0x38b   :  { %8424 = vmatpush1.bf16.msra.mxu1 %v12436_v55  ;;  %14998 = vst [vmem:[#allocation188_spill] sm:$0xff] %v12466_v2 }
 0x38c   :  { %8426 = vmatprep.subr.bf16.mxu1 %v12439_v7 }
 0x38f   :  { %8428 = vmatpush1.bf16.msra.mxu1 %v12454_v13 }
 0x390   :  { %8430 = vmatprep.subr.bf16.mxu1 %v12457_v34  ;;  %v7653_v34 = vld [vmem:[%s14541_s4 + $0x518] sm:$0xff] }
 0x393   :  { %8432 = vmatpush1.bf16.msra.mxu1 %v12466_v2 }
 0x394   :  { %2782 = vmatprep.subr.mxu1 %v7499_v43  ;;  %v12495_v43 = vpack.c.bf16 %v7653_v34, %v7652_v27  ;;  %v7657_v34 = vld [vmem:[%s14541_s4 + $0x538] sm:$0xff]  ;;  %v7659_v27 = vld [vmem:[%s14541_s4 + $0x548] sm:$0xff] }
 0x396   :  { %15000 = vst [vmem:[#allocation190_spill] sm:$0xff] %v12495_v43 }
 0x397   :  { %2783 = vmatpush1.msra.mxu1 %v7498_v56 }
 0x398   :  { %2807 = vmatmul.mubr.f32.vlgmr.msra.gmra.mrb[8].mxu1 %v11839_v41  ;;  %8673 = vmatprep.subr.bf16.mxu1 %v14950_v31  ;;  %v12506_v41 = vpack.c.bf16 %v7655_v63, %v7654_v5  ;;  %v7660_v63 = vld [vmem:[%s14541_s4 + $0x550] sm:$0xff] }
 0x399   :  { %7501 = vmatprep.mubr.msk.f32.mxu1 %vm928_vm5, %v11875_v62  ;;  %8675 = vmatpush1.bf16.msra.mxu1 %v12482_v20  ;;  %v7656_v62 = vld [vmem:[%s14541_s4 + $0x530] sm:$0xff] }
 0x39a   :  { %8676 = vmatprep.subr.bf16.mxu1 %v14950_v31  ;;  %15001 = vst [vmem:[#allocation191_spill] sm:$0xff] %v12506_v41  ;;  %v12516_v56 = vpack.c.bf16 %v7657_v34, %v7656_v62  ;;  %v7661_v62 = vld [vmem:[%s14541_s4 + $0x558] sm:$0xff] }
 0x39b   :  { %v12537_v34 = vpack.c.bf16 %v7661_v62, %v7660_v63  ;;  %v7663_v63 = vld [vmem:[%s14541_s4 + $0x568] sm:$0xff] }
 0x39c   :  { %2813 = vmatmul.mubr.f32.gmra.mrb[10].mxu1 %v11871_v46  ;;  %15002 = vst [vmem:[#allocation192_spill] sm:$0xff] %v12516_v56  ;;  %v7658_v46 = vld [vmem:[%s14541_s4 + $0x540] sm:$0xff] }
 0x39d   :  { %8678 = vmatpush1.bf16.msra.mxu1 %v12495_v43  ;;  %v12526_v5 = vpack.c.bf16 %v7659_v27, %v7658_v46  ;;  %15004 = vst [vmem:[#allocation194_spill] sm:$0xff] %v12537_v34  ;;  %v7514_v46 = vld [vmem:[%s14541_s4 + $0x100] sm:$0xff]  ;;  %v7515_v27 = vld [vmem:[%s14541_s4 + $0x108] sm:$0xff] }
 0x39e   :  { %8679 = vmatprep.subr.bf16.mxu1 %v14950_v31  ;;  %v7666_v43 = vld [vmem:[%s14541_s4 + $0x580] sm:$0xff] }
 0x39f   :  { %15003 = vst [vmem:[#allocation193_spill] sm:$0xff] %v12526_v5 }
 0x3a1   :  { %8681 = vmatpush1.bf16.msra.mxu1 %v12506_v41 }
 0x3a2   :  { %8682 = vmatprep.subr.bf16.mxu1 %v14950_v31 }
 0x3a5   :  { %8684 = vmatpush1.bf16.msra.mxu1 %v12516_v56  ;;  %v7662_v56 = vld [vmem:[%s14541_s4 + $0x560] sm:$0xff] }
 0x3a6   :  { %8685 = vmatprep.subr.bf16.mxu1 %v14950_v31  ;;  %v12556_v62 = vpack.c.bf16 %v7663_v63, %v7662_v56  ;;  %v7664_v56 = vld [vmem:[%s14541_s4 + $0x570] sm:$0xff]  ;;  %v7665_v63 = vld [vmem:[%s14541_s4 + $0x578] sm:$0xff] }
 0x3a7   :  { %v12576_v41 = vpack.c.bf16 %v7665_v63, %v7664_v56  ;;  %v7667_v56 = vld [vmem:[%s14541_s4 + $0x588] sm:$0xff]  ;;  %v7520_v63 = vld [vmem:[%s14541_s4 + $0x130] sm:$0xff] }
 0x3a8   :  { %15005 = vst [vmem:[#allocation195_spill] sm:$0xff] %v12556_v62  ;;  %v12598_v20 = vpack.c.bf16 %v7667_v56, %v7666_v43  ;;  %v2823_v56 = vld [vmem:[%s14545_s8] sm:$0x3] }
 0x3a9   :  { %8687 = vmatpush1.bf16.msra.mxu1 %v12526_v5  ;;  %v12546_v5 = vpack.c.bf16 %v7515_v27, %v7514_v46  ;;  %v7516_v46 = vld [vmem:[%s14541_s4 + $0x110] sm:$0xff]  ;;  %v7517_v27 = vld [vmem:[%s14541_s4 + $0x118] sm:$0xff]  ;;  %15006 = vst [vmem:[#allocation196_spill] sm:$0xff] %v12576_v41 }
 0x3aa   :  { %8688 = vmatprep.subr.bf16.mxu1 %v14950_v31  ;;  %15007 = vst [vmem:[#allocation197_spill] sm:$0xff] %v12598_v20 }
 0x3ab   :  { %8453 = vmatpush1.bf16.msra.mxu0 %v12546_v5 }
 0x3ac   :  { %8454 = vmatprep.subr.bf16.mxu0 %v14950_v31 }
 0x3ad   :  { %8690 = vmatpush1.bf16.msra.mxu1 %v12537_v34  ;;  %v12566_v34 = vpack.c.bf16 %v7517_v27, %v7516_v46  ;;  %v7518_v46 = vld [vmem:[%s14541_s4 + $0x120] sm:$0xff]  ;;  %v7519_v27 = vld [vmem:[%s14541_s4 + $0x128] sm:$0xff] }
 0x3ae   :  { %8691 = vmatprep.subr.bf16.mxu1 %v14950_v31 }
 0x3af   :  { %8456 = vmatpush1.bf16.msra.mxu0 %v12566_v34 }
 0x3b0   :  { %8457 = vmatprep.subr.bf16.mxu0 %v14950_v31 }
 0x3b1   :  { %8693 = vmatpush1.bf16.msra.mxu1 %v12556_v62  ;;  %v12586_v62 = vpack.c.bf16 %v7519_v27, %v7518_v46  ;;  %v7521_v46 = vld [vmem:[%s14541_s4 + $0x138] sm:$0xff]  ;;  %v7668_v27 = vld [vmem:[%s14541_s4 + $0x590] sm:$0xff] }
 0x3b2   :  { %8694 = vmatprep.subr.bf16.mxu1 %v14950_v31  ;;  %v12610_v2 = vpack.c.bf16 %v7521_v46, %v7520_v63  ;;  %v15009_v63 = vsub.s32 0, %v10220_v26 }
 0x3b3   :  { %8459 = vmatpush1.bf16.msra.mxu0 %v12586_v62 }
 0x3b4   :  { %8460 = vmatprep.subr.bf16.mxu0 %v14950_v31  ;;  %v12626_v46 = vrot.slane %v2823_v56, %v15009_v63 }
 0x3b5   :  { %8696 = vmatpush1.bf16.msra.mxu1 %v12576_v41  ;;  %v7669_v41 = vld [vmem:[%s14541_s4 + $0x598] sm:$0xff] }
 0x3b6   :  { %8697 = vmatprep.subr.bf16.mxu1 %v14950_v31  ;;  %v12614_v43 = vpack.c.bf16 %v7669_v41, %v7668_v27  ;;  %v15010_v41 = vsub.s32 1, %v10220_v26  ;;  %v2843_v26 = vld [vmem:[%s14541_s4] sm:$0xff] }
 0x3b7   :  { %8462 = vmatpush1.bf16.msra.mxu0 %v12610_v2 }
 0x3b8   :  { %15008 = vst [vmem:[#allocation198_spill] sm:$0xff] %v12614_v43  ;;  %8463 = vmatprep.subr.bf16.mxu0 %v14950_v31  ;;  %v12630_v27 = vrot.slane %v2823_v56, %v15010_v41 }
 0x3b9   :  { %8699 = vmatpush1.bf16.msra.mxu1 %v12598_v20 }
 0x3ba   :  { %8700 = vmatprep.subr.bf16.mxu1 %v14950_v31 }
 0x3bd   :  { %8702 = vmatpush1.bf16.msra.mxu1 %v12614_v43 }
 0x3be   :  { %8734 = vmatprep.subr.bf16.mxu1 %v9947_v3 }
 0x46b   :  { %v2808_v20 = vpop.f32.mrb[8].mxu1 }
 0x46c   :  { %v2835_v13 = vadd.f32 %v12626_v46, %v2808_v20  ;;  %v2810_v7 = vpop.f32.mrb[9].mxu1  ;;  %v2844_v20 = vld [vmem:[%s14541_s4 + $0x8] sm:$0xff] }
 0x46d   :  { %v2836_v43 = vadd.f32 %v12630_v27, %v2810_v7 }
 0x46e   :  { %9766 = vtanh.f32 %v2835_v13 }
 0x46f   :  { %9768 = vtanh.f32 %v2836_v43  ;;  %v2814_v3 = vpop.f32.mrb[10].mxu1  ;;  %v12647_v43 = vpack.c.bf16 %v2844_v20, %v2843_v26  ;;  %v2847_v26 = vld [vmem:[%s14541_s4 + $0x20] sm:$0xff]  ;;  %v2848_v20 = vld [vmem:[%s14541_s4 + $0x28] sm:$0xff] }
 0x470   :  { %v2816_v55 = vpop.f32.mrb[11].mxu1  ;;  %v2837_v23 = vadd.f32 %v12626_v46, %v2814_v3 }
 0x471   :  { %v2838_v12 = vadd.f32 %v12630_v27, %v2816_v55 }
 0x473   :  { %9770 = vtanh.f32 %v2838_v12  ;;  %v2845_v12 = vld [vmem:[%s14541_s4 + $0x10] sm:$0xff] }
 0x474   :  { %9772 = vtanh.f32 %v2837_v23  ;;  %v2846_v23 = vld [vmem:[%s14541_s4 + $0x18] sm:$0xff] }
 0x475   :  { %v12662_v41 = vpack.c.bf16 %v2846_v23, %v2845_v12  ;;  %v2850_v12 = vld [vmem:[%s14541_s4 + $0x38] sm:$0xff]  ;;  %v2851_v23 = vld [vmem:[%s14541_s4 + $0x40] sm:$0xff] }
 0x478   :  { %v12642_v56 = vpop.eup %9766 }
 0x479   :  { %v12644_v7 = vpop.eup %9768  ;;  %v2886_v55 = vrot.slane %v12642_v56, 1 }
 0x47a   :  { %v2887_v13 = vrot.slane %v12644_v7, 1 }
 0x47c   :  { %7522 = vmatprep.mubr.msk.f32.mxu0 %vm67_vm0, %v2887_v13  ;;  %v12680_v13 = vpack.c.bf16 %v2848_v20, %v2847_v26  ;;  %v7697_v26 = vld [vmem:[%s14537_s0 + $0x29] sm:$0xff] }
 0x47d   :  { %v12657_v63 = vpop.eup %9770  ;;  %2956 = vmatmul.mubr.f32.vlgmr.msra.gmra.mrb[40].mxu0 %v2886_v55  ;;  %v2849_v55 = vld [vmem:[%s14541_s4 + $0x30] sm:$0xff] }
 0x47e   :  { %8465 = vmatpush1.bf16.msra.mxu0 %v12647_v43  ;;  %7523 = vmatprep.mubr.msk.f32.mxu0 %vm67_vm0, %v12644_v7  ;;  %v12664_v3 = vpop.eup %9772  ;;  %v2853_v20 = vld [vmem:[%s14541_s4 + $0x50] sm:$0xff] }
 0x47f   :  { %7670 = vmatprep.mubr.msk.f32.mxu1 %vm67_vm0, %v12657_v63  ;;  %8466 = vmatprep.subr.bf16.mxu0 %v14950_v31 }
 0x480   :  { %3704 = vmatmul.mubr.f32.vlgmr.msra.gmra.mrb[12].mxu1 %v12664_v3 }
 0x481   :  { %8736 = vmatpush1.bf16.msra.mxu1 %v9960_v8  ;;  %3896 = vmatprep.mubr.f32.mxu1 %v14839_v52  ;;  %v7696_v8 = vld [vmem:[%s14537_s0 + $0x21] sm:$0xff] }
 0x482   :  { %8468 = vmatpush1.bf16.msra.mxu0 %v12662_v41  ;;  %8738 = vmatprep.subr.bf16.mxu1 %v9962_v9  ;;  %v12694_v9 = vpack.c.bf16 %v2850_v12, %v2849_v55  ;;  %v2854_v55 = vld [vmem:[%s14541_s4 + $0x58] sm:$0xff]  ;;  %v2855_v12 = vld [vmem:[%s14541_s4 + $0x60] sm:$0xff] }
 0x483   :  { %8469 = vmatprep.subr.bf16.mxu0 %v14950_v31 }
 0x485   :  { %8740 = vmatpush1.bf16.msra.mxu1 %v9978_v14  ;;  %v2852_v14 = vld [vmem:[%s14541_s4 + $0x48] sm:$0xff] }
 0x486   :  { %8471 = vmatpush1.bf16.msra.mxu0 %v12680_v13  ;;  %8742 = vmatprep.subr.bf16.mxu1 %v9981_v15  ;;  %v12711_v15 = vpack.c.bf16 %v2852_v14, %v2851_v23  ;;  %v2857_v23 = vld [vmem:[%s14541_s4 + $0x70] sm:$0xff]  ;;  %v2858_v14 = vld [vmem:[%s14541_s4 + $0x78] sm:$0xff] }
 0x487   :  { %8472 = vmatprep.subr.bf16.mxu0 %v14950_v31 }
 0x488   :  { %7700 = vmatmul.mubr.msk.f32.vlgmr.msra.gmra.mrb[14].mxu1 %vm67_vm0, %v7696_v8  ;;  %v2856_v8 = vld [vmem:[%s14541_s4 + $0x68] sm:$0xff] }
 0x489   :  { %3902 = vmatprep.mubr.f32.mxu1 %v14839_v52  ;;  %8744 = vmatpush1.bf16.msra.mxu1 %v9999_v21  ;;  %v7698_v21 = vld [vmem:[%s14537_s0 + $0x31] sm:$0xff] }
 0x48a   :  { %8474 = vmatpush1.bf16.msra.mxu0 %v12694_v9  ;;  %8746 = vmatprep.subr.bf16.mxu1 %v10002_v22  ;;  %v12728_v22 = vpack.c.bf16 %v2854_v55, %v2853_v20  ;;  %v12759_v20 = vpack.c.bf16 %v2858_v14, %v2857_v23  ;;  %v2859_v55 = vld [vmem:[%s14541_s4 + $0x80] sm:$0xff]  ;;  %v2862_v23 = vld [vmem:[%s14541_s4 + $0x98] sm:$0xff] }
 0x48b   :  { %8475 = vmatprep.subr.bf16.mxu0 %v14950_v31  ;;  %v7524_v14 = vld [vmem:[%s14541_s4 + $0x140] sm:$0xff] }
 0x48c   :  { %7701 = vmatmul.mubr.msk.f32.gmra.mrb[16].mxu1 %vm67_vm0, %v7697_v26  ;;  %v7692_v26 = vld [vmem:[%s14537_s0 + $0x20] sm:$0xff] }
 0x48d   :  { %3908 = vmatprep.mubr.f32.mxu1 %v14839_v52  ;;  %8748 = vmatpush1.bf16.msra.mxu1 %v10022_v28  ;;  %v7699_v28 = vld [vmem:[%s14537_s0 + $0x39] sm:$0xf] }
 0x48e   :  { %8477 = vmatpush1.bf16.msra.mxu0 %v12711_v15  ;;  %8750 = vmatprep.subr.bf16.mxu1 %v10025_v29  ;;  %v12744_v29 = vpack.c.bf16 %v2856_v8, %v2855_v12  ;;  %v7693_v12 = vld [vmem:[%s14537_s0 + $0x28] sm:$0xff] }
 0x48f   :  { %8478 = vmatprep.subr.bf16.mxu0 %v14950_v31 }
 0x490   :  { %7702 = vmatmul.mubr.msk.f32.gmra.mrb[18].mxu1 %vm67_vm0, %v7698_v21  ;;  %v2860_v21 = vld [vmem:[%s14541_s4 + $0x88] sm:$0xff] }
 0x491   :  { %3914 = vmatprep.mubr.f32.mxu1 %v14839_v52  ;;  %v12775_v8 = vpack.c.bf16 %v2860_v21, %v2859_v55  ;;  %v7526_v55 = vld [vmem:[%s14541_s4 + $0x150] sm:$0xff]  ;;  %v7527_v21 = vld [vmem:[%s14541_s4 + $0x158] sm:$0xff] }
 0x492   :  { %8480 = vmatpush1.bf16.msra.mxu0 %v12728_v22 }
 0x493   :  { %8481 = vmatprep.subr.bf16.mxu0 %v14950_v31 }
 0x494   :  { %7703 = vmatmul.mubr.msk.f32.gmra.mrb[20].mxu1 %vm67_vm0, %v7699_v28  ;;  %v2861_v28 = vld [vmem:[%s14541_s4 + $0x90] sm:$0xff] }
 0x495   :  { %3997 = vmatprep.mubr.f32.mxu1 %v14839_v52 }
 0x496   :  { %8483 = vmatpush1.bf16.msra.mxu0 %v12744_v29 }
 0x497   :  { %8484 = vmatprep.subr.bf16.mxu0 %v14950_v31 }
 0x498   :  { %7704 = vmatmul.mubr.msk.f32.vlgmr.msra.gmra.mrb[14].mxu1 %vm67_vm0, %v7692_v26  ;;  %v7525_v26 = vld [vmem:[%s14541_s4 + $0x148] sm:$0xff] }
 0x499   :  { %4003 = vmatprep.mubr.f32.mxu1 %v14839_v52  ;;  %8752 = vmatpush1.bf16.msra.mxu1 %v10056_v37  ;;  %v7694_v37 = vld [vmem:[%s14537_s0 + $0x30] sm:$0xff] }
 0x49a   :  { %8486 = vmatpush1.bf16.msra.mxu0 %v12759_v20  ;;  %8754 = vmatprep.subr.bf16.mxu1 %v10058_v38  ;;  %v12792_v38 = vpack.c.bf16 %v2862_v23, %v2861_v28  ;;  %v7708_v28 = vld [vmem:[%s14537_s0 + $0x22] sm:$0xff]  ;;  %v12826_v23 = vpack.c.bf16 %v7527_v21, %v7526_v55  ;;  %v7530_v55 = vld [vmem:[%s14541_s4 + $0x170] sm:$0xff]  ;;  %v7531_v21 = vld [vmem:[%s14541_s4 + $0x178] sm:$0xff] }
 0x49b   :  { %8487 = vmatprep.subr.bf16.mxu0 %v14950_v31 }
 0x49c   :  { %7705 = vmatmul.mubr.msk.f32.gmra.mrb[16].mxu1 %vm67_vm0, %v7693_v12  ;;  %v3055_v12 = vrot.slane %v12644_v7, 2 }
 0x49d   :  { %4009 = vmatprep.mubr.f32.mxu1 %v14839_v52  ;;  %8756 = vmatpush1.bf16.msra.mxu1 %v10078_v44  ;;  %v7695_v44 = vld [vmem:[%s14537_s0 + $0x38] sm:$0xf] }
 0x49e   :  { %8489 = vmatpush1.bf16.msra.mxu0 %v12775_v8  ;;  %8758 = vmatprep.subr.bf16.mxu1 %v10081_v45  ;;  %v12808_v45 = vpack.c.bf16 %v7525_v26, %v7524_v14  ;;  %v7529_v14 = vld [vmem:[%s14541_s4 + $0x168] sm:$0xff] }
 0x49f   :  { %8490 = vmatprep.subr.bf16.mxu0 %v14950_v31  ;;  %v7709_v26 = vld [vmem:[%s14537_s0 + $0x2a] sm:$0xff] }
 0x4a0   :  { %7706 = vmatmul.mubr.msk.f32.gmra.mrb[18].mxu1 %vm67_vm0, %v7694_v37  ;;  %v7528_v37 = vld [vmem:[%s14541_s4 + $0x160] sm:$0xff] }
 0x4a1   :  { %4015 = vmatprep.mubr.f32.mxu1 %v14839_v52 }
 0x4a2   :  { %8492 = vmatpush1.bf16.msra.mxu0 %v12792_v38 }
 0x4a3   :  { %8493 = vmatprep.subr.bf16.mxu0 %v14950_v31 }
 0x4a4   :  { %7707 = vmatmul.mubr.msk.f32.gmra.mrb[20].mxu1 %vm67_vm0, %v7695_v44  ;;  %v12842_v44 = vpack.c.bf16 %v7529_v14, %v7528_v37  ;;  %v7534_v37 = vld [vmem:[%s14541_s4 + $0x190] sm:$0xff]  ;;  %v7535_v14 = vld [vmem:[%s14541_s4 + $0x198] sm:$0xff] }
 0x4a5   :  { %3028 = vmatmul.mubr.f32.vlgmr.msra.gmra.mrb[42].mxu0 %v12642_v56  ;;  %4102 = vmatprep.mubr.f32.mxu1 %v14839_v52 }
 0x4a6   :  { %8495 = vmatpush1.bf16.msra.mxu0 %v12808_v45  ;;  %7544 = vmatprep.mubr.msk.f32.mxu0 %vm67_vm0, %v3055_v12  ;;  %v7532_v12 = vld [vmem:[%s14541_s4 + $0x180] sm:$0xff] }
 0x4a7   :  { %8496 = vmatprep.subr.bf16.mxu0 %v14950_v31 }
 0x4a8   :  { %7712 = vmatmul.mubr.msk.f32.vlgmr.msra.gmra.mrb[14].mxu1 %vm67_vm0, %v7708_v28  ;;  %v7533_v28 = vld [vmem:[%s14541_s4 + $0x188] sm:$0xff] }
 0x4a9   :  { %4108 = vmatprep.mubr.f32.mxu1 %v14839_v52  ;;  %8760 = vmatpush1.bf16.msra.mxu1 %v10112_v53  ;;  %v7710_v53 = vld [vmem:[%s14537_s0 + $0x32] sm:$0xff] }
 0x4aa   :  { %8498 = vmatpush1.bf16.msra.mxu0 %v12826_v23  ;;  %8762 = vmatprep.subr.bf16.mxu1 %v10114_v54  ;;  %v12859_v54 = vpack.c.bf16 %v7531_v21, %v7530_v55  ;;  %v12890_v55 = vpack.c.bf16 %v7535_v14, %v7534_v37  ;;  %v7536_v21 = vld [vmem:[%s14541_s4 + $0x1a0] sm:$0xff]  ;;  %v7539_v37 = vld [vmem:[%s14541_s4 + $0x1b8] sm:$0xff] }
 0x4ab   :  { %8499 = vmatprep.subr.bf16.mxu0 %v14950_v31  ;;  %v7540_v14 = vld [vmem:[%s14541_s4 + $0x1c0] sm:$0xff] }
 0x4ac   :  { %7713 = vmatmul.mubr.msk.f32.gmra.mrb[16].mxu1 %vm67_vm0, %v7709_v26  ;;  %v7716_v26 = vld [vmem:[%s14537_s0 + $0x23] sm:$0xff]  ;;  %15012 = vst [vmem:[#allocation200_spill] sm:$0xff] %v12890_v55 }
 0x4ad   :  { %4114 = vmatprep.mubr.f32.mxu1 %v14839_v52  ;;  %8764 = vmatpush1.bf16.msra.mxu1 %v10134_v60  ;;  %v7711_v60 = vld [vmem:[%s14537_s0 + $0x3a] sm:$0xf] }
 0x4ae   :  { %8501 = vmatpush1.bf16.msra.mxu0 %v12842_v44  ;;  %8766 = vmatprep.subr.bf16.mxu1 %v10137_v61  ;;  %v12875_v61 = vpack.c.bf16 %v7533_v28, %v7532_v12  ;;  %v7717_v12 = vld [vmem:[%s14537_s0 + $0x2b] sm:$0xff] }
 0x4af   :  { %8502 = vmatprep.subr.bf16.mxu0 %v14950_v31 }
 0x4b0   :  { %7714 = vmatmul.mubr.msk.f32.gmra.mrb[18].mxu1 %vm67_vm0, %v7710_v53  ;;  %15011 = vst [vmem:[#allocation199_spill] sm:$0xff] %v12875_v61  ;;  %v7537_v53 = vld [vmem:[%s14541_s4 + $0x1a8] sm:$0xff] }
 0x4b1   :  { %4120 = vmatprep.mubr.f32.mxu1 %v14839_v52  ;;  %v12906_v28 = vpack.c.bf16 %v7537_v53, %v7536_v21  ;;  %v7542_v53 = vld [vmem:[%s14541_s4 + $0x1d0] sm:$0xff] }
 0x4b2   :  { %8504 = vmatpush1.bf16.msra.mxu0 %v12859_v54 }
 0x4b3   :  { %8505 = vmatprep.subr.bf16.mxu0 %v14950_v31  ;;  %15013 = vst [vmem:[#allocation201_spill] sm:$0xff] %v12906_v28 }
 0x4b4   :  { %7715 = vmatmul.mubr.msk.f32.gmra.mrb[20].mxu1 %vm67_vm0, %v7711_v60  ;;  %v7538_v60 = vld [vmem:[%s14541_s4 + $0x1b0] sm:$0xff] }
 0x4b5   :  { %4215 = vmatprep.mubr.f32.mxu1 %v14839_v52 }
 0x4b6   :  { %8507 = vmatpush1.bf16.msra.mxu0 %v12875_v61 }
 0x4b7   :  { %8508 = vmatprep.subr.bf16.mxu0 %v14950_v31 }
 0x4b8   :  { %7720 = vmatmul.mubr.msk.f32.vlgmr.msra.gmra.mrb[14].mxu1 %vm67_vm0, %v7716_v26  ;;  %v7541_v26 = vld [vmem:[%s14541_s4 + $0x1c8] sm:$0xff] }
 0x4b9   :  { %4221 = vmatprep.mubr.f32.mxu1 %v14839_v52  ;;  %8768 = vmatpush1.bf16.msra.mxu1 %v10168_v6  ;;  %v7718_v6 = vld [vmem:[%s14537_s0 + $0x33] sm:$0xff]  ;;  %v12938_v21 = vpack.c.bf16 %v7541_v26, %v7540_v14  ;;  %v7546_v14 = vld [vmem:[%s14541_s4 + $0x1e8] sm:$0xff] }
 0x4ba   :  { %8510 = vmatpush1.bf16.msra.mxu0 %v12890_v55  ;;  %8770 = vmatprep.subr.bf16.mxu1 %v10170_v10  ;;  %v12923_v10 = vpack.c.bf16 %v7539_v37, %v7538_v60  ;;  %v7724_v60 = vld [vmem:[%s14537_s0 + $0x24] sm:$0xff]  ;;  %v7725_v26 = vld [vmem:[%s14537_s0 + $0x2c] sm:$0xff] }
 0x4bb   :  { %8511 = vmatprep.subr.bf16.mxu0 %v14950_v31  ;;  %15015 = vst [vmem:[#allocation203_spill] sm:$0xff] %v12938_v21 }
 0x4bc   :  { %7721 = vmatmul.mubr.msk.f32.gmra.mrb[16].mxu1 %vm67_vm0, %v7717_v12  ;;  %15014 = vst [vmem:[#allocation202_spill] sm:$0xff] %v12923_v10  ;;  %v7543_v12 = vld [vmem:[%s14541_s4 + $0x1d8] sm:$0xff] }
 0x4bd   :  { %4227 = vmatprep.mubr.f32.mxu1 %v14839_v52  ;;  %8772 = vmatpush1.bf16.msra.mxu1 %v10184_v16  ;;  %v7719_v16 = vld [vmem:[%s14537_s0 + $0x3b] sm:$0xf]  ;;  %v12953_v37 = vpack.c.bf16 %v7543_v12, %v7542_v53  ;;  %v3054_v53 = vrot.slane %v12642_v56, 2  ;;  %v7547_v12 = vld [vmem:[%s14541_s4 + $0x1f0] sm:$0xff] }
 0x4be   :  { %8513 = vmatpush1.bf16.msra.mxu0 %v12906_v28 }
 0x4bf   :  { %8514 = vmatprep.subr.bf16.mxu0 %v14950_v31  ;;  %15016 = vst [vmem:[#allocation204_spill] sm:$0xff] %v12953_v37 }
 0x4c0   :  { %7722 = vmatmul.mubr.msk.f32.gmra.mrb[18].mxu1 %vm67_vm0, %v7718_v6  ;;  %v7545_v6 = vld [vmem:[%s14541_s4 + $0x1e0] sm:$0xff] }
 0x4c1   :  { %4233 = vmatprep.mubr.f32.mxu1 %v14839_v52 }
 0x4c2   :  { %8516 = vmatpush1.bf16.msra.mxu0 %v12923_v10 }
 0x4c3   :  { %8517 = vmatprep.subr.bf16.mxu0 %v14950_v31 }
 0x4c4   :  { %7723 = vmatmul.mubr.msk.f32.gmra.mrb[20].mxu1 %vm67_vm0, %v7719_v16  ;;  %v12968_v16 = vpack.c.bf16 %v7546_v14, %v7545_v6  ;;  %v7726_v6 = vld [vmem:[%s14537_s0 + $0x34] sm:$0xff] }
 0x4c5   :  { %4328 = vmatprep.mubr.f32.mxu1 %v14839_v52 }
 0x4c6   :  { %8519 = vmatpush1.bf16.msra.mxu0 %v12938_v21  ;;  %15017 = vst [vmem:[#allocation205_spill] sm:$0xff] %v12968_v16  ;;  %v3152_v21 = vrot.slane %v12644_v7, 3 }
 0x4c7   :  { %8520 = vmatprep.subr.bf16.mxu0 %v14950_v31 }
 0x4c8   :  { %7728 = vmatmul.mubr.msk.f32.vlgmr.msra.gmra.mrb[14].mxu1 %vm67_vm0, %v7724_v60  ;;  %v7548_v60 = vld [vmem:[%s14541_s4 + $0x1f8] sm:$0xff] }
 0x4c9   :  { %4334 = vmatprep.mubr.f32.mxu1 %v14839_v52  ;;  %v12986_v14 = vpack.c.bf16 %v7548_v60, %v7547_v12  ;;  %v7551_v60 = vld [vmem:[%s14541_s4 + $0x210] sm:$0xff] }
 0x4ca   :  { %8522 = vmatpush1.bf16.msra.mxu0 %v12953_v37 }
 0x4cb   :  { %8523 = vmatprep.subr.bf16.mxu0 %v14950_v31  ;;  %15018 = vst [vmem:[#allocation206_spill] sm:$0xff] %v12986_v14 }
 0x4cc   :  { %7729 = vmatmul.mubr.msk.f32.gmra.mrb[16].mxu1 %vm67_vm0, %v7725_v26  ;;  %v7549_v26 = vld [vmem:[%s14541_s4 + $0x200] sm:$0xff] }
 0x4cd   :  { %3124 = vmatmul.mubr.f32.vlgmr.msra.gmra.mrb[44].mxu0 %v3054_v53  ;;  %4340 = vmatprep.mubr.f32.mxu1 %v14839_v52  ;;  %v7550_v53 = vld [vmem:[%s14541_s4 + $0x208] sm:$0xff] }
 0x4ce   :  { %8525 = vmatpush1.bf16.msra.mxu0 %v12968_v16  ;;  %7565 = vmatprep.mubr.msk.f32.mxu0 %vm67_vm0, %v3152_v21  ;;  %v7727_v21 = vld [vmem:[%s14537_s0 + $0x3c] sm:$0xf]  ;;  %v13001_v12 = vpack.c.bf16 %v7550_v53, %v7549_v26  ;;  %v7553_v26 = vld [vmem:[%s14541_s4 + $0x220] sm:$0xff]  ;;  %v7554_v53 = vld [vmem:[%s14541_s4 + $0x228] sm:$0xff] }
 0x4cf   :  { %8526 = vmatprep.subr.bf16.mxu0 %v14950_v31 }
 0x4d0   :  { %7730 = vmatmul.mubr.msk.f32.gmra.mrb[18].mxu1 %vm67_vm0, %v7726_v6  ;;  %15019 = vst [vmem:[#allocation207_spill] sm:$0xff] %v13001_v12  ;;  %v7552_v6 = vld [vmem:[%s14541_s4 + $0x218] sm:$0xff] }
 0x4d1   :  { %4346 = vmatprep.mubr.f32.mxu1 %v14839_v52  ;;  %v13013_v16 = vpack.c.bf16 %v7552_v6, %v7551_v60  ;;  %v7556_v60 = vld [vmem:[%s14541_s4 + $0x238] sm:$0xff] }
 0x4d2   :  { %8528 = vmatpush1.bf16.msra.mxu0 %v12986_v14  ;;  %v13023_v14 = vpack.c.bf16 %v7554_v53, %v7553_v26  ;;  %v7557_v26 = vld [vmem:[%s14541_s4 + $0x240] sm:$0xff]  ;;  %v7558_v53 = vld [vmem:[%s14541_s4 + $0x248] sm:$0xff] }
 0x4d3   :  { %8529 = vmatprep.subr.bf16.mxu0 %v14950_v31  ;;  %15020 = vst [vmem:[#allocation208_spill] sm:$0xff] %v13013_v16 }
 0x4d4   :  { %7731 = vmatmul.mubr.msk.f32.gmra.mrb[20].mxu1 %vm67_vm0, %v7727_v21  ;;  %15021 = vst [vmem:[#allocation209_spill] sm:$0xff] %v13023_v14  ;;  %v7555_v21 = vld [vmem:[%s14541_s4 + $0x230] sm:$0xff] }
 0x4d5   :  { %4767 = vmatprep.mubr.f32.mxu1 %v14839_v52  ;;  %v13033_v6 = vpack.c.bf16 %v7556_v60, %v7555_v21  ;;  %v7559_v21 = vld [vmem:[%s14541_s4 + $0x250] sm:$0xff]  ;;  %v7560_v60 = vld [vmem:[%s14541_s4 + $0x258] sm:$0xff] }
 0x4d6   :  { %8531 = vmatpush1.bf16.msra.mxu0 %v13001_v12  ;;  %v3151_v12 = vrot.slane %v12642_v56, 3 }
 0x4d7   :  { %8532 = vmatprep.subr.bf16.mxu0 %v14950_v31  ;;  %15022 = vst [vmem:[#allocation210_spill] sm:$0xff] %v13033_v6 }
 0x4da   :  { %8534 = vmatpush1.bf16.msra.mxu0 %v13013_v16  ;;  %v13043_v16 = vpack.c.bf16 %v7558_v53, %v7557_v26  ;;  %v7561_v26 = vld [vmem:[%s14541_s4 + $0x260] sm:$0xff]  ;;  %v7562_v53 = vld [vmem:[%s14541_s4 + $0x268] sm:$0xff] }
 0x4db   :  { %8535 = vmatprep.subr.bf16.mxu0 %v14950_v31 }
 0x4dc   :  { %15023 = vst [vmem:[#allocation211_spill] sm:$0xff] %v13043_v16 }
 0x4de   :  { %8537 = vmatpush1.bf16.msra.mxu0 %v13023_v14  ;;  %v13053_v14 = vpack.c.bf16 %v7560_v60, %v7559_v21  ;;  %v7563_v21 = vld [vmem:[%s14541_s4 + $0x270] sm:$0xff]  ;;  %v7564_v60 = vld [vmem:[%s14541_s4 + $0x278] sm:$0xff] }
 0x4df   :  { %8538 = vmatprep.subr.bf16.mxu0 %v14950_v31 }
 0x4e0   :  { %15024 = vst [vmem:[#allocation212_spill] sm:$0xff] %v13053_v14 }
 0x4e2   :  { %8540 = vmatpush1.bf16.msra.mxu0 %v13033_v6  ;;  %v13063_v6 = vpack.c.bf16 %v7562_v53, %v7561_v26  ;;  %v7566_v26 = vld [vmem:[%s14541_s4 + $0x280] sm:$0xff]  ;;  %v7567_v53 = vld [vmem:[%s14541_s4 + $0x288] sm:$0xff] }
 0x4e3   :  { %8541 = vmatprep.subr.bf16.mxu0 %v14950_v31 }
 0x4e4   :  { %15025 = vst [vmem:[#allocation213_spill] sm:$0xff] %v13063_v6 }
 0x4e6   :  { %8543 = vmatpush1.bf16.msra.mxu0 %v13043_v16  ;;  %v13073_v16 = vpack.c.bf16 %v7564_v60, %v7563_v21  ;;  %v7568_v21 = vld [vmem:[%s14541_s4 + $0x290] sm:$0xff]  ;;  %v7569_v60 = vld [vmem:[%s14541_s4 + $0x298] sm:$0xff] }
 0x4e7   :  { %8544 = vmatprep.subr.bf16.mxu0 %v14950_v31 }
 0x4e8   :  { %15026 = vst [vmem:[#allocation214_spill] sm:$0xff] %v13073_v16 }
 0x4ea   :  { %8546 = vmatpush1.bf16.msra.mxu0 %v13053_v14  ;;  %v13083_v14 = vpack.c.bf16 %v7567_v53, %v7566_v26  ;;  %v13096_v26 = vpack.c.bf16 %v7569_v60, %v7568_v21  ;;  %v7570_v53 = vld [vmem:[%s14541_s4 + $0x2a0] sm:$0xff]  ;;  %v7575_v60 = vld [vmem:[%s14541_s4 + $0x2c8] sm:$0xff] }
 0x4eb   :  { %8547 = vmatprep.subr.bf16.mxu0 %v14950_v31 }
 0x4ec   :  { %15027 = vst [vmem:[#allocation215_spill] sm:$0xff] %v13083_v14  ;;  %15028 = vst [vmem:[#allocation216_spill] sm:$0xff] %v13096_v26 }
 0x4ee   :  { %8549 = vmatpush1.bf16.msra.mxu0 %v13063_v6  ;;  %v3249_v6 = vrot.slane %v12644_v7, 4 }
 0x4ef   :  { %8550 = vmatprep.subr.bf16.mxu0 %v14950_v31 }
 0x4f2   :  { %8552 = vmatpush1.bf16.msra.mxu0 %v13073_v16  ;;  %v7571_v16 = vld [vmem:[%s14541_s4 + $0x2a8] sm:$0xff] }
 0x4f3   :  { %8553 = vmatprep.subr.bf16.mxu0 %v14950_v31  ;;  %v13106_v37 = vpack.c.bf16 %v7571_v16, %v7570_v53  ;;  %v7574_v16 = vld [vmem:[%s14541_s4 + $0x2c0] sm:$0xff] }
 0x4f4   :  { %v13126_v53 = vpack.c.bf16 %v7575_v60, %v7574_v16  ;;  %v7578_v16 = vld [vmem:[%s14541_s4 + $0x2e0] sm:$0xff]  ;;  %v7579_v60 = vld [vmem:[%s14541_s4 + $0x2e8] sm:$0xff] }
 0x4f5   :  { %3221 = vmatmul.mubr.f32.vlgmr.msra.gmra.mrb[46].mxu0 %v3151_v12  ;;  %15029 = vst [vmem:[#allocation217_spill] sm:$0xff] %v13106_v37  ;;  %v7572_v12 = vld [vmem:[%s14541_s4 + $0x2b0] sm:$0xff] }
 0x4f6   :  { %8555 = vmatpush1.bf16.msra.mxu0 %v13083_v14  ;;  %7586 = vmatprep.mubr.msk.f32.mxu0 %vm67_vm0, %v3249_v6  ;;  %v7573_v6 = vld [vmem:[%s14541_s4 + $0x2b8] sm:$0xff]  ;;  %15031 = vst [vmem:[#allocation219_spill] sm:$0xff] %v13126_v53 }
 0x4f7   :  { %8556 = vmatprep.subr.bf16.mxu0 %v14950_v31  ;;  %v13116_v21 = vpack.c.bf16 %v7573_v6, %v7572_v12  ;;  %v7576_v12 = vld [vmem:[%s14541_s4 + $0x2d0] sm:$0xff]  ;;  %v7577_v6 = vld [vmem:[%s14541_s4 + $0x2d8] sm:$0xff] }
 0x4f9   :  { %15030 = vst [vmem:[#allocation218_spill] sm:$0xff] %v13116_v21 }
 0x4fa   :  { %8558 = vmatpush1.bf16.msra.mxu0 %v13096_v26  ;;  %v3248_v26 = vrot.slane %v12642_v56, 4 }
 0x4fb   :  { %8559 = vmatprep.subr.bf16.mxu0 %v14950_v31 }
 0x4fe   :  { %8561 = vmatpush1.bf16.msra.mxu0 %v13106_v37  ;;  %v13136_v37 = vpack.c.bf16 %v7577_v6, %v7576_v12  ;;  %v7580_v12 = vld [vmem:[%s14541_s4 + $0x2f0] sm:$0xff]  ;;  %v7581_v6 = vld [vmem:[%s14541_s4 + $0x2f8] sm:$0xff] }
 0x4ff   :  { %8562 = vmatprep.subr.bf16.mxu0 %v14950_v31 }
 0x500   :  { %15032 = vst [vmem:[#allocation220_spill] sm:$0xff] %v13136_v37 }
 0x502   :  { %8564 = vmatpush1.bf16.msra.mxu0 %v13116_v21  ;;  %v13146_v21 = vpack.c.bf16 %v7579_v60, %v7578_v16  ;;  %v7582_v16 = vld [vmem:[%s14541_s4 + $0x300] sm:$0xff]  ;;  %v7583_v60 = vld [vmem:[%s14541_s4 + $0x308] sm:$0xff] }
 0x503   :  { %8565 = vmatprep.subr.bf16.mxu0 %v14950_v31 }
 0x504   :  { %15033 = vst [vmem:[#allocation221_spill] sm:$0xff] %v13146_v21 }
 0x506   :  { %8567 = vmatpush1.bf16.msra.mxu0 %v13126_v53  ;;  %v13156_v53 = vpack.c.bf16 %v7581_v6, %v7580_v12  ;;  %v7584_v12 = vld [vmem:[%s14541_s4 + $0x310] sm:$0xff]  ;;  %v7585_v6 = vld [vmem:[%s14541_s4 + $0x318] sm:$0xff] }
 0x507   :  { %8568 = vmatprep.subr.bf16.mxu0 %v14950_v31 }
 0x508   :  { %15034 = vst [vmem:[#allocation222_spill] sm:$0xff] %v13156_v53 }
 0x50a   :  { %8570 = vmatpush1.bf16.msra.mxu0 %v13136_v37  ;;  %v13166_v37 = vpack.c.bf16 %v7583_v60, %v7582_v16  ;;  %v7587_v16 = vld [vmem:[%s14541_s4 + $0x320] sm:$0xff]  ;;  %v7588_v60 = vld [vmem:[%s14541_s4 + $0x328] sm:$0xff] }
 0x50b   :  { %8571 = vmatprep.subr.bf16.mxu0 %v14950_v31 }
 0x50c   :  { %15035 = vst [vmem:[#allocation223_spill] sm:$0xff] %v13166_v37 }
 0x50e   :  { %8573 = vmatpush1.bf16.msra.mxu0 %v13146_v21  ;;  %v13176_v21 = vpack.c.bf16 %v7585_v6, %v7584_v12  ;;  %v7589_v12 = vld [vmem:[%s14541_s4 + $0x330] sm:$0xff]  ;;  %v7590_v6 = vld [vmem:[%s14541_s4 + $0x338] sm:$0xff] }
 0x50f   :  { %8574 = vmatprep.subr.bf16.mxu0 %v14950_v31 }
 0x510   :  { %15036 = vst [vmem:[#allocation224_spill] sm:$0xff] %v13176_v21 }
 0x512   :  { %8576 = vmatpush1.bf16.msra.mxu0 %v13156_v53  ;;  %v13186_v53 = vpack.c.bf16 %v7588_v60, %v7587_v16  ;;  %v13199_v16 = vpack.c.bf16 %v7590_v6, %v7589_v12  ;;  %v7591_v60 = vld [vmem:[%s14541_s4 + $0x340] sm:$0xff]  ;;  %v7596_v6 = vld [vmem:[%s14541_s4 + $0x368] sm:$0xff] }
 0x513   :  { %8577 = vmatprep.subr.bf16.mxu0 %v14950_v31 }
 0x514   :  { %15037 = vst [vmem:[#allocation225_spill] sm:$0xff] %v13186_v53  ;;  %15038 = vst [vmem:[#allocation226_spill] sm:$0xff] %v13199_v16 }
 0x516   :  { %8579 = vmatpush1.bf16.msra.mxu0 %v13166_v37  ;;  %v3346_v37 = vrot.slane %v12644_v7, 5 }
 0x517   :  { %8580 = vmatprep.subr.bf16.mxu0 %v14950_v31 }
 0x51a   :  { %8582 = vmatpush1.bf16.msra.mxu0 %v13176_v21  ;;  %v7592_v21 = vld [vmem:[%s14541_s4 + $0x348] sm:$0xff] }
 0x51b   :  { %8583 = vmatprep.subr.bf16.mxu0 %v14950_v31  ;;  %v13209_v14 = vpack.c.bf16 %v7592_v21, %v7591_v60  ;;  %v7595_v21 = vld [vmem:[%s14541_s4 + $0x360] sm:$0xff] }
 0x51c   :  { %v13229_v60 = vpack.c.bf16 %v7596_v6, %v7595_v21  ;;  %v7599_v21 = vld [vmem:[%s14541_s4 + $0x380] sm:$0xff]  ;;  %v7600_v6 = vld [vmem:[%s14541_s4 + $0x388] sm:$0xff] }
 0x51d   :  { %3318 = vmatmul.mubr.f32.vlgmr.msra.gmra.mrb[48].mxu0 %v3248_v26  ;;  %15039 = vst [vmem:[#allocation227_spill] sm:$0xff] %v13209_v14  ;;  %v7594_v26 = vld [vmem:[%s14541_s4 + $0x358] sm:$0xff] }
 0x51e   :  { %8585 = vmatpush1.bf16.msra.mxu0 %v13186_v53  ;;  %7607 = vmatprep.mubr.msk.f32.mxu0 %vm67_vm0, %v3346_v37  ;;  %v7593_v37 = vld [vmem:[%s14541_s4 + $0x350] sm:$0xff]  ;;  %15041 = vst [vmem:[#allocation229_spill] sm:$0xff] %v13229_v60 }
 0x51f   :  { %8586 = vmatprep.subr.bf16.mxu0 %v14950_v31  ;;  %v13219_v12 = vpack.c.bf16 %v7594_v26, %v7593_v37  ;;  %v7597_v37 = vld [vmem:[%s14541_s4 + $0x370] sm:$0xff]  ;;  %v7598_v26 = vld [vmem:[%s14541_s4 + $0x378] sm:$0xff] }
 0x521   :  { %15040 = vst [vmem:[#allocation228_spill] sm:$0xff] %v13219_v12 }
 0x522   :  { %8588 = vmatpush1.bf16.msra.mxu0 %v13199_v16  ;;  %v3345_v16 = vrot.slane %v12642_v56, 5 }
 0x523   :  { %8589 = vmatprep.subr.bf16.mxu0 %v14950_v31 }
 0x526   :  { %8591 = vmatpush1.bf16.msra.mxu0 %v13209_v14  ;;  %v13239_v14 = vpack.c.bf16 %v7598_v26, %v7597_v37  ;;  %v7601_v37 = vld [vmem:[%s14541_s4 + $0x390] sm:$0xff]  ;;  %v7602_v26 = vld [vmem:[%s14541_s4 + $0x398] sm:$0xff] }
 0x527   :  { %8592 = vmatprep.subr.bf16.mxu0 %v14950_v31 }
 0x528   :  { %15042 = vst [vmem:[#allocation230_spill] sm:$0xff] %v13239_v14 }
 0x52a   :  { %8594 = vmatpush1.bf16.msra.mxu0 %v13219_v12  ;;  %v13249_v12 = vpack.c.bf16 %v7600_v6, %v7599_v21  ;;  %v7603_v21 = vld [vmem:[%s14541_s4 + $0x3a0] sm:$0xff]  ;;  %v7604_v6 = vld [vmem:[%s14541_s4 + $0x3a8] sm:$0xff] }
 0x52b   :  { %8595 = vmatprep.subr.bf16.mxu0 %v14950_v31 }
 0x52c   :  { %15043 = vst [vmem:[#allocation231_spill] sm:$0xff] %v13249_v12 }
 0x52e   :  { %8597 = vmatpush1.bf16.msra.mxu0 %v13229_v60  ;;  %v13259_v60 = vpack.c.bf16 %v7602_v26, %v7601_v37  ;;  %v7605_v37 = vld [vmem:[%s14541_s4 + $0x3b0] sm:$0xff]  ;;  %v7606_v26 = vld [vmem:[%s14541_s4 + $0x3b8] sm:$0xff] }
 0x52f   :  { %8598 = vmatprep.subr.bf16.mxu0 %v14950_v31 }
 0x530   :  { %15044 = vst [vmem:[#allocation232_spill] sm:$0xff] %v13259_v60 }
 0x532   :  { %8600 = vmatpush1.bf16.msra.mxu0 %v13239_v14  ;;  %v13269_v14 = vpack.c.bf16 %v7604_v6, %v7603_v21  ;;  %v7608_v21 = vld [vmem:[%s14541_s4 + $0x3c0] sm:$0xff]  ;;  %v7609_v6 = vld [vmem:[%s14541_s4 + $0x3c8] sm:$0xff] }
 0x533   :  { %8601 = vmatprep.subr.bf16.mxu0 %v14950_v31 }
 0x534   :  { %15045 = vst [vmem:[#allocation233_spill] sm:$0xff] %v13269_v14 }
 0x536   :  { %8603 = vmatpush1.bf16.msra.mxu0 %v13249_v12  ;;  %v13279_v12 = vpack.c.bf16 %v7606_v26, %v7605_v37  ;;  %v7610_v37 = vld [vmem:[%s14541_s4 + $0x3d0] sm:$0xff]  ;;  %v7611_v26 = vld [vmem:[%s14541_s4 + $0x3d8] sm:$0xff] }
 0x537   :  { %8604 = vmatprep.subr.bf16.mxu0 %v14950_v31 }
 0x538   :  { %15046 = vst [vmem:[#allocation234_spill] sm:$0xff] %v13279_v12 }
 0x53a   :  { %8606 = vmatpush1.bf16.msra.mxu0 %v13259_v60  ;;  %v13289_v60 = vpack.c.bf16 %v7609_v6, %v7608_v21  ;;  %v13302_v21 = vpack.c.bf16 %v7611_v26, %v7610_v37  ;;  %v7612_v6 = vld [vmem:[%s14541_s4 + $0x3e0] sm:$0xff]  ;;  %v7617_v26 = vld [vmem:[%s14541_s4 + $0x408] sm:$0xff] }
 0x53b   :  { %8607 = vmatprep.subr.bf16.mxu0 %v14950_v31 }
 0x53c   :  { %15047 = vst [vmem:[#allocation235_spill] sm:$0xff] %v13289_v60  ;;  %15048 = vst [vmem:[#allocation236_spill] sm:$0xff] %v13302_v21 }
 0x53e   :  { %8609 = vmatpush1.bf16.msra.mxu0 %v13269_v14  ;;  %v3443_v14 = vrot.slane %v12644_v7, 6 }
 0x53f   :  { %8610 = vmatprep.subr.bf16.mxu0 %v14950_v31 }
 0x542   :  { %8612 = vmatpush1.bf16.msra.mxu0 %v13279_v12  ;;  %v7613_v12 = vld [vmem:[%s14541_s4 + $0x3e8] sm:$0xff] }
 0x543   :  { %8613 = vmatprep.subr.bf16.mxu0 %v14950_v31  ;;  %v13312_v53 = vpack.c.bf16 %v7613_v12, %v7612_v6  ;;  %v7616_v12 = vld [vmem:[%s14541_s4 + $0x400] sm:$0xff] }
 0x545   :  { %3415 = vmatmul.mubr.f32.vlgmr.msra.gmra.mrb[50].mxu0 %v3345_v16  ;;  %15049 = vst [vmem:[#allocation237_spill] sm:$0xff] %v13312_v53  ;;  %v7615_v16 = vld [vmem:[%s14541_s4 + $0x3f8] sm:$0xff] }
 0x546   :  { %8615 = vmatpush1.bf16.msra.mxu0 %v13289_v60  ;;  %7628 = vmatprep.mubr.msk.f32.mxu0 %vm67_vm0, %v3443_v14  ;;  %v7614_v14 = vld [vmem:[%s14541_s4 + $0x3f0] sm:$0xff]  ;;  %v13332_v60 = vpack.c.bf16 %v7617_v26, %v7616_v12  ;;  %v7620_v12 = vld [vmem:[%s14541_s4 + $0x420] sm:$0xff]  ;;  %v7621_v26 = vld [vmem:[%s14541_s4 + $0x428] sm:$0xff] }
 0x547   :  { %8616 = vmatprep.subr.bf16.mxu0 %v14950_v31  ;;  %v13322_v37 = vpack.c.bf16 %v7615_v16, %v7614_v14  ;;  %v7618_v14 = vld [vmem:[%s14541_s4 + $0x410] sm:$0xff]  ;;  %v7619_v16 = vld [vmem:[%s14541_s4 + $0x418] sm:$0xff] }
 0x548   :  { %15051 = vst [vmem:[#allocation239_spill] sm:$0xff] %v13332_v60 }
 0x549   :  { %15050 = vst [vmem:[#allocation238_spill] sm:$0xff] %v13322_v37 }
 0x54a   :  { %8618 = vmatpush1.bf16.msra.mxu0 %v13302_v21 }
 0x54b   :  { %8619 = vmatprep.subr.bf16.mxu0 %v14950_v31 }
 0x54e   :  { %8621 = vmatpush1.bf16.msra.mxu0 %v13312_v53 }
 0x54f   :  { %8622 = vmatprep.subr.bf16.mxu0 %v14950_v31 }
 0x550   :  { %v2957_v6 = vpop.f32.mrb[40].mxu0 }
 0x551   :  { %v2959_v21 = vpop.f32.mrb[41].mxu0 }
 0x552   :  { %8624 = vmatpush1.bf16.msra.mxu0 %v13322_v37  ;;  %v13344_v21 = vpack.c.bf16 %v7619_v16, %v7618_v14  ;;  %v13354_v37 = vpack.c.bf16 %v7621_v26, %v7620_v12  ;;  %v7623_v14 = vld [vmem:[%s14541_s4 + $0x438] sm:$0xff]  ;;  %v7624_v12 = vld [vmem:[%s14541_s4 + $0x440] sm:$0xff]  ;;  %v7625_v26 = vld [vmem:[%s14541_s4 + $0x448] sm:$0xff] }
 0x553   :  { %v13334_v10 = vpop.f32.mrb[12].mxu1  ;;  %8625 = vmatprep.subr.bf16.mxu0 %v14950_v31 }
 0x554   :  { %v3707_v53 = vpop.f32.mrb[13].mxu1  ;;  %15052 = vst [vmem:[#allocation240_spill] sm:$0xff] %v13344_v21  ;;  %15053 = vst [vmem:[#allocation241_spill] sm:$0xff] %v13354_v37 }
 0x555   :  { %v7622_v53 = vld [vmem:[%s14541_s4 + $0x430] sm:$0xff] }
 0x556   :  { %8627 = vmatpush1.bf16.msra.mxu0 %v13332_v60  ;;  %v13364_v16 = vpack.c.bf16 %v7623_v14, %v7622_v53  ;;  %v7626_v53 = vld [vmem:[%s14541_s4 + $0x450] sm:$0xff]  ;;  %v7627_v14 = vld [vmem:[%s14541_s4 + $0x458] sm:$0xff]  ;;  %v3442_v60 = vrot.slane %v12642_v56, 6 }
 0x557   :  { %8628 = vmatprep.subr.bf16.mxu0 %v14950_v31 }
 0x558   :  { %15054 = vst [vmem:[#allocation242_spill] sm:$0xff] %v13364_v16 }
 0x55a   :  { %8630 = vmatpush1.bf16.msra.mxu0 %v13344_v21  ;;  %v13374_v21 = vpack.c.bf16 %v7625_v26, %v7624_v12  ;;  %v7629_v12 = vld [vmem:[%s14541_s4 + $0x460] sm:$0xff]  ;;  %v7630_v26 = vld [vmem:[%s14541_s4 + $0x468] sm:$0xff] }
 0x55b   :  { %8631 = vmatprep.subr.bf16.mxu0 %v14950_v31 }
 0x55c   :  { %15055 = vst [vmem:[#allocation243_spill] sm:$0xff] %v13374_v21 }
 0x55e   :  { %8633 = vmatpush1.bf16.msra.mxu0 %v13354_v37  ;;  %v13384_v37 = vpack.c.bf16 %v7627_v14, %v7626_v53  ;;  %v7631_v53 = vld [vmem:[%s14541_s4 + $0x470] sm:$0xff]  ;;  %v7632_v14 = vld [vmem:[%s14541_s4 + $0x478] sm:$0xff] }
 0x55f   :  { %8634 = vmatprep.subr.bf16.mxu0 %v14950_v31 }
 0x560   :  { %15056 = vst [vmem:[#allocation244_spill] sm:$0xff] %v13384_v37 }
 0x562   :  { %8636 = vmatpush1.bf16.msra.mxu0 %v13364_v16  ;;  %v13394_v16 = vpack.c.bf16 %v7630_v26, %v7629_v12  ;;  %v13407_v12 = vpack.c.bf16 %v7632_v14, %v7631_v53  ;;  %v7633_v26 = vld [vmem:[%s14541_s4 + $0x480] sm:$0xff]  ;;  %v7638_v14 = vld [vmem:[%s14541_s4 + $0x4a8] sm:$0xff] }
 0x563   :  { %8637 = vmatprep.subr.bf16.mxu0 %v14950_v31 }
 0x564   :  { %15057 = vst [vmem:[#allocation245_spill] sm:$0xff] %v13394_v16  ;;  %15058 = vst [vmem:[#allocation246_spill] sm:$0xff] %v13407_v12 }
 0x566   :  { %8639 = vmatpush1.bf16.msra.mxu0 %v13374_v21  ;;  %v3540_v21 = vrot.slane %v12644_v7, 7 }
 0x567   :  { %8640 = vmatprep.subr.bf16.mxu0 %v14950_v31 }
 0x56a   :  { %8642 = vmatpush1.bf16.msra.mxu0 %v13384_v37  ;;  %v7634_v37 = vld [vmem:[%s14541_s4 + $0x488] sm:$0xff] }
 0x56b   :  { %8643 = vmatprep.subr.bf16.mxu0 %v14950_v31  ;;  %v13417_v7 = vpack.c.bf16 %v7634_v37, %v7633_v26  ;;  %v7637_v37 = vld [vmem:[%s14541_s4 + $0x4a0] sm:$0xff] }
 0x56c   :  { %v13439_v28 = vpack.c.bf16 %v7638_v14, %v7637_v37  ;;  %v7643_v14 = vld [vmem:[%s14541_s4 + $0x4d0] sm:$0xff] }
 0x56d   :  { %3512 = vmatmul.mubr.f32.vlgmr.msra.gmra.mrb[52].mxu0 %v3442_v60  ;;  %15059 = vst [vmem:[#allocation247_spill] sm:$0xff] %v13417_v7  ;;  %v7635_v60 = vld [vmem:[%s14541_s4 + $0x490] sm:$0xff] }
 0x56e   :  { %8645 = vmatpush1.bf16.msra.mxu0 %v13394_v16  ;;  %7649 = vmatprep.mubr.msk.f32.mxu0 %vm67_vm0, %v3540_v21  ;;  %v7636_v21 = vld [vmem:[%s14541_s4 + $0x498] sm:$0xff]  ;;  %15061 = vst [vmem:[#allocation249_spill] sm:$0xff] %v13439_v28 }
 0x56f   :  { %8646 = vmatprep.subr.bf16.mxu0 %v14950_v31  ;;  %v13427_v53 = vpack.c.bf16 %v7636_v21, %v7635_v60  ;;  %v7639_v60 = vld [vmem:[%s14541_s4 + $0x4b0] sm:$0xff]  ;;  %v7640_v21 = vld [vmem:[%s14541_s4 + $0x4b8] sm:$0xff] }
 0x571   :  { %15060 = vst [vmem:[#allocation248_spill] sm:$0xff] %v13427_v53 }
 0x572   :  { %8648 = vmatpush1.bf16.msra.mxu0 %v13407_v12 }
 0x573   :  { %8649 = vmatprep.subr.bf16.mxu0 %v14950_v31 }
 0x576   :  { %8651 = vmatpush1.bf16.msra.mxu0 %v13417_v7  ;;  %v13449_v7 = vpack.c.bf16 %v7640_v21, %v7639_v60  ;;  %v7645_v21 = vld [vmem:[%s14541_s4 + $0x4e0] sm:$0xff] }
 0x577   :  { %8652 = vmatprep.subr.bf16.mxu0 %v14950_v31 }
 0x578   :  { %v3029_v26 = vpop.f32.mrb[42].mxu0  ;;  %15062 = vst [vmem:[#allocation250_spill] sm:$0xff] %v13449_v7 }
 0x579   :  { %v13436_v12 = vadd.f32 %v3029_v26, %v2957_v6  ;;  %v3031_v16 = vpop.f32.mrb[43].mxu0  ;;  %v7641_v6 = vld [vmem:[%s14541_s4 + $0x4c0] sm:$0xff]  ;;  %v7644_v26 = vld [vmem:[%s14541_s4 + $0x4d8] sm:$0xff] }
 0x57a   :  { %8654 = vmatpush1.bf16.msra.mxu0 %v13427_v53  ;;  %v7642_v16 = vld [vmem:[%s14541_s4 + $0x4c8] sm:$0xff]  ;;  %v13469_v60 = vpack.c.bf16 %v7644_v26, %v7643_v14  ;;  %v7647_v14 = vld [vmem:[%s14541_s4 + $0x4f0] sm:$0xff]  ;;  %v7648_v26 = vld [vmem:[%s14541_s4 + $0x4f8] sm:$0xff] }
 0x57b   :  { %8655 = vmatprep.subr.bf16.mxu0 %v14950_v31  ;;  %v13459_v37 = vpack.c.bf16 %v7642_v16, %v7641_v6  ;;  %v7646_v6 = vld [vmem:[%s14541_s4 + $0x4e8] sm:$0xff] }
 0x57c   :  { %15064 = vst [vmem:[#allocation252_spill] sm:$0xff] %v13469_v60  ;;  %v13479_v16 = vpack.c.bf16 %v7646_v6, %v7645_v21  ;;  %v7671_v21 = vld [vmem:[%s14541_s4 + $0x5a0] sm:$0xff]  ;;  %v7672_v6 = vld [vmem:[%s14541_s4 + $0x5a8] sm:$0xff] }
 0x57d   :  { %15063 = vst [vmem:[#allocation251_spill] sm:$0xff] %v13459_v37 }
 0x57e   :  { %8657 = vmatpush1.bf16.msra.mxu0 %v13439_v28  ;;  %15065 = vst [vmem:[#allocation253_spill] sm:$0xff] %v13479_v16  ;;  %v7680_v28 = vld [vmem:[%s14541_s4 + $0x5e8] sm:$0xff] }
 0x57f   :  { %8658 = vmatprep.subr.bf16.mxu0 %v14950_v31 }
 0x582   :  { %8660 = vmatpush1.bf16.msra.mxu0 %v13449_v7  ;;  %v3539_v7 = vrot.slane %v12642_v56, 7  ;;  %v7675_v56 = vld [vmem:[%s14541_s4 + $0x5c0] sm:$0xff] }
 0x583   :  { %8661 = vmatprep.subr.bf16.mxu0 %v14950_v31 }
 0x586   :  { %8663 = vmatpush1.bf16.msra.mxu0 %v13459_v37  ;;  %v13489_v37 = vpack.c.bf16 %v7648_v26, %v7647_v14  ;;  %v7673_v14 = vld [vmem:[%s14541_s4 + $0x5b0] sm:$0xff]  ;;  %v7674_v26 = vld [vmem:[%s14541_s4 + $0x5b8] sm:$0xff] }
 0x587   :  { %8664 = vmatprep.subr.bf16.mxu0 %v14950_v31 }
 0x588   :  { %15066 = vst [vmem:[#allocation254_spill] sm:$0xff] %v13489_v37 }
 0x58a   :  { %8666 = vmatpush1.bf16.msra.mxu0 %v13469_v60  ;;  %v13499_v60 = vpack.c.bf16 %v7672_v6, %v7671_v21  ;;  %v13512_v21 = vpack.c.bf16 %v7674_v26, %v7673_v14  ;;  %v7676_v6 = vld [vmem:[%s14541_s4 + $0x5c8] sm:$0xff]  ;;  %v7678_v14 = vld [vmem:[%s14541_s4 + $0x5d8] sm:$0xff] }
 0x58b   :  { %8667 = vmatprep.subr.bf16.mxu0 %v14950_v31 }
 0x58c   :  { %15067 = vst [vmem:[#allocation255_spill] sm:$0xff] %v13499_v60  ;;  %15068 = vst [vmem:[#allocation256_spill] sm:$0xff] %v13512_v21 }
 0x58e   :  { %8669 = vmatpush1.bf16.msra.mxu0 %v13479_v16  ;;  %v3733_v16 = vrot.slane %v12657_v63, 1  ;;  %v13522_v63 = vpack.c.bf16 %v7676_v6, %v7675_v56 }
 0x58f   :  { %8670 = vmatprep.subr.bf16.mxu0 %v14950_v31 }
 0x590   :  { %15069 = vst [vmem:[#allocation257_spill] sm:$0xff] %v13522_v63 }
 0x592   :  { %8672 = vmatpush1.bf16.msra.mxu0 %v13489_v37 }
 0x593   :  { %8703 = vmatprep.subr.bf16.mxu0 %v14950_v31 }
 0x595   :  { %3609 = vmatmul.mubr.f32.vlgmr.msra.gmra.mrb[54].mxu0 %v3539_v7 }
 0x596   :  { %8705 = vmatpush1.bf16.msra.mxu0 %v13499_v60  ;;  %7691 = vmatprep.mubr.msk.f32.mxu0 %vm67_vm0, %v3733_v16  ;;  %v7677_v16 = vld [vmem:[%s14541_s4 + $0x5d0] sm:$0xff] }
 0x597   :  { %8706 = vmatprep.subr.bf16.mxu0 %v14950_v31  ;;  %v13534_v56 = vpack.c.bf16 %v7678_v14, %v7677_v16 }
 0x59a   :  { %8708 = vmatpush1.bf16.msra.mxu0 %v13512_v21  ;;  %v7679_v21 = vld [vmem:[%s14541_s4 + $0x5e0] sm:$0xff] }
 0x59b   :  { %v4330_v7 = vpop.f32.mrb[14].mxu1  ;;  %8709 = vmatprep.subr.bf16.mxu0 %v14950_v31  ;;  %v13549_v55 = vpack.c.bf16 %v7680_v28, %v7679_v21 }
 0x59c   :  { %v4361_v26 = vadd.f32 %v4330_v7, %v10229_v32  ;;  %v4332_v60 = vpop.f32.mrb[15].mxu1 }
 0x59d   :  { %v4362_v37 = vadd.f32 %v4332_v60, %v10233_v33 }
 0x59e   :  { %8711 = vmatpush1.bf16.msra.mxu0 %v13522_v63  ;;  %9774 = vtanh.f32 %v4361_v26  ;;  %v7681_v26 = vld [vmem:[%s14541_s4 + $0x5f0] sm:$0xff] }
 0x59f   :  { %v4336_v6 = vpop.f32.mrb[16].mxu1  ;;  %8712 = vmatprep.subr.bf16.mxu0 %v14950_v31  ;;  %9776 = vtanh.f32 %v4362_v37 }
 0x5a0   :  { %v4363_v7 = vadd.f32 %v4336_v6, %v10229_v32  ;;  %v4338_v53 = vpop.f32.mrb[17].mxu1  ;;  %v3125_v60 = vpop.f32.mrb[44].mxu0  ;;  %v7683_v6 = vld [vmem:[%s14541_s4 + $0x600] sm:$0xff] }
 0x5a1   :  { %v4364_v16 = vadd.f32 %v4338_v53, %v10233_v33  ;;  %v13546_v14 = vadd.f32 %v3125_v60, %v13436_v12  ;;  %v3127_v63 = vpop.f32.mrb[45].mxu0  ;;  %v7682_v53 = vld [vmem:[%s14541_s4 + $0x5f8] sm:$0xff] }
 0x5a2   :  { %9778 = vtanh.f32 %v4363_v7  ;;  %8714 = vmatpush1.bf16.msra.mxu0 %v13534_v56  ;;  %v13561_v28 = vpack.c.bf16 %v7682_v53, %v7681_v26  ;;  %v7684_v7 = vld [vmem:[%s14541_s4 + $0x608] sm:$0xff] }
 0x5a3   :  { %9780 = vtanh.f32 %v4364_v16  ;;  %v4342_v61 = vpop.f32.mrb[18].mxu1  ;;  %8715 = vmatprep.subr.bf16.mxu0 %v14950_v31  ;;  %v13573_v53 = vpack.c.bf16 %v7684_v7, %v7683_v6  ;;  %v7687_v7 = vld [vmem:[%s14541_s4 + $0x620] sm:$0xff] }
 0x5a4   :  { %v4365_v12 = vadd.f32 %v4342_v61, %v10229_v32  ;;  %v4344_v37 = vpop.f32.mrb[19].mxu1  ;;  %15070 = vst [vmem:[#allocation258_spill] sm:$0xff] %v13561_v28 }
 0x5a5   :  { %v4366_v63 = vadd.f32 %v4344_v37, %v10233_v33  ;;  %15071 = vst [vmem:[#allocation259_spill] sm:$0xff] %v13573_v53 }
 0x5a6   :  { %8717 = vmatpush1.bf16.msra.mxu0 %v13549_v55  ;;  %9782 = vtanh.f32 %v4365_v12  ;;  %v7685_v12 = vld [vmem:[%s14541_s4 + $0x610] sm:$0xff] }
 0x5a7   :  { %v4348_v21 = vpop.f32.mrb[20].mxu1  ;;  %8718 = vmatprep.subr.bf16.mxu0 %v14950_v31  ;;  %9784 = vtanh.f32 %v4366_v63 }
 0x5a8   :  { %v4367_v61 = vadd.f32 %v4348_v21, %v10229_v32  ;;  %v4350_v60 = vpop.f32.mrb[21].mxu1  ;;  %v9775_v26 = vpop.eup %9774  ;;  %v7686_v32 = vld [vmem:[%s14541_s4 + $0x618] sm:$0xff] }
 0x5a9   :  { %v4368_v16 = vadd.f32 %v4350_v60, %v10233_v33  ;;  %v9777_v37 = vpop.eup %9776  ;;  %v13587_v6 = vpack.c.bf16 %v7686_v32, %v7685_v12  ;;  %v7688_v60 = vld [vmem:[%s14541_s4 + $0x628] sm:$0xff]  ;;  %v7689_v12 = vld [vmem:[%s14541_s4 + $0x630] sm:$0xff]  ;;  %v7690_v32 = vld [vmem:[%s14541_s4 + $0x638] sm:$0xff] }
 0x5aa   :  { %9786 = vtanh.f32 %v4367_v61  ;;  %8720 = vmatpush1.bf16.msra.mxu0 %v13561_v28 }
 0x5ab   :  { %9788 = vtanh.f32 %v4368_v16  ;;  %8721 = vmatprep.subr.bf16.mxu0 %v14950_v31 }
 0x5ac   :  { %v9779_v63 = vpop.eup %9778 }
 0x5ad   :  { %v9781_v33 = vpop.eup %9780  ;;  %v13582_v21 = vpack.c.bf16 %v9779_v63, %v9775_v26  ;;  %v13599_v26 = vpack.c.bf16 %v7688_v60, %v7687_v7  ;;  %v13613_v7 = vpack.c.bf16 %v7690_v32, %v7689_v12  ;;  %v3732_v60 = vrot.slane %v12664_v3, 1  ;;  %v9805_v3 = vld [vmem:[%s14539_s2 + $0x28] sm:$0x3]  ;;  %v9807_v12 = vld [vmem:[%s14539_s2] sm:$0xff] }
 0x5ae   :  { %v13584_v61 = vpack.c.bf16 %v9781_v33, %v9777_v37  ;;  %8723 = vmatpush1.bf16.msra.mxu0 %v13573_v53 }
 0x5af   :  { %8724 = vmatprep.subr.bf16.mxu0 %v14950_v31 }
 0x5b0   :  { %8874 = vmatprep.subr.bf16.mxu1 %v13584_v61  ;;  %v9783_v16 = vpop.eup %9782 }
 0x5b1   :  { %8876 = vmatpush1.bf16.msra.mxu1 %v13582_v21  ;;  %v9785_v37 = vpop.eup %9784 }
 0x5b2   :  { %8726 = vmatpush1.bf16.msra.mxu0 %v13587_v6 }
 0x5b3   :  { %8727 = vmatprep.subr.bf16.mxu0 %v14950_v31 }
 0x5b4   :  { %v9787_v63 = vpop.eup %9786 }
 0x5b5   :  { %v9789_v33 = vpop.eup %9788  ;;  %v13608_v53 = vpack.c.bf16 %v9787_v63, %v9783_v16  ;;  %v9804_v16 = vld [vmem:[%s14539_s2 + $0x20] sm:$0xff]  ;;  %v9808_v63 = vld [vmem:[%s14539_s2 + $0x38] sm:$0x3] }
 0x5b6   :  { %v13610_v28 = vpack.c.bf16 %v9789_v33, %v9785_v37  ;;  %8729 = vmatpush1.bf16.msra.mxu0 %v13599_v26  ;;  %v9806_v37 = vld [vmem:[%s14539_s2 + $0x30] sm:$0xff] }
 0x5b7   :  { %8730 = vmatprep.subr.bf16.mxu0 %v14950_v31 }
 0x5b8   :  { %8879 = vmatprep.subr.msk.bf16.mxu1 %vm10254_vm3, %v13610_v28 }
 0x5b9   :  { %8882 = vmatpush1.bf16.msk.msra.mxu1 %vm10254_vm3, %v13608_v53 }
 0x5ba   :  { %8924 = vmatprep.subr.bf16.mxu1 %v13584_v61  ;;  %8732 = vmatpush1.bf16.msra.mxu0 %v13613_v7 }
 0x5bb   :  { %8774 = vmatprep.subr.bf16.mxu0 %v13584_v61 }
 0x5bc   :  { %7746 = vmatmul.mubr.msk.f32.vlgmr.msra.gmra.mrb[22].mxu1 %vm666_vm4, %v9804_v16  ;;  %v9809_v16 = vld [vmem:[%s14539_s2 + $0x8] sm:$0x3] }
 0x5bd   :  { %8926 = vmatpush1.bf16.msra.mxu1 %v13582_v21  ;;  %3802 = vmatmul.mubr.f32.vlgmr.msra.gmra.mrb[56].mxu0 %v3732_v60 }
 0x5be   :  { %8929 = vmatprep.subr.msk.bf16.mxu1 %vm10254_vm3, %v13610_v28  ;;  %8776 = vmatpush1.bf16.msra.mxu0 %v13582_v21 }
 0x5bf   :  { %8779 = vmatprep.subr.msk.bf16.mxu0 %vm10254_vm3, %v13610_v28  ;;  %4773 = vmatprep.mubr.f32.mxu1 %v14839_v52 }
 0x5c0   :  { %7747 = vmatmul.mubr.msk.f32.gmra.mrb[24].mxu1 %vm666_vm4, %v9805_v3  ;;  %4447 = vmatprep.mubr.f32.mxu0 %v14839_v52  ;;  %v9811_v3 = vld [vmem:[%s14539_s2 + $0x10] sm:$0xff] }
 0x5c1   :  { %8932 = vmatpush1.bf16.msk.msra.mxu1 %vm10254_vm3, %v13608_v53  ;;  %4931 = vmatprep.mubr.f32.mxu1 %v14839_v52 }
 0x5c2   :  { %8974 = vmatprep.subr.bf16.mxu1 %v13584_v61  ;;  %8782 = vmatpush1.bf16.msk.msra.mxu0 %vm10254_vm3, %v13608_v53 }
 0x5c3   :  { %8784 = vmatprep.subr.bf16.mxu0 %v13584_v61 }
 0x5c4   :  { %7752 = vmatmul.mubr.msk.f32.vlgmr.msra.gmra.mrb[26].mxu1 %vm666_vm4, %v9806_v37  ;;  %v9813_v37 = vld [vmem:[%s14539_s2 + $0x18] sm:$0x3] }
 0x5c5   :  { %8976 = vmatpush1.bf16.msra.mxu1 %v13582_v21  ;;  %7734 = vmatmul.mubr.msk.f32.vlgmr.msra.gmra.mrb[58].mxu0 %vm666_vm4, %v9807_v12  ;;  %v15077_v12 = vld [vmem:[#allocation10_spill] sm:$0xff] }
 0x5c6   :  { %8979 = vmatprep.subr.msk.bf16.mxu1 %vm10254_vm3, %v13610_v28  ;;  %8786 = vmatpush1.bf16.msra.mxu0 %v13582_v21 }
 0x5c7   :  { %8789 = vmatprep.subr.msk.bf16.mxu0 %vm10254_vm3, %v13610_v28  ;;  %4937 = vmatprep.mubr.f32.mxu1 %v14839_v52 }
 0x5c8   :  { %v3222_v32 = vpop.f32.mrb[46].mxu0  ;;  %4453 = vmatprep.mubr.f32.mxu0 %v14839_v52  ;;  %7753 = vmatmul.mubr.msk.f32.gmra.mrb[28].mxu1 %vm666_vm4, %v9808_v63 }
 0x5c9   :  { %v13676_v33 = vadd.f32 %v3222_v32, %v13546_v14  ;;  %8982 = vmatpush1.bf16.msk.msra.mxu1 %vm10254_vm3, %v13608_v53  ;;  %v3224_v60 = vpop.f32.mrb[47].mxu0  ;;  %7735 = vmatmul.mubr.msk.f32.gmra.mrb[60].mxu0 %vm666_vm4, %v9809_v16  ;;  %v9810_v14 = vld [vmem:[%s14539_s2 + $0x40] sm:$0xff]  ;;  %v9821_v32 = vld [vmem:[%s14539_s2 + $0x88] sm:$0x3] }
 0x5ca   :  { %9024 = vmatprep.subr.bf16.mxu1 %v13584_v61  ;;  %8792 = vmatpush1.bf16.msk.msra.mxu0 %vm10254_vm3, %v13608_v53  ;;  %v9822_v60 = vld [vmem:[%s14540_s3 + $0x298] sm:$0xff] }
 0x5cb   :  { %5095 = vmatprep.mubr.f32.mxu1 %v14839_v52  ;;  %4524 = vmatprep.mubr.f32.mxu0 %v14839_v52  ;;  %v15080_v16 = vld [vmem:[#allocation12_spill] sm:$0xff] }
 0x5cc   :  { %7758 = vmatmul.mubr.msk.f32.vlgmr.msra.gmra.mrb[30].mxu1 %vm666_vm4, %v9810_v14  ;;  %8794 = vmatprep.subr.bf16.mxu0 %v10304_v24  ;;  %v9812_v24 = vld [vmem:[%s14539_s2 + $0x48] sm:$0x3]  ;;  %v9825_v14 = vld [vmem:[%s14539_s2 + $0x98] sm:$0x3] }
 0x5cd   :  { %9026 = vmatpush1.bf16.msra.mxu1 %v13582_v21  ;;  %7738 = vmatmul.mubr.msk.f32.vlgmr.msra.gmra.mrb[62].mxu0 %vm666_vm4, %v9811_v3  ;;  %v15081_v3 = vld [vmem:[#allocation140_spill] sm:$0xff] }
 0x5ce   :  { %9029 = vmatprep.subr.msk.bf16.mxu1 %vm10254_vm3, %v13610_v28  ;;  %5101 = vmatprep.mubr.f32.mxu1 %v14839_v52 }
 0x5cf   :  { %4530 = vmatprep.mubr.f32.mxu0 %v14839_v52  ;;  %8796 = vmatpush1.bf16.msra.mxu0 %v10330_v36  ;;  %v9814_v36 = vld [vmem:[%s14539_s2 + $0x50] sm:$0xff] }
 0x5d0   :  { %7759 = vmatmul.mubr.msk.f32.gmra.mrb[32].mxu1 %vm666_vm4, %v9812_v24  ;;  %8798 = vmatprep.subr.bf16.mxu0 %v10364_v49  ;;  %v9815_v49 = vld [vmem:[%s14539_s2 + $0x58] sm:$0x3] }
 0x5d1   :  { %9032 = vmatpush1.bf16.msk.msra.mxu1 %vm10254_vm3, %v13608_v53  ;;  %7739 = vmatmul.mubr.msk.f32.gmra.mrb[64].mxu0 %vm666_vm4, %v9813_v37  ;;  %v15082_v24 = vld [vmem:[#allocation143_spill] sm:$0xff]  ;;  %v15083_v37 = vld [vmem:[#allocation146_spill] sm:$0xff] }
 0x5d2   :  { %9074 = vmatprep.subr.bf16.mxu1 %v13584_v61  ;;  %5259 = vmatprep.mubr.f32.mxu1 %v14839_v52 }
 0x5d3   :  { %8800 = vmatpush1.bf16.msra.mxu0 %v10367_v50  ;;  %v9816_v50 = vld [vmem:[%s14539_s2 + $0x60] sm:$0xff] }
 0x5d4   :  { %7764 = vmatmul.mubr.msk.f32.vlgmr.msra.gmra.mrb[34].mxu1 %vm666_vm4, %v9814_v36  ;;  %8802 = vmatprep.subr.bf16.mxu0 %v10371_v51  ;;  %v9817_v51 = vld [vmem:[%s14539_s2 + $0x68] sm:$0x3]  ;;  %v15084_v36 = vld [vmem:[#allocation151_spill] sm:$0xff] }
 0x5d5   :  { %9076 = vmatpush1.bf16.msra.mxu1 %v13582_v21  ;;  %5265 = vmatprep.mubr.f32.mxu1 %v14839_v52 }
 0x5d6   :  { %9079 = vmatprep.subr.msk.bf16.mxu1 %vm10254_vm3, %v13610_v28 }
 0x5d7   :  { %8804 = vmatpush1.bf16.msra.mxu0 %v10395_v59  ;;  %v9818_v59 = vld [vmem:[%s14539_s2 + $0x70] sm:$0xff] }
 0x5d8   :  { %7765 = vmatmul.mubr.msk.f32.gmra.mrb[36].mxu1 %vm666_vm4, %v9815_v49  ;;  %8806 = vmatprep.subr.bf16.mxu0 %v10399_v0  ;;  %v15072_v0 = vld [vmem:[#allocation5_spill] sm:$0xff] }
 0x5d9   :  { %9082 = vmatpush1.bf16.msk.msra.mxu1 %vm10254_vm3, %v13608_v53  ;;  %5423 = vmatprep.mubr.f32.mxu1 %v14839_v52 }
 0x5da   :  { %9124 = vmatprep.subr.bf16.mxu1 %v13584_v61 }
 0x5db   :  { %8808 = vmatpush1.bf16.msra.mxu0 %v10422_v18  ;;  %v9819_v18 = vld [vmem:[%s14539_s2 + $0x78] sm:$0x3] }
 0x5dc   :  { %7770 = vmatmul.mubr.msk.f32.vlgmr.msra.gmra.mrb[38].mxu1 %vm666_vm4, %v9816_v50  ;;  %8810 = vmatprep.subr.bf16.mxu0 %v10426_v19  ;;  %v15073_v19 = vld [vmem:[#allocation6_spill] sm:$0xff] }
 0x5dd   :  { %9126 = vmatpush1.bf16.msra.mxu1 %v13582_v21  ;;  %5429 = vmatprep.mubr.f32.mxu1 %v14839_v52 }
 0x5de   :  { %9129 = vmatprep.subr.msk.bf16.mxu1 %vm10254_vm3, %v13610_v28 }
 0x5df   :  { %8812 = vmatpush1.bf16.msra.mxu0 %v10449_v35  ;;  %v15074_v35 = vld [vmem:[#allocation7_spill] sm:$0xff] }
 0x5e0   :  { %7771 = vmatmul.mubr.msk.f32.gmra.mrb[40].mxu1 %vm666_vm4, %v9817_v51  ;;  %8814 = vmatprep.subr.bf16.mxu0 %v10453_v39  ;;  %v9820_v39 = vld [vmem:[%s14539_s2 + $0x80] sm:$0xff] }
 0x5e1   :  { %9132 = vmatpush1.bf16.msk.msra.mxu1 %vm10254_vm3, %v13608_v53  ;;  %5587 = vmatprep.mubr.f32.mxu1 %v14839_v52 }
 0x5e2   :  { %9174 = vmatprep.subr.bf16.mxu1 %v13584_v61 }
 0x5e3   :  { %8816 = vmatpush1.bf16.msra.mxu0 %v10476_v47  ;;  %v15075_v47 = vld [vmem:[#allocation8_spill] sm:$0xff] }
 0x5e4   :  { %7776 = vmatmul.mubr.msk.f32.vlgmr.msra.gmra.mrb[42].mxu1 %vm666_vm4, %v9818_v59  ;;  %8818 = vmatprep.subr.bf16.mxu0 %v10480_v48  ;;  %v15076_v48 = vld [vmem:[#allocation9_spill] sm:$0xff] }
 0x5e5   :  { %9176 = vmatpush1.bf16.msra.mxu1 %v13582_v21  ;;  %5593 = vmatprep.mubr.f32.mxu1 %v14839_v52 }
 0x5e6   :  { %9179 = vmatprep.subr.msk.bf16.mxu1 %vm10254_vm3, %v13610_v28 }
 0x5e7   :  { %8820 = vmatpush1.bf16.msra.mxu0 %v15072_v0 }
 0x5e8   :  { %7777 = vmatmul.mubr.msk.f32.gmra.mrb[44].mxu1 %vm666_vm4, %v9819_v18  ;;  %8822 = vmatprep.subr.bf16.mxu0 %v15073_v19 }
 0x5e9   :  { %9182 = vmatpush1.bf16.msk.msra.mxu1 %vm10254_vm3, %v13608_v53  ;;  %5751 = vmatprep.mubr.f32.mxu1 %v14839_v52 }
 0x5ea   :  { %9224 = vmatprep.subr.bf16.mxu1 %v13584_v61 }
 0x5eb   :  { %8824 = vmatpush1.bf16.msra.mxu0 %v15074_v35 }
 0x5ec   :  { %7782 = vmatmul.mubr.msk.f32.vlgmr.msra.gmra.mrb[46].mxu1 %vm666_vm4, %v9820_v39  ;;  %8826 = vmatprep.subr.bf16.mxu0 %v15075_v47 }
 0x5ed   :  { %9226 = vmatpush1.bf16.msra.mxu1 %v13582_v21  ;;  %5757 = vmatprep.mubr.f32.mxu1 %v14839_v52 }
 0x5ee   :  { %9229 = vmatprep.subr.msk.bf16.mxu1 %vm10254_vm3, %v13610_v28  ;;  %v15078_v28 = vld [vmem:[#allocation11_spill] sm:$0xff] }
 0x5ef   :  { %8828 = vmatpush1.bf16.msra.mxu0 %v15076_v48 }
 0x5f0   :  { %v3319_v61 = vpop.f32.mrb[48].mxu0  ;;  %8830 = vmatprep.subr.bf16.mxu0 %v15077_v12  ;;  %7783 = vmatmul.mubr.msk.f32.gmra.mrb[48].mxu1 %vm666_vm4, %v9821_v32 }
 0x5f1   :  { %v3323_v63 = vadd.f32 %v3319_v61, %v13676_v33  ;;  %9232 = vmatpush1.bf16.msk.msra.mxu1 %vm10254_vm3, %v13608_v53  ;;  %v3321_v21 = vpop.f32.mrb[49].mxu0  ;;  %5915 = vmatprep.mubr.f32.mxu1 %v14839_v52  ;;  %v9823_v33 = vld [vmem:[%s14539_s2 + $0x90] sm:$0xff] }
 0x5f2   :  { %9273 = vmatprep.subr.bf16.mxu1 %v14950_v31  ;;  %v9824_v53 = vld [vmem:[%s14540_s3 + $0x290] sm:$0xff] }
 0x5f3   :  { %8832 = vmatpush1.bf16.msra.mxu0 %v15078_v28 }
 0x5f4   :  { %4583 = vmatprep.subr.mxu0 %v9822_v60  ;;  %7788 = vmatmul.mubr.msk.f32.vlgmr.msra.gmra.mrb[50].mxu1 %vm666_vm4, %v9823_v33 }
 0x5f5   :  { %5921 = vmatprep.mubr.f32.mxu1 %v14839_v52  ;;  %9275 = vmatpush1.bf16.msra.mxu1 %v15079_v11  ;;  %v15085_v11 = vld [vmem:[#allocation13_spill] sm:$0xff] }
 0x5f6   :  { %9276 = vmatprep.subr.bf16.mxu1 %v14950_v31 }
 0x5f7   :  { %4584 = vmatpush1.msra.mxu0 %v9824_v53 }
 0x5f8   :  { %8834 = vmatprep.subr.bf16.mxu0 %v15080_v16  ;;  %7789 = vmatmul.mubr.msk.f32.gmra.mrb[52].mxu1 %vm666_vm4, %v9825_v14  ;;  %v15086_v14 = vld [vmem:[#allocation14_spill] sm:$0xff] }
 0x5f9   :  { %9278 = vmatpush1.bf16.msra.mxu1 %v15081_v3  ;;  %v15087_v3 = vld [vmem:[#allocation15_spill] sm:$0xff] }
 0x5fa   :  { %9279 = vmatprep.subr.bf16.mxu1 %v14950_v31 }
 0x5fd   :  { %9281 = vmatpush1.bf16.msra.mxu1 %v15082_v24  ;;  %v15088_v24 = vld [vmem:[#allocation16_spill] sm:$0xff] }
 0x5fe   :  { %9282 = vmatprep.subr.bf16.mxu1 %v14950_v31 }
 0x601   :  { %9284 = vmatpush1.bf16.msra.mxu1 %v15083_v37  ;;  %v15089_v37 = vld [vmem:[#allocation17_spill] sm:$0xff] }
 0x602   :  { %9285 = vmatprep.subr.bf16.mxu1 %v14950_v31 }
 0x605   :  { %9287 = vmatpush1.bf16.msra.mxu1 %v12015_v58 }
 0x606   :  { %9288 = vmatprep.subr.bf16.mxu1 %v14950_v31 }
 0x609   :  { %9290 = vmatpush1.bf16.msra.mxu1 %v15084_v36  ;;  %v15090_v36 = vld [vmem:[#allocation18_spill] sm:$0xff] }
 0x60a   :  { %9291 = vmatprep.subr.bf16.mxu1 %v14950_v31 }
 0x60d   :  { %9293 = vmatpush1.bf16.msra.mxu1 %v12546_v5 }
 0x60e   :  { %9294 = vmatprep.subr.bf16.mxu1 %v14950_v31 }
 0x611   :  { %9296 = vmatpush1.bf16.msra.mxu1 %v12566_v34 }
 0x612   :  { %9297 = vmatprep.subr.bf16.mxu1 %v14950_v31 }
 0x615   :  { %9299 = vmatpush1.bf16.msra.mxu1 %v12586_v62 }
 0x616   :  { %9300 = vmatprep.subr.bf16.mxu1 %v14950_v31 }
 0x618   :  { %v3416_v49 = vpop.f32.mrb[50].mxu0 }
 0x619   :  { %v3420_v58 = vadd.f32 %v3416_v49, %v3323_v63  ;;  %v3418_v50 = vpop.f32.mrb[51].mxu0  ;;  %9302 = vmatpush1.bf16.msra.mxu1 %v12610_v2  ;;  %v15091_v49 = vld [vmem:[#allocation19_spill] sm:$0xff] }
 0x61a   :  { %9303 = vmatprep.subr.bf16.mxu1 %v14950_v31  ;;  %v15093_v50 = vld [vmem:[#allocation21_spill] sm:$0xff] }
 0x640   :  { %v3513_v51 = vpop.f32.mrb[52].mxu0 }
 0x641   :  { %v3517_v59 = vadd.f32 %v3513_v51, %v3420_v58  ;;  %v3515_v5 = vpop.f32.mrb[53].mxu0  ;;  %v15092_v58 = vld [vmem:[#allocation20_spill] sm:$0xff]  ;;  %v15094_v51 = vld [vmem:[#allocation22_spill] sm:$0xff] }
 0x642   :  { %v15096_v5 = vld [vmem:[#allocation24_spill] sm:$0xff] }
 0x668   :  { %v3610_v0 = vpop.f32.mrb[54].mxu0 }
 0x669   :  { %v3614_v18 = vadd.f32 %v3610_v0, %v3517_v59  ;;  %v3612_v19 = vpop.f32.mrb[55].mxu0  ;;  %v15095_v59 = vld [vmem:[#allocation23_spill] sm:$0xff]  ;;  %v15097_v0 = vld [vmem:[#allocation25_spill] sm:$0xff] }
 0x66a   :  { %v15099_v19 = vld [vmem:[#allocation27_spill] sm:$0xff] }
 0x66b   :  { %v3709_v34 = vadd.f32 %v13334_v10, %v3614_v18  ;;  %v15098_v18 = vld [vmem:[#allocation26_spill] sm:$0xff] }
 0x68f   :  { %v13848_v35 = vpop.f32.mrb[22].mxu1 }
 0x690   :  { %v3803_v62 = vpop.f32.mrb[56].mxu0  ;;  %v4771_v39 = vpop.f32.mrb[23].mxu1 }
 0x691   :  { %v13850_v47 = vadd.f32 %v3803_v62, %v3709_v34  ;;  %v3805_v48 = vpop.f32.mrb[57].mxu0  ;;  %v15100_v34 = vld [vmem:[#allocation28_spill] sm:$0xff] }
 0x693   :  { %v13852_v12 = vpop.f32.mrb[24].mxu1 }
 0x694   :  { %v13854_v32 = vpop.f32.mrb[25].mxu1 }
 0x697   :  { %v13856_v21 = vpop.f32.mrb[26].mxu1 }
 0x698   :  { %v4449_v61 = vpop.f32.mrb[58].mxu0  ;;  %v13858_v60 = vpop.f32.mrb[27].mxu1 }
 0x699   :  { %v4451_v2 = vpop.f32.mrb[59].mxu0 }
 0x69b   :  { %v13879_v62 = vpop.f32.mrb[28].mxu1 }
 0x69c   :  { %v4455_v63 = vpop.f32.mrb[60].mxu0  ;;  %v13881_v48 = vpop.f32.mrb[29].mxu1 }
 0x69d   :  { %v4457_v28 = vpop.f32.mrb[61].mxu0 }
 0x6a0   :  { %v4526_v10 = vpop.f32.mrb[62].mxu0 }
 0x6a1   :  { %v4528_v33 = vpop.f32.mrb[63].mxu0 }
 0x6a2   :  { %7740 = vmatprep.mubr.msk.f32.mxu0 %vm928_vm5, %v4528_v33  ;;  %v13885_v33 = vpop.f32.mrb[30].mxu1 }
 0x6a3   :  { %4608 = vmatmul.mubr.f32.vlgmr.msra.gmra.mrb[66].mxu0 %v4526_v10  ;;  %v15102_v10 = vld [vmem:[#allocation30_spill] sm:$0xff] }
 0x6a4   :  { %8836 = vmatpush1.bf16.msra.mxu0 %v15085_v11  ;;  %v4532_v53 = vpop.f32.mrb[64].mxu0  ;;  %v13887_v11 = vpop.f32.mrb[31].mxu1 }
 0x6a5   :  { %v4534_v16 = vpop.f32.mrb[65].mxu0  ;;  %8838 = vmatprep.subr.bf16.mxu0 %v15086_v14  ;;  %v9827_v14 = vld [vmem:[%s14540_s3 + $0x140] sm:$0xff] }
 0x6a6   :  { %7741 = vmatprep.mubr.msk.f32.mxu0 %vm928_vm5, %v4534_v16  ;;  %v9826_v16 = vld [vmem:[%s14540_s3 + $0x148] sm:$0xff] }
 0x6a7   :  { %4614 = vmatmul.mubr.f32.gmra.mrb[68].mxu0 %v4532_v53  ;;  %v15103_v53 = vld [vmem:[#allocation31_spill] sm:$0xff] }
 0x6a8   :  { %8840 = vmatpush1.bf16.msra.mxu0 %v15087_v3  ;;  %7742 = vmatprep.mubr.msk.f32.mxu0 %vm928_vm5, %v4451_v2  ;;  %v15101_v2 = vld [vmem:[#allocation29_spill] sm:$0xff]  ;;  %v15104_v3 = vld [vmem:[#allocation32_spill] sm:$0xff] }
 0x6a9   :  { %8842 = vmatprep.subr.bf16.mxu0 %v15088_v24  ;;  %v15105_v24 = vld [vmem:[#allocation33_spill] sm:$0xff] }
 0x6ac   :  { %8844 = vmatpush1.bf16.msra.mxu0 %v15089_v37  ;;  %v15106_v37 = vld [vmem:[#allocation34_spill] sm:$0xff] }
 0x6ad   :  { %8846 = vmatprep.subr.bf16.mxu0 %v15090_v36  ;;  %v15107_v36 = vld [vmem:[#allocation35_spill] sm:$0xff] }
 0x6b0   :  { %8848 = vmatpush1.bf16.msra.mxu0 %v15091_v49  ;;  %v15108_v49 = vld [vmem:[#allocation36_spill] sm:$0xff] }
 0x6b1   :  { %8850 = vmatprep.subr.bf16.mxu0 %v15092_v58  ;;  %v15109_v58 = vld [vmem:[#allocation37_spill] sm:$0xff] }
 0x6b4   :  { %8852 = vmatpush1.bf16.msra.mxu0 %v15093_v50  ;;  %v15110_v50 = vld [vmem:[#allocation38_spill] sm:$0xff] }
 0x6b5   :  { %8854 = vmatprep.subr.bf16.mxu0 %v15094_v51  ;;  %v15112_v51 = vld [vmem:[#allocation40_spill] sm:$0xff] }
 0x6b8   :  { %8856 = vmatpush1.bf16.msra.mxu0 %v15095_v59  ;;  %v15114_v59 = vld [vmem:[#allocation42_spill] sm:$0xff] }
 0x6b9   :  { %8858 = vmatprep.subr.bf16.mxu0 %v15096_v5  ;;  %v15115_v5 = vld [vmem:[#allocation43_spill] sm:$0xff] }
 0x6bc   :  { %8860 = vmatpush1.bf16.msra.mxu0 %v15097_v0  ;;  %v15117_v0 = vld [vmem:[#allocation45_spill] sm:$0xff] }
 0x6bd   :  { %8862 = vmatprep.subr.bf16.mxu0 %v15098_v18  ;;  %v15119_v18 = vld [vmem:[#allocation47_spill] sm:$0xff] }
 0x6c0   :  { %8864 = vmatpush1.bf16.msra.mxu0 %v15099_v19  ;;  %v15120_v19 = vld [vmem:[#allocation48_spill] sm:$0xff] }
 0x6c1   :  { %8866 = vmatprep.subr.bf16.mxu0 %v15100_v34  ;;  %v13915_v34 = vpop.f32.mrb[32].mxu1 }
 0x6c4   :  { %8868 = vmatpush1.bf16.msra.mxu0 %v15101_v2  ;;  %v13917_v2 = vpop.f32.mrb[33].mxu1 }
 0x6c5   :  { %8870 = vmatprep.subr.bf16.mxu0 %v15102_v10  ;;  %v15121_v10 = vld [vmem:[#allocation49_spill] sm:$0xff] }
 0x6c8   :  { %8872 = vmatpush1.bf16.msra.mxu0 %v15103_v53  ;;  %v15122_v53 = vld [vmem:[#allocation50_spill] sm:$0xff] }
 0x6c9   :  { %4666 = vmatprep.subr.mxu0 %v9826_v16  ;;  %v13921_v16 = vpop.f32.mrb[34].mxu1 }
 0x6cc   :  { %4667 = vmatpush1.msra.mxu0 %v9827_v14  ;;  %v13923_v14 = vpop.f32.mrb[35].mxu1 }
 0x6cd   :  { %4691 = vmatmul.mubr.f32.vlgmr.msra.gmra.mrb[66].mxu0 %v4449_v61  ;;  %8884 = vmatprep.subr.bf16.mxu0 %v15104_v3  ;;  %v15111_v61 = vld [vmem:[#allocation39_spill] sm:$0xff] }
 0x6ce   :  { %7743 = vmatprep.mubr.msk.f32.mxu0 %vm928_vm5, %v4457_v28  ;;  %8886 = vmatpush1.bf16.msra.mxu0 %v15105_v24  ;;  %v15113_v28 = vld [vmem:[#allocation41_spill] sm:$0xff]  ;;  %v15123_v3 = vld [vmem:[#allocation51_spill] sm:$0xff] }
 0x6cf   :  { %8888 = vmatprep.subr.bf16.mxu0 %v15106_v37  ;;  %v9828_v24 = vld [vmem:[%s14540_s3 + $0x3e8] sm:$0xff]  ;;  %v9829_v37 = vld [vmem:[%s14540_s3 + $0x3e0] sm:$0xff] }
 0x6d1   :  { %4697 = vmatmul.mubr.f32.gmra.mrb[68].mxu0 %v4455_v63  ;;  %v15116_v63 = vld [vmem:[#allocation44_spill] sm:$0xff] }
 0x6d2   :  { %8890 = vmatpush1.bf16.msra.mxu0 %v15107_v36  ;;  %7748 = vmatprep.mubr.msk.f32.mxu0 %vm928_vm5, %v4771_v39  ;;  %v15118_v39 = vld [vmem:[#allocation46_spill] sm:$0xff]  ;;  %v15124_v36 = vld [vmem:[#allocation52_spill] sm:$0xff] }
 0x6d3   :  { %8892 = vmatprep.subr.bf16.mxu0 %v15108_v49  ;;  %v15125_v49 = vld [vmem:[#allocation53_spill] sm:$0xff] }
 0x6d6   :  { %8894 = vmatpush1.bf16.msra.mxu0 %v15109_v58  ;;  %v15126_v58 = vld [vmem:[#allocation54_spill] sm:$0xff] }
 0x6d7   :  { %8896 = vmatprep.subr.bf16.mxu0 %v15110_v50  ;;  %v15127_v50 = vld [vmem:[#allocation55_spill] sm:$0xff] }
 0x6da   :  { %8898 = vmatpush1.bf16.msra.mxu0 %v15111_v61  ;;  %v15128_v61 = vld [vmem:[#allocation56_spill] sm:$0xff] }
 0x6db   :  { %8900 = vmatprep.subr.bf16.mxu0 %v15112_v51  ;;  %v15129_v51 = vld [vmem:[#allocation57_spill] sm:$0xff] }
 0x6de   :  { %8902 = vmatpush1.bf16.msra.mxu0 %v15113_v28  ;;  %v15131_v28 = vld [vmem:[#allocation59_spill] sm:$0xff] }
 0x6df   :  { %8904 = vmatprep.subr.bf16.mxu0 %v15114_v59  ;;  %v15132_v59 = vld [vmem:[#allocation60_spill] sm:$0xff] }
 0x6e2   :  { %8906 = vmatpush1.bf16.msra.mxu0 %v15115_v5  ;;  %v15134_v5 = vld [vmem:[#allocation62_spill] sm:$0xff] }
 0x6e3   :  { %8908 = vmatprep.subr.bf16.mxu0 %v15116_v63  ;;  %v15136_v63 = vld [vmem:[#allocation64_spill] sm:$0xff] }
 0x6e6   :  { %8910 = vmatpush1.bf16.msra.mxu0 %v15117_v0  ;;  %v15137_v0 = vld [vmem:[#allocation65_spill] sm:$0xff] }
 0x6e7   :  { %8912 = vmatprep.subr.bf16.mxu0 %v15118_v39  ;;  %v15139_v39 = vld [vmem:[#allocation67_spill] sm:$0xff] }
 0x6ea   :  { %8914 = vmatpush1.bf16.msra.mxu0 %v15119_v18  ;;  %v15140_v18 = vld [vmem:[#allocation68_spill] sm:$0xff] }
 0x6eb   :  { %8916 = vmatprep.subr.bf16.mxu0 %v15120_v19  ;;  %v13955_v19 = vpop.f32.mrb[36].mxu1 }
 0x6ee   :  { %8918 = vmatpush1.bf16.msra.mxu0 %v15121_v10  ;;  %v13957_v10 = vpop.f32.mrb[37].mxu1 }
 0x6ef   :  { %8920 = vmatprep.subr.bf16.mxu0 %v15122_v53  ;;  %v15141_v53 = vld [vmem:[#allocation69_spill] sm:$0xff] }
 0x6f2   :  { %8922 = vmatpush1.bf16.msra.mxu0 %v15123_v3  ;;  %v15142_v3 = vld [vmem:[#allocation70_spill] sm:$0xff] }
 0x6f3   :  { %4826 = vmatprep.subr.mxu0 %v9828_v24  ;;  %v13961_v24 = vpop.f32.mrb[38].mxu1 }
 0x6f6   :  { %4827 = vmatpush1.msra.mxu0 %v9829_v37  ;;  %v13963_v37 = vpop.f32.mrb[39].mxu1 }
 0x6f7   :  { %4851 = vmatmul.mubr.f32.vlgmr.msra.gmra.mrb[66].mxu0 %v13848_v35  ;;  %8934 = vmatprep.subr.bf16.mxu0 %v15124_v36  ;;  %v15130_v35 = vld [vmem:[#allocation58_spill] sm:$0xff]  ;;  %v15143_v36 = vld [vmem:[#allocation71_spill] sm:$0xff] }
 0x6f8   :  { %8936 = vmatpush1.bf16.msra.mxu0 %v15125_v49  ;;  %7749 = vmatprep.mubr.msk.f32.mxu0 %vm928_vm5, %v13854_v32  ;;  %v15133_v32 = vld [vmem:[#allocation61_spill] sm:$0xff]  ;;  %v9830_v49 = vld [vmem:[%s14540_s3 + $0x538] sm:$0xff] }
 0x6f9   :  { %8938 = vmatprep.subr.bf16.mxu0 %v15126_v58  ;;  %v9831_v58 = vld [vmem:[%s14540_s3 + $0x530] sm:$0xff] }
 0x6fb   :  { %4857 = vmatmul.mubr.f32.gmra.mrb[68].mxu0 %v13852_v12  ;;  %v15135_v12 = vld [vmem:[#allocation63_spill] sm:$0xff] }
 0x6fc   :  { %8940 = vmatpush1.bf16.msra.mxu0 %v15127_v50  ;;  %7754 = vmatprep.mubr.msk.f32.mxu0 %vm928_vm5, %v13858_v60  ;;  %v15138_v60 = vld [vmem:[#allocation66_spill] sm:$0xff]  ;;  %v15144_v50 = vld [vmem:[#allocation72_spill] sm:$0xff] }
 0x6fd   :  { %8942 = vmatprep.subr.bf16.mxu0 %v15128_v61  ;;  %v15145_v61 = vld [vmem:[#allocation73_spill] sm:$0xff] }
 0x700   :  { %8944 = vmatpush1.bf16.msra.mxu0 %v15129_v51  ;;  %v15146_v51 = vld [vmem:[#allocation74_spill] sm:$0xff] }
 0x701   :  { %8946 = vmatprep.subr.bf16.mxu0 %v15130_v35  ;;  %v15147_v35 = vld [vmem:[#allocation75_spill] sm:$0xff] }
 0x704   :  { %8948 = vmatpush1.bf16.msra.mxu0 %v15131_v28  ;;  %v15148_v28 = vld [vmem:[#allocation76_spill] sm:$0xff] }
 0x705   :  { %8950 = vmatprep.subr.bf16.mxu0 %v15132_v59  ;;  %v15149_v59 = vld [vmem:[#allocation77_spill] sm:$0xff] }
 0x708   :  { %8952 = vmatpush1.bf16.msra.mxu0 %v15133_v32  ;;  %v15151_v32 = vld [vmem:[#allocation79_spill] sm:$0xff] }
 0x709   :  { %8954 = vmatprep.subr.bf16.mxu0 %v15134_v5  ;;  %v15152_v5 = vld [vmem:[#allocation80_spill] sm:$0xff] }
 0x70c   :  { %8956 = vmatpush1.bf16.msra.mxu0 %v15135_v12  ;;  %v15154_v12 = vld [vmem:[#allocation82_spill] sm:$0xff] }
 0x70d   :  { %8958 = vmatprep.subr.bf16.mxu0 %v15136_v63  ;;  %v15156_v63 = vld [vmem:[#allocation84_spill] sm:$0xff] }
 0x710   :  { %8960 = vmatpush1.bf16.msra.mxu0 %v15137_v0  ;;  %v15157_v0 = vld [vmem:[#allocation85_spill] sm:$0xff] }
 0x711   :  { %8962 = vmatprep.subr.bf16.mxu0 %v15138_v60  ;;  %v15159_v60 = vld [vmem:[#allocation87_spill] sm:$0xff] }
 0x714   :  { %8964 = vmatpush1.bf16.msra.mxu0 %v15139_v39  ;;  %v15160_v39 = vld [vmem:[#allocation88_spill] sm:$0xff] }
 0x715   :  { %8966 = vmatprep.subr.bf16.mxu0 %v15140_v18  ;;  %v13995_v18 = vpop.f32.mrb[40].mxu1 }
 0x718   :  { %8968 = vmatpush1.bf16.msra.mxu0 %v15141_v53  ;;  %v13997_v53 = vpop.f32.mrb[41].mxu1 }
 0x719   :  { %8970 = vmatprep.subr.bf16.mxu0 %v15142_v3  ;;  %v15161_v3 = vld [vmem:[#allocation89_spill] sm:$0xff] }
 0x71c   :  { %8972 = vmatpush1.bf16.msra.mxu0 %v15143_v36  ;;  %v15162_v36 = vld [vmem:[#allocation90_spill] sm:$0xff] }
 0x71d   :  { %4990 = vmatprep.subr.mxu0 %v9830_v49  ;;  %v14001_v49 = vpop.f32.mrb[42].mxu1 }
 0x720   :  { %4991 = vmatpush1.msra.mxu0 %v9831_v58  ;;  %v14003_v58 = vpop.f32.mrb[43].mxu1 }
 0x721   :  { %5015 = vmatmul.mubr.f32.vlgmr.msra.gmra.mrb[66].mxu0 %v13856_v21  ;;  %8984 = vmatprep.subr.bf16.mxu0 %v15144_v50  ;;  %v15150_v21 = vld [vmem:[#allocation78_spill] sm:$0xff]  ;;  %v15163_v50 = vld [vmem:[#allocation91_spill] sm:$0xff] }
 0x722   :  { %8986 = vmatpush1.bf16.msra.mxu0 %v15145_v61  ;;  %7755 = vmatprep.mubr.msk.f32.mxu0 %vm928_vm5, %v13881_v48  ;;  %v15153_v48 = vld [vmem:[#allocation81_spill] sm:$0xff] }
 0x723   :  { %8988 = vmatprep.subr.bf16.mxu0 %v15146_v51  ;;  %v9832_v61 = vld [vmem:[%s14540_s3 + $0x688] sm:$0xff]  ;;  %v9833_v51 = vld [vmem:[%s14540_s3 + $0x680] sm:$0xff] }
 0x725   :  { %5021 = vmatmul.mubr.f32.gmra.mrb[68].mxu0 %v13879_v62  ;;  %v15155_v62 = vld [vmem:[#allocation83_spill] sm:$0xff] }
 0x726   :  { %8990 = vmatpush1.bf16.msra.mxu0 %v15147_v35  ;;  %7760 = vmatprep.mubr.msk.f32.mxu0 %vm928_vm5, %v13887_v11  ;;  %v15158_v11 = vld [vmem:[#allocation86_spill] sm:$0xff]  ;;  %v15164_v35 = vld [vmem:[#allocation92_spill] sm:$0xff] }
 0x727   :  { %8992 = vmatprep.subr.bf16.mxu0 %v15148_v28  ;;  %v15165_v28 = vld [vmem:[#allocation93_spill] sm:$0xff] }
 0x72a   :  { %8994 = vmatpush1.bf16.msra.mxu0 %v15149_v59  ;;  %v15166_v59 = vld [vmem:[#allocation94_spill] sm:$0xff] }
 0x72b   :  { %8996 = vmatprep.subr.bf16.mxu0 %v15150_v21  ;;  %v15167_v21 = vld [vmem:[#allocation95_spill] sm:$0xff] }
 0x72e   :  { %8998 = vmatpush1.bf16.msra.mxu0 %v15151_v32  ;;  %v15168_v32 = vld [vmem:[#allocation96_spill] sm:$0xff] }
 0x72f   :  { %9000 = vmatprep.subr.bf16.mxu0 %v15152_v5  ;;  %v15169_v5 = vld [vmem:[#allocation97_spill] sm:$0xff] }
 0x732   :  { %9002 = vmatpush1.bf16.msra.mxu0 %v15153_v48  ;;  %v15171_v48 = vld [vmem:[#allocation99_spill] sm:$0xff] }
 0x733   :  { %9004 = vmatprep.subr.bf16.mxu0 %v15154_v12  ;;  %v15172_v12 = vld [vmem:[#allocation100_spill] sm:$0xff] }
 0x736   :  { %9006 = vmatpush1.bf16.msra.mxu0 %v15155_v62  ;;  %v15174_v62 = vld [vmem:[#allocation102_spill] sm:$0xff] }
 0x737   :  { %9008 = vmatprep.subr.bf16.mxu0 %v15156_v63  ;;  %v15176_v63 = vld [vmem:[#allocation104_spill] sm:$0xff] }
 0x73a   :  { %9010 = vmatpush1.bf16.msra.mxu0 %v15157_v0  ;;  %v15177_v0 = vld [vmem:[#allocation105_spill] sm:$0xff] }
 0x73b   :  { %9012 = vmatprep.subr.bf16.mxu0 %v15158_v11  ;;  %v15179_v11 = vld [vmem:[#allocation107_spill] sm:$0xff] }
 0x73e   :  { %9014 = vmatpush1.bf16.msra.mxu0 %v15159_v60  ;;  %v15180_v60 = vld [vmem:[#allocation108_spill] sm:$0xff] }
 0x73f   :  { %9016 = vmatprep.subr.bf16.mxu0 %v15160_v39  ;;  %v14035_v39 = vpop.f32.mrb[44].mxu1 }
 0x742   :  { %9018 = vmatpush1.bf16.msra.mxu0 %v15161_v3  ;;  %v14037_v3 = vpop.f32.mrb[45].mxu1 }
 0x743   :  { %9020 = vmatprep.subr.bf16.mxu0 %v15162_v36  ;;  %v15181_v36 = vld [vmem:[#allocation109_spill] sm:$0xff] }
 0x746   :  { %9022 = vmatpush1.bf16.msra.mxu0 %v15163_v50  ;;  %v15182_v50 = vld [vmem:[#allocation110_spill] sm:$0xff] }
 0x747   :  { %5154 = vmatprep.subr.mxu0 %v9832_v61  ;;  %v14041_v61 = vpop.f32.mrb[46].mxu1 }
 0x74a   :  { %5155 = vmatpush1.msra.mxu0 %v9833_v51  ;;  %v14043_v51 = vpop.f32.mrb[47].mxu1 }
 0x74b   :  { %5179 = vmatmul.mubr.f32.vlgmr.msra.gmra.mrb[66].mxu0 %v13885_v33  ;;  %9034 = vmatprep.subr.bf16.mxu0 %v15164_v35  ;;  %v15170_v33 = vld [vmem:[#allocation98_spill] sm:$0xff]  ;;  %v15183_v35 = vld [vmem:[#allocation111_spill] sm:$0xff] }
 0x74c   :  { %9036 = vmatpush1.bf16.msra.mxu0 %v15165_v28  ;;  %7761 = vmatprep.mubr.msk.f32.mxu0 %vm928_vm5, %v13917_v2  ;;  %v15173_v2 = vld [vmem:[#allocation101_spill] sm:$0xff]  ;;  %v9834_v28 = vld [vmem:[%s14540_s3 + $0x7d8] sm:$0xff] }
 0x74d   :  { %9038 = vmatprep.subr.bf16.mxu0 %v15166_v59  ;;  %v9835_v59 = vld [vmem:[%s14540_s3 + $0x7d0] sm:$0xff] }
 0x74f   :  { %5185 = vmatmul.mubr.f32.gmra.mrb[68].mxu0 %v13915_v34  ;;  %v15175_v34 = vld [vmem:[#allocation103_spill] sm:$0xff] }
 0x750   :  { %9040 = vmatpush1.bf16.msra.mxu0 %v15167_v21  ;;  %7766 = vmatprep.mubr.msk.f32.mxu0 %vm928_vm5, %v13923_v14  ;;  %v15178_v14 = vld [vmem:[#allocation106_spill] sm:$0xff]  ;;  %v15184_v21 = vld [vmem:[#allocation112_spill] sm:$0xff] }
 0x751   :  { %9042 = vmatprep.subr.bf16.mxu0 %v15168_v32  ;;  %v15185_v32 = vld [vmem:[#allocation113_spill] sm:$0xff] }
 0x754   :  { %9044 = vmatpush1.bf16.msra.mxu0 %v15169_v5  ;;  %v15186_v5 = vld [vmem:[#allocation114_spill] sm:$0xff] }
 0x755   :  { %9046 = vmatprep.subr.bf16.mxu0 %v15170_v33  ;;  %v15187_v33 = vld [vmem:[#allocation115_spill] sm:$0xff] }
 0x758   :  { %9048 = vmatpush1.bf16.msra.mxu0 %v15171_v48  ;;  %v15188_v48 = vld [vmem:[#allocation116_spill] sm:$0xff] }
 0x759   :  { %9050 = vmatprep.subr.bf16.mxu0 %v15172_v12  ;;  %v15189_v12 = vld [vmem:[#allocation117_spill] sm:$0xff] }
 0x75c   :  { %9052 = vmatpush1.bf16.msra.mxu0 %v15173_v2  ;;  %v15191_v2 = vld [vmem:[#allocation119_spill] sm:$0xff] }
 0x75d   :  { %9054 = vmatprep.subr.bf16.mxu0 %v15174_v62  ;;  %v15192_v62 = vld [vmem:[#allocation120_spill] sm:$0xff] }
 0x760   :  { %9056 = vmatpush1.bf16.msra.mxu0 %v15175_v34  ;;  %v15194_v34 = vld [vmem:[#allocation122_spill] sm:$0xff] }
 0x761   :  { %9058 = vmatprep.subr.bf16.mxu0 %v15176_v63  ;;  %v15196_v63 = vld [vmem:[#allocation124_spill] sm:$0xff] }
 0x764   :  { %9060 = vmatpush1.bf16.msra.mxu0 %v15177_v0  ;;  %v15197_v0 = vld [vmem:[#allocation125_spill] sm:$0xff] }
 0x765   :  { %9062 = vmatprep.subr.bf16.mxu0 %v15178_v14  ;;  %v15199_v14 = vld [vmem:[#allocation127_spill] sm:$0xff] }
 0x768   :  { %9064 = vmatpush1.bf16.msra.mxu0 %v15179_v11  ;;  %v15200_v11 = vld [vmem:[#allocation128_spill] sm:$0xff] }
 0x769   :  { %9066 = vmatprep.subr.bf16.mxu0 %v15180_v60  ;;  %v14075_v60 = vpop.f32.mrb[48].mxu1 }
 0x76c   :  { %9068 = vmatpush1.bf16.msra.mxu0 %v15181_v36  ;;  %v14077_v36 = vpop.f32.mrb[49].mxu1 }
 0x76d   :  { %9070 = vmatprep.subr.bf16.mxu0 %v15182_v50  ;;  %v15201_v50 = vld [vmem:[#allocation129_spill] sm:$0xff] }
 0x770   :  { %9072 = vmatpush1.bf16.msra.mxu0 %v15183_v35  ;;  %v15202_v35 = vld [vmem:[#allocation130_spill] sm:$0xff] }
 0x771   :  { %5318 = vmatprep.subr.mxu0 %v9834_v28  ;;  %v14081_v28 = vpop.f32.mrb[50].mxu1 }
 0x774   :  { %5319 = vmatpush1.msra.mxu0 %v9835_v59  ;;  %v14083_v59 = vpop.f32.mrb[51].mxu1 }
 0x775   :  { %5343 = vmatmul.mubr.f32.vlgmr.msra.gmra.mrb[66].mxu0 %v13921_v16  ;;  %9084 = vmatprep.subr.bf16.mxu0 %v15184_v21  ;;  %v15190_v16 = vld [vmem:[#allocation118_spill] sm:$0xff]  ;;  %v15203_v21 = vld [vmem:[#allocation131_spill] sm:$0xff] }
 0x776   :  { %9086 = vmatpush1.bf16.msra.mxu0 %v15185_v32  ;;  %7767 = vmatprep.mubr.msk.f32.mxu0 %vm928_vm5, %v13957_v10  ;;  %v15193_v10 = vld [vmem:[#allocation121_spill] sm:$0xff] }
 0x777   :  { %9088 = vmatprep.subr.bf16.mxu0 %v15186_v5  ;;  %v9836_v32 = vld [vmem:[%s14540_s3 + $0x928] sm:$0xff]  ;;  %v14089_v5 = vpop.f32.mrb[52].mxu1 }
 0x779   :  { %5349 = vmatmul.mubr.f32.gmra.mrb[68].mxu0 %v13955_v19  ;;  %v15195_v19 = vld [vmem:[#allocation123_spill] sm:$0xff] }
 0x77a   :  { %9090 = vmatpush1.bf16.msra.mxu0 %v15187_v33  ;;  %7772 = vmatprep.mubr.msk.f32.mxu0 %vm928_vm5, %v13963_v37  ;;  %v15198_v37 = vld [vmem:[#allocation126_spill] sm:$0xff]  ;;  %v9837_v33 = vld [vmem:[%s14540_s3 + $0x920] sm:$0xff] }
 0x77b   :  { %9092 = vmatprep.subr.bf16.mxu0 %v15188_v48  ;;  %v14094_v48 = vpop.f32.mrb[53].mxu1 }
 0x77e   :  { %9094 = vmatpush1.bf16.msra.mxu0 %v15189_v12  ;;  %v15204_v12 = vld [vmem:[#allocation132_spill] sm:$0xff] }
 0x77f   :  { %9096 = vmatprep.subr.bf16.mxu0 %v15190_v16  ;;  %v15205_v16 = vld [vmem:[#allocation133_spill] sm:$0xff] }
 0x782   :  { %9098 = vmatpush1.bf16.msra.mxu0 %v15191_v2  ;;  %v15206_v2 = vld [vmem:[#allocation134_spill] sm:$0xff] }
 0x783   :  { %9100 = vmatprep.subr.bf16.mxu0 %v15192_v62  ;;  %v15207_v62 = vld [vmem:[#allocation135_spill] sm:$0xff] }
 0x786   :  { %9102 = vmatpush1.bf16.msra.mxu0 %v15193_v10  ;;  %v15208_v10 = vld [vmem:[#allocation136_spill] sm:$0xff] }
 0x787   :  { %9104 = vmatprep.subr.bf16.mxu0 %v15194_v34  ;;  %v15209_v34 = vld [vmem:[#allocation138_spill] sm:$0xff] }
 0x78a   :  { %9106 = vmatpush1.bf16.msra.mxu0 %v15195_v19  ;;  %v15211_v19 = vld [vmem:[#allocation141_spill] sm:$0xff] }
 0x78b   :  { %9108 = vmatprep.subr.bf16.mxu0 %v15196_v63  ;;  %v15212_v63 = vld [vmem:[#allocation142_spill] sm:$0xff] }
 0x78e   :  { %9110 = vmatpush1.bf16.msra.mxu0 %v15197_v0  ;;  %v15214_v0 = vld [vmem:[#allocation145_spill] sm:$0xff] }
 0x78f   :  { %9112 = vmatprep.subr.bf16.mxu0 %v15198_v37  ;;  %v15216_v37 = vld [vmem:[#allocation148_spill] sm:$0xff] }
 0x792   :  { %9114 = vmatpush1.bf16.msra.mxu0 %v15199_v14  ;;  %v15217_v14 = vld [vmem:[#allocation149_spill] sm:$0xff] }
 0x793   :  { %9116 = vmatprep.subr.bf16.mxu0 %v15200_v11  ;;  %v15219_v11 = vld [vmem:[#allocation152_spill] sm:$0xff] }
 0x796   :  { %9118 = vmatpush1.bf16.msra.mxu0 %v15201_v50  ;;  %v15220_v50 = vld [vmem:[#allocation153_spill] sm:$0xff] }
 0x797   :  { %9120 = vmatprep.subr.bf16.mxu0 %v15202_v35  ;;  %v15221_v35 = vld [vmem:[#allocation154_spill] sm:$0xff] }
 0x79a   :  { %9122 = vmatpush1.bf16.msra.mxu0 %v15203_v21  ;;  %v15222_v21 = vld [vmem:[#allocation155_spill] sm:$0xff] }
 0x79b   :  { %5482 = vmatprep.subr.mxu0 %v9836_v32  ;;  %v15223_v32 = vld [vmem:[#allocation156_spill] sm:$0xff] }
 0x79e   :  { %5483 = vmatpush1.msra.mxu0 %v9837_v33  ;;  %v9838_v33 = vld [vmem:[%s14540_s3 + $0xa78] sm:$0xff] }
 0x79f   :  { %5507 = vmatmul.mubr.f32.vlgmr.msra.gmra.mrb[66].mxu0 %v13961_v24  ;;  %9134 = vmatprep.subr.bf16.mxu0 %v15204_v12  ;;  %v15210_v24 = vld [vmem:[#allocation139_spill] sm:$0xff] }
 0x7a0   :  { %9136 = vmatpush1.bf16.msra.mxu0 %v15205_v16  ;;  %7773 = vmatprep.mubr.msk.f32.mxu0 %vm928_vm5, %v13997_v53  ;;  %v15213_v53 = vld [vmem:[#allocation144_spill] sm:$0xff]  ;;  %v9839_v12 = vld [vmem:[%s14540_s3 + $0xa70] sm:$0xff]  ;;  %v15224_v16 = vld [vmem:[#allocation157_spill] sm:$0xff] }
 0x7a1   :  { %9138 = vmatprep.subr.bf16.mxu0 %v15206_v2  ;;  %v15225_v2 = vld [vmem:[#allocation158_spill] sm:$0xff] }
 0x7a3   :  { %5513 = vmatmul.mubr.f32.gmra.mrb[68].mxu0 %v13995_v18  ;;  %v15215_v18 = vld [vmem:[#allocation147_spill] sm:$0xff] }
 0x7a4   :  { %9140 = vmatpush1.bf16.msra.mxu0 %v15207_v62  ;;  %7778 = vmatprep.mubr.msk.f32.mxu0 %vm928_vm5, %v14003_v58  ;;  %v15218_v58 = vld [vmem:[#allocation150_spill] sm:$0xff] }
 0x7a5   :  { %9142 = vmatprep.subr.bf16.mxu0 %v15208_v10  ;;  %v15233_v62 = vld [vmem:[#allocation166_spill] sm:$0xff]  ;;  %v15235_v10 = vld [vmem:[#allocation168_spill] sm:$0xff] }
 0x7a8   :  { %9144 = vmatpush1.bf16.msra.mxu0 %v15209_v34  ;;  %v15236_v34 = vld [vmem:[#allocation169_spill] sm:$0xff] }
 0x7a9   :  { %9146 = vmatprep.subr.bf16.mxu0 %v15210_v24  ;;  %v15237_v24 = vld [vmem:[#allocation170_spill] sm:$0xff] }
 0x7ac   :  { %9148 = vmatpush1.bf16.msra.mxu0 %v15211_v19  ;;  %v15238_v19 = vld [vmem:[#allocation171_spill] sm:$0xff] }
 0x7ad   :  { %9150 = vmatprep.subr.bf16.mxu0 %v15212_v63  ;;  %v15239_v63 = vld [vmem:[#allocation172_spill] sm:$0xff] }
 0x7b0   :  { %9152 = vmatpush1.bf16.msra.mxu0 %v15213_v53  ;;  %v9840_v53 = vld [vmem:[%s14540_s3 + $0xbc8] sm:$0xff] }
 0x7b1   :  { %9154 = vmatprep.subr.bf16.mxu0 %v15214_v0  ;;  %v9841_v0 = vld [vmem:[%s14540_s3 + $0xbc0] sm:$0xff] }
 0x7b4   :  { %9156 = vmatpush1.bf16.msra.mxu0 %v15215_v18  ;;  %v15240_v18 = vld [vmem:[#allocation173_spill] sm:$0xff] }
 0x7b5   :  { %9158 = vmatprep.subr.bf16.mxu0 %v15216_v37  ;;  %v15241_v37 = vld [vmem:[#allocation174_spill] sm:$0xff] }
 0x7b8   :  { %9160 = vmatpush1.bf16.msra.mxu0 %v15217_v14  ;;  %v15249_v14 = vld [vmem:[#allocation182_spill] sm:$0xff] }
 0x7b9   :  { %9162 = vmatprep.subr.bf16.mxu0 %v15218_v58  ;;  %v15251_v58 = vld [vmem:[#allocation184_spill] sm:$0xff] }
 0x7bc   :  { %9164 = vmatpush1.bf16.msra.mxu0 %v15219_v11  ;;  %v15252_v11 = vld [vmem:[#allocation185_spill] sm:$0xff] }
 0x7bd   :  { %9166 = vmatprep.subr.bf16.mxu0 %v15220_v50  ;;  %v15253_v50 = vld [vmem:[#allocation186_spill] sm:$0xff] }
 0x7c0   :  { %9168 = vmatpush1.bf16.msra.mxu0 %v15221_v35  ;;  %v15254_v35 = vld [vmem:[#allocation187_spill] sm:$0xff] }
 0x7c1   :  { %9170 = vmatprep.subr.bf16.mxu0 %v15222_v21  ;;  %v15255_v21 = vld [vmem:[#allocation188_spill] sm:$0xff] }
 0x7c4   :  { %9172 = vmatpush1.bf16.msra.mxu0 %v15223_v32  ;;  %v9842_v32 = vld [vmem:[%s14540_s3 + $0xd18] sm:$0xff] }
 0x7c5   :  { %5646 = vmatprep.subr.mxu0 %v9838_v33  ;;  %v9843_v33 = vld [vmem:[%s14540_s3 + $0xd10] sm:$0xff] }
 0x7c8   :  { %5647 = vmatpush1.msra.mxu0 %v9839_v12  ;;  %v15256_v12 = vld [vmem:[#allocation189_spill] sm:$0xff] }
 0x7c9   :  { %5671 = vmatmul.mubr.f32.vlgmr.msra.gmra.mrb[66].mxu0 %v14001_v49  ;;  %9184 = vmatprep.subr.bf16.mxu0 %v12110_v57  ;;  %v15226_v49 = vld [vmem:[#allocation159_spill] sm:$0xff]  ;;  %v15227_v57 = vld [vmem:[#allocation160_spill] sm:$0xff] }
 0x7ca   :  { %9186 = vmatpush1.bf16.msra.mxu0 %v12112_v30  ;;  %7779 = vmatprep.mubr.msk.f32.mxu0 %vm928_vm5, %v14037_v3  ;;  %v15228_v30 = vld [vmem:[#allocation161_spill] sm:$0xff]  ;;  %v15229_v3 = vld [vmem:[#allocation162_spill] sm:$0xff] }
 0x7cb   :  { %9188 = vmatprep.subr.bf16.mxu0 %v12114_v17  ;;  %v15230_v17 = vld [vmem:[#allocation163_spill] sm:$0xff] }
 0x7cd   :  { %5677 = vmatmul.mubr.f32.gmra.mrb[68].mxu0 %v14035_v39  ;;  %v15231_v39 = vld [vmem:[#allocation164_spill] sm:$0xff] }
 0x7ce   :  { %9190 = vmatpush1.bf16.msra.mxu0 %v12131_v42  ;;  %7784 = vmatprep.mubr.msk.f32.mxu0 %vm928_vm5, %v14043_v51  ;;  %v15232_v42 = vld [vmem:[#allocation165_spill] sm:$0xff]  ;;  %v15234_v51 = vld [vmem:[#allocation167_spill] sm:$0xff] }
 0x7cf   :  { %9192 = vmatprep.subr.bf16.mxu0 %v15224_v16  ;;  %v15257_v16 = vld [vmem:[#allocation190_spill] sm:$0xff] }
 0x7d2   :  { %9194 = vmatpush1.bf16.msra.mxu0 %v15225_v2  ;;  %v15258_v2 = vld [vmem:[#allocation191_spill] sm:$0xff] }
 0x7d3   :  { %9196 = vmatprep.subr.bf16.mxu0 %v15226_v49  ;;  %v15260_v49 = vld [vmem:[#allocation193_spill] sm:$0xff] }
 0x7d6   :  { %9198 = vmatpush1.bf16.msra.mxu0 %v15227_v57  ;;  %v15263_v57 = vld [vmem:[#allocation196_spill] sm:$0xff] }
 0x7d7   :  { %9200 = vmatprep.subr.bf16.mxu0 %v15228_v30  ;;  %v15264_v30 = vld [vmem:[#allocation197_spill] sm:$0xff] }
 0x7da   :  { %9202 = vmatpush1.bf16.msra.mxu0 %v15229_v3  ;;  %v15265_v3 = vld [vmem:[#allocation198_spill] sm:$0xff] }
 0x7db   :  { %9204 = vmatprep.subr.bf16.mxu0 %v15230_v17 }
 0x7de   :  { %9206 = vmatpush1.bf16.msra.mxu0 %v15231_v39 }
 0x7df   :  { %9208 = vmatprep.subr.bf16.mxu0 %v15232_v42 }
 0x7e2   :  { %9210 = vmatpush1.bf16.msra.mxu0 %v15233_v62 }
 0x7e3   :  { %9212 = vmatprep.subr.bf16.mxu0 %v15234_v51 }
 0x7e6   :  { %9214 = vmatpush1.bf16.msra.mxu0 %v15235_v10 }
 0x7e7   :  { %9216 = vmatprep.subr.bf16.mxu0 %v15236_v34 }
 0x7ea   :  { %9218 = vmatpush1.bf16.msra.mxu0 %v15237_v24 }
 0x7eb   :  { %9220 = vmatprep.subr.bf16.mxu0 %v15238_v19 }
 0x7ee   :  { %9222 = vmatpush1.bf16.msra.mxu0 %v15239_v63 }
 0x7ef   :  { %5810 = vmatprep.subr.mxu0 %v9840_v53 }
 0x7f2   :  { %5811 = vmatpush1.msra.mxu0 %v9841_v0 }
 0x7f3   :  { %5835 = vmatmul.mubr.f32.vlgmr.msra.gmra.mrb[66].mxu0 %v14041_v61  ;;  %9234 = vmatprep.subr.bf16.mxu0 %v12302_v4  ;;  %v15242_v61 = vld [vmem:[#allocation175_spill] sm:$0xff]  ;;  %v15243_v4 = vld [vmem:[#allocation176_spill] sm:$0xff] }
 0x7f4   :  { %9236 = vmatpush1.bf16.msra.mxu0 %v12304_v40  ;;  %7785 = vmatprep.mubr.msk.f32.mxu0 %vm928_vm5, %v14077_v36  ;;  %v15244_v40 = vld [vmem:[#allocation177_spill] sm:$0xff]  ;;  %v15245_v36 = vld [vmem:[#allocation178_spill] sm:$0xff] }
 0x7f5   :  { %9238 = vmatprep.subr.bf16.mxu0 %v12306_v25  ;;  %v15246_v25 = vld [vmem:[#allocation179_spill] sm:$0xff] }
 0x7f7   :  { %5841 = vmatmul.mubr.f32.gmra.mrb[68].mxu0 %v14075_v60  ;;  %v15247_v60 = vld [vmem:[#allocation180_spill] sm:$0xff] }
 0x7f8   :  { %9240 = vmatpush1.bf16.msra.mxu0 %v12323_v1  ;;  %7790 = vmatprep.mubr.msk.f32.mxu0 %vm928_vm5, %v14083_v59  ;;  %v15248_v1 = vld [vmem:[#allocation181_spill] sm:$0xff]  ;;  %v15250_v59 = vld [vmem:[#allocation183_spill] sm:$0xff] }
 0x7f9   :  { %9242 = vmatprep.subr.bf16.mxu0 %v15240_v18 }
 0x7fc   :  { %9244 = vmatpush1.bf16.msra.mxu0 %v15241_v37  ;;  %v15278_v37 = vld [vmem:[#allocation211_spill] sm:$0xff] }
 0x7fd   :  { %9246 = vmatprep.subr.bf16.mxu0 %v15242_v61  ;;  %v15279_v61 = vld [vmem:[#allocation212_spill] sm:$0xff] }
 0x800   :  { %9248 = vmatpush1.bf16.msra.mxu0 %v15243_v4  ;;  %v15280_v4 = vld [vmem:[#allocation213_spill] sm:$0xff] }
 0x801   :  { %9250 = vmatprep.subr.bf16.mxu0 %v15244_v40  ;;  %v15281_v40 = vld [vmem:[#allocation214_spill] sm:$0xff] }
 0x804   :  { %9252 = vmatpush1.bf16.msra.mxu0 %v15245_v36 }
 0x805   :  { %9254 = vmatprep.subr.bf16.mxu0 %v15246_v25 }
 0x808   :  { %9256 = vmatpush1.bf16.msra.mxu0 %v15247_v60  ;;  %v15282_v60 = vld [vmem:[#allocation215_spill] sm:$0xff] }
 0x809   :  { %9258 = vmatprep.subr.bf16.mxu0 %v15248_v1  ;;  %v15283_v1 = vld [vmem:[#allocation216_spill] sm:$0xff] }
 0x80c   :  { %9260 = vmatpush1.bf16.msra.mxu0 %v15249_v14  ;;  %v15284_v14 = vld [vmem:[#allocation217_spill] sm:$0xff] }
 0x80d   :  { %9262 = vmatprep.subr.bf16.mxu0 %v15250_v59  ;;  %v15285_v59 = vld [vmem:[#allocation218_spill] sm:$0xff] }
 0x810   :  { %9264 = vmatpush1.bf16.msra.mxu0 %v15251_v58  ;;  %v15286_v58 = vld [vmem:[#allocation219_spill] sm:$0xff] }
 0x811   :  { %9266 = vmatprep.subr.bf16.mxu0 %v15252_v11  ;;  %v15287_v11 = vld [vmem:[#allocation220_spill] sm:$0xff] }
 0x814   :  { %9268 = vmatpush1.bf16.msra.mxu0 %v15253_v50  ;;  %v15288_v50 = vld [vmem:[#allocation221_spill] sm:$0xff] }
 0x815   :  { %9270 = vmatprep.subr.bf16.mxu0 %v15254_v35  ;;  %v15289_v35 = vld [vmem:[#allocation222_spill] sm:$0xff] }
 0x818   :  { %9272 = vmatpush1.bf16.msra.mxu0 %v15255_v21  ;;  %v15290_v21 = vld [vmem:[#allocation223_spill] sm:$0xff] }
 0x819   :  { %5974 = vmatprep.subr.mxu0 %v9842_v32  ;;  %v15291_v32 = vld [vmem:[#allocation224_spill] sm:$0xff] }
 0x81c   :  { %5975 = vmatpush1.msra.mxu0 %v9843_v33 }
 0x81d   :  { %5999 = vmatmul.mubr.f32.vlgmr.msra.gmra.mrb[66].mxu0 %v14081_v28  ;;  %9513 = vmatprep.subr.bf16.mxu0 %v14950_v31  ;;  %v15259_v28 = vld [vmem:[#allocation192_spill] sm:$0xff] }
 0x81e   :  { %7791 = vmatprep.mubr.msk.f32.mxu0 %vm928_vm5, %v14094_v48  ;;  %9515 = vmatpush1.bf16.msra.mxu0 %v15256_v12  ;;  %v15261_v48 = vld [vmem:[#allocation194_spill] sm:$0xff] }
 0x81f   :  { %9516 = vmatprep.subr.bf16.mxu0 %v14950_v31 }
 0x821   :  { %6005 = vmatmul.mubr.f32.gmra.mrb[68].mxu0 %v14089_v5  ;;  %v15262_v5 = vld [vmem:[#allocation195_spill] sm:$0xff] }
 0x822   :  { %9518 = vmatpush1.bf16.msra.mxu0 %v15257_v16  ;;  %v15292_v16 = vld [vmem:[#allocation225_spill] sm:$0xff] }
 0x823   :  { %9519 = vmatprep.subr.bf16.mxu0 %v14950_v31 }
 0x826   :  { %9521 = vmatpush1.bf16.msra.mxu0 %v15258_v2  ;;  %v15293_v2 = vld [vmem:[#allocation226_spill] sm:$0xff] }
 0x827   :  { %9522 = vmatprep.subr.bf16.mxu0 %v14950_v31 }
 0x82a   :  { %9524 = vmatpush1.bf16.msra.mxu0 %v15259_v28  ;;  %v15294_v28 = vld [vmem:[#allocation227_spill] sm:$0xff] }
 0x82b   :  { %9525 = vmatprep.subr.bf16.mxu0 %v14950_v31 }
 0x82e   :  { %9527 = vmatpush1.bf16.msra.mxu0 %v15260_v49  ;;  %v15295_v49 = vld [vmem:[#allocation228_spill] sm:$0xff] }
 0x82f   :  { %9528 = vmatprep.subr.bf16.mxu0 %v14950_v31 }
 0x832   :  { %9530 = vmatpush1.bf16.msra.mxu0 %v15261_v48  ;;  %v15296_v48 = vld [vmem:[#allocation229_spill] sm:$0xff] }
 0x833   :  { %9531 = vmatprep.subr.bf16.mxu0 %v14950_v31 }
 0x836   :  { %9533 = vmatpush1.bf16.msra.mxu0 %v15262_v5  ;;  %v15297_v5 = vld [vmem:[#allocation230_spill] sm:$0xff] }
 0x837   :  { %9534 = vmatprep.subr.bf16.mxu0 %v14950_v31 }
 0x83a   :  { %9536 = vmatpush1.bf16.msra.mxu0 %v15263_v57  ;;  %v15298_v57 = vld [vmem:[#allocation231_spill] sm:$0xff] }
 0x83b   :  { %9537 = vmatprep.subr.bf16.mxu0 %v14950_v31 }
 0x83e   :  { %9539 = vmatpush1.bf16.msra.mxu0 %v15264_v30  ;;  %v15299_v30 = vld [vmem:[#allocation232_spill] sm:$0xff] }
 0x83f   :  { %9540 = vmatprep.subr.bf16.mxu0 %v14950_v31 }
 0x842   :  { %9542 = vmatpush1.bf16.msra.mxu0 %v15265_v3  ;;  %v15300_v3 = vld [vmem:[#allocation233_spill] sm:$0xff] }
 0x843   :  { %9573 = vmatprep.subr.bf16.mxu0 %v14950_v31 }
 0x8f0   :  { %v6000_v17 = vpop.f32.mrb[66].mxu0 }
 0x8f1   :  { %v6015_v39 = vadd.f32 %v6000_v17, %v12626_v46  ;;  %v6002_v42 = vpop.f32.mrb[67].mxu0  ;;  %v15301_v17 = vld [vmem:[#allocation234_spill] sm:$0xff] }
 0x8f2   :  { %v6016_v62 = vadd.f32 %v6002_v42, %v12630_v27 }
 0x8f3   :  { %9790 = vtanh.f32 %v6015_v39 }
 0x8f4   :  { %9792 = vtanh.f32 %v6016_v62  ;;  %v6006_v51 = vpop.f32.mrb[68].mxu0  ;;  %v15302_v62 = vld [vmem:[#allocation235_spill] sm:$0xff] }
 0x8f5   :  { %v6008_v10 = vpop.f32.mrb[69].mxu0  ;;  %v6017_v34 = vadd.f32 %v6006_v51, %v12626_v46  ;;  %v15303_v51 = vld [vmem:[#allocation236_spill] sm:$0xff] }
 0x8f6   :  { %v6018_v24 = vadd.f32 %v6008_v10, %v12630_v27  ;;  %v15304_v10 = vld [vmem:[#allocation237_spill] sm:$0xff] }
 0x8f8   :  { %9794 = vtanh.f32 %v6018_v24 }
 0x8f9   :  { %9796 = vtanh.f32 %v6017_v34 }
 0x8fd   :  { %v14221_v19 = vpop.eup %9790 }
 0x8fe   :  { %v14223_v63 = vpop.eup %9792  ;;  %v6025_v0 = vrot.slane %v14221_v19, 1  ;;  %v6248_v36 = vrot.slane %v14221_v19, 3  ;;  %v6324_v33 = vrot.slane %v14221_v19, 4  ;;  %v6400_v39 = vrot.slane %v14221_v19, 5 }
 0x8ff   :  { %v6026_v53 = vrot.slane %v14223_v63, 1  ;;  %v6173_v27 = vrot.slane %v14223_v63, 2  ;;  %v6325_v25 = vrot.slane %v14223_v63, 4  ;;  %v6401_v12 = vrot.slane %v14223_v63, 5 }
 0x900   :  { %v6477_v42 = vrot.slane %v14223_v63, 6 }
 0x901   :  { %7792 = vmatprep.mubr.msk.f32.mxu1 %vm67_vm0, %v6026_v53  ;;  %v15305_v53 = vld [vmem:[#allocation238_spill] sm:$0xff] }
 0x902   :  { %v14228_v18 = vpop.eup %9794  ;;  %6095 = vmatmul.mubr.f32.vlgmr.msra.gmra.mrb[54].mxu1 %v6025_v0 }
 0x903   :  { %9305 = vmatpush1.bf16.msra.mxu1 %v12647_v43  ;;  %7793 = vmatprep.mubr.msk.f32.mxu1 %vm67_vm0, %v14223_v63  ;;  %v14233_v46 = vpop.eup %9796  ;;  %v15266_v43 = vld [vmem:[#allocation199_spill] sm:$0xff] }
 0x904   :  { %7800 = vmatprep.mubr.msk.f32.mxu0 %vm67_vm0, %v14228_v18  ;;  %9306 = vmatprep.subr.bf16.mxu1 %v14950_v31 }
 0x905   :  { %6696 = vmatmul.mubr.f32.vlgmr.msra.gmra.mrb[70].mxu0 %v14233_v46 }
 0x906   :  { %7865 = vmatprep.mubr.msk.f32.mxu0 %vm9871_vm6, %v14839_v52 }
 0x907   :  { %9308 = vmatpush1.bf16.msra.mxu1 %v12662_v41  ;;  %v15267_v41 = vld [vmem:[#allocation200_spill] sm:$0xff] }
 0x908   :  { %9309 = vmatprep.subr.bf16.mxu1 %v14950_v31 }
 0x90b   :  { %9311 = vmatpush1.bf16.msra.mxu1 %v12680_v13  ;;  %v15268_v13 = vld [vmem:[#allocation201_spill] sm:$0xff] }
 0x90c   :  { %9312 = vmatprep.subr.bf16.mxu1 %v14950_v31 }
 0x90f   :  { %9314 = vmatpush1.bf16.msra.mxu1 %v12694_v9  ;;  %v15269_v9 = vld [vmem:[#allocation202_spill] sm:$0xff] }
 0x910   :  { %9315 = vmatprep.subr.bf16.mxu1 %v14950_v31 }
 0x913   :  { %9317 = vmatpush1.bf16.msra.mxu1 %v12711_v15  ;;  %v15270_v15 = vld [vmem:[#allocation203_spill] sm:$0xff] }
 0x914   :  { %9318 = vmatprep.subr.bf16.mxu1 %v14950_v31 }
 0x917   :  { %9320 = vmatpush1.bf16.msra.mxu1 %v12728_v22  ;;  %v15271_v22 = vld [vmem:[#allocation204_spill] sm:$0xff] }
 0x918   :  { %9321 = vmatprep.subr.bf16.mxu1 %v14950_v31 }
 0x91b   :  { %9323 = vmatpush1.bf16.msra.mxu1 %v12744_v29  ;;  %v6172_v29 = vrot.slane %v14221_v19, 2 }
 0x91c   :  { %9324 = vmatprep.subr.bf16.mxu1 %v14950_v31 }
 0x91f   :  { %9326 = vmatpush1.bf16.msra.mxu1 %v12759_v20  ;;  %v6249_v20 = vrot.slane %v14223_v63, 3 }
 0x920   :  { %9327 = vmatprep.subr.bf16.mxu1 %v14950_v31 }
 0x923   :  { %9329 = vmatpush1.bf16.msra.mxu1 %v12775_v8  ;;  %v15272_v8 = vld [vmem:[#allocation205_spill] sm:$0xff] }
 0x924   :  { %9330 = vmatprep.subr.bf16.mxu1 %v14950_v31 }
 0x927   :  { %9332 = vmatpush1.bf16.msra.mxu1 %v12792_v38  ;;  %v15273_v38 = vld [vmem:[#allocation206_spill] sm:$0xff] }
 0x928   :  { %9333 = vmatprep.subr.bf16.mxu1 %v14950_v31 }
 0x92a   :  { %6167 = vmatmul.mubr.f32.vlgmr.msra.gmra.mrb[56].mxu1 %v14221_v19 }
 0x92b   :  { %9335 = vmatpush1.bf16.msra.mxu1 %v12808_v45  ;;  %7794 = vmatprep.mubr.msk.f32.mxu1 %vm67_vm0, %v6173_v27  ;;  %v15274_v45 = vld [vmem:[#allocation207_spill] sm:$0xff] }
 0x92c   :  { %9336 = vmatprep.subr.bf16.mxu1 %v14950_v31 }
 0x92f   :  { %9338 = vmatpush1.bf16.msra.mxu1 %v12826_v23  ;;  %v15275_v23 = vld [vmem:[#allocation208_spill] sm:$0xff] }
 0x930   :  { %9339 = vmatprep.subr.bf16.mxu1 %v14950_v31 }
 0x933   :  { %9341 = vmatpush1.bf16.msra.mxu1 %v12842_v44  ;;  %v15276_v44 = vld [vmem:[#allocation209_spill] sm:$0xff] }
 0x934   :  { %9342 = vmatprep.subr.bf16.mxu1 %v14950_v31 }
 0x937   :  { %9344 = vmatpush1.bf16.msra.mxu1 %v12859_v54  ;;  %v15277_v54 = vld [vmem:[#allocation210_spill] sm:$0xff] }
 0x938   :  { %9345 = vmatprep.subr.bf16.mxu1 %v14950_v31 }
 0x93b   :  { %9347 = vmatpush1.bf16.msra.mxu1 %v15266_v43  ;;  %v15306_v43 = vld [vmem:[#allocation239_spill] sm:$0xff] }
 0x93c   :  { %9348 = vmatprep.subr.bf16.mxu1 %v14950_v31 }
 0x93f   :  { %9350 = vmatpush1.bf16.msra.mxu1 %v15267_v41  ;;  %v15307_v41 = vld [vmem:[#allocation240_spill] sm:$0xff] }
 0x940   :  { %9351 = vmatprep.subr.bf16.mxu1 %v14950_v31 }
 0x943   :  { %9353 = vmatpush1.bf16.msra.mxu1 %v15268_v13  ;;  %v15308_v13 = vld [vmem:[#allocation241_spill] sm:$0xff] }
 0x944   :  { %9354 = vmatprep.subr.bf16.mxu1 %v14950_v31 }
 0x947   :  { %9356 = vmatpush1.bf16.msra.mxu1 %v15269_v9  ;;  %v15309_v9 = vld [vmem:[#allocation242_spill] sm:$0xff] }
 0x948   :  { %9357 = vmatprep.subr.bf16.mxu1 %v14950_v31 }
 0x94b   :  { %9359 = vmatpush1.bf16.msra.mxu1 %v15270_v15  ;;  %v15310_v15 = vld [vmem:[#allocation243_spill] sm:$0xff] }
 0x94c   :  { %9360 = vmatprep.subr.bf16.mxu1 %v14950_v31 }
 0x94f   :  { %9362 = vmatpush1.bf16.msra.mxu1 %v15271_v22  ;;  %v15311_v22 = vld [vmem:[#allocation244_spill] sm:$0xff] }
 0x950   :  { %9363 = vmatprep.subr.bf16.mxu1 %v14950_v31 }
 0x952   :  { %6242 = vmatmul.mubr.f32.vlgmr.msra.gmra.mrb[58].mxu1 %v6172_v29  ;;  %v6476_v29 = vrot.slane %v14221_v19, 6 }
 0x953   :  { %9365 = vmatpush1.bf16.msra.mxu1 %v15272_v8  ;;  %7795 = vmatprep.mubr.msk.f32.mxu1 %vm67_vm0, %v6249_v20  ;;  %v6553_v20 = vrot.slane %v14223_v63, 7  ;;  %v15312_v8 = vld [vmem:[#allocation245_spill] sm:$0xff] }
 0x954   :  { %9366 = vmatprep.subr.bf16.mxu1 %v14950_v31  ;;  %v15316_v63 = vld [vmem:[#allocation249_spill] sm:$0xff] }
 0x957   :  { %9368 = vmatpush1.bf16.msra.mxu1 %v15273_v38  ;;  %v15313_v38 = vld [vmem:[#allocation246_spill] sm:$0xff] }
 0x958   :  { %9369 = vmatprep.subr.bf16.mxu1 %v14950_v31 }
 0x95b   :  { %9371 = vmatpush1.bf16.msra.mxu1 %v15274_v45  ;;  %v15314_v45 = vld [vmem:[#allocation247_spill] sm:$0xff] }
 0x95c   :  { %9372 = vmatprep.subr.bf16.mxu1 %v14950_v31 }
 0x95f   :  { %9374 = vmatpush1.bf16.msra.mxu1 %v15275_v23 }
 0x960   :  { %9375 = vmatprep.subr.bf16.mxu1 %v14950_v31 }
 0x963   :  { %9377 = vmatpush1.bf16.msra.mxu1 %v15276_v44 }
 0x964   :  { %9378 = vmatprep.subr.bf16.mxu1 %v14950_v31 }
 0x967   :  { %9380 = vmatpush1.bf16.msra.mxu1 %v15277_v54 }
 0x968   :  { %9381 = vmatprep.subr.bf16.mxu1 %v14950_v31 }
 0x96b   :  { %9383 = vmatpush1.bf16.msra.mxu1 %v15278_v37  ;;  %v15315_v37 = vld [vmem:[#allocation248_spill] sm:$0xff] }
 0x96c   :  { %9384 = vmatprep.subr.bf16.mxu1 %v14950_v31 }
 0x96f   :  { %9386 = vmatpush1.bf16.msra.mxu1 %v15279_v61  ;;  %v15317_v61 = vld [vmem:[#allocation250_spill] sm:$0xff] }
 0x970   :  { %9387 = vmatprep.subr.bf16.mxu1 %v14950_v31 }
 0x973   :  { %9389 = vmatpush1.bf16.msra.mxu1 %v15280_v4  ;;  %v15318_v4 = vld [vmem:[#allocation251_spill] sm:$0xff] }
 0x974   :  { %9390 = vmatprep.subr.bf16.mxu1 %v14950_v31 }
 0x977   :  { %9392 = vmatpush1.bf16.msra.mxu1 %v15281_v40  ;;  %v15319_v40 = vld [vmem:[#allocation252_spill] sm:$0xff] }
 0x978   :  { %9393 = vmatprep.subr.bf16.mxu1 %v14950_v31 }
 0x97a   :  { %6318 = vmatmul.mubr.f32.vlgmr.msra.gmra.mrb[60].mxu1 %v6248_v36  ;;  %v15320_v36 = vld [vmem:[#allocation253_spill] sm:$0xff] }
 0x97b   :  { %9395 = vmatpush1.bf16.msra.mxu1 %v15282_v60  ;;  %7796 = vmatprep.mubr.msk.f32.mxu1 %vm67_vm0, %v6325_v25  ;;  %v15321_v25 = vld [vmem:[#allocation254_spill] sm:$0xff]  ;;  %v6552_v60 = vrot.slane %v14221_v19, 7 }
 0x97c   :  { %9396 = vmatprep.subr.bf16.mxu1 %v14950_v31 }
 0x97f   :  { %9398 = vmatpush1.bf16.msra.mxu1 %v15283_v1  ;;  %v6704_v1 = vrot.slane %v14228_v18, 1  ;;  %v15325_v18 = vld [vmem:[#allocation258_spill] sm:$0xff] }
 0x980   :  { %9399 = vmatprep.subr.bf16.mxu1 %v14950_v31 }
 0x983   :  { %9401 = vmatpush1.bf16.msra.mxu1 %v15284_v14  ;;  %v15322_v14 = vld [vmem:[#allocation255_spill] sm:$0xff] }
 0x984   :  { %9402 = vmatprep.subr.bf16.mxu1 %v14950_v31 }
 0x987   :  { %9404 = vmatpush1.bf16.msra.mxu1 %v15285_v59  ;;  %v15323_v59 = vld [vmem:[#allocation256_spill] sm:$0xff] }
 0x988   :  { %9405 = vmatprep.subr.bf16.mxu1 %v14950_v31 }
 0x98b   :  { %9407 = vmatpush1.bf16.msra.mxu1 %v15286_v58  ;;  %v15324_v58 = vld [vmem:[#allocation257_spill] sm:$0xff] }
 0x98c   :  { %9408 = vmatprep.subr.bf16.mxu1 %v14950_v31 }
 0x98f   :  { %9410 = vmatpush1.bf16.msra.mxu1 %v15287_v11 }
 0x990   :  { %9411 = vmatprep.subr.bf16.mxu1 %v14950_v31 }
 0x993   :  { %9413 = vmatpush1.bf16.msra.mxu1 %v15288_v50 }
 0x994   :  { %9414 = vmatprep.subr.bf16.mxu1 %v14950_v31 }
 0x997   :  { %9416 = vmatpush1.bf16.msra.mxu1 %v15289_v35  ;;  %v15326_v35 = vld [vmem:[#allocation259_spill] sm:$0xff] }
 0x998   :  { %9417 = vmatprep.subr.bf16.mxu1 %v14950_v31 }
 0x99b   :  { %9419 = vmatpush1.bf16.msra.mxu1 %v15290_v21 }
 0x99c   :  { %9420 = vmatprep.subr.bf16.mxu1 %v14950_v31 }
 0x99f   :  { %9422 = vmatpush1.bf16.msra.mxu1 %v15291_v32 }
 0x9a0   :  { %9423 = vmatprep.subr.bf16.mxu1 %v14950_v31 }
 0x9a2   :  { %6394 = vmatmul.mubr.f32.vlgmr.msra.gmra.mrb[62].mxu1 %v6324_v33 }
 0x9a3   :  { %9425 = vmatpush1.bf16.msra.mxu1 %v15292_v16  ;;  %7797 = vmatprep.mubr.msk.f32.mxu1 %vm67_vm0, %v6401_v12  ;;  %v6790_v16 = vld [vmem:[%s14542_s5 + $0x20] sm:$0xff] }
 0x9a4   :  { %9426 = vmatprep.subr.bf16.mxu1 %v14950_v31 }
 0x9a7   :  { %9428 = vmatpush1.bf16.msra.mxu1 %v15293_v2  ;;  %v6791_v2 = vld [vmem:[%s14542_s5 + $0x28] sm:$0xff] }
 0x9a8   :  { %9429 = vmatprep.subr.bf16.mxu1 %v14950_v31 }
 0x9ab   :  { %9431 = vmatpush1.bf16.msra.mxu1 %v15294_v28 }
 0x9ac   :  { %9432 = vmatprep.subr.bf16.mxu1 %v14950_v31 }
 0x9af   :  { %9434 = vmatpush1.bf16.msra.mxu1 %v15295_v49  ;;  %v9580_v49 = vpack.c.bf16 %v6791_v2, %v6790_v16 }
 0x9b0   :  { %9435 = vmatprep.subr.bf16.mxu1 %v14950_v31 }
 0x9b3   :  { %9437 = vmatpush1.bf16.msra.mxu1 %v15296_v48 }
 0x9b4   :  { %9438 = vmatprep.subr.bf16.mxu1 %v14950_v31 }
 0x9b7   :  { %9440 = vmatpush1.bf16.msra.mxu1 %v15297_v5 }
 0x9b8   :  { %9441 = vmatprep.subr.bf16.mxu1 %v14950_v31 }
 0x9bb   :  { %9443 = vmatpush1.bf16.msra.mxu1 %v15298_v57  ;;  %v6792_v57 = vld [vmem:[%s14542_s5 + $0x30] sm:$0xff] }
 0x9bc   :  { %9444 = vmatprep.subr.bf16.mxu1 %v14950_v31 }
 0x9bf   :  { %9446 = vmatpush1.bf16.msra.mxu1 %v15299_v30  ;;  %v6793_v30 = vld [vmem:[%s14542_s5 + $0x38] sm:$0xff] }
 0x9c0   :  { %9447 = vmatprep.subr.bf16.mxu1 %v14950_v31 }
 0x9c3   :  { %9449 = vmatpush1.bf16.msra.mxu1 %v15300_v3  ;;  %v9583_v3 = vpack.c.bf16 %v6793_v30, %v6792_v57 }
 0x9c4   :  { %9450 = vmatprep.subr.bf16.mxu1 %v14950_v31 }
 0x9c7   :  { %9452 = vmatpush1.bf16.msra.mxu1 %v15301_v17  ;;  %v6794_v17 = vld [vmem:[%s14542_s5 + $0x40] sm:$0xff] }
 0x9c8   :  { %9453 = vmatprep.subr.bf16.mxu1 %v14950_v31 }
 0x9ca   :  { %6470 = vmatmul.mubr.f32.vlgmr.msra.gmra.mrb[64].mxu1 %v6400_v39  ;;  %v6795_v39 = vld [vmem:[%s14542_s5 + $0x48] sm:$0xff] }
 0x9cb   :  { %9455 = vmatpush1.bf16.msra.mxu1 %v15302_v62  ;;  %7798 = vmatprep.mubr.msk.f32.mxu1 %vm67_vm0, %v6477_v42  ;;  %v9586_v42 = vpack.c.bf16 %v6795_v39, %v6794_v17 }
 0x9cc   :  { %9456 = vmatprep.subr.bf16.mxu1 %v14950_v31 }
 0x9cf   :  { %9458 = vmatpush1.bf16.msra.mxu1 %v15303_v51 }
 0x9d0   :  { %9459 = vmatprep.subr.bf16.mxu1 %v14950_v31 }
 0x9d3   :  { %9461 = vmatpush1.bf16.msra.mxu1 %v15304_v10 }
 0x9d4   :  { %9462 = vmatprep.subr.bf16.mxu1 %v14950_v31 }
 0x9d5   :  { %v6096_v34 = vpop.f32.mrb[54].mxu1 }
 0x9d6   :  { %v6098_v24 = vpop.f32.mrb[55].mxu1 }
 0x9d7   :  { %9464 = vmatpush1.bf16.msra.mxu1 %v15305_v53  ;;  %v6797_v24 = vld [vmem:[%s14542_s5 + $0x58] sm:$0xff] }
 0x9d8   :  { %v14359_v0 = vpop.f32.mrb[70].mxu0  ;;  %9465 = vmatprep.subr.bf16.mxu1 %v14950_v31 }
 0x9d9   :  { %v6699_v27 = vpop.f32.mrb[71].mxu0 }
 0x9da   :  { %v6798_v27 = vld [vmem:[%s14542_s5 + $0x60] sm:$0xff] }
 0x9db   :  { %9467 = vmatpush1.bf16.msra.mxu1 %v15306_v43  ;;  %v6799_v43 = vld [vmem:[%s14542_s5 + $0x68] sm:$0xff] }
 0x9dc   :  { %9468 = vmatprep.subr.bf16.mxu1 %v14950_v31 }
 0x9df   :  { %9470 = vmatpush1.bf16.msra.mxu1 %v15307_v41  ;;  %v9592_v41 = vpack.c.bf16 %v6799_v43, %v6798_v27 }
 0x9e0   :  { %9471 = vmatprep.subr.bf16.mxu1 %v14950_v31 }
 0x9e3   :  { %9473 = vmatpush1.bf16.msra.mxu1 %v15308_v13  ;;  %v6800_v13 = vld [vmem:[%s14542_s5 + $0x70] sm:$0xff] }
 0x9e4   :  { %9474 = vmatprep.subr.bf16.mxu1 %v14950_v31 }
 0x9e7   :  { %9476 = vmatpush1.bf16.msra.mxu1 %v15309_v9  ;;  %v6883_v9 = vld [vmem:[%s14543_s6] sm:$0xff] }
 0x9e8   :  { %9477 = vmatprep.subr.bf16.mxu1 %v14950_v31 }
 0x9eb   :  { %9479 = vmatpush1.bf16.msra.mxu1 %v15310_v15  ;;  %v6884_v15 = vld [vmem:[%s14543_s6 + $0x8] sm:$0xff] }
 0x9ec   :  { %9480 = vmatprep.subr.bf16.mxu1 %v14950_v31 }
 0x9ef   :  { %9482 = vmatpush1.bf16.msra.mxu1 %v15311_v22  ;;  %v6885_v22 = vld [vmem:[%s14543_s6 + $0x10] sm:$0xff] }
 0x9f0   :  { %9483 = vmatprep.subr.bf16.mxu1 %v14950_v31 }
 0x9f2   :  { %6546 = vmatmul.mubr.f32.vlgmr.msra.gmra.mrb[66].mxu1 %v6476_v29  ;;  %v9595_v29 = vpack.c.bf16 %v6884_v15, %v6883_v9 }
 0x9f3   :  { %9485 = vmatpush1.bf16.msra.mxu1 %v15312_v8  ;;  %7799 = vmatprep.mubr.msk.f32.mxu1 %vm67_vm0, %v6553_v20  ;;  %v6886_v20 = vld [vmem:[%s14543_s6 + $0x18] sm:$0xff] }
 0x9f4   :  { %9486 = vmatprep.subr.bf16.mxu1 %v14950_v31  ;;  %v9598_v8 = vpack.c.bf16 %v6886_v20, %v6885_v22 }
 0x9f7   :  { %9488 = vmatpush1.bf16.msra.mxu1 %v15313_v38 }
 0x9f8   :  { %9489 = vmatprep.subr.bf16.mxu1 %v14950_v31 }
 0x9fb   :  { %9491 = vmatpush1.bf16.msra.mxu1 %v15314_v45 }
 0x9fc   :  { %9492 = vmatprep.subr.bf16.mxu1 %v14950_v31 }
 0x9fd   :  { %v6168_v23 = vpop.f32.mrb[56].mxu1 }
 0x9fe   :  { %v6169_v44 = vadd.f32 %v6168_v23, %v6096_v34  ;;  %v6170_v54 = vpop.f32.mrb[57].mxu1  ;;  %v6796_v34 = vld [vmem:[%s14542_s5 + $0x50] sm:$0xff] }
 0x9ff   :  { %9494 = vmatpush1.bf16.msra.mxu1 %v15315_v37  ;;  %v9589_v53 = vpack.c.bf16 %v6797_v24, %v6796_v34 }
 0xa00   :  { %9495 = vmatprep.subr.bf16.mxu1 %v14950_v31 }
 0xa03   :  { %9497 = vmatpush1.bf16.msra.mxu1 %v15316_v63 }
 0xa04   :  { %9498 = vmatprep.subr.bf16.mxu1 %v14950_v31 }
 0xa07   :  { %9500 = vmatpush1.bf16.msra.mxu1 %v15317_v61  ;;  %v3808_v61 = vld [vmem:[%s14546_s9] sm:$0x1] }
 0xa08   :  { %9501 = vmatprep.subr.bf16.mxu1 %v14950_v31 }
 0xa0b   :  { %9503 = vmatpush1.bf16.msra.mxu1 %v15318_v4 }
 0xa0c   :  { %9504 = vmatprep.subr.bf16.mxu1 %v14950_v31 }
 0xa0f   :  { %9506 = vmatpush1.bf16.msra.mxu1 %v15319_v40 }
 0xa10   :  { %9507 = vmatprep.subr.bf16.mxu1 %v14950_v31 }
 0xa13   :  { %9509 = vmatpush1.bf16.msra.mxu1 %v15320_v36 }
 0xa14   :  { %9510 = vmatprep.subr.bf16.mxu1 %v14950_v31 }
 0xa17   :  { %9512 = vmatpush1.bf16.msra.mxu1 %v15321_v25  ;;  %v3809_v25 = vadd.f32 %v3808_v61, %v13850_v47  ;;  %v6889_v47 = vld [vmem:[%s14543_s6 + $0x30] sm:$0xff] }
 0xa18   :  { %9543 = vmatprep.subr.bf16.mxu1 %v14950_v31 }
 0xa1a   :  { %6622 = vmatmul.mubr.f32.vlgmr.msra.gmra.mrb[68].mxu1 %v6552_v60 }
 0xa1b   :  { %9545 = vmatpush1.bf16.msra.mxu1 %v15322_v14  ;;  %7801 = vmatprep.mubr.msk.f32.mxu1 %vm67_vm0, %v6704_v1 }
 0xa1c   :  { %9546 = vmatprep.subr.bf16.mxu1 %v14950_v31 }
 0xa1f   :  { %9548 = vmatpush1.bf16.msra.mxu1 %v15323_v59 }
 0xa20   :  { %9549 = vmatprep.subr.bf16.mxu1 %v14950_v31 }
 0xa23   :  { %9551 = vmatpush1.bf16.msra.mxu1 %v15324_v58 }
 0xa24   :  { %9552 = vmatprep.subr.bf16.mxu1 %v14950_v31 }
 0xa25   :  { %v6243_v19 = vpop.f32.mrb[58].mxu1 }
 0xa26   :  { %v6247_v11 = vadd.f32 %v6243_v19, %v6169_v44  ;;  %v6245_v50 = vpop.f32.mrb[59].mxu1  ;;  %v6888_v19 = vld [vmem:[%s14543_s6 + $0x28] sm:$0xff] }
 0xa27   :  { %9554 = vmatpush1.bf16.msra.mxu1 %v13534_v56  ;;  %v6890_v50 = vld [vmem:[%s14543_s6 + $0x38] sm:$0xff] }
 0xa28   :  { %9555 = vmatprep.subr.bf16.mxu1 %v14950_v31 }
 0xa2b   :  { %9557 = vmatpush1.bf16.msra.mxu1 %v13549_v55  ;;  %v6703_v55 = vrot.slane %v14233_v46, 1  ;;  %v6789_v46 = vld [vmem:[%s14542_s5 + $0x18] sm:$0xff] }
 0xa2c   :  { %9558 = vmatprep.subr.bf16.mxu1 %v14950_v31 }
 0xa2f   :  { %9560 = vmatpush1.bf16.msra.mxu1 %v15325_v18  ;;  %v9604_v18 = vpack.c.bf16 %v6890_v50, %v6889_v47 }
 0xa30   :  { %9561 = vmatprep.subr.bf16.mxu1 %v14950_v31 }
 0xa33   :  { %9563 = vmatpush1.bf16.msra.mxu1 %v15326_v35  ;;  %v6891_v35 = vld [vmem:[%s14543_s6 + $0x40] sm:$0xff] }
 0xa34   :  { %9564 = vmatprep.subr.bf16.mxu1 %v14950_v31 }
 0xa37   :  { %9566 = vmatpush1.bf16.msra.mxu1 %v13587_v6  ;;  %v6786_v6 = vld [vmem:[%s14542_s5] sm:$0xff] }
 0xa38   :  { %9567 = vmatprep.subr.bf16.mxu1 %v14950_v31 }
 0xa3b   :  { %9569 = vmatpush1.bf16.msra.mxu1 %v13599_v26  ;;  %v6787_v26 = vld [vmem:[%s14542_s5 + $0x8] sm:$0xff] }
 0xa3c   :  { %9570 = vmatprep.subr.bf16.mxu1 %v14950_v31  ;;  %v9574_v33 = vpack.c.bf16 %v6787_v26, %v6786_v6 }
 0xa3e   :  { %9575 = vmatpush3.bf16.msra.mxu0 %v9574_v33 }
 0xa3f   :  { %9572 = vmatpush1.bf16.msra.mxu1 %v13613_v7  ;;  %v6788_v7 = vld [vmem:[%s14542_s5 + $0x10] sm:$0xff]  ;;  %9576 = vmatprep.subr.bf16.mxu0 %v14950_v31 }
 0xa40   :  { %9594 = vmatprep.subr.bf16.mxu1 %v14950_v31  ;;  %v9577_v12 = vpack.c.bf16 %v6789_v46, %v6788_v7 }
 0xa42   :  { %6773 = vmatmul.mubr.f32.vlgmr.msra.gmra.mrb[70].mxu1 %v6703_v55  ;;  %9578 = vmatpush3.bf16.msra.mxu0 %v9577_v12  ;;  %v6892_v55 = vld [vmem:[%s14543_s6 + $0x48] sm:$0xff] }
 0xa43   :  { %9579 = vmatprep.subr.bf16.mxu0 %v14950_v31  ;;  %7890 = vmatprep.mubr.msk.f32.mxu1 %vm9871_vm6, %v14839_v52 }
 0xa44   :  { %9596 = vmatpush3.bf16.msra.mxu1 %v9595_v29 }
 0xa45   :  { %9597 = vmatprep.subr.bf16.mxu1 %v14950_v31 }
 0xa46   :  { %9581 = vmatpush3.bf16.msra.mxu0 %v9580_v49 }
 0xa47   :  { %9582 = vmatprep.subr.bf16.mxu0 %v14950_v31 }
 0xa48   :  { %9599 = vmatpush3.bf16.msra.mxu1 %v9598_v8 }
 0xa49   :  { %9600 = vmatprep.subr.bf16.mxu1 %v14950_v31 }
 0xa4a   :  { %9584 = vmatpush3.bf16.msra.mxu0 %v9583_v3 }
 0xa4b   :  { %9585 = vmatprep.subr.bf16.mxu0 %v14950_v31 }
 0xa4d   :  { %v6319_v56 = vpop.f32.mrb[60].mxu1 }
 0xa4e   :  { %v6323_v21 = vadd.f32 %v6319_v56, %v6247_v11  ;;  %v6321_v32 = vpop.f32.mrb[61].mxu1  ;;  %9587 = vmatpush3.bf16.msra.mxu0 %v9586_v42  ;;  %v9607_v56 = vpack.c.bf16 %v6892_v55, %v6891_v35 }
 0xa4f   :  { %9588 = vmatprep.subr.bf16.mxu0 %v14950_v31  ;;  %v7802_v32 = vld [vmem:[%s14547_s10] ss:$0 sm:$0xff] }
 0xa52   :  { %9590 = vmatpush3.bf16.msra.mxu0 %v9589_v53 }
 0xa53   :  { %9591 = vmatprep.subr.bf16.mxu0 %v14950_v31 }
 0xa56   :  { %9593 = vmatpush3.bf16.msra.mxu0 %v9592_v41 }
 0xa57   :  { %7863 = vmatprep.subr.mxu0 %v14839_v52 }
 0xa5a   :  { %7864 = vmatpush3.msra.mxu0 %v6800_v13 }
 0xa75   :  { %v6395_v28 = vpop.f32.mrb[62].mxu1 }
 0xa76   :  { %v6399_v48 = vadd.f32 %v6395_v28, %v6323_v21  ;;  %v6397_v5 = vpop.f32.mrb[63].mxu1  ;;  %v6893_v21 = vld [vmem:[%s14543_s6 + $0x50] sm:$0xf] }
 0xa9d   :  { %v6471_v62 = vpop.f32.mrb[64].mxu1 }
 0xa9e   :  { %v6475_v51 = vadd.f32 %v6471_v62, %v6399_v48  ;;  %v6473_v10 = vpop.f32.mrb[65].mxu1 }
 0xac5   :  { %v6547_v38 = vpop.f32.mrb[66].mxu1 }
 0xac6   :  { %v6551_v45 = vadd.f32 %v6547_v38, %v6475_v51  ;;  %v6549_v23 = vpop.f32.mrb[67].mxu1 }
 0xaed   :  { %v6623_v44 = vpop.f32.mrb[68].mxu1 }
 0xaee   :  { %v6627_v54 = vadd.f32 %v6623_v44, %v6551_v45  ;;  %v6625_v37 = vpop.f32.mrb[69].mxu1 }
 0xaf0   :  { %v6701_v63 = vadd.f32 %v14359_v0, %v6627_v54  ;;  %v6887_v0 = vld [vmem:[%s14543_s6 + $0x20] sm:$0xff]  ;;  %s9844_s6 = scalar_lea.vmem %s6987_s1, 32 }
 0xaf1   :  { %v9601_v11 = vpack.c.bf16 %v6888_v19, %v6887_v0  ;;  %p9845_p0 = scmp.ne.s32.totalorder %s6987_s1, %s9844_s6  ;;  %p9850_p2 = scmp.lt.s32.totalorder %s9844_s6, %s9844_s6 }
 0xaf3   :  { %9602 = vmatpush3.bf16.msra.mxu1 %v9601_v11  ;;  %p9851_p3 = por %p9850_p2, %p9849_p1 }
 0xaf4   :  { %9603 = vmatprep.subr.bf16.mxu1 %v14950_v31 }
 0xaf5   :  { %p9852_p4 = pnand %p9851_p3, %p9845_p0 }
 0xaf7   :  { %9605 = vmatpush3.bf16.msra.mxu1 %v9604_v18 }
 0xaf8   :  { %9606 = vmatprep.subr.bf16.mxu1 %v14950_v31 }
 0xafb   :  { %9608 = vmatpush3.bf16.msra.mxu1 %v9607_v56 }
 0xafc   :  { %7888 = vmatprep.subr.mxu1 %v14839_v52  ;;  %v7804_v52 = vld [vmem:[%s14548_s11] ss:$0 sm:$0xff] }
 0xaff   :  { %7889 = vmatpush3.msk.msra.mxu1 %vm673_vm1, %v6893_v21 }
 0xb15   :  { %v6774_v4 = vpop.f32.mrb[70].mxu1 }
 0xb16   :  { %v6778_v40 = vadd.f32 %v6774_v4, %v6701_v63  ;;  %v6776_v36 = vpop.f32.mrb[71].mxu1 }
 0xb18   :  { %v6779_v60 = vadd.f32 %v6778_v40, %v3808_v61 }
 0xb1a   :  { %9798 = vtanh.f32 %v6779_v60 }
 0xb1b   :  { %9800 = vtanh.f32 %v3809_v25 }
 0xb24   :  { %v9799_v1 = vpop.eup %9798 }
 0xb25   :  { %v6782_v14 = vrot.slane %v9799_v1, 7  ;;  %v9801_v59 = vpop.eup %9800 }
 0xb27   :  { %v6785_v58 = vsel %vm6784_vm7, %v9801_v59, %v6782_v14 }
 0xb28   :  { %7866 = vmatmul.mubr.msk.f32.vlgmr.msra.gmra.mrb[72].mxu0 %vm6808_vm8, %v6785_v58 }
 0xbfb   :  { %v6878_v6 = vpop.f32.mrb[72].mxu0 }
 0xbfc   :  { %v6879_v26 = vadd.f32 %v7802_v32, %v6878_v6  ;;  %v7867_v7 = vpop.f32.mrb[73].mxu0 }
 0xbfe   :  { %9802 = vtanh.f32 %v6879_v26 }
 0xc08   :  { %v9803_v33 = vpop.eup %9802 }
 0xc09   :  { %7891 = vmatmul.mubr.msk.f32.vlgmr.msra.gmra.mrb[72].mxu1 %vm6901_vm9, %v9803_v33 }
 0xcdc   :  { %v6974_v31 = vpop.f32.mrb[72].mxu1 }
 0xcdd   :  { %v6975_v46 = vadd.f32 %v7804_v52, %v6974_v31  ;;  %v7892_v12 = vpop.f32.mrb[73].mxu1 }
 0xcdf   :  { %6979 = vst.msk [vmem:[#allocation2] sm:$0x3] %vm6978_vm10, %v6975_v46 }
 0xce0   :  { %9855 = shalt.err (!%p9852_p4)
}
 0xce1   :  { %s9856_s23 = scalar_lea.hbm %s14549_s12, 32 }
 0xce2   :  { %p9857_p5 = scmp.ne.s32.totalorder %s14549_s12, %s9856_s23  ;;  %p9860_p6 = scmp.lt.u32.totalorder %s9856_s23, %s14549_s12 }
 0xce4   :  { %p9862_p7 = pnand %p9860_p6, %p9857_p5 }
 0xce6   :  { %9865 = shalt.err (!%p9862_p7)
}
 0xce7   :  { %6989 = dma.vmem_to_hbm [thread:$0]  %s6987_s1, 32, %s14549_s12, [#allocation3]  }
 0xce8   :  { %9866 = dma.done.wait [#allocation3], 32  }
 0xce9   :  { %9867 = vsyncadd [#allocation3], 4294967264 }
 0xcea   :  { %6993 = vsyncpa [#allocation3], 1 }

</bundles_post_ra>
